<compile_context>
chip_gen: v5e
topology: v5e:2x2
jax: 0.10.0
libtpu: 0.0.40
codegen_flags: <defaults>
</compile_context>

<pallas_src>
import functools

import numpy as np
import jax
import jax.numpy as jnp
from jax import lax
from jax.experimental import pallas as pl
from jax.experimental.pallas import tpu as pltpu

# Large negative additive bias (not -f32.max) so that bias + logits never
# overflows to -inf; exp(bias - max) underflows cleanly to 0.
_MASK_VALUE = -1e30


# ---------------------------------------------------------------------------
# heuristics
# ---------------------------------------------------------------------------

def _divisors_desc(n):
    return [d for d in range(n, 0, -1) if n % d == 0]


def _chip_config():
    """Returns (keep_two_way_leading_grid, vmem_budget_bytes, vmem_limit_bytes)."""
    try:
        kind = jax.devices()[0].device_kind.lower()
    except Exception:  # pragma: no cover - defensive
        kind = ''
    single_tc = any(s in kind for s in
                    ('v5e', 'v5 lite', 'v5lite', 'v6e', 'v6 lite', 'v6lite'))
    if single_tc:
        # One TensorCore, 128 MiB physical VMEM: fuse aggressively.
        return False, 48 * 1024 * 1024, 80 * 1024 * 1024
    if '7' in kind:
        # v7x: 2 TCs/chip but only 64 MiB VMEM per TC.
        return True, 24 * 1024 * 1024, 44 * 1024 * 1024
    # v4 / v5p / unknown: keep a >=2 leading axis for megacore, stay conservative.
    return True, 32 * 1024 * 1024, 48 * 1024 * 1024


def _choose_bucket_block(buckets, w, backward, forward, row_cap):
    """Pick how many buckets to fuse per grid step."""
    t = buckets * w

    def ok(d):
        rows = d * w
        if rows != t and rows % 8:                 # TPU sublane rule
            return False
        if d == buckets:                           # single block: no halos fetched
            return True
        if backward and (d < backward or d % backward or (backward * w) % 8):
            return False
        if forward and (d < forward or d % forward or (forward * w) % 8):
            return False
        return True

    cands = [d for d in _divisors_desc(buckets) if ok(d)]
    assert cands, 'internal: d == buckets is always a valid bucket block'
    capped = [d for d in cands if d * w <= row_cap] or cands

    span = 1 + backward + forward

    def score(d):
        rows = d * w
        cols = rows if d == buckets else (d + backward + forward) * w
        lane_pen = 0 if cols % 128 == 0 else (1 if cols % 8 == 0 else 2)
        small_pen = 0 if rows >= min(128, t) else 1
        waste = cols / float(span * w)             # compute kept / compute done
        return (small_pen, lane_pen, waste, rows)

    return min(capped, key=score)


def _choose_bh_block(bh, rows, lhw, rhw, e, itemsize, vmem_budget, keep_two):
    """How many (batch*head) slices to fuse per grid step (VMEM aware)."""
    cols = lhw + rows + rhw

    def vmem_need(g):
        # q, k_core, v_core, out core windows + halo k/v windows, double buffered.
        dma = g * e * itemsize * (4 * rows + 2 * (lhw + rhw)) * 2
        # f32 scores + probabilities + accumulator intermediates.
        inter = g * rows * (2 * cols + e) * 4
        bias = rows * cols * 4 * 2
        return dma + inter + bias + (256 << 10)

    for d in _divisors_desc(bh):
        if keep_two and bh >= 2 and bh // d < 2:
            continue
        if vmem_need(d) <= vmem_budget:
            return d
    return 1


# ---------------------------------------------------------------------------
# precomputed (grid-step invariant) additive mask biases
# ---------------------------------------------------------------------------

def _build_biases(bucket_block, w, backward, forward, causal, use_left, use_right):
    rows = bucket_block * w
    r = np.arange(rows)[:, None]
    rb = r // w
    mv = _MASK_VALUE

    c = np.arange(rows)[None, :]
    kb = c // w                                    # key bucket offset within block
    keep = (kb >= rb - backward) & (kb <= rb + forward)
    if causal:
        keep &= (r >= c)
    bias_core = np.where(keep, 0.0, mv).astype(np.float32)

    bias_left = bias_right = None
    if use_left:
        lhw = backward * w
        cl = np.arange(lhw)[None, :]
        kbl = cl // w - backward                   # bucket offsets -backward .. -1
        keepl = (kbl >= rb - backward) & (kbl <= rb + forward)
        # causal never masks the left halo (those keys strictly precede the block)
        bias_left = np.where(keepl, 0.0, mv).astype(np.float32)
    if use_right:
        rhw = forward * w
        cr = np.arange(rhw)[None, :]
        kbr = bucket_block + cr // w               # bucket offsets block .. block+F-1
        keepr = (kbr >= rb - backward) & (kbr <= rb + forward)
        if causal:                                 # unreachable (causal => forward==0)
            keepr &= False
        bias_right = np.where(keepr, 0.0, mv).astype(np.float32)
    return bias_core, bias_left, bias_right


# ---------------------------------------------------------------------------
# kernel
# ---------------------------------------------------------------------------

def _local_attn_kernel(*refs, use_left, use_right, bf16_matmul, bf16_exp,
                       approx_reciprocal):
    it = iter(refs)
    q_ref = next(it)
    kc_ref = next(it)
    kl_ref = next(it) if use_left else None
    kr_ref = next(it) if use_right else None
    vc_ref = next(it)
    vl_ref = next(it) if use_left else None
    vr_ref = next(it) if use_right else None
    bc_ref = next(it)
    bl_ref = next(it) if use_left else None
    br_ref = next(it) if use_right else None
    o_ref = next(it)

    j = pl.program_id(1)
    mdt = jnp.bfloat16 if bf16_matmul else q_ref.dtype

    def to_mdt(x):
        return x if x.dtype == mdt else x.astype(mdt)

    q = to_mdt(q_ref[...])                                     # (G, rows, e)

    def scores(k_ref, bias):
        # Q @ K^T contracting the head dim (no transposed K copy), f32 accumulate.
        s = lax.dot_general(q, to_mdt(k_ref[...]),
                            (((2,), (2,)), ((0,), (0,))),
                            preferred_element_type=jnp.float32)
        return s + bias                                        # bias broadcasts over G

    zero = jnp.float32(0.0)
    mv = jnp.float32(_MASK_VALUE)

    parts = []                                                 # (scores, v_ref)
    if use_left:
        # The whole left halo is out-of-range padding only on the first step.
        left_pad = jnp.where(j == 0, mv, zero)
        parts.append((scores(kl_ref, bl_ref[...] + left_pad), vl_ref))
    parts.append((scores(kc_ref, bc_ref[...]), vc_ref))
    if use_right:
        # The whole right halo is out-of-range padding only on the last step.
        right_pad = jnp.where(j == pl.num_programs(1) - 1, mv, zero)
        parts.append((scores(kr_ref, br_ref[...] + right_pad), vr_ref))

    # Softmax over the concatenation of the parts without materializing it.
    m = parts[0][0].max(axis=-1, keepdims=True)
    for s, _ in parts[1:]:
        m = jnp.maximum(m, s.max(axis=-1, keepdims=True))

    acc = None
    l = None
    for s, v_ref in parts:
        x = s - m
        if bf16_exp:
            x = x.astype(jnp.bfloat16)
        p = jnp.exp(x)
        l_part = jnp.sum(p.astype(jnp.float32), axis=-1, keepdims=True)
        pv = lax.dot_general(to_mdt(p), to_mdt(v_ref[...]),
                             (((2,), (1,)), ((0,), (0,))),
                             preferred_element_type=jnp.float32)
        acc = pv if acc is None else acc + pv
        l = l_part if l is None else l + l_part

    out = acc * pl.reciprocal(l, approx=approx_reciprocal)
    o_ref[...] = out.astype(o_ref.dtype)


# ---------------------------------------------------------------------------
# wrapper
# ---------------------------------------------------------------------------

def local_attention(q, k, v, *, buckets, causal=False, look_backward=1,
                    look_forward=0, row_cap=256, bf16_matmul=False,
                    bf16_exp=False, approx_reciprocal=True):
    assert not (causal and look_forward > 0), 'you cannot look forward if causal'
    b, h, t, e = q.shape
    assert t % buckets == 0, 'sequence length must be divisible by buckets'
    w = t // buckets
    bh = b * h

    # Looking further than (buckets - 1) buckets only adds fully-masked padding.
    backward = min(look_backward, buckets - 1)
    forward = min(look_forward, buckets - 1)

    bucket_block = _choose_bucket_block(buckets, w, backward, forward, row_cap)
    njb = buckets // bucket_block
    rows = bucket_block * w
    use_left = backward > 0 and njb > 1
    use_right = forward > 0 and njb > 1
    lhw = backward * w if use_left else 0
    rhw = forward * w if use_right else 0

    keep_two, vmem_budget, vmem_limit = _chip_config()
    g_blk = _choose_bh_block(bh, rows, lhw, rhw, e, q.dtype.itemsize,
                             vmem_budget, keep_two)
    num_g = bh // g_blk

    q3 = q.reshape(bh, t, e)
    k3 = k.reshape(bh, t, e)
    v3 = v.reshape(bh, t, e)

    bias_core, bias_left, bias_right = _build_biases(
        bucket_block, w, backward, forward, causal, use_left, use_right)

    core_spec = pl.BlockSpec((g_blk, rows, e), lambda g, j: (g, j, 0))

    def const_spec(shape):
        # Constant index map -> the bias tile stays resident, never re-DMA'd.
        return pl.BlockSpec(shape, lambda g, j: (0, 0))

    in_specs = [core_spec, core_spec]                 # q, k_core
    operands = [q3, k3]
    left_spec = right_spec = None
    if use_left:
        step_b = bucket_block // backward
        left_spec = pl.BlockSpec(
            (g_blk, lhw, e),
            lambda g, j, step_b=step_b: (g, jnp.maximum(j * step_b - 1, 0), 0))
        in_specs.append(left_spec)
        operands.append(k3)
    if use_right:
        step_f = bucket_block // forward
        last_f = buckets // forward - 1
        right_spec = pl.BlockSpec(
            (g_blk, rhw, e),
            lambda g, j, step_f=step_f, last_f=last_f: (
                g, jnp.minimum((j + 1) * step_f, last_f), 0))
        in_specs.append(right_spec)
        operands.append(k3)
    in_specs.append(core_spec)                        # v_core
    operands.append(v3)
    if use_left:
        in_specs.append(left_spec)
        operands.append(v3)
    if use_right:
        in_specs.append(right_spec)
        operands.append(v3)

    in_specs.append(const_spec((rows, rows)))
    operands.append(jnp.asarray(bias_core))
    if use_left:
        in_specs.append(const_spec((rows, lhw)))
        operands.append(jnp.asarray(bias_left))
    if use_right:
        in_specs.append(const_spec((rows, rhw)))
        operands.append(jnp.asarray(bias_right))

    kernel = functools.partial(
        _local_attn_kernel, use_left=use_left, use_right=use_right,
        bf16_matmul=bf16_matmul, bf16_exp=bf16_exp,
        approx_reciprocal=approx_reciprocal)

    out = pl.pallas_call(
        kernel,
        out_shape=jax.ShapeDtypeStruct((bh, t, e), q.dtype),
        grid=(num_g, njb),
        in_specs=in_specs,
        out_specs=core_spec,
        compiler_params=pltpu.CompilerParams(
            dimension_semantics=("parallel", "parallel"),
            vmem_limit_bytes=vmem_limit),
    )(*operands)

    return out.reshape(b, h, t, e)


# ---------------------------------------------------------------------------
# pure-JAX reference (transcription of the PyTorch forward) for verification
# ---------------------------------------------------------------------------

def _look_around(x, backward, forward, pad_value):
    pads = [(0, 0)] * x.ndim
    pads[1] = (backward, forward)
    px = jnp.pad(x, pads, constant_values=pad_value)
    n = x.shape[1]
    parts = [px[:, ind:ind + n] for ind in range(forward + backward + 1)]
    return jnp.concatenate(parts, axis=2)


def local_attention_ref(q, k, v, *, buckets, causal=False, look_backward=1,
                        look_forward=0):
    b, h, t, e = q.shape
    w = t // buckets
    ticker = jnp.arange(t, dtype=q.dtype)[None, :]
    b_t = ticker.reshape(1, buckets, w)
    bq = q.reshape(b * h, buckets, w, e)
    bk = _look_around(k.reshape(b * h, buckets, w, e), look_backward,
                      look_forward, -1.0)
    bv = _look_around(v.reshape(b * h, buckets, w, e), look_backward,
                      look_forward, -1.0)
    bq_t = b_t
    bq_k = _look_around(b_t, look_backward, look_forward, -1.0)
    dots = jnp.einsum('bhie,bhje->bhij', bq, bk)
    mask_value = -jnp.finfo(dots.dtype).max
    if causal:
        dots = jnp.where(bq_t[:, :, :, None] < bq_k[:, :, None, :],
                         mask_value, dots)
    dots = jnp.where(bq_k[:, :, None, :] == -1, mask_value, dots)
    attn = jax.nn.softmax(dots, axis=-1)
    out = jnp.einsum('bhij,bhje->bhie', attn, bv)
    return out.reshape(b, h, t, e)


# ---------------------------------------------------------------------------
# self test
# ---------------------------------------------------------------------------

if __name__ == "__main__":
    root = jax.random.PRNGKey(0)
    key_q, key_k, key_v = jax.random.split(root, 3)

    b, h, t, e = 2, 4, 512, 64
    buckets = 16
    # The module itself does NOT scale by 1/sqrt(e); like any real caller we
    # feed pre-scaled queries so the logits are O(1).
    q = jax.random.normal(key_q, (b, h, t, e), dtype=jnp.float32) * (e ** -0.5)
    k = jax.random.normal(key_k, (b, h, t, e), dtype=jnp.float32)
    v = jax.random.normal(key_v, (b, h, t, e), dtype=jnp.float32)

    cases = [
        (dict(causal=False, look_backward=1, look_forward=0,
              approx_reciprocal=False), 3e-2),
        (dict(causal=True, look_backward=1, look_forward=0), 3e-2),
        (dict(causal=False, look_backward=1, look_forward=1), 3e-2),
        (dict(causal=True, look_backward=1, look_forward=0,
              bf16_matmul=True, bf16_exp=True), 6e-2),
    ]

    ok = True
    for cfg, tol in cases:
        ref_cfg = {name: val for name, val in cfg.items()
                   if name in ('causal', 'look_backward', 'look_forward')}
        out = jax.block_until_ready(
            local_attention(q, k, v, buckets=buckets, **cfg))
        ref = jax.block_until_ready(
            local_attention_ref(q, k, v, buckets=buckets, **ref_cfg))
        if not jnp.allclose(out, ref, atol=tol, rtol=tol):
            ok = False
            err = float(jnp.max(jnp.abs(out - ref)))
            print(f"mismatch {cfg}: max abs err {err}")

    if ok:
        print("KERNEL_OK")
</pallas_src>

<mosaic_0001>
module attributes {stable_mosaic.version = 11 : i64} {
  func.func @_local_attn_kernel(%arg0: i32, %arg1: i32, %arg2: memref<4x128x64xf32, #tpu.memory_space<vmem>>, %arg3: memref<4x128x64xf32, #tpu.memory_space<vmem>>, %arg4: memref<4x32x64xf32, #tpu.memory_space<vmem>>, %arg5: memref<4x128x64xf32, #tpu.memory_space<vmem>>, %arg6: memref<4x32x64xf32, #tpu.memory_space<vmem>>, %arg7: memref<128x128xf32, #tpu.memory_space<vmem>>, %arg8: memref<128x32xf32, #tpu.memory_space<vmem>>, %arg9: memref<4x128x64xf32, #tpu.memory_space<vmem>>) attributes {dimension_semantics = [#tpu.dimension_semantics<parallel>, #tpu.dimension_semantics<parallel>], iteration_bounds = array<i64: 2, 4>, scalar_prefetch = 0 : i64, scratch_operands = 0 : i64, tpu.core_type = #tpu.core_type<tc>, window_params = [{transform_indices = @transform_0, window_bounds = array<i64: 4, 128, 64>}, {transform_indices = @transform_1, window_bounds = array<i64: 4, 128, 64>}, {transform_indices = @transform_2, window_bounds = array<i64: 4, 32, 64>}, {transform_indices = @transform_3, window_bounds = array<i64: 4, 128, 64>}, {transform_indices = @transform_4, window_bounds = array<i64: 4, 32, 64>}, {pipeline_mode = #tpu.pipeline_mode<synchronous>, transform_indices = @transform_5, window_bounds = array<i64: 128, 128>}, {pipeline_mode = #tpu.pipeline_mode<synchronous>, transform_indices = @transform_6, window_bounds = array<i64: 128, 32>}, {transform_indices = @transform_7, window_bounds = array<i64: 4, 128, 64>}]} {
    %c0 = arith.constant 0 : index
    %c0_0 = arith.constant 0 : index
    %c0_1 = arith.constant 0 : index
    %0 = vector.load %arg2[%c0, %c0_0, %c0_1] : memref<4x128x64xf32, #tpu.memory_space<vmem>>, vector<4x128x64xf32>
    %c0_i32 = arith.constant 0 : i32
    %1 = arith.cmpi eq, %arg1, %c0_i32 : i32
    %cst = arith.constant -1.000000e+30 : f32
    %cst_2 = arith.constant 0.000000e+00 : f32
    %2 = arith.select %1, %cst, %cst_2 : f32
    %c0_3 = arith.constant 0 : index
    %c0_4 = arith.constant 0 : index
    %3 = vector.load %arg8[%c0_3, %c0_4] : memref<128x32xf32, #tpu.memory_space<vmem>>, vector<128x32xf32>
    %4 = vector.broadcast %2 : f32 to vector<128x32xf32>
    %5 = arith.addf %3, %4 : vector<128x32xf32>
    %c0_5 = arith.constant 0 : index
    %c0_6 = arith.constant 0 : index
    %c0_7 = arith.constant 0 : index
    %6 = vector.load %arg4[%c0_5, %c0_6, %c0_7] : memref<4x32x64xf32, #tpu.memory_space<vmem>>, vector<4x32x64xf32>
    %cst_8 = arith.constant dense<0.000000e+00> : vector<4x128x32xf32>
    %7 = tpu.matmul %0, %6, %cst_8 {dimension_numbers = #tpu.dot_dimension_numbers<[2], [2], [1], [1], [0, 0, 0, 1, 1, 1], [0], [0]>} : vector<4x128x64xf32>, vector<4x32x64xf32>, vector<4x128x32xf32> -> vector<4x128x32xf32>
    %8 = vector.shape_cast %5 : vector<128x32xf32> to vector<1x128x32xf32>
    %9 = vector.broadcast %8 : vector<1x128x32xf32> to vector<4x128x32xf32>
    %10 = arith.addf %7, %9 : vector<4x128x32xf32>
    %c0_9 = arith.constant 0 : index
    %c0_10 = arith.constant 0 : index
    %11 = vector.load %arg7[%c0_9, %c0_10] : memref<128x128xf32, #tpu.memory_space<vmem>>, vector<128x128xf32>
    %c0_11 = arith.constant 0 : index
    %c0_12 = arith.constant 0 : index
    %c0_13 = arith.constant 0 : index
    %12 = vector.load %arg3[%c0_11, %c0_12, %c0_13] : memref<4x128x64xf32, #tpu.memory_space<vmem>>, vector<4x128x64xf32>
    %cst_14 = arith.constant dense<0.000000e+00> : vector<4x128x128xf32>
    %13 = tpu.matmul %0, %12, %cst_14 {dimension_numbers = #tpu.dot_dimension_numbers<[2], [2], [1], [1], [0, 0, 0, 1, 1, 1], [0], [0]>} : vector<4x128x64xf32>, vector<4x128x64xf32>, vector<4x128x128xf32> -> vector<4x128x128xf32>
    %14 = vector.shape_cast %11 : vector<128x128xf32> to vector<1x128x128xf32>
    %15 = vector.broadcast %14 : vector<1x128x128xf32> to vector<4x128x128xf32>
    %16 = arith.addf %13, %15 : vector<4x128x128xf32>
    %cst_15 = arith.constant dense<0xFF800000> : vector<4x128xf32>
    %17 = vector.multi_reduction <maximumf>, %10, %cst_15 [2] : vector<4x128x32xf32> to vector<4x128xf32>
    %18 = vector.shape_cast %17 : vector<4x128xf32> to vector<4x128x1xf32>
    %cst_16 = arith.constant dense<0xFF800000> : vector<4x128xf32>
    %19 = vector.multi_reduction <maximumf>, %16, %cst_16 [2] : vector<4x128x128xf32> to vector<4x128xf32>
    %20 = vector.shape_cast %19 : vector<4x128xf32> to vector<4x128x1xf32>
    %21 = arith.maximumf %18, %20 : vector<4x128x1xf32>
    %22 = vector.broadcast %21 : vector<4x128x1xf32> to vector<4x128x32xf32>
    %23 = arith.subf %10, %22 : vector<4x128x32xf32>
    %24 = math.exp %23 : vector<4x128x32xf32>
    %cst_17 = arith.constant dense<0.000000e+00> : vector<4x128xf32>
    %25 = vector.multi_reduction <add>, %24, %cst_17 [2] : vector<4x128x32xf32> to vector<4x128xf32>
    %26 = vector.shape_cast %25 : vector<4x128xf32> to vector<4x128x1xf32>
    %c0_18 = arith.constant 0 : index
    %c0_19 = arith.constant 0 : index
    %c0_20 = arith.constant 0 : index
    %27 = vector.load %arg6[%c0_18, %c0_19, %c0_20] : memref<4x32x64xf32, #tpu.memory_space<vmem>>, vector<4x32x64xf32>
    %cst_21 = arith.constant dense<0.000000e+00> : vector<4x128x64xf32>
    %28 = tpu.matmul %24, %27, %cst_21 {dimension_numbers = #tpu.dot_dimension_numbers<[2], [1], [1], [2], [0, 0, 0, 1, 1, 2], [0], [0]>} : vector<4x128x32xf32>, vector<4x32x64xf32>, vector<4x128x64xf32> -> vector<4x128x64xf32>
    %29 = vector.broadcast %21 : vector<4x128x1xf32> to vector<4x128x128xf32>
    %30 = arith.subf %16, %29 : vector<4x128x128xf32>
    %31 = math.exp %30 : vector<4x128x128xf32>
    %cst_22 = arith.constant dense<0.000000e+00> : vector<4x128xf32>
    %32 = vector.multi_reduction <add>, %31, %cst_22 [2] : vector<4x128x128xf32> to vector<4x128xf32>
    %33 = vector.shape_cast %32 : vector<4x128xf32> to vector<4x128x1xf32>
    %c0_23 = arith.constant 0 : index
    %c0_24 = arith.constant 0 : index
    %c0_25 = arith.constant 0 : index
    %34 = vector.load %arg5[%c0_23, %c0_24, %c0_25] : memref<4x128x64xf32, #tpu.memory_space<vmem>>, vector<4x128x64xf32>
    %cst_26 = arith.constant dense<0.000000e+00> : vector<4x128x64xf32>
    %35 = tpu.matmul %31, %34, %cst_26 {dimension_numbers = #tpu.dot_dimension_numbers<[2], [1], [1], [2], [0, 0, 0, 1, 1, 2], [0], [0]>} : vector<4x128x128xf32>, vector<4x128x64xf32>, vector<4x128x64xf32> -> vector<4x128x64xf32>
    %36 = arith.addf %28, %35 : vector<4x128x64xf32>
    %37 = arith.addf %26, %33 : vector<4x128x1xf32>
    %38 = tpu.reciprocal %37 : vector<4x128x1xf32> -> vector<4x128x1xf32>
    %39 = vector.broadcast %38 : vector<4x128x1xf32> to vector<4x128x64xf32>
    %40 = arith.mulf %36, %39 : vector<4x128x64xf32>
    %c0_27 = arith.constant 0 : index
    %c0_28 = arith.constant 0 : index
    %c0_29 = arith.constant 0 : index
    %41 = vector.load %arg9[%c0_27, %c0_28, %c0_29] : memref<4x128x64xf32, #tpu.memory_space<vmem>>, vector<4x128x64xf32>
    tpu.vector_store %arg9[%c0_27, %c0_28, %c0_29], %40 {strides = array<i32>} : memref<4x128x64xf32, #tpu.memory_space<vmem>>, vector<4x128x64xf32>,
    return
  }
  func.func @transform_0(%arg0: i32, %arg1: i32) -> (i32, i32, i32) {
    %c0_i32 = arith.constant 0 : i32
    %c0_i32_0 = arith.constant 0 : i32
    return %arg0, %arg1, %c0_i32 : i32, i32, i32
  }
  func.func @transform_1(%arg0: i32, %arg1: i32) -> (i32, i32, i32) {
    %c0_i32 = arith.constant 0 : i32
    %c0_i32_0 = arith.constant 0 : i32
    return %arg0, %arg1, %c0_i32 : i32, i32, i32
  }
  func.func @transform_2(%arg0: i32, %arg1: i32) -> (i32, i32, i32) {
    %c4_i32 = arith.constant 4 : i32
    %0 = arith.muli %arg1, %c4_i32 : i32
    %c1_i32 = arith.constant 1 : i32
    %1 = arith.subi %0, %c1_i32 : i32
    %c0_i32 = arith.constant 0 : i32
    %2 = arith.maxsi %1, %c0_i32 : i32
    %c0_i32_0 = arith.constant 0 : i32
    %c0_i32_1 = arith.constant 0 : i32
    return %arg0, %2, %c0_i32_0 : i32, i32, i32
  }
  func.func @transform_3(%arg0: i32, %arg1: i32) -> (i32, i32, i32) {
    %c0_i32 = arith.constant 0 : i32
    %c0_i32_0 = arith.constant 0 : i32
    return %arg0, %arg1, %c0_i32 : i32, i32, i32
  }
  func.func @transform_4(%arg0: i32, %arg1: i32) -> (i32, i32, i32) {
    %c4_i32 = arith.constant 4 : i32
    %0 = arith.muli %arg1, %c4_i32 : i32
    %c1_i32 = arith.constant 1 : i32
    %1 = arith.subi %0, %c1_i32 : i32
    %c0_i32 = arith.constant 0 : i32
    %2 = arith.maxsi %1, %c0_i32 : i32
    %c0_i32_0 = arith.constant 0 : i32
    %c0_i32_1 = arith.constant 0 : i32
    return %arg0, %2, %c0_i32_0 : i32, i32, i32
  }
  func.func @transform_5(%arg0: i32, %arg1: i32) -> (i32, i32) {
    %c0_i32 = arith.constant 0 : i32
    %c0_i32_0 = arith.constant 0 : i32
    %c0_i32_1 = arith.constant 0 : i32
    return %c0_i32, %c0_i32_0 : i32, i32
  }
  func.func @transform_6(%arg0: i32, %arg1: i32) -> (i32, i32) {
    %c0_i32 = arith.constant 0 : i32
    %c0_i32_0 = arith.constant 0 : i32
    %c0_i32_1 = arith.constant 0 : i32
    return %c0_i32, %c0_i32_0 : i32, i32
  }
  func.func @transform_7(%arg0: i32, %arg1: i32) -> (i32, i32, i32) {
    %c0_i32 = arith.constant 0 : i32
    %c0_i32_0 = arith.constant 0 : i32
    return %arg0, %arg1, %c0_i32 : i32, i32, i32
  }
}

</mosaic_0001>

<bundles_post_ra>
// kernel: tpu_custom_call.1
= control target key start
LH: loop header
LB: loop body
LE: loop exit
PB: predicated region body
PF: predicated region fallthrough
CT: control target
= control target key end

     0   :  { %s11865_s0 = inlined_call_operand.vmem [shape: f32[8,512,64], index: 0, kind: input, shape index: {}]   ;;  %s11866_s1 = inlined_call_operand.vmem [shape: f32[8,512,64], index: 1, kind: input, shape index: {}]   ;;  %s11867_s2 = inlined_call_operand.vmem [shape: f32[8,512,64], index: 2, kind: input, shape index: {}]   ;;  %s11868_s3 = inlined_call_operand.vmem [shape: f32[8,512,64], index: 3, kind: input, shape index: {}]   ;;  %s11869_s4 = inlined_call_operand.vmem [shape: f32[8,512,64], index: 4, kind: input, shape index: {}]   ;;  %s11870_s5 = inlined_call_operand.vmem [shape: f32[128,128], index: 5, kind: input, shape index: {}]   ;;  %s11871_s6 = inlined_call_operand.vmem [shape: f32[128,32], index: 6, kind: input, shape index: {}]   ;;  %s11872_s7 = inlined_call_operand.vmem [shape: f32[8,512,64], index: 7, kind: output, shape index: {}]  }
   0x1   :  { %12049 = sst [smem:[#allocation151_spill]] %s11865_s0 }
   0x2   :  { %s6966_s24 = smov 0   ;;  %s6968_s25 = smov 0  }
   0x3   :  { %s6970_s26 = smov 0   ;;  %s6972_s27 = smov 0  }
   0x4   :  { %s6974_s28 = smov 0   ;;  %s6976_s29 = smov 0  }
   0x5   :  { %s6978_s30 = smov 0   ;;  %s6980_s8 = smov 0  }
   0x6   :  { %s6982_s9 = smov 0  }
   0x7 LB: > { %s26_s10 = sadd.s32 1, %s6916_s30  ;;  %s29_s11 = sadd.s32 1, %s6920_s8  ;;  %s6924_s9 = sphi %s6982_s9, %s17_s9   ;;  %s6920_s8 = sphi %s6980_s8, %s12792_s8   ;;  %s6916_s30 = sphi %s6978_s30, %s12791_s30   ;;  %s6912_s29 = sphi %s6976_s29, %s12790_s29   ;;  %s6908_s28 = sphi %s6974_s28, %s12789_s28   ;;  %s6904_s27 = sphi %s6972_s27, %s12788_s27   ;;  %s6900_s26 = sphi %s6970_s26, %s12787_s26   ;;  %s6896_s25 = sphi %s6968_s25, %s12786_s25   ;;  %s6892_s24 = sphi %s6966_s24, %s12785_s24  }
   0x8   : > { %p27_p0 = scmp.ge.s32.totalorder %s26_s10, 4  ;;  %s38_s12 = sadd.s32 1, %s6904_s27 }
   0x9   : > { %p45_p1 = scmp.ne.s32.totalorder %s6904_s27, %s6900_s26  ;;  %p46_p2 = scmp.eq.s32.totalorder %s6924_s9, 0 }
   0xa   : > { %s12794_s10 = smov (%p27_p0, %s26_s10), 0  ;;  %s12796_s11 = smov (!%p27_p0, %s29_s11), %s6920_s8 }
   0xb   : > { %12050 = sst [smem:[#allocation8_spill]] %s12794_s10  ;;  %s34_s13 = ssub.s32 %s6916_s30, %s12794_s10 }
   0xc   : > { %p31_p3 = scmp.ge.s32.totalorder %s12796_s11, 2  ;;  %s6067_s14 = sshll.u32 %s6916_s30, 2 }
   0xd   : > { %p7028_p4 = por %p46_p2, %p45_p1  ;;  %s6068_s16 = sadd.s32 4294967295, %s6067_s14 }
   0xe   : > { %s12798_s11 = smov (%p31_p3, %s12796_s11), 0  ;;  %p91_p5 = scmp.gt.s32.totalorder %s6068_s16, 0 }
   0xf   : > { %12052 = sst [smem:[#allocation9_spill]] %s12798_s11  ;;  %s6069_s17 = sshll.u32 %s12794_s10, 2 }
  0x10   : > { %s33_s18 = ssub.s32 %s6920_s8, %s12798_s11  ;;  %s6070_s19 = sadd.s32 4294967295, %s6069_s17 }
  0x11   : > { %s35_s20 = sor.u32 %s34_s13, %s33_s18  ;;  %p95_p6 = scmp.gt.s32.totalorder %s6070_s19, 0 }
  0x12   : > { %s6065_s21 = sadd.s32 4294967295, %s6924_s9   ;;  %p36_p7 = scmp.eq.s32.totalorder %s35_s20, 0 }
  0x13   : > { %s12800_s16 = smov (!%p91_p5, %s6068_s16), 0  ;;  %s12802_s19 = smov (!%p95_p6, %s6070_s19), 0 }
  0x14   : > { %s7041_s22 = scalar_select %p36_p7, %s6904_s27, %s38_s12  }
  0x15   : > { %p109_p8 = scmp.ne.s32.totalorder %s6896_s25, %s6892_s24  ;;  %p247_p9 = scmp.eq.s32.totalorder %s6065_s21, 7 }
  0x16   : > { %12053 = sst [smem:[#allocation10_spill]] %s7041_s22  ;;  %s98_s23 = ssub.s32 %s12800_s16, %s12802_s19 }
  0x17   : > { %s102_s14 = sadd.s32 1, %s6896_s25  ;;  %s99_s10 = sor.u32 %s98_s23, %s33_s18 }
  0x18   : > { %p7049_p10 = por %p109_p8, %p46_p2  ;;  %p100_p11 = scmp.eq.s32.totalorder %s99_s10, 0 }
  0x19   : > { %p7056_p12 = por %p247_p9, %p45_p1  ;;  %p6076_p13 = scmp.ge.s32.totalorder %s6924_s9, 8 }
  0x1a   : > { %s7061_s17 = scalar_select %p100_p11, %s6896_s25, %s102_s14  }
  0x1b   : > { %275 = sbr.rel (%p6076_p13) target bundleno = 294 (0x126), region = 24 }
  0x20   : > { %278 = sbr.rel (!%p7028_p4) target bundleno = 106 (0x6a), region = 28  ;;  %s280_s12 = sand.u32 (%p7028_p4), 1, %s6904_s27  }
  0x21   : > { %s6079_s18 = sshll.u32 (%p7028_p4), %s6916_s30, 4  ;;  %s6077_s19 = sshll.u32 (%p7028_p4), %s280_s12, 9 }
  0x22   : > { %s6392_s10 = sshll.u32 (%p7028_p4), %s6920_s8, 8  ;;  %s12056_s0 = sld [smem:[#allocation151_spill]] (%p7028_p4) }
  0x23   : > { %s286_s20 = sadd.s32 (%p7028_p4), %s6392_s10, %s6079_s18  ;;  %s7077_s12 = scalar_lea.vmem (%p7028_p4), [#allocation2], %s6077_s19 }
  0x24   : > { %s6081_s21 = sshll.u32 (%p7028_p4), %s286_s20, 3 }
  0x28   : > { %s7072_s14 = scalar_lea.vmem %s12056_s0, %s6081_s21 }
  0x29   : > { %v443_v0 = vld [vmem:[%s7072_s14] sm:$0xff]  ;;  %v445_v1 = vld [vmem:[%s7072_s14 + $0x8] sm:$0xff]  ;;  %v447_v2 = vld [vmem:[%s7072_s14 + $0x10] sm:$0xff] }
  0x2a   : > { %444 = vst [vmem:[%s7077_s12] sm:$0xff] %v443_v0  ;;  %v449_v3 = vld [vmem:[%s7072_s14 + $0x18] sm:$0xff]  ;;  %v451_v4 = vld [vmem:[%s7072_s14 + $0x20] sm:$0xff]  ;;  %v453_v5 = vld [vmem:[%s7072_s14 + $0x28] sm:$0xff] }
  0x2b   : > { %446 = vst [vmem:[%s7077_s12 + $0x8] sm:$0xff] %v445_v1  ;;  %v455_v6 = vld [vmem:[%s7072_s14 + $0x30] sm:$0xff]  ;;  %v457_v7 = vld [vmem:[%s7072_s14 + $0x38] sm:$0xff]  ;;  %v459_v8 = vld [vmem:[%s7072_s14 + $0x40] sm:$0xff] }
  0x2c   : > { %448 = vst [vmem:[%s7077_s12 + $0x10] sm:$0xff] %v447_v2  ;;  %v461_v9 = vld [vmem:[%s7072_s14 + $0x48] sm:$0xff]  ;;  %v463_v10 = vld [vmem:[%s7072_s14 + $0x50] sm:$0xff]  ;;  %v465_v11 = vld [vmem:[%s7072_s14 + $0x58] sm:$0xff] }
  0x2d   : > { %450 = vst [vmem:[%s7077_s12 + $0x18] sm:$0xff] %v449_v3  ;;  %v467_v12 = vld [vmem:[%s7072_s14 + $0x60] sm:$0xff]  ;;  %v469_v13 = vld [vmem:[%s7072_s14 + $0x68] sm:$0xff]  ;;  %v471_v14 = vld [vmem:[%s7072_s14 + $0x70] sm:$0xff] }
  0x2e   : > { %452 = vst [vmem:[%s7077_s12 + $0x20] sm:$0xff] %v451_v4  ;;  %v473_v15 = vld [vmem:[%s7072_s14 + $0x78] sm:$0xff]  ;;  %v475_v16 = vld [vmem:[%s7072_s14 + $0x200] sm:$0xff]  ;;  %v477_v17 = vld [vmem:[%s7072_s14 + $0x208] sm:$0xff] }
  0x2f   : > { %454 = vst [vmem:[%s7077_s12 + $0x28] sm:$0xff] %v453_v5  ;;  %v479_v18 = vld [vmem:[%s7072_s14 + $0x210] sm:$0xff]  ;;  %v481_v19 = vld [vmem:[%s7072_s14 + $0x218] sm:$0xff]  ;;  %v483_v20 = vld [vmem:[%s7072_s14 + $0x220] sm:$0xff] }
  0x30   : > { %456 = vst [vmem:[%s7077_s12 + $0x30] sm:$0xff] %v455_v6  ;;  %v485_v21 = vld [vmem:[%s7072_s14 + $0x228] sm:$0xff]  ;;  %v487_v22 = vld [vmem:[%s7072_s14 + $0x230] sm:$0xff]  ;;  %v489_v23 = vld [vmem:[%s7072_s14 + $0x238] sm:$0xff] }
  0x31   : > { %458 = vst [vmem:[%s7077_s12 + $0x38] sm:$0xff] %v457_v7  ;;  %v491_v24 = vld [vmem:[%s7072_s14 + $0x240] sm:$0xff]  ;;  %v493_v25 = vld [vmem:[%s7072_s14 + $0x248] sm:$0xff]  ;;  %v495_v26 = vld [vmem:[%s7072_s14 + $0x250] sm:$0xff] }
  0x32   : > { %460 = vst [vmem:[%s7077_s12 + $0x40] sm:$0xff] %v459_v8  ;;  %v497_v27 = vld [vmem:[%s7072_s14 + $0x258] sm:$0xff]  ;;  %v499_v28 = vld [vmem:[%s7072_s14 + $0x260] sm:$0xff]  ;;  %v501_v29 = vld [vmem:[%s7072_s14 + $0x268] sm:$0xff] }
  0x33   : > { %462 = vst [vmem:[%s7077_s12 + $0x48] sm:$0xff] %v461_v9  ;;  %v503_v30 = vld [vmem:[%s7072_s14 + $0x270] sm:$0xff]  ;;  %v505_v31 = vld [vmem:[%s7072_s14 + $0x278] sm:$0xff]  ;;  %v507_v32 = vld [vmem:[%s7072_s14 + $0x400] sm:$0xff] }
  0x34   : > { %464 = vst [vmem:[%s7077_s12 + $0x50] sm:$0xff] %v463_v10  ;;  %v509_v33 = vld [vmem:[%s7072_s14 + $0x408] sm:$0xff]  ;;  %v511_v34 = vld [vmem:[%s7072_s14 + $0x410] sm:$0xff]  ;;  %v513_v35 = vld [vmem:[%s7072_s14 + $0x418] sm:$0xff] }
  0x35   : > { %466 = vst [vmem:[%s7077_s12 + $0x58] sm:$0xff] %v465_v11  ;;  %v515_v36 = vld [vmem:[%s7072_s14 + $0x420] sm:$0xff]  ;;  %v517_v37 = vld [vmem:[%s7072_s14 + $0x428] sm:$0xff]  ;;  %v519_v38 = vld [vmem:[%s7072_s14 + $0x430] sm:$0xff] }
  0x36   : > { %468 = vst [vmem:[%s7077_s12 + $0x60] sm:$0xff] %v467_v12  ;;  %v521_v39 = vld [vmem:[%s7072_s14 + $0x438] sm:$0xff]  ;;  %v523_v40 = vld [vmem:[%s7072_s14 + $0x440] sm:$0xff]  ;;  %v525_v41 = vld [vmem:[%s7072_s14 + $0x448] sm:$0xff] }
  0x37   : > { %470 = vst [vmem:[%s7077_s12 + $0x68] sm:$0xff] %v469_v13  ;;  %v527_v42 = vld [vmem:[%s7072_s14 + $0x450] sm:$0xff]  ;;  %v529_v43 = vld [vmem:[%s7072_s14 + $0x458] sm:$0xff]  ;;  %v531_v44 = vld [vmem:[%s7072_s14 + $0x460] sm:$0xff] }
  0x38   : > { %472 = vst [vmem:[%s7077_s12 + $0x70] sm:$0xff] %v471_v14  ;;  %v533_v45 = vld [vmem:[%s7072_s14 + $0x468] sm:$0xff]  ;;  %v535_v46 = vld [vmem:[%s7072_s14 + $0x470] sm:$0xff]  ;;  %v537_v47 = vld [vmem:[%s7072_s14 + $0x478] sm:$0xff] }
  0x39   : > { %474 = vst [vmem:[%s7077_s12 + $0x78] sm:$0xff] %v473_v15  ;;  %v539_v48 = vld [vmem:[%s7072_s14 + $0x600] sm:$0xff]  ;;  %v541_v49 = vld [vmem:[%s7072_s14 + $0x608] sm:$0xff]  ;;  %v543_v50 = vld [vmem:[%s7072_s14 + $0x610] sm:$0xff] }
  0x3a   : > { %476 = vst [vmem:[%s7077_s12 + $0x80] sm:$0xff] %v475_v16  ;;  %v545_v51 = vld [vmem:[%s7072_s14 + $0x618] sm:$0xff]  ;;  %v547_v52 = vld [vmem:[%s7072_s14 + $0x620] sm:$0xff]  ;;  %v549_v53 = vld [vmem:[%s7072_s14 + $0x628] sm:$0xff] }
  0x3b   : > { %478 = vst [vmem:[%s7077_s12 + $0x88] sm:$0xff] %v477_v17  ;;  %v551_v54 = vld [vmem:[%s7072_s14 + $0x630] sm:$0xff]  ;;  %v553_v55 = vld [vmem:[%s7072_s14 + $0x638] sm:$0xff]  ;;  %v555_v56 = vld [vmem:[%s7072_s14 + $0x640] sm:$0xff] }
  0x3c   : > { %480 = vst [vmem:[%s7077_s12 + $0x90] sm:$0xff] %v479_v18  ;;  %v557_v57 = vld [vmem:[%s7072_s14 + $0x648] sm:$0xff]  ;;  %v559_v58 = vld [vmem:[%s7072_s14 + $0x650] sm:$0xff]  ;;  %v561_v59 = vld [vmem:[%s7072_s14 + $0x658] sm:$0xff] }
  0x3d   : > { %482 = vst [vmem:[%s7077_s12 + $0x98] sm:$0xff] %v481_v19  ;;  %v563_v60 = vld [vmem:[%s7072_s14 + $0x660] sm:$0xff]  ;;  %v565_v61 = vld [vmem:[%s7072_s14 + $0x668] sm:$0xff]  ;;  %v567_v62 = vld [vmem:[%s7072_s14 + $0x670] sm:$0xff] }
  0x3e   : > { %484 = vst [vmem:[%s7077_s12 + $0xa0] sm:$0xff] %v483_v20  ;;  %v569_v63 = vld [vmem:[%s7072_s14 + $0x678] sm:$0xff] }
  0x3f   : > { %486 = vst [vmem:[%s7077_s12 + $0xa8] sm:$0xff] %v485_v21 }
  0x40   : > { %488 = vst [vmem:[%s7077_s12 + $0xb0] sm:$0xff] %v487_v22 }
  0x41   : > { %490 = vst [vmem:[%s7077_s12 + $0xb8] sm:$0xff] %v489_v23 }
  0x42   : > { %492 = vst [vmem:[%s7077_s12 + $0xc0] sm:$0xff] %v491_v24 }
  0x43   : > { %494 = vst [vmem:[%s7077_s12 + $0xc8] sm:$0xff] %v493_v25 }
  0x44   : > { %496 = vst [vmem:[%s7077_s12 + $0xd0] sm:$0xff] %v495_v26 }
  0x45   : > { %498 = vst [vmem:[%s7077_s12 + $0xd8] sm:$0xff] %v497_v27 }
  0x46   : > { %500 = vst [vmem:[%s7077_s12 + $0xe0] sm:$0xff] %v499_v28 }
  0x47   : > { %502 = vst [vmem:[%s7077_s12 + $0xe8] sm:$0xff] %v501_v29 }
  0x48   : > { %504 = vst [vmem:[%s7077_s12 + $0xf0] sm:$0xff] %v503_v30 }
  0x49   : > { %506 = vst [vmem:[%s7077_s12 + $0xf8] sm:$0xff] %v505_v31 }
  0x4a   : > { %508 = vst [vmem:[%s7077_s12 + $0x100] sm:$0xff] %v507_v32 }
  0x4b   : > { %510 = vst [vmem:[%s7077_s12 + $0x108] sm:$0xff] %v509_v33 }
  0x4c   : > { %512 = vst [vmem:[%s7077_s12 + $0x110] sm:$0xff] %v511_v34 }
  0x4d   : > { %514 = vst [vmem:[%s7077_s12 + $0x118] sm:$0xff] %v513_v35 }
  0x4e   : > { %516 = vst [vmem:[%s7077_s12 + $0x120] sm:$0xff] %v515_v36 }
  0x4f   : > { %518 = vst [vmem:[%s7077_s12 + $0x128] sm:$0xff] %v517_v37 }
  0x50   : > { %520 = vst [vmem:[%s7077_s12 + $0x130] sm:$0xff] %v519_v38 }
  0x51   : > { %522 = vst [vmem:[%s7077_s12 + $0x138] sm:$0xff] %v521_v39 }
  0x52   : > { %524 = vst [vmem:[%s7077_s12 + $0x140] sm:$0xff] %v523_v40 }
  0x53   : > { %526 = vst [vmem:[%s7077_s12 + $0x148] sm:$0xff] %v525_v41 }
  0x54   : > { %528 = vst [vmem:[%s7077_s12 + $0x150] sm:$0xff] %v527_v42 }
  0x55   : > { %530 = vst [vmem:[%s7077_s12 + $0x158] sm:$0xff] %v529_v43 }
  0x56   : > { %532 = vst [vmem:[%s7077_s12 + $0x160] sm:$0xff] %v531_v44 }
  0x57   : > { %534 = vst [vmem:[%s7077_s12 + $0x168] sm:$0xff] %v533_v45 }
  0x58   : > { %536 = vst [vmem:[%s7077_s12 + $0x170] sm:$0xff] %v535_v46 }
  0x59   : > { %538 = vst [vmem:[%s7077_s12 + $0x178] sm:$0xff] %v537_v47 }
  0x5a   : > { %540 = vst [vmem:[%s7077_s12 + $0x180] sm:$0xff] %v539_v48 }
  0x5b   : > { %542 = vst [vmem:[%s7077_s12 + $0x188] sm:$0xff] %v541_v49 }
  0x5c   : > { %544 = vst [vmem:[%s7077_s12 + $0x190] sm:$0xff] %v543_v50 }
  0x5d   : > { %546 = vst [vmem:[%s7077_s12 + $0x198] sm:$0xff] %v545_v51 }
  0x5e   : > { %548 = vst [vmem:[%s7077_s12 + $0x1a0] sm:$0xff] %v547_v52 }
  0x5f   : > { %550 = vst [vmem:[%s7077_s12 + $0x1a8] sm:$0xff] %v549_v53 }
  0x60   : > { %552 = vst [vmem:[%s7077_s12 + $0x1b0] sm:$0xff] %v551_v54 }
  0x61   : > { %554 = vst [vmem:[%s7077_s12 + $0x1b8] sm:$0xff] %v553_v55 }
  0x62   : > { %556 = vst [vmem:[%s7077_s12 + $0x1c0] sm:$0xff] %v555_v56 }
  0x63   : > { %558 = vst [vmem:[%s7077_s12 + $0x1c8] sm:$0xff] %v557_v57 }
  0x64   : > { %560 = vst [vmem:[%s7077_s12 + $0x1d0] sm:$0xff] %v559_v58 }
  0x65   : > { %562 = vst [vmem:[%s7077_s12 + $0x1d8] sm:$0xff] %v561_v59 }
  0x66   : > { %564 = vst [vmem:[%s7077_s12 + $0x1e0] sm:$0xff] %v563_v60 }
  0x67   : > { %566 = vst [vmem:[%s7077_s12 + $0x1e8] sm:$0xff] %v565_v61 }
  0x68   : > { %568 = vst [vmem:[%s7077_s12 + $0x1f0] sm:$0xff] %v567_v62 }
  0x69   : > { %570 = vst [vmem:[%s7077_s12 + $0x1f8] sm:$0xff] %v569_v63 }
  0x6a PF: > { %576 = sbr.rel (!%p7028_p4) target bundleno = 177 (0xb1), region = 66  ;;  %s578_s22 = sand.u32 (%p7028_p4), 1, %s6904_s27  }
  0x6b   : > { %s6084_s18 = sshll.u32 (%p7028_p4), %s6916_s30, 4  ;;  %s6082_s19 = sshll.u32 (%p7028_p4), %s578_s22, 9 }
  0x6c   : > { %s6393_s10 = sshll.u32 (%p7028_p4), %s6920_s8, 8  ;;  %s7217_s12 = scalar_lea.vmem (%p7028_p4), [#allocation3], %s6082_s19 }
  0x6d   : > { %s584_s20 = sadd.s32 (%p7028_p4), %s6393_s10, %s6084_s18 }
  0x6e   : > { %s6086_s21 = sshll.u32 (%p7028_p4), %s584_s20, 3 }
  0x6f   : > { %s7212_s14 = scalar_lea.vmem %s11866_s1, %s6086_s21 }
  0x70   : > { %v741_v0 = vld [vmem:[%s7212_s14] sm:$0xff]  ;;  %v743_v1 = vld [vmem:[%s7212_s14 + $0x8] sm:$0xff]  ;;  %v745_v2 = vld [vmem:[%s7212_s14 + $0x10] sm:$0xff] }
  0x71   : > { %742 = vst [vmem:[%s7217_s12] sm:$0xff] %v741_v0  ;;  %v747_v3 = vld [vmem:[%s7212_s14 + $0x18] sm:$0xff]  ;;  %v749_v4 = vld [vmem:[%s7212_s14 + $0x20] sm:$0xff]  ;;  %v751_v5 = vld [vmem:[%s7212_s14 + $0x28] sm:$0xff] }
  0x72   : > { %744 = vst [vmem:[%s7217_s12 + $0x8] sm:$0xff] %v743_v1  ;;  %v753_v6 = vld [vmem:[%s7212_s14 + $0x30] sm:$0xff]  ;;  %v755_v7 = vld [vmem:[%s7212_s14 + $0x38] sm:$0xff]  ;;  %v757_v8 = vld [vmem:[%s7212_s14 + $0x40] sm:$0xff] }
  0x73   : > { %746 = vst [vmem:[%s7217_s12 + $0x10] sm:$0xff] %v745_v2  ;;  %v759_v9 = vld [vmem:[%s7212_s14 + $0x48] sm:$0xff]  ;;  %v761_v10 = vld [vmem:[%s7212_s14 + $0x50] sm:$0xff]  ;;  %v763_v11 = vld [vmem:[%s7212_s14 + $0x58] sm:$0xff] }
  0x74   : > { %748 = vst [vmem:[%s7217_s12 + $0x18] sm:$0xff] %v747_v3  ;;  %v765_v12 = vld [vmem:[%s7212_s14 + $0x60] sm:$0xff]  ;;  %v767_v13 = vld [vmem:[%s7212_s14 + $0x68] sm:$0xff]  ;;  %v769_v14 = vld [vmem:[%s7212_s14 + $0x70] sm:$0xff] }
  0x75   : > { %750 = vst [vmem:[%s7217_s12 + $0x20] sm:$0xff] %v749_v4  ;;  %v771_v15 = vld [vmem:[%s7212_s14 + $0x78] sm:$0xff]  ;;  %v773_v16 = vld [vmem:[%s7212_s14 + $0x200] sm:$0xff]  ;;  %v775_v17 = vld [vmem:[%s7212_s14 + $0x208] sm:$0xff] }
  0x76   : > { %752 = vst [vmem:[%s7217_s12 + $0x28] sm:$0xff] %v751_v5  ;;  %v777_v18 = vld [vmem:[%s7212_s14 + $0x210] sm:$0xff]  ;;  %v779_v19 = vld [vmem:[%s7212_s14 + $0x218] sm:$0xff]  ;;  %v781_v20 = vld [vmem:[%s7212_s14 + $0x220] sm:$0xff] }
  0x77   : > { %754 = vst [vmem:[%s7217_s12 + $0x30] sm:$0xff] %v753_v6  ;;  %v783_v21 = vld [vmem:[%s7212_s14 + $0x228] sm:$0xff]  ;;  %v785_v22 = vld [vmem:[%s7212_s14 + $0x230] sm:$0xff]  ;;  %v787_v23 = vld [vmem:[%s7212_s14 + $0x238] sm:$0xff] }
  0x78   : > { %756 = vst [vmem:[%s7217_s12 + $0x38] sm:$0xff] %v755_v7  ;;  %v789_v24 = vld [vmem:[%s7212_s14 + $0x240] sm:$0xff]  ;;  %v791_v25 = vld [vmem:[%s7212_s14 + $0x248] sm:$0xff]  ;;  %v793_v26 = vld [vmem:[%s7212_s14 + $0x250] sm:$0xff] }
  0x79   : > { %758 = vst [vmem:[%s7217_s12 + $0x40] sm:$0xff] %v757_v8  ;;  %v795_v27 = vld [vmem:[%s7212_s14 + $0x258] sm:$0xff]  ;;  %v797_v28 = vld [vmem:[%s7212_s14 + $0x260] sm:$0xff]  ;;  %v799_v29 = vld [vmem:[%s7212_s14 + $0x268] sm:$0xff] }
  0x7a   : > { %760 = vst [vmem:[%s7217_s12 + $0x48] sm:$0xff] %v759_v9  ;;  %v801_v30 = vld [vmem:[%s7212_s14 + $0x270] sm:$0xff]  ;;  %v803_v31 = vld [vmem:[%s7212_s14 + $0x278] sm:$0xff]  ;;  %v805_v32 = vld [vmem:[%s7212_s14 + $0x400] sm:$0xff] }
  0x7b   : > { %762 = vst [vmem:[%s7217_s12 + $0x50] sm:$0xff] %v761_v10  ;;  %v807_v33 = vld [vmem:[%s7212_s14 + $0x408] sm:$0xff]  ;;  %v809_v34 = vld [vmem:[%s7212_s14 + $0x410] sm:$0xff]  ;;  %v811_v35 = vld [vmem:[%s7212_s14 + $0x418] sm:$0xff] }
  0x7c   : > { %764 = vst [vmem:[%s7217_s12 + $0x58] sm:$0xff] %v763_v11  ;;  %v813_v36 = vld [vmem:[%s7212_s14 + $0x420] sm:$0xff]  ;;  %v815_v37 = vld [vmem:[%s7212_s14 + $0x428] sm:$0xff]  ;;  %v817_v38 = vld [vmem:[%s7212_s14 + $0x430] sm:$0xff] }
  0x7d   : > { %766 = vst [vmem:[%s7217_s12 + $0x60] sm:$0xff] %v765_v12  ;;  %v819_v39 = vld [vmem:[%s7212_s14 + $0x438] sm:$0xff]  ;;  %v821_v40 = vld [vmem:[%s7212_s14 + $0x440] sm:$0xff]  ;;  %v823_v41 = vld [vmem:[%s7212_s14 + $0x448] sm:$0xff] }
  0x7e   : > { %768 = vst [vmem:[%s7217_s12 + $0x68] sm:$0xff] %v767_v13  ;;  %v825_v42 = vld [vmem:[%s7212_s14 + $0x450] sm:$0xff]  ;;  %v827_v43 = vld [vmem:[%s7212_s14 + $0x458] sm:$0xff]  ;;  %v829_v44 = vld [vmem:[%s7212_s14 + $0x460] sm:$0xff] }
  0x7f   : > { %770 = vst [vmem:[%s7217_s12 + $0x70] sm:$0xff] %v769_v14  ;;  %v831_v45 = vld [vmem:[%s7212_s14 + $0x468] sm:$0xff]  ;;  %v833_v46 = vld [vmem:[%s7212_s14 + $0x470] sm:$0xff]  ;;  %v835_v47 = vld [vmem:[%s7212_s14 + $0x478] sm:$0xff] }
  0x80   : > { %772 = vst [vmem:[%s7217_s12 + $0x78] sm:$0xff] %v771_v15  ;;  %v837_v48 = vld [vmem:[%s7212_s14 + $0x600] sm:$0xff]  ;;  %v839_v49 = vld [vmem:[%s7212_s14 + $0x608] sm:$0xff]  ;;  %v841_v50 = vld [vmem:[%s7212_s14 + $0x610] sm:$0xff] }
  0x81   : > { %774 = vst [vmem:[%s7217_s12 + $0x80] sm:$0xff] %v773_v16  ;;  %v843_v51 = vld [vmem:[%s7212_s14 + $0x618] sm:$0xff]  ;;  %v845_v52 = vld [vmem:[%s7212_s14 + $0x620] sm:$0xff]  ;;  %v847_v53 = vld [vmem:[%s7212_s14 + $0x628] sm:$0xff] }
  0x82   : > { %776 = vst [vmem:[%s7217_s12 + $0x88] sm:$0xff] %v775_v17  ;;  %v849_v54 = vld [vmem:[%s7212_s14 + $0x630] sm:$0xff]  ;;  %v851_v55 = vld [vmem:[%s7212_s14 + $0x638] sm:$0xff]  ;;  %v853_v56 = vld [vmem:[%s7212_s14 + $0x640] sm:$0xff] }
  0x83   : > { %778 = vst [vmem:[%s7217_s12 + $0x90] sm:$0xff] %v777_v18  ;;  %v855_v57 = vld [vmem:[%s7212_s14 + $0x648] sm:$0xff]  ;;  %v857_v58 = vld [vmem:[%s7212_s14 + $0x650] sm:$0xff]  ;;  %v859_v59 = vld [vmem:[%s7212_s14 + $0x658] sm:$0xff] }
  0x84   : > { %780 = vst [vmem:[%s7217_s12 + $0x98] sm:$0xff] %v779_v19  ;;  %v861_v60 = vld [vmem:[%s7212_s14 + $0x660] sm:$0xff]  ;;  %v863_v61 = vld [vmem:[%s7212_s14 + $0x668] sm:$0xff]  ;;  %v865_v62 = vld [vmem:[%s7212_s14 + $0x670] sm:$0xff] }
  0x85   : > { %782 = vst [vmem:[%s7217_s12 + $0xa0] sm:$0xff] %v781_v20  ;;  %v867_v63 = vld [vmem:[%s7212_s14 + $0x678] sm:$0xff] }
  0x86   : > { %784 = vst [vmem:[%s7217_s12 + $0xa8] sm:$0xff] %v783_v21 }
  0x87   : > { %786 = vst [vmem:[%s7217_s12 + $0xb0] sm:$0xff] %v785_v22 }
  0x88   : > { %788 = vst [vmem:[%s7217_s12 + $0xb8] sm:$0xff] %v787_v23 }
  0x89   : > { %790 = vst [vmem:[%s7217_s12 + $0xc0] sm:$0xff] %v789_v24 }
  0x8a   : > { %792 = vst [vmem:[%s7217_s12 + $0xc8] sm:$0xff] %v791_v25 }
  0x8b   : > { %794 = vst [vmem:[%s7217_s12 + $0xd0] sm:$0xff] %v793_v26 }
  0x8c   : > { %796 = vst [vmem:[%s7217_s12 + $0xd8] sm:$0xff] %v795_v27 }
  0x8d   : > { %798 = vst [vmem:[%s7217_s12 + $0xe0] sm:$0xff] %v797_v28 }
  0x8e   : > { %800 = vst [vmem:[%s7217_s12 + $0xe8] sm:$0xff] %v799_v29 }
  0x8f   : > { %802 = vst [vmem:[%s7217_s12 + $0xf0] sm:$0xff] %v801_v30 }
  0x90   : > { %804 = vst [vmem:[%s7217_s12 + $0xf8] sm:$0xff] %v803_v31 }
  0x91   : > { %806 = vst [vmem:[%s7217_s12 + $0x100] sm:$0xff] %v805_v32 }
  0x92   : > { %808 = vst [vmem:[%s7217_s12 + $0x108] sm:$0xff] %v807_v33 }
  0x93   : > { %810 = vst [vmem:[%s7217_s12 + $0x110] sm:$0xff] %v809_v34 }
  0x94   : > { %812 = vst [vmem:[%s7217_s12 + $0x118] sm:$0xff] %v811_v35 }
  0x95   : > { %814 = vst [vmem:[%s7217_s12 + $0x120] sm:$0xff] %v813_v36 }
  0x96   : > { %816 = vst [vmem:[%s7217_s12 + $0x128] sm:$0xff] %v815_v37 }
  0x97   : > { %818 = vst [vmem:[%s7217_s12 + $0x130] sm:$0xff] %v817_v38 }
  0x98   : > { %820 = vst [vmem:[%s7217_s12 + $0x138] sm:$0xff] %v819_v39 }
  0x99   : > { %822 = vst [vmem:[%s7217_s12 + $0x140] sm:$0xff] %v821_v40 }
  0x9a   : > { %824 = vst [vmem:[%s7217_s12 + $0x148] sm:$0xff] %v823_v41 }
  0x9b   : > { %826 = vst [vmem:[%s7217_s12 + $0x150] sm:$0xff] %v825_v42 }
  0x9c   : > { %828 = vst [vmem:[%s7217_s12 + $0x158] sm:$0xff] %v827_v43 }
  0x9d   : > { %830 = vst [vmem:[%s7217_s12 + $0x160] sm:$0xff] %v829_v44 }
  0x9e   : > { %832 = vst [vmem:[%s7217_s12 + $0x168] sm:$0xff] %v831_v45 }
  0x9f   : > { %834 = vst [vmem:[%s7217_s12 + $0x170] sm:$0xff] %v833_v46 }
  0xa0   : > { %836 = vst [vmem:[%s7217_s12 + $0x178] sm:$0xff] %v835_v47 }
  0xa1   : > { %838 = vst [vmem:[%s7217_s12 + $0x180] sm:$0xff] %v837_v48 }
  0xa2   : > { %840 = vst [vmem:[%s7217_s12 + $0x188] sm:$0xff] %v839_v49 }
  0xa3   : > { %842 = vst [vmem:[%s7217_s12 + $0x190] sm:$0xff] %v841_v50 }
  0xa4   : > { %844 = vst [vmem:[%s7217_s12 + $0x198] sm:$0xff] %v843_v51 }
  0xa5   : > { %846 = vst [vmem:[%s7217_s12 + $0x1a0] sm:$0xff] %v845_v52 }
  0xa6   : > { %848 = vst [vmem:[%s7217_s12 + $0x1a8] sm:$0xff] %v847_v53 }
  0xa7   : > { %850 = vst [vmem:[%s7217_s12 + $0x1b0] sm:$0xff] %v849_v54 }
  0xa8   : > { %852 = vst [vmem:[%s7217_s12 + $0x1b8] sm:$0xff] %v851_v55 }
  0xa9   : > { %854 = vst [vmem:[%s7217_s12 + $0x1c0] sm:$0xff] %v853_v56 }
  0xaa   : > { %856 = vst [vmem:[%s7217_s12 + $0x1c8] sm:$0xff] %v855_v57 }
  0xab   : > { %858 = vst [vmem:[%s7217_s12 + $0x1d0] sm:$0xff] %v857_v58 }
  0xac   : > { %860 = vst [vmem:[%s7217_s12 + $0x1d8] sm:$0xff] %v859_v59 }
  0xad   : > { %862 = vst [vmem:[%s7217_s12 + $0x1e0] sm:$0xff] %v861_v60 }
  0xae   : > { %864 = vst [vmem:[%s7217_s12 + $0x1e8] sm:$0xff] %v863_v61 }
  0xaf   : > { %866 = vst [vmem:[%s7217_s12 + $0x1f0] sm:$0xff] %v865_v62 }
  0xb0   : > { %868 = vst [vmem:[%s7217_s12 + $0x1f8] sm:$0xff] %v867_v63 }
  0xb1 PF: > { %874 = sbr.rel (!%p7049_p10) target bundleno = 200 (0xc8), region = 104  ;;  %s876_s0 = sand.u32 (%p7049_p10), 1, %s6896_s25  }
  0xb2   : > { %s6091_s22 = sshll.u32 (%p7049_p10), %s12800_s16, 2  ;;  %s6087_s18 = sshll.u32 (%p7049_p10), %s876_s0, 7 }
  0xb3   : > { %s6394_s19 = sshll.u32 (%p7049_p10), %s6920_s8, 8  ;;  %s878_s12 = scalar_lea.vmem (%p7049_p10), [#allocation4], %s6087_s18 }
  0xb4   : > { %s886_s10 = sadd.s32 (%p7049_p10), %s6394_s19, %s6091_s22 }
  0xb5   : > { %s6093_s20 = sshll.u32 (%p7049_p10), %s886_s10, 3 }
  0xb6   : > { %s7352_s14 = scalar_lea.vmem %s11867_s2, %s6093_s20 }
  0xb7   : > { %v947_v0 = vld [vmem:[%s7352_s14] sm:$0xff]  ;;  %v949_v1 = vld [vmem:[%s7352_s14 + $0x8] sm:$0xff]  ;;  %v951_v2 = vld [vmem:[%s7352_s14 + $0x10] sm:$0xff] }
  0xb8   : > { %948 = vst [vmem:[%s878_s12] sm:$0xff] %v947_v0  ;;  %v953_v3 = vld [vmem:[%s7352_s14 + $0x18] sm:$0xff]  ;;  %v955_v4 = vld [vmem:[%s7352_s14 + $0x200] sm:$0xff]  ;;  %v957_v5 = vld [vmem:[%s7352_s14 + $0x208] sm:$0xff] }
  0xb9   : > { %950 = vst [vmem:[%s878_s12 + $0x8] sm:$0xff] %v949_v1  ;;  %v959_v6 = vld [vmem:[%s7352_s14 + $0x210] sm:$0xff]  ;;  %v961_v7 = vld [vmem:[%s7352_s14 + $0x218] sm:$0xff]  ;;  %v963_v8 = vld [vmem:[%s7352_s14 + $0x400] sm:$0xff] }
  0xba   : > { %952 = vst [vmem:[%s878_s12 + $0x10] sm:$0xff] %v951_v2  ;;  %v965_v9 = vld [vmem:[%s7352_s14 + $0x408] sm:$0xff]  ;;  %v967_v10 = vld [vmem:[%s7352_s14 + $0x410] sm:$0xff]  ;;  %v969_v11 = vld [vmem:[%s7352_s14 + $0x418] sm:$0xff] }
  0xbb   : > { %954 = vst [vmem:[%s878_s12 + $0x18] sm:$0xff] %v953_v3  ;;  %v971_v12 = vld [vmem:[%s7352_s14 + $0x600] sm:$0xff]  ;;  %v973_v13 = vld [vmem:[%s7352_s14 + $0x608] sm:$0xff]  ;;  %v975_v14 = vld [vmem:[%s7352_s14 + $0x610] sm:$0xff] }
  0xbc   : > { %956 = vst [vmem:[%s878_s12 + $0x20] sm:$0xff] %v955_v4  ;;  %v977_v15 = vld [vmem:[%s7352_s14 + $0x618] sm:$0xff] }
  0xbd   : > { %958 = vst [vmem:[%s878_s12 + $0x28] sm:$0xff] %v957_v5 }
  0xbe   : > { %960 = vst [vmem:[%s878_s12 + $0x30] sm:$0xff] %v959_v6 }
  0xbf   : > { %962 = vst [vmem:[%s878_s12 + $0x38] sm:$0xff] %v961_v7 }
  0xc0   : > { %964 = vst [vmem:[%s878_s12 + $0x40] sm:$0xff] %v963_v8 }
  0xc1   : > { %966 = vst [vmem:[%s878_s12 + $0x48] sm:$0xff] %v965_v9 }
  0xc2   : > { %968 = vst [vmem:[%s878_s12 + $0x50] sm:$0xff] %v967_v10 }
  0xc3   : > { %970 = vst [vmem:[%s878_s12 + $0x58] sm:$0xff] %v969_v11 }
  0xc4   : > { %972 = vst [vmem:[%s878_s12 + $0x60] sm:$0xff] %v971_v12 }
  0xc5   : > { %974 = vst [vmem:[%s878_s12 + $0x68] sm:$0xff] %v973_v13 }
  0xc6   : > { %976 = vst [vmem:[%s878_s12 + $0x70] sm:$0xff] %v975_v14 }
  0xc7   : > { %978 = vst [vmem:[%s878_s12 + $0x78] sm:$0xff] %v977_v15 }
  0xc8 PF: > { %984 = sbr.rel (!%p7028_p4) target bundleno = 271 (0x10f), region = 142  ;;  %s986_s0 = sand.u32 (%p7028_p4), 1, %s6904_s27  }
  0xc9   : > { %s6096_s22 = sshll.u32 (%p7028_p4), %s6916_s30, 4  ;;  %s6094_s18 = sshll.u32 (%p7028_p4), %s986_s0, 9 }
  0xca   : > { %s6395_s19 = sshll.u32 (%p7028_p4), %s6920_s8, 8  ;;  %s7383_s15 = scalar_lea.vmem (%p7028_p4), [#allocation5], %s6094_s18 }
  0xcb   : > { %s992_s10 = sadd.s32 (%p7028_p4), %s6395_s19, %s6096_s22 }
  0xcc   : > { %s6098_s20 = sshll.u32 (%p7028_p4), %s992_s10, 3 }
  0xcd   : > { %s7378_s14 = scalar_lea.vmem %s11868_s3, %s6098_s20 }
  0xce   : > { %v1149_v16 = vld [vmem:[%s7378_s14] sm:$0xff]  ;;  %v1151_v17 = vld [vmem:[%s7378_s14 + $0x8] sm:$0xff]  ;;  %v1153_v18 = vld [vmem:[%s7378_s14 + $0x10] sm:$0xff] }
  0xcf   : > { %1150 = vst [vmem:[%s7383_s15] sm:$0xff] %v1149_v16  ;;  %v1155_v19 = vld [vmem:[%s7378_s14 + $0x18] sm:$0xff]  ;;  %v1157_v20 = vld [vmem:[%s7378_s14 + $0x20] sm:$0xff]  ;;  %v1159_v21 = vld [vmem:[%s7378_s14 + $0x28] sm:$0xff] }
  0xd0   : > { %1152 = vst [vmem:[%s7383_s15 + $0x8] sm:$0xff] %v1151_v17  ;;  %v1161_v22 = vld [vmem:[%s7378_s14 + $0x30] sm:$0xff]  ;;  %v1163_v23 = vld [vmem:[%s7378_s14 + $0x38] sm:$0xff]  ;;  %v1165_v24 = vld [vmem:[%s7378_s14 + $0x40] sm:$0xff] }
  0xd1   : > { %1154 = vst [vmem:[%s7383_s15 + $0x10] sm:$0xff] %v1153_v18  ;;  %v1167_v25 = vld [vmem:[%s7378_s14 + $0x48] sm:$0xff]  ;;  %v1169_v26 = vld [vmem:[%s7378_s14 + $0x50] sm:$0xff]  ;;  %v1171_v27 = vld [vmem:[%s7378_s14 + $0x58] sm:$0xff] }
  0xd2   : > { %1156 = vst [vmem:[%s7383_s15 + $0x18] sm:$0xff] %v1155_v19  ;;  %v1173_v28 = vld [vmem:[%s7378_s14 + $0x60] sm:$0xff]  ;;  %v1175_v29 = vld [vmem:[%s7378_s14 + $0x68] sm:$0xff]  ;;  %v1177_v30 = vld [vmem:[%s7378_s14 + $0x70] sm:$0xff] }
  0xd3   : > { %1158 = vst [vmem:[%s7383_s15 + $0x20] sm:$0xff] %v1157_v20  ;;  %v1179_v31 = vld [vmem:[%s7378_s14 + $0x78] sm:$0xff]  ;;  %v1181_v32 = vld [vmem:[%s7378_s14 + $0x200] sm:$0xff]  ;;  %v1183_v33 = vld [vmem:[%s7378_s14 + $0x208] sm:$0xff] }
  0xd4   : > { %1160 = vst [vmem:[%s7383_s15 + $0x28] sm:$0xff] %v1159_v21  ;;  %v1185_v34 = vld [vmem:[%s7378_s14 + $0x210] sm:$0xff]  ;;  %v1187_v35 = vld [vmem:[%s7378_s14 + $0x218] sm:$0xff]  ;;  %v1189_v36 = vld [vmem:[%s7378_s14 + $0x220] sm:$0xff] }
  0xd5   : > { %1162 = vst [vmem:[%s7383_s15 + $0x30] sm:$0xff] %v1161_v22  ;;  %v1191_v37 = vld [vmem:[%s7378_s14 + $0x228] sm:$0xff]  ;;  %v1193_v38 = vld [vmem:[%s7378_s14 + $0x230] sm:$0xff]  ;;  %v1195_v39 = vld [vmem:[%s7378_s14 + $0x238] sm:$0xff] }
  0xd6   : > { %1164 = vst [vmem:[%s7383_s15 + $0x38] sm:$0xff] %v1163_v23  ;;  %v1197_v40 = vld [vmem:[%s7378_s14 + $0x240] sm:$0xff]  ;;  %v1199_v41 = vld [vmem:[%s7378_s14 + $0x248] sm:$0xff]  ;;  %v1201_v42 = vld [vmem:[%s7378_s14 + $0x250] sm:$0xff] }
  0xd7   : > { %1166 = vst [vmem:[%s7383_s15 + $0x40] sm:$0xff] %v1165_v24  ;;  %v1203_v43 = vld [vmem:[%s7378_s14 + $0x258] sm:$0xff]  ;;  %v1205_v44 = vld [vmem:[%s7378_s14 + $0x260] sm:$0xff]  ;;  %v1207_v45 = vld [vmem:[%s7378_s14 + $0x268] sm:$0xff] }
  0xd8   : > { %1168 = vst [vmem:[%s7383_s15 + $0x48] sm:$0xff] %v1167_v25  ;;  %v1209_v46 = vld [vmem:[%s7378_s14 + $0x270] sm:$0xff]  ;;  %v1211_v47 = vld [vmem:[%s7378_s14 + $0x278] sm:$0xff]  ;;  %v1213_v48 = vld [vmem:[%s7378_s14 + $0x400] sm:$0xff] }
  0xd9   : > { %1170 = vst [vmem:[%s7383_s15 + $0x50] sm:$0xff] %v1169_v26  ;;  %v1215_v49 = vld [vmem:[%s7378_s14 + $0x408] sm:$0xff]  ;;  %v1217_v50 = vld [vmem:[%s7378_s14 + $0x410] sm:$0xff]  ;;  %v1219_v51 = vld [vmem:[%s7378_s14 + $0x418] sm:$0xff] }
  0xda   : > { %1172 = vst [vmem:[%s7383_s15 + $0x58] sm:$0xff] %v1171_v27  ;;  %v1221_v52 = vld [vmem:[%s7378_s14 + $0x420] sm:$0xff]  ;;  %v1223_v53 = vld [vmem:[%s7378_s14 + $0x428] sm:$0xff]  ;;  %v1225_v54 = vld [vmem:[%s7378_s14 + $0x430] sm:$0xff] }
  0xdb   : > { %1174 = vst [vmem:[%s7383_s15 + $0x60] sm:$0xff] %v1173_v28  ;;  %v1227_v55 = vld [vmem:[%s7378_s14 + $0x438] sm:$0xff]  ;;  %v1229_v56 = vld [vmem:[%s7378_s14 + $0x440] sm:$0xff]  ;;  %v1231_v57 = vld [vmem:[%s7378_s14 + $0x448] sm:$0xff] }
  0xdc   : > { %1176 = vst [vmem:[%s7383_s15 + $0x68] sm:$0xff] %v1175_v29  ;;  %v1233_v58 = vld [vmem:[%s7378_s14 + $0x450] sm:$0xff]  ;;  %v1235_v59 = vld [vmem:[%s7378_s14 + $0x458] sm:$0xff]  ;;  %v1237_v60 = vld [vmem:[%s7378_s14 + $0x460] sm:$0xff] }
  0xdd   : > { %1178 = vst [vmem:[%s7383_s15 + $0x70] sm:$0xff] %v1177_v30  ;;  %v1239_v61 = vld [vmem:[%s7378_s14 + $0x468] sm:$0xff]  ;;  %v1241_v62 = vld [vmem:[%s7378_s14 + $0x470] sm:$0xff]  ;;  %v1243_v63 = vld [vmem:[%s7378_s14 + $0x478] sm:$0xff] }
  0xde   : > { %1180 = vst [vmem:[%s7383_s15 + $0x78] sm:$0xff] %v1179_v31  ;;  %v1245_v0 = vld [vmem:[%s7378_s14 + $0x600] sm:$0xff]  ;;  %v1247_v1 = vld [vmem:[%s7378_s14 + $0x608] sm:$0xff]  ;;  %v1249_v2 = vld [vmem:[%s7378_s14 + $0x610] sm:$0xff] }
  0xdf   : > { %1182 = vst [vmem:[%s7383_s15 + $0x80] sm:$0xff] %v1181_v32  ;;  %v1251_v3 = vld [vmem:[%s7378_s14 + $0x618] sm:$0xff]  ;;  %v1253_v4 = vld [vmem:[%s7378_s14 + $0x620] sm:$0xff]  ;;  %v1255_v5 = vld [vmem:[%s7378_s14 + $0x628] sm:$0xff] }
  0xe0   : > { %1184 = vst [vmem:[%s7383_s15 + $0x88] sm:$0xff] %v1183_v33  ;;  %v1257_v6 = vld [vmem:[%s7378_s14 + $0x630] sm:$0xff]  ;;  %v1259_v7 = vld [vmem:[%s7378_s14 + $0x638] sm:$0xff]  ;;  %v1261_v8 = vld [vmem:[%s7378_s14 + $0x640] sm:$0xff] }
  0xe1   : > { %1186 = vst [vmem:[%s7383_s15 + $0x90] sm:$0xff] %v1185_v34  ;;  %v1263_v9 = vld [vmem:[%s7378_s14 + $0x648] sm:$0xff]  ;;  %v1265_v10 = vld [vmem:[%s7378_s14 + $0x650] sm:$0xff]  ;;  %v1267_v11 = vld [vmem:[%s7378_s14 + $0x658] sm:$0xff] }
  0xe2   : > { %1188 = vst [vmem:[%s7383_s15 + $0x98] sm:$0xff] %v1187_v35  ;;  %v1269_v12 = vld [vmem:[%s7378_s14 + $0x660] sm:$0xff]  ;;  %v1271_v13 = vld [vmem:[%s7378_s14 + $0x668] sm:$0xff]  ;;  %v1273_v14 = vld [vmem:[%s7378_s14 + $0x670] sm:$0xff] }
  0xe3   : > { %1190 = vst [vmem:[%s7383_s15 + $0xa0] sm:$0xff] %v1189_v36  ;;  %v1275_v15 = vld [vmem:[%s7378_s14 + $0x678] sm:$0xff] }
  0xe4   : > { %1192 = vst [vmem:[%s7383_s15 + $0xa8] sm:$0xff] %v1191_v37 }
  0xe5   : > { %1194 = vst [vmem:[%s7383_s15 + $0xb0] sm:$0xff] %v1193_v38 }
  0xe6   : > { %1196 = vst [vmem:[%s7383_s15 + $0xb8] sm:$0xff] %v1195_v39 }
  0xe7   : > { %1198 = vst [vmem:[%s7383_s15 + $0xc0] sm:$0xff] %v1197_v40 }
  0xe8   : > { %1200 = vst [vmem:[%s7383_s15 + $0xc8] sm:$0xff] %v1199_v41 }
  0xe9   : > { %1202 = vst [vmem:[%s7383_s15 + $0xd0] sm:$0xff] %v1201_v42 }
  0xea   : > { %1204 = vst [vmem:[%s7383_s15 + $0xd8] sm:$0xff] %v1203_v43 }
  0xeb   : > { %1206 = vst [vmem:[%s7383_s15 + $0xe0] sm:$0xff] %v1205_v44 }
  0xec   : > { %1208 = vst [vmem:[%s7383_s15 + $0xe8] sm:$0xff] %v1207_v45 }
  0xed   : > { %1210 = vst [vmem:[%s7383_s15 + $0xf0] sm:$0xff] %v1209_v46 }
  0xee   : > { %1212 = vst [vmem:[%s7383_s15 + $0xf8] sm:$0xff] %v1211_v47 }
  0xef   : > { %1214 = vst [vmem:[%s7383_s15 + $0x100] sm:$0xff] %v1213_v48 }
  0xf0   : > { %1216 = vst [vmem:[%s7383_s15 + $0x108] sm:$0xff] %v1215_v49 }
  0xf1   : > { %1218 = vst [vmem:[%s7383_s15 + $0x110] sm:$0xff] %v1217_v50 }
  0xf2   : > { %1220 = vst [vmem:[%s7383_s15 + $0x118] sm:$0xff] %v1219_v51 }
  0xf3   : > { %1222 = vst [vmem:[%s7383_s15 + $0x120] sm:$0xff] %v1221_v52 }
  0xf4   : > { %1224 = vst [vmem:[%s7383_s15 + $0x128] sm:$0xff] %v1223_v53 }
  0xf5   : > { %1226 = vst [vmem:[%s7383_s15 + $0x130] sm:$0xff] %v1225_v54 }
  0xf6   : > { %1228 = vst [vmem:[%s7383_s15 + $0x138] sm:$0xff] %v1227_v55 }
  0xf7   : > { %1230 = vst [vmem:[%s7383_s15 + $0x140] sm:$0xff] %v1229_v56 }
  0xf8   : > { %1232 = vst [vmem:[%s7383_s15 + $0x148] sm:$0xff] %v1231_v57 }
  0xf9   : > { %1234 = vst [vmem:[%s7383_s15 + $0x150] sm:$0xff] %v1233_v58 }
  0xfa   : > { %1236 = vst [vmem:[%s7383_s15 + $0x158] sm:$0xff] %v1235_v59 }
  0xfb   : > { %1238 = vst [vmem:[%s7383_s15 + $0x160] sm:$0xff] %v1237_v60 }
  0xfc   : > { %1240 = vst [vmem:[%s7383_s15 + $0x168] sm:$0xff] %v1239_v61 }
  0xfd   : > { %1242 = vst [vmem:[%s7383_s15 + $0x170] sm:$0xff] %v1241_v62 }
  0xfe   : > { %1244 = vst [vmem:[%s7383_s15 + $0x178] sm:$0xff] %v1243_v63 }
  0xff   : > { %1246 = vst [vmem:[%s7383_s15 + $0x180] sm:$0xff] %v1245_v0 }
 0x100   : > { %1248 = vst [vmem:[%s7383_s15 + $0x188] sm:$0xff] %v1247_v1 }
 0x101   : > { %1250 = vst [vmem:[%s7383_s15 + $0x190] sm:$0xff] %v1249_v2 }
 0x102   : > { %1252 = vst [vmem:[%s7383_s15 + $0x198] sm:$0xff] %v1251_v3 }
 0x103   : > { %1254 = vst [vmem:[%s7383_s15 + $0x1a0] sm:$0xff] %v1253_v4 }
 0x104   : > { %1256 = vst [vmem:[%s7383_s15 + $0x1a8] sm:$0xff] %v1255_v5 }
 0x105   : > { %1258 = vst [vmem:[%s7383_s15 + $0x1b0] sm:$0xff] %v1257_v6 }
 0x106   : > { %1260 = vst [vmem:[%s7383_s15 + $0x1b8] sm:$0xff] %v1259_v7 }
 0x107   : > { %1262 = vst [vmem:[%s7383_s15 + $0x1c0] sm:$0xff] %v1261_v8 }
 0x108   : > { %1264 = vst [vmem:[%s7383_s15 + $0x1c8] sm:$0xff] %v1263_v9 }
 0x109   : > { %1266 = vst [vmem:[%s7383_s15 + $0x1d0] sm:$0xff] %v1265_v10 }
 0x10a   : > { %1268 = vst [vmem:[%s7383_s15 + $0x1d8] sm:$0xff] %v1267_v11 }
 0x10b   : > { %1270 = vst [vmem:[%s7383_s15 + $0x1e0] sm:$0xff] %v1269_v12 }
 0x10c   : > { %1272 = vst [vmem:[%s7383_s15 + $0x1e8] sm:$0xff] %v1271_v13 }
 0x10d   : > { %1274 = vst [vmem:[%s7383_s15 + $0x1f0] sm:$0xff] %v1273_v14 }
 0x10e   : > { %1276 = vst [vmem:[%s7383_s15 + $0x1f8] sm:$0xff] %v1275_v15 }
 0x10f PF: > { %1282 = sbr.rel (!%p7049_p10) target bundleno = 294 (0x126), region = 180  ;;  %s1284_s12 = sand.u32 (%p7049_p10), 1, %s6896_s25  }
 0x110   : > { %s6103_s0 = sshll.u32 (%p7049_p10), %s12800_s16, 2  ;;  %s6099_s22 = sshll.u32 (%p7049_p10), %s1284_s12, 7 }
 0x111   : > { %s6396_s18 = sshll.u32 (%p7049_p10), %s6920_s8, 8  ;;  %s1286_s11 = scalar_lea.vmem (%p7049_p10), [#allocation6], %s6099_s22 }
 0x112   : > { %s1294_s19 = sadd.s32 (%p7049_p10), %s6396_s18, %s6103_s0 }
 0x113   : > { %s6105_s10 = sshll.u32 (%p7049_p10), %s1294_s19, 3 }
 0x114   : > { %s7518_s23 = scalar_lea.vmem %s11869_s4, %s6105_s10 }
 0x115   : > { %v1355_v16 = vld [vmem:[%s7518_s23] sm:$0xff]  ;;  %v1357_v17 = vld [vmem:[%s7518_s23 + $0x8] sm:$0xff]  ;;  %v1359_v18 = vld [vmem:[%s7518_s23 + $0x10] sm:$0xff] }
 0x116   : > { %1356 = vst [vmem:[%s1286_s11] sm:$0xff] %v1355_v16  ;;  %v1361_v19 = vld [vmem:[%s7518_s23 + $0x18] sm:$0xff]  ;;  %v1363_v20 = vld [vmem:[%s7518_s23 + $0x200] sm:$0xff]  ;;  %v1365_v21 = vld [vmem:[%s7518_s23 + $0x208] sm:$0xff] }
 0x117   : > { %1358 = vst [vmem:[%s1286_s11 + $0x8] sm:$0xff] %v1357_v17  ;;  %v1367_v22 = vld [vmem:[%s7518_s23 + $0x210] sm:$0xff]  ;;  %v1369_v23 = vld [vmem:[%s7518_s23 + $0x218] sm:$0xff]  ;;  %v1371_v24 = vld [vmem:[%s7518_s23 + $0x400] sm:$0xff] }
 0x118   : > { %1360 = vst [vmem:[%s1286_s11 + $0x10] sm:$0xff] %v1359_v18  ;;  %v1373_v25 = vld [vmem:[%s7518_s23 + $0x408] sm:$0xff]  ;;  %v1375_v26 = vld [vmem:[%s7518_s23 + $0x410] sm:$0xff]  ;;  %v1377_v27 = vld [vmem:[%s7518_s23 + $0x418] sm:$0xff] }
 0x119   : > { %1362 = vst [vmem:[%s1286_s11 + $0x18] sm:$0xff] %v1361_v19  ;;  %v1379_v28 = vld [vmem:[%s7518_s23 + $0x600] sm:$0xff]  ;;  %v1381_v29 = vld [vmem:[%s7518_s23 + $0x608] sm:$0xff]  ;;  %v1383_v30 = vld [vmem:[%s7518_s23 + $0x610] sm:$0xff] }
 0x11a   : > { %1364 = vst [vmem:[%s1286_s11 + $0x20] sm:$0xff] %v1363_v20  ;;  %v1385_v31 = vld [vmem:[%s7518_s23 + $0x618] sm:$0xff] }
 0x11b   : > { %1366 = vst [vmem:[%s1286_s11 + $0x28] sm:$0xff] %v1365_v21 }
 0x11c   : > { %1368 = vst [vmem:[%s1286_s11 + $0x30] sm:$0xff] %v1367_v22 }
 0x11d   : > { %1370 = vst [vmem:[%s1286_s11 + $0x38] sm:$0xff] %v1369_v23 }
 0x11e   : > { %1372 = vst [vmem:[%s1286_s11 + $0x40] sm:$0xff] %v1371_v24 }
 0x11f   : > { %1374 = vst [vmem:[%s1286_s11 + $0x48] sm:$0xff] %v1373_v25 }
 0x120   : > { %1376 = vst [vmem:[%s1286_s11 + $0x50] sm:$0xff] %v1375_v26 }
 0x121   : > { %1378 = vst [vmem:[%s1286_s11 + $0x58] sm:$0xff] %v1377_v27 }
 0x122   : > { %1380 = vst [vmem:[%s1286_s11 + $0x60] sm:$0xff] %v1379_v28 }
 0x123   : > { %1382 = vst [vmem:[%s1286_s11 + $0x68] sm:$0xff] %v1381_v29 }
 0x124   : > { %1384 = vst [vmem:[%s1286_s11 + $0x70] sm:$0xff] %v1383_v30 }
 0x125   : > { %1386 = vst [vmem:[%s1286_s11 + $0x78] sm:$0xff] %v1385_v31 }
 0x126 PF: > { %p6106_p0 = scmp.ge.s32.totalorder %s6924_s9, 1  ;;  %p1391_p1 = scmp.lt.s32.totalorder %s6924_s9, 9 }
 0x128   : > { %p1392_p2 = pnand %p6106_p0, %p1391_p1 }
 0x12a   : > { %1395 = sbr.rel (%p1392_p2) target bundleno = 1388 (0x56c), region = 218 }
 0x12f   : > { %s1412_s16 = sand.u32 1, %s6892_s24   ;;  %vm1607_vm0 = vcmask 523264   ;;  %s1398_s24 = sand.u32 1, %s6900_s26   ;;  %vm2640_vm1 = vcmask 261120  }
 0x130   : > { %s7539_s14 = sshll.u32 %s1412_s16, 7  ;;  %s7551_s12 = sshll.u32 %s1398_s24, 9 }
 0x131   : > { %s1414_s15 = scalar_lea.vmem [#allocation4], %s7539_s14  ;;  %s7560_s26 = scalar_lea.vmem [#allocation2], %s7551_s12 }
 0x132   : > { %v1594_v32 = vld [vmem:[%s1414_s15 + $0x18] sm:$0xff]  ;;  %v1593_v35 = vld [vmem:[%s1414_s15 + $0x10] sm:$0xff]  ;;  %v1592_v40 = vld [vmem:[%s1414_s15 + $0x8] sm:$0xff]  ;;  %s7581_s0 = scalar_lea.vmem [#allocation3], %s7551_s12  ;;  %p1556_p3 = scmp.eq.s32.totalorder %s6908_s28, 0 }
 0x133   : > { %v1602_v33 = vld [vmem:[%s1414_s15 + $0x58] sm:$0xff]  ;;  %6113 = vmatpush.xpose.msk.msra.mxu0 %vm1607_vm0, %v1594_v32  ;;  %v1601_v36 = vld [vmem:[%s1414_s15 + $0x50] sm:$0xff]  ;;  %v1600_v41 = vld [vmem:[%s1414_s15 + $0x48] sm:$0xff]  ;;  %s8662_s16 = scalar_lea.vmem [#allocation5], %s7551_s12  ;;  %s9411_s18 = scalar_lea.vmem [#allocation6], %s7539_s14 }
 0x134   : > { %v1606_v34 = vld [vmem:[%s1414_s15 + $0x78] sm:$0xff]  ;;  %6153 = vmatpush.xpose.msk.msra.mxu2 %vm1607_vm0, %v1602_v33  ;;  %v1605_v38 = vld [vmem:[%s1414_s15 + $0x70] sm:$0xff]  ;;  %v1604_v42 = vld [vmem:[%s1414_s15 + $0x68] sm:$0xff]  ;;  %s1557_s22 = scalar_select %p1556_p3, -1e+30, 0.0 }
 0x135   : > { %6173 = vmatpush.xpose.msk.msra.mxu3 %vm1607_vm0, %v1606_v34  ;;  %v1598_v37 = vld [vmem:[%s1414_s15 + $0x38] sm:$0xff]  ;;  %v1597_v39 = vld [vmem:[%s1414_s15 + $0x30] sm:$0xff]  ;;  %v1596_v43 = vld [vmem:[%s1414_s15 + $0x28] sm:$0xff]  ;;  %s10279_s14 = scalar_lea.vmem [#allocation7], %s7551_s12  ;;  %s6387_s12 = sshll.u32 (%p7056_p12), %s6908_s28, 4 }
 0x136   : > { %6133 = vmatpush.xpose.msk.msra.mxu1 %vm1607_vm0, %v1598_v37  ;;  %v1591_v44 = vld [vmem:[%s1414_s15] sm:$0xff]  ;;  %v2171_v52 = vld [vmem:[%s7581_s0 + $0x178] sm:$0xff]  ;;  %v2170_v55 = vld [vmem:[%s7581_s0 + $0x170] sm:$0xff]  ;;  %s6397_s19 = sshll.u32 (%p7056_p12), %s6912_s29, 8 }
 0x137   : > { %6114 = vmatpush.xpose.msk.msra.mxu0 %vm1607_vm0, %v1593_v35  ;;  %v1599_v45 = vld [vmem:[%s1414_s15 + $0x40] sm:$0xff]  ;;  %v2139_v53 = vld [vmem:[%s7581_s0 + $0x78] sm:$0xff]  ;;  %v7597_v57 = vld [vmem:[%s7560_s26 + $0x108] sm:$0xff]  ;;  %s5619_s10 = sadd.s32 (%p7056_p12), %s6397_s19, %s6387_s12 }
 0x138   : > { %6154 = vmatpush.xpose.msk.msra.mxu2 %vm1607_vm0, %v1601_v36  ;;  %v1603_v46 = vld [vmem:[%s1414_s15 + $0x60] sm:$0xff]  ;;  %v2155_v54 = vld [vmem:[%s7581_s0 + $0xf8] sm:$0xff]  ;;  %v7600_v58 = vld [vmem:[%s7560_s26 + $0x8] sm:$0xff]  ;;  %s6389_s20 = sshll.u32 (%p7056_p12), %s5619_s10, 3 }
 0x139   : > { %6174 = vmatpush.xpose.msk.msra.mxu3 %vm1607_vm0, %v1605_v38  ;;  %v1595_v47 = vld [vmem:[%s1414_s15 + $0x20] sm:$0xff]  ;;  %v2187_v56 = vld [vmem:[%s7581_s0 + $0x1f8] sm:$0xff]  ;;  %v7604_v59 = vld [vmem:[%s7560_s26 + $0x188] sm:$0xff]  ;;  %s11710_s23 = scalar_lea.vmem (%p7056_p12), %s11872_s7, %s6389_s20 }
 0x13a   : > { %6134 = vmatpush.xpose.msk.msra.mxu1 %vm1607_vm0, %v1597_v39  ;;  %v7563_v48 = vld [vmem:[%s7560_s26] sm:$0xff]  ;;  %v7607_v60 = vld [vmem:[%s7560_s26 + $0x88] sm:$0xff]  ;;  %v2138_v61 = vld [vmem:[%s7581_s0 + $0x70] sm:$0xff] }
 0x13b   : > { %6115 = vmatpush.xpose.msk.msra.mxu0 %vm1607_vm0, %v1592_v40  ;;  %v7566_v49 = vld [vmem:[%s7560_s26 + $0x100] sm:$0xff]  ;;  %v2154_v62 = vld [vmem:[%s7581_s0 + $0xf0] sm:$0xff]  ;;  %v2169_v63 = vld [vmem:[%s7581_s0 + $0x168] sm:$0xff] }
 0x13c   : > { %6155 = vmatpush.xpose.msk.msra.mxu2 %vm1607_vm0, %v1600_v41  ;;  %v7570_v50 = vld [vmem:[%s7560_s26 + $0x180] sm:$0xff]  ;;  %v2186_v0 = vld [vmem:[%s7581_s0 + $0x1f0] sm:$0xff]  ;;  %v2137_v5 = vld [vmem:[%s7581_s0 + $0x68] sm:$0xff] }
 0x13d   : > { %6175 = vmatpush.xpose.msk.msra.mxu3 %vm1607_vm0, %v1604_v42  ;;  %v7574_v51 = vld [vmem:[%s7560_s26 + $0x80] sm:$0xff]  ;;  %v7625_v1 = vld [vmem:[%s7560_s26 + $0x110] sm:$0xff]  ;;  %v2153_v6 = vld [vmem:[%s7581_s0 + $0xe8] sm:$0xff] }
 0x13e   : > { %6135 = vmatpush.xpose.msk.msra.mxu1 %vm1607_vm0, %v1596_v43  ;;  %v7628_v2 = vld [vmem:[%s7560_s26 + $0x10] sm:$0xff]  ;;  %v2168_v7 = vld [vmem:[%s7581_s0 + $0x160] sm:$0xff]  ;;  %v2185_v8 = vld [vmem:[%s7581_s0 + $0x1e8] sm:$0xff] }
 0x13f   : > { %6116 = vmatpush.xpose.msk.msra.mxu0 %vm1607_vm0, %v1591_v44  ;;  %v7632_v3 = vld [vmem:[%s7560_s26 + $0x190] sm:$0xff]  ;;  %v2136_v9 = vld [vmem:[%s7581_s0 + $0x60] sm:$0xff]  ;;  %v7656_v11 = vld [vmem:[%s7560_s26 + $0x118] sm:$0xff] }
 0x140   : > { %6156 = vmatpush.xpose.msk.msra.mxu2 %vm1607_vm0, %v1599_v45  ;;  %v7635_v4 = vld [vmem:[%s7560_s26 + $0x90] sm:$0xff]  ;;  %v2152_v10 = vld [vmem:[%s7581_s0 + $0xe0] sm:$0xff]  ;;  %v7659_v12 = vld [vmem:[%s7560_s26 + $0x18] sm:$0xff] }
 0x141   : > { %6176 = vmatpush.xpose.msk.msra.mxu3 %vm1607_vm0, %v1603_v46  ;;  %v7663_v13 = vld [vmem:[%s7560_s26 + $0x198] sm:$0xff]  ;;  %v2184_v16 = vld [vmem:[%s7581_s0 + $0x1e0] sm:$0xff]  ;;  %v2166_v19 = vld [vmem:[%s7581_s0 + $0x150] sm:$0xff] }
 0x142   : > { %6136 = vmatpush.xpose.msk.msra.mxu1 %vm1607_vm0, %v1595_v47  ;;  %6117 = vmatmul.msk.f32.vlgmr.msra.gmra.mxu0 %vm1607_vm0, %v7563_v48  ;;  %v7666_v14 = vld [vmem:[%s7560_s26 + $0x98] sm:$0xff]  ;;  %v7688_v21 = vld [vmem:[%s7560_s26 + $0x20] sm:$0xff]  ;;  %v2134_v25 = vld [vmem:[%s7581_s0 + $0x50] sm:$0xff] }
 0x143   : > { %6157 = vmatmul.msk.f32.vlgmr.msra.gmra.mxu2 %vm1607_vm0, %v7566_v49  ;;  %6193 = vmatpush.xpose.msk.msrb.mxu0 %vm1607_vm0, %v2139_v53  ;;  %v2167_v15 = vld [vmem:[%s7581_s0 + $0x158] sm:$0xff]  ;;  %v7691_v22 = vld [vmem:[%s7560_s26 + $0x120] sm:$0xff]  ;;  %v2150_v26 = vld [vmem:[%s7581_s0 + $0xd0] sm:$0xff] }
 0x144   : > { %6177 = vmatmul.msk.f32.vlgmr.msra.gmra.mxu3 %vm1607_vm0, %v7570_v50  ;;  %6257 = vmatpush.xpose.msk.msrb.mxu2 %vm1607_vm0, %v2171_v52  ;;  %v2135_v17 = vld [vmem:[%s7581_s0 + $0x58] sm:$0xff]  ;;  %v7695_v23 = vld [vmem:[%s7560_s26 + $0x1a0] sm:$0xff]  ;;  %v2165_v27 = vld [vmem:[%s7581_s0 + $0x148] sm:$0xff] }
 0x145   : > { %6137 = vmatmul.msk.f32.vlgmr.msra.gmra.mxu1 %vm1607_vm0, %v7574_v51  ;;  %6289 = vmatpush.xpose.msk.msrb.mxu3 %vm1607_vm0, %v2187_v56  ;;  %v2151_v18 = vld [vmem:[%s7581_s0 + $0xd8] sm:$0xff]  ;;  %v7699_v24 = vld [vmem:[%s7560_s26 + $0xa0] sm:$0xff]  ;;  %v2182_v28 = vld [vmem:[%s7581_s0 + $0x1d0] sm:$0xff] }
 0x146   : > { %6225 = vmatpush.xpose.msk.msrb.mxu1 %vm1607_vm0, %v2155_v54  ;;  %v2183_v20 = vld [vmem:[%s7581_s0 + $0x1d8] sm:$0xff]  ;;  %v7717_v29 = vld [vmem:[%s7560_s26 + $0x28] sm:$0xff]  ;;  %v2164_v35 = vld [vmem:[%s7581_s0 + $0x140] sm:$0xff] }
 0x147   : > { %6194 = vmatpush.xpose.msk.msrb.mxu0 %vm1607_vm0, %v2138_v61  ;;  %v7720_v30 = vld [vmem:[%s7560_s26 + $0x128] sm:$0xff]  ;;  %v2132_v37 = vld [vmem:[%s7581_s0 + $0x40] sm:$0xff]  ;;  %v7748_v39 = vld [vmem:[%s7560_s26 + $0x30] sm:$0xff] }
 0x148   : > { %6258 = vmatpush.xpose.msk.msrb.mxu2 %vm1607_vm0, %v2170_v55  ;;  %v7724_v31 = vld [vmem:[%s7560_s26 + $0x1a8] sm:$0xff]  ;;  %v2148_v38 = vld [vmem:[%s7581_s0 + $0xc0] sm:$0xff]  ;;  %v7751_v40 = vld [vmem:[%s7560_s26 + $0x130] sm:$0xff] }
 0x149   : > { %6290 = vmatpush.xpose.msk.msrb.mxu3 %vm1607_vm0, %v2186_v0  ;;  %v7727_v32 = vld [vmem:[%s7560_s26 + $0xa8] sm:$0xff]  ;;  %v7755_v41 = vld [vmem:[%s7560_s26 + $0x1b0] sm:$0xff]  ;;  %v2163_v43 = vld [vmem:[%s7581_s0 + $0x138] sm:$0xff] }
 0x14a   : > { %6118 = vmatmul.msk.f32.gmra.mxu0 %vm1607_vm0, %v7600_v58  ;;  %6226 = vmatpush.xpose.msk.msrb.mxu1 %vm1607_vm0, %v2154_v62  ;;  %v2133_v33 = vld [vmem:[%s7581_s0 + $0x48] sm:$0xff]  ;;  %v7758_v42 = vld [vmem:[%s7560_s26 + $0xb0] sm:$0xff]  ;;  %v2180_v44 = vld [vmem:[%s7581_s0 + $0x1c0] sm:$0xff] }
 0x14b   : > { %6158 = vmatmul.msk.f32.gmra.mxu2 %vm1607_vm0, %v7597_v57  ;;  %6195 = vmatpush.xpose.msk.msrb.mxu0 %vm1607_vm0, %v2137_v5  ;;  %v2149_v34 = vld [vmem:[%s7581_s0 + $0xc8] sm:$0xff]  ;;  %v2131_v45 = vld [vmem:[%s7581_s0 + $0x38] sm:$0xff]  ;;  %v2162_v47 = vld [vmem:[%s7581_s0 + $0x130] sm:$0xff] }
 0x14c   : > { %6178 = vmatmul.msk.f32.gmra.mxu3 %vm1607_vm0, %v7604_v59  ;;  %6259 = vmatpush.xpose.msk.msrb.mxu2 %vm1607_vm0, %v2169_v63  ;;  %v2181_v36 = vld [vmem:[%s7581_s0 + $0x1c8] sm:$0xff]  ;;  %v2147_v46 = vld [vmem:[%s7581_s0 + $0xb8] sm:$0xff]  ;;  %v2130_v61 = vld [vmem:[%s7581_s0 + $0x30] sm:$0xff] }
 0x14d   : > { %6138 = vmatmul.msk.f32.gmra.mxu1 %vm1607_vm0, %v7607_v60  ;;  %6291 = vmatpush.xpose.msk.msrb.mxu3 %vm1607_vm0, %v2185_v8  ;;  %v2179_v52 = vld [vmem:[%s7581_s0 + $0x1b8] sm:$0xff]  ;;  %v2146_v62 = vld [vmem:[%s7581_s0 + $0xb0] sm:$0xff]  ;;  %v2161_v63 = vld [vmem:[%s7581_s0 + $0x128] sm:$0xff] }
 0x14e   : > { %6227 = vmatpush.xpose.msk.msrb.mxu1 %vm1607_vm0, %v2153_v6  ;;  %v7780_v53 = vld [vmem:[%s7560_s26 + $0x138] sm:$0xff]  ;;  %v2178_v0 = vld [vmem:[%s7581_s0 + $0x1b0] sm:$0xff]  ;;  %v7809_v5 = vld [vmem:[%s7560_s26 + $0x40] sm:$0xff] }
 0x14f   : > { %6196 = vmatpush.xpose.msk.msrb.mxu0 %vm1607_vm0, %v2136_v9  ;;  %v7783_v54 = vld [vmem:[%s7560_s26 + $0x38] sm:$0xff]  ;;  %v7812_v6 = vld [vmem:[%s7560_s26 + $0x140] sm:$0xff]  ;;  %v7830_v9 = vld [vmem:[%s7560_s26 + $0x48] sm:$0xff] }
 0x150   : > { %6260 = vmatpush.xpose.msk.msrb.mxu2 %vm1607_vm0, %v2168_v7  ;;  %v7787_v55 = vld [vmem:[%s7560_s26 + $0x1b8] sm:$0xff]  ;;  %v7816_v7 = vld [vmem:[%s7560_s26 + $0x1c0] sm:$0xff] }
 0x151   : > { %6292 = vmatpush.xpose.msk.msrb.mxu3 %vm1607_vm0, %v2184_v16  ;;  %v7791_v56 = vld [vmem:[%s7560_s26 + $0xb8] sm:$0xff]  ;;  %v7819_v8 = vld [vmem:[%s7560_s26 + $0xc0] sm:$0xff]  ;;  %v7839_v16 = vld [vmem:[%s7560_s26 + $0xc8] sm:$0xff] }
 0x152   : > { %6119 = vmatmul.msk.f32.gmra.mxu0 %vm1607_vm0, %v7628_v2  ;;  %6228 = vmatpush.xpose.msk.msrb.mxu1 %vm1607_vm0, %v2152_v10  ;;  %v7833_v10 = vld [vmem:[%s7560_s26 + $0x148] sm:$0xff] }
 0x153   : > { %6159 = vmatmul.msk.f32.gmra.mxu2 %vm1607_vm0, %v7625_v1  ;;  %6197 = vmatpush.xpose.msk.msrb.mxu0 %vm1607_vm0, %v2135_v17  ;;  %v7850_v17 = vld [vmem:[%s7560_s26 + $0x150] sm:$0xff] }
 0x154   : > { %6179 = vmatmul.msk.f32.gmra.mxu3 %vm1607_vm0, %v7632_v3  ;;  %6261 = vmatpush.xpose.msk.msrb.mxu2 %vm1607_vm0, %v2167_v15  ;;  %v7836_v15 = vld [vmem:[%s7560_s26 + $0x1c8] sm:$0xff] }
 0x155   : > { %6139 = vmatmul.msk.f32.gmra.mxu1 %vm1607_vm0, %v7635_v4  ;;  %6293 = vmatpush.xpose.msk.msrb.mxu3 %vm1607_vm0, %v2183_v20  ;;  %v7859_v20 = vld [vmem:[%s7560_s26 + $0xd0] sm:$0xff] }
 0x156   : > { %6229 = vmatpush.xpose.msk.msrb.mxu1 %vm1607_vm0, %v2151_v18  ;;  %v7853_v18 = vld [vmem:[%s7560_s26 + $0x50] sm:$0xff] }
 0x157   : > { %6198 = vmatpush.xpose.msk.msrb.mxu0 %vm1607_vm0, %v2134_v25  ;;  %v7870_v25 = vld [vmem:[%s7560_s26 + $0x58] sm:$0xff] }
 0x158   : > { %6262 = vmatpush.xpose.msk.msrb.mxu2 %vm1607_vm0, %v2166_v19  ;;  %v7856_v19 = vld [vmem:[%s7560_s26 + $0x1d0] sm:$0xff] }
 0x159   : > { %6294 = vmatpush.xpose.msk.msrb.mxu3 %vm1607_vm0, %v2182_v28  ;;  %v7879_v28 = vld [vmem:[%s7560_s26 + $0xd8] sm:$0xff] }
 0x15a   : > { %6120 = vmatmul.msk.f32.gmra.mxu0 %vm1607_vm0, %v7659_v12  ;;  %6230 = vmatpush.xpose.msk.msrb.mxu1 %vm1607_vm0, %v2150_v26  ;;  %v7873_v26 = vld [vmem:[%s7560_s26 + $0x158] sm:$0xff] }
 0x15b   : > { %6160 = vmatmul.msk.f32.gmra.mxu2 %vm1607_vm0, %v7656_v11  ;;  %6199 = vmatpush.xpose.msk.msrb.mxu0 %vm1607_vm0, %v2133_v33  ;;  %v7890_v33 = vld [vmem:[%s7560_s26 + $0x60] sm:$0xff] }
 0x15c   : > { %6180 = vmatmul.msk.f32.gmra.mxu3 %vm1607_vm0, %v7663_v13  ;;  %6263 = vmatpush.xpose.msk.msrb.mxu2 %vm1607_vm0, %v2165_v27  ;;  %v7876_v27 = vld [vmem:[%s7560_s26 + $0x1d8] sm:$0xff]  ;;  %12057 = vst [vmem:[#allocation11_spill] sm:$0xff] %v7890_v33 }
 0x15d   : > { %6140 = vmatmul.msk.f32.gmra.mxu1 %vm1607_vm0, %v7666_v14  ;;  %6295 = vmatpush.xpose.msk.msrb.mxu3 %vm1607_vm0, %v2181_v36  ;;  %v2145_v36 = vld [vmem:[%s7581_s0 + $0xa8] sm:$0xff] }
 0x15e   : > { %6231 = vmatpush.xpose.msk.msrb.mxu1 %vm1607_vm0, %v2149_v34  ;;  %v7893_v34 = vld [vmem:[%s7560_s26 + $0x160] sm:$0xff] }
 0x15f   : > { %6200 = vmatpush.xpose.msk.msrb.mxu0 %vm1607_vm0, %v2132_v37  ;;  %v7904_v37 = vld [vmem:[%s7560_s26 + $0x1e0] sm:$0xff] }
 0x160   : > { %6264 = vmatpush.xpose.msk.msrb.mxu2 %vm1607_vm0, %v2164_v35  ;;  %v2129_v35 = vld [vmem:[%s7581_s0 + $0x28] sm:$0xff]  ;;  %12058 = vst [vmem:[#allocation12_spill] sm:$0xff] %v7904_v37 }
 0x161   : > { %6296 = vmatpush.xpose.msk.msrb.mxu3 %vm1607_vm0, %v2180_v44  ;;  %v7911_v44 = vld [vmem:[%s7560_s26 + $0xe0] sm:$0xff] }
 0x162   : > { %6121 = vmatmul.msk.f32.gmra.mxu0 %vm1607_vm0, %v7688_v21  ;;  %6232 = vmatpush.xpose.msk.msrb.mxu1 %vm1607_vm0, %v2148_v38  ;;  %v2160_v38 = vld [vmem:[%s7581_s0 + $0x120] sm:$0xff]  ;;  %12059 = vst [vmem:[#allocation13_spill] sm:$0xff] %v7911_v44 }
 0x163   : > { %6161 = vmatmul.msk.f32.gmra.mxu2 %vm1607_vm0, %v7691_v22  ;;  %6201 = vmatpush.xpose.msk.msrb.mxu0 %vm1607_vm0, %v2131_v45  ;;  %v2128_v45 = vld [vmem:[%s7581_s0 + $0x20] sm:$0xff] }
 0x164   : > { %6181 = vmatmul.msk.f32.gmra.mxu3 %vm1607_vm0, %v7695_v23  ;;  %6265 = vmatpush.xpose.msk.msrb.mxu2 %vm1607_vm0, %v2163_v43  ;;  %v2177_v43 = vld [vmem:[%s7581_s0 + $0x1a8] sm:$0xff] }
 0x165   : > { %6141 = vmatmul.msk.f32.gmra.mxu1 %vm1607_vm0, %v7699_v24  ;;  %6297 = vmatpush.xpose.msk.msrb.mxu3 %vm1607_vm0, %v2179_v52  ;;  %v2159_v52 = vld [vmem:[%s7581_s0 + $0x118] sm:$0xff] }
 0x166   : > { %6233 = vmatpush.xpose.msk.msrb.mxu1 %vm1607_vm0, %v2147_v46  ;;  %v2144_v46 = vld [vmem:[%s7581_s0 + $0xa0] sm:$0xff] }
 0x167   : > { %6202 = vmatpush.xpose.msk.msrb.mxu0 %vm1607_vm0, %v2130_v61  ;;  %v2176_v61 = vld [vmem:[%s7581_s0 + $0x1a0] sm:$0xff] }
 0x168   : > { %6266 = vmatpush.xpose.msk.msrb.mxu2 %vm1607_vm0, %v2162_v47  ;;  %v7922_v47 = vld [vmem:[%s7560_s26 + $0x168] sm:$0xff] }
 0x169   : > { %6298 = vmatpush.xpose.msk.msrb.mxu3 %vm1607_vm0, %v2178_v0  ;;  %12060 = vst [vmem:[#allocation14_spill] sm:$0xff] %v7922_v47  ;;  %v7942_v0 = vld [vmem:[%s7560_s26 + $0x1e8] sm:$0xff] }
 0x16a   : > { %6122 = vmatmul.msk.f32.gmra.mxu0 %vm1607_vm0, %v7717_v29  ;;  %6234 = vmatpush.xpose.msk.msrb.mxu1 %vm1607_vm0, %v2146_v62  ;;  %v7929_v62 = vld [vmem:[%s7560_s26 + $0x68] sm:$0xff]  ;;  %12063 = vst [vmem:[#allocation17_spill] sm:$0xff] %v7942_v0 }
 0x16b   : > { %6162 = vmatmul.msk.f32.gmra.mxu2 %vm1607_vm0, %v7720_v30  ;;  %6203 = vmatpush.xpose.msk.msrb.mxu0 %vm1607_vm0, %v2129_v35  ;;  %12061 = vst [vmem:[#allocation15_spill] sm:$0xff] %v7929_v62  ;;  %v2127_v35 = vld [vmem:[%s7581_s0 + $0x18] sm:$0xff] }
 0x16c   : > { %6182 = vmatmul.msk.f32.gmra.mxu3 %vm1607_vm0, %v7724_v31  ;;  %6267 = vmatpush.xpose.msk.msrb.mxu2 %vm1607_vm0, %v2161_v63  ;;  %v7934_v63 = vld [vmem:[%s7560_s26 + $0xe8] sm:$0xff] }
 0x16d   : > { %6142 = vmatmul.msk.f32.gmra.mxu1 %vm1607_vm0, %v7727_v32  ;;  %6299 = vmatpush.xpose.msk.msrb.mxu3 %vm1607_vm0, %v2177_v43  ;;  %12062 = vst [vmem:[#allocation16_spill] sm:$0xff] %v7934_v63  ;;  %v2175_v43 = vld [vmem:[%s7581_s0 + $0x198] sm:$0xff] }
 0x16e   : > { %6235 = vmatpush.xpose.msk.msrb.mxu1 %vm1607_vm0, %v2145_v36  ;;  %v2143_v36 = vld [vmem:[%s7581_s0 + $0x98] sm:$0xff] }
 0x16f   : > { %6204 = vmatpush.xpose.msk.msrb.mxu0 %vm1607_vm0, %v2128_v45  ;;  %v7953_v45 = vld [vmem:[%s7560_s26 + $0x70] sm:$0xff] }
 0x170   : > { %6268 = vmatpush.xpose.msk.msrb.mxu2 %vm1607_vm0, %v2160_v38  ;;  %v2158_v38 = vld [vmem:[%s7581_s0 + $0x110] sm:$0xff]  ;;  %12064 = vst [vmem:[#allocation18_spill] sm:$0xff] %v7953_v45 }
 0x171   : > { %6300 = vmatpush.xpose.msk.msrb.mxu3 %vm1607_vm0, %v2176_v61  ;;  %v7965_v61 = vld [vmem:[%s7560_s26 + $0xf0] sm:$0xff] }
 0x172   : > { %6123 = vmatmul.msk.f32.gmra.mxu0 %vm1607_vm0, %v7748_v39  ;;  %6236 = vmatpush.xpose.msk.msrb.mxu1 %vm1607_vm0, %v2144_v46  ;;  %v1558_v46 = vld [vmem:[%s11871_s6] sm:$0xff]  ;;  %12065 = vst [vmem:[#allocation19_spill] sm:$0xff] %v7965_v61 }
 0x173   : > { %6163 = vmatmul.msk.f32.gmra.mxu2 %vm1607_vm0, %v7751_v40  ;;  %6205 = vmatpush.xpose.msk.msrb.mxu0 %vm1607_vm0, %v2127_v35  ;;  %v7968_v35 = vld [vmem:[%s7560_s26 + $0x170] sm:$0xff] }
 0x174   : > { %6183 = vmatmul.msk.f32.gmra.mxu3 %vm1607_vm0, %v7755_v41  ;;  %6269 = vmatpush.xpose.msk.msrb.mxu2 %vm1607_vm0, %v2159_v52  ;;  %v7960_v52 = vstv %s1557_s22  ;;  %12066 = vst [vmem:[#allocation20_spill] sm:$0xff] %v7968_v35 }
 0x175   : > { %6143 = vmatmul.msk.f32.gmra.mxu1 %vm1607_vm0, %v7758_v42  ;;  %6301 = vmatpush.xpose.msk.msrb.mxu3 %vm1607_vm0, %v2175_v43  ;;  %v2142_v43 = vld [vmem:[%s7581_s0 + $0x90] sm:$0xff] }
 0x176   : > { %6237 = vmatpush.xpose.msk.msrb.mxu1 %vm1607_vm0, %v2143_v36  ;;  %v7971_v36 = vld [vmem:[%s7560_s26 + $0x1f0] sm:$0xff] }
 0x177   : > { %12067 = vst [vmem:[#allocation21_spill] sm:$0xff] %v7971_v36 }
 0x178   : > { %6270 = vmatpush.xpose.msk.msrb.mxu2 %vm1607_vm0, %v2158_v38  ;;  %v2126_v38 = vld [vmem:[%s7581_s0 + $0x10] sm:$0xff] }
 0x179   : > { %6206 = vmatpush.xpose.msk.msrb.mxu0 %vm1607_vm0, %v2126_v38 }
 0x17a   : > { %6124 = vmatmul.msk.f32.gmra.mxu0 %vm1607_vm0, %v7783_v54  ;;  %6238 = vmatpush.xpose.msk.msrb.mxu1 %vm1607_vm0, %v2142_v43 }
 0x17b   : > { %6164 = vmatmul.msk.f32.gmra.mxu2 %vm1607_vm0, %v7780_v53 }
 0x17c   : > { %6184 = vmatmul.msk.f32.gmra.mxu3 %vm1607_vm0, %v7787_v55 }
 0x17d   : > { %6144 = vmatmul.msk.f32.gmra.mxu1 %vm1607_vm0, %v7791_v56 }
 0x182   : > { %6125 = vmatmul.msk.f32.gmra.mxu0 %vm1607_vm0, %v7809_v5 }
 0x183   : > { %6165 = vmatmul.msk.f32.gmra.mxu2 %vm1607_vm0, %v7812_v6 }
 0x184   : > { %6185 = vmatmul.msk.f32.gmra.mxu3 %vm1607_vm0, %v7816_v7 }
 0x185   : > { %6145 = vmatmul.msk.f32.gmra.mxu1 %vm1607_vm0, %v7819_v8 }
 0x18a   : > { %6126 = vmatmul.msk.f32.gmra.mxu0 %vm1607_vm0, %v7830_v9 }
 0x18b   : > { %6166 = vmatmul.msk.f32.gmra.mxu2 %vm1607_vm0, %v7833_v10 }
 0x18c   : > { %6186 = vmatmul.msk.f32.gmra.mxu3 %vm1607_vm0, %v7836_v15 }
 0x18d   : > { %6146 = vmatmul.msk.f32.gmra.mxu1 %vm1607_vm0, %v7839_v16 }
 0x192   : > { %6127 = vmatmul.msk.f32.gmra.mxu0 %vm1607_vm0, %v7853_v18 }
 0x193   : > { %6167 = vmatmul.msk.f32.gmra.mxu2 %vm1607_vm0, %v7850_v17 }
 0x194   : > { %6187 = vmatmul.msk.f32.gmra.mxu3 %vm1607_vm0, %v7856_v19 }
 0x195   : > { %6147 = vmatmul.msk.f32.gmra.mxu1 %vm1607_vm0, %v7859_v20 }
 0x19a   : > { %6128 = vmatmul.msk.f32.gmra.mxu0 %vm1607_vm0, %v7870_v25 }
 0x19b   : > { %6168 = vmatmul.msk.f32.gmra.mxu2 %vm1607_vm0, %v7873_v26 }
 0x19c   : > { %6188 = vmatmul.msk.f32.gmra.mxu3 %vm1607_vm0, %v7876_v27 }
 0x19d   : > { %6148 = vmatmul.msk.f32.gmra.mxu1 %vm1607_vm0, %v7879_v28 }
 0x1a2   : > { %6129 = vmatmul.msk.f32.gmra.mxu0 %vm1607_vm0, %v7890_v33 }
 0x1a3   : > { %6169 = vmatmul.msk.f32.gmra.mxu2 %vm1607_vm0, %v7893_v34 }
 0x1a4   : > { %6189 = vmatmul.msk.f32.gmra.mxu3 %vm1607_vm0, %v7904_v37  ;;  %v8018_v37 = vld [vmem:[%s7560_s26 + $0xf8] sm:$0xff] }
 0x1a5   : > { %6149 = vmatmul.msk.f32.gmra.mxu1 %vm1607_vm0, %v7911_v44 }
 0x1aa   : > { %6130 = vmatmul.msk.f32.gmra.mxu0 %vm1607_vm0, %v7929_v62  ;;  %v7998_v62 = vld [vmem:[%s7560_s26 + $0x178] sm:$0xff] }
 0x1ab   : > { %6170 = vmatmul.msk.f32.gmra.mxu2 %vm1607_vm0, %v7922_v47  ;;  %12071 = vst [vmem:[#allocation25_spill] sm:$0xff] %v7998_v62  ;;  %v2125_v47 = vld [vmem:[%s7581_s0 + $0x8] sm:$0xff] }
 0x1ac   : > { %6190 = vmatmul.msk.f32.gmra.mxu3 %vm1607_vm0, %v7942_v0  ;;  %v1575_v0 = vadd.f32 %v7960_v52, %v1558_v46  ;;  %6207 = vmatpush.xpose.msk.msrb.mxu0 %vm1607_vm0, %v2125_v47 }
 0x1ad   : > { %6150 = vmatmul.msk.f32.gmra.mxu1 %vm1607_vm0, %v7934_v63 }
 0x1b2   : > { %6131 = vmatmul.msk.f32.gmra.mxu0 %vm1607_vm0, %v7953_v45  ;;  %v2157_v45 = vld [vmem:[%s7581_s0 + $0x108] sm:$0xff] }
 0x1b3   : > { %6171 = vmatmul.msk.f32.gmra.mxu2 %vm1607_vm0, %v7968_v35 }
 0x1b4   : > { %6191 = vmatmul.msk.f32.gmra.mxu3 %vm1607_vm0, %v7971_v36  ;;  %6271 = vmatpush.xpose.msk.msrb.mxu2 %vm1607_vm0, %v2157_v45  ;;  %v7995_v36 = vld [vmem:[%s7560_s26 + $0x78] sm:$0xff]  ;;  %v1559_v45 = vld [vmem:[%s11871_s6 + $0x8] sm:$0xff] }
 0x1b5   : > { %6151 = vmatmul.msk.f32.gmra.mxu1 %vm1607_vm0, %v7965_v61  ;;  %v2174_v61 = vld [vmem:[%s7581_s0 + $0x190] sm:$0xff]  ;;  %12070 = vst [vmem:[#allocation24_spill] sm:$0xff] %v7995_v36 }
 0x1b6   : > { %6302 = vmatpush.xpose.msk.msrb.mxu3 %vm1607_vm0, %v2174_v61  ;;  %v8008_v61 = vld [vmem:[%s7560_s26 + $0x1f8] sm:$0xff] }
 0x1b7   : > { %12072 = vst [vmem:[#allocation26_spill] sm:$0xff] %v8008_v61 }
 0x1ba   : > { %6132 = vmatmul.msk.f32.gmra.mxu0 %vm1607_vm0, %v7995_v36 }
 0x1bb   : > { %6172 = vmatmul.msk.f32.gmra.mxu2 %vm1607_vm0, %v7998_v62 }
 0x1bc   : > { %6192 = vmatmul.msk.f32.gmra.mxu3 %vm1607_vm0, %v8008_v61  ;;  %v2124_v61 = vld [vmem:[%s7581_s0] sm:$0xff] }
 0x1bd   : > { %6152 = vmatmul.msk.f32.gmra.mxu1 %vm1607_vm0, %v8018_v37  ;;  %6208 = vmatpush.xpose.msk.msrb.mxu0 %vm1607_vm0, %v2124_v61 }
 0x1bf   : > { %v1685_v63 = vpop.f32.mrf.mxu0 }
 0x1c0   : > { %v7988_v46 = vadd.f32 %v1685_v63, %v1575_v0  ;;  %v2141_v63 = vld [vmem:[%s7581_s0 + $0x88] sm:$0xff] }
 0x1c1   : > { %6239 = vmatpush.xpose.msk.msrb.mxu1 %vm1607_vm0, %v2141_v63 }
 0x1c2   : > { %12068 = vst [vmem:[#allocation22_spill] sm:$0xff] %v7988_v46  ;;  %v1810_v35 = vpop.f32.mrf.mxu1  ;;  %v2641_v38 = vsel %vm2640_vm1, %v7988_v46, -inf  ;;  %v2156_v46 = vld [vmem:[%s7581_s0 + $0x100] sm:$0xff]  ;;  %6209 = vmatmul.msk.f32.vlgmr.msrb.gmra.mxu0 %vm1607_vm0, %v7563_v48 }
 0x1c3   : > { %v7992_v43 = vadd.f32 %v1810_v35, %v1575_v0  ;;  %2642 = vmax.xlane.f32.xlu0 %v2641_v38  ;;  %v2173_v38 = vld [vmem:[%s7581_s0 + $0x188] sm:$0xff]  ;;  %6272 = vmatpush.xpose.msk.msrb.mxu2 %vm1607_vm0, %v2156_v46  ;;  %v2140_v46 = vld [vmem:[%s7581_s0 + $0x80] sm:$0xff] }
 0x1c4   : > { %6303 = vmatpush.xpose.msk.msrb.mxu3 %vm1607_vm0, %v2173_v38  ;;  %v1560_v38 = vld [vmem:[%s11871_s6 + $0x10] sm:$0xff] }
 0x1c5   : > { %12069 = vst [vmem:[#allocation23_spill] sm:$0xff] %v7992_v43  ;;  %v2689_v35 = vsel %vm2640_vm1, %v7992_v43, -inf  ;;  %v1576_v43 = vadd.f32 %v7960_v52, %v1559_v45  ;;  %6240 = vmatpush.xpose.msk.msrb.mxu1 %vm1607_vm0, %v2140_v46  ;;  %v1577_v61 = vadd.f32 %v7960_v52, %v1560_v38 }
 0x1c6   : > { %v1935_v44 = vpop.f32.mrf.mxu2  ;;  %2690 = vmax.xlane.f32.xlu1 %v2689_v35  ;;  %6273 = vmatmul.msk.f32.vlgmr.msrb.gmra.mxu2 %vm1607_vm0, %v7566_v49 }
 0x1c7   : > { %v2060_v36 = vpop.f32.mrf.mxu3  ;;  %v8021_v33 = vadd.f32 %v1935_v44, %v1575_v0  ;;  %v1688_v62 = vpop.f32.mrf.mxu0 }
 0x1c8   : > { %v8027_v47 = vadd.f32 %v2060_v36, %v1575_v0  ;;  %v2172_v0 = vld [vmem:[%s7581_s0 + $0x180] sm:$0xff]  ;;  %v8042_v36 = vadd.f32 %v1688_v62, %v1576_v43  ;;  %6241 = vmatmul.msk.f32.vlgmr.msrb.gmra.mxu1 %vm1607_vm0, %v7574_v51 }
 0x1c9   : > { %v2737_v44 = vsel %vm2640_vm1, %v8021_v33, -inf  ;;  %6304 = vmatpush.xpose.msk.msrb.mxu3 %vm1607_vm0, %v2172_v0 }
 0x1ca   : > { %12073 = vst [vmem:[#allocation27_spill] sm:$0xff] %v8027_v47  ;;  %2738 = vmax.xlane.f32.xlu2 %v2737_v44  ;;  %v2785_v45 = vsel %vm2640_vm1, %v8027_v47, -inf  ;;  %v1813_v63 = vpop.f32.mrf.mxu1  ;;  %v2644_v49 = vsel %vm2640_vm1, %v8042_v36, -inf  ;;  %6210 = vmatmul.msk.f32.gmra.mxu0 %vm1607_vm0, %v7600_v58 }
 0x1cb   : > { %v8036_v35 = vadd.f32 %v1813_v63, %v1576_v43  ;;  %2786 = vmax.xlane.f32.xlu0 %v2785_v45 }
 0x1cc   : > { %6305 = vmatmul.msk.f32.vlgmr.msrb.gmra.mxu3 %vm1607_vm0, %v7570_v50 }
 0x1cd   : > { %12074 = vst [vmem:[#allocation28_spill] sm:$0xff] %v8036_v35  ;;  %v2692_v45 = vsel %vm2640_vm1, %v8036_v35, -inf }
 0x1ce   : > { %v1938_v44 = vpop.f32.mrf.mxu2  ;;  %6274 = vmatmul.msk.f32.gmra.mxu2 %vm1607_vm0, %v7597_v57 }
 0x1cf   : > { %v2063_v63 = vpop.f32.mrf.mxu3  ;;  %v1691_v47 = vpop.f32.mrf.mxu0  ;;  %v8070_v51 = vadd.f32 %v1938_v44, %v1576_v43 }
 0x1d0   : > { %v8055_v62 = vadd.f32 %v2063_v63, %v1576_v43  ;;  %v8066_v48 = vadd.f32 %v1691_v47, %v1577_v61  ;;  %v1561_v47 = vld [vmem:[%s11871_s6 + $0x18] sm:$0xff]  ;;  %6242 = vmatmul.msk.f32.gmra.mxu1 %vm1607_vm0, %v7607_v60  ;;  %v1562_v60 = vld [vmem:[%s11871_s6 + $0x20] sm:$0xff] }
 0x1d1   : > { %v2740_v58 = vsel %vm2640_vm1, %v8070_v51, -inf  ;;  %v1578_v43 = vadd.f32 %v7960_v52, %v1561_v47  ;;  %v1579_v47 = vadd.f32 %v7960_v52, %v1562_v60 }
 0x1d2   : > { %12075 = vst [vmem:[#allocation29_spill] sm:$0xff] %v8055_v62  ;;  %2693 = vmax.xlane.f32.xlu2 %v2692_v45  ;;  %v2788_v46 = vsel %vm2640_vm1, %v8055_v62, -inf  ;;  %v1816_v0 = vpop.f32.mrf.mxu1  ;;  %v2647_v45 = vsel %vm2640_vm1, %v8066_v48, -inf  ;;  %6211 = vmatmul.msk.f32.gmra.mxu0 %vm1607_vm0, %v7628_v2 }
 0x1d3   : > { %2789 = vmax.xlane.f32.xlu1 %v2788_v46  ;;  %2645 = vmax.xlane.f32.xlu0 %v2644_v49  ;;  %12076 = vst [vmem:[#allocation30_spill] sm:$0xff] %v8066_v48  ;;  %v8090_v44 = vadd.f32 %v1816_v0, %v1577_v61 }
 0x1d4   : > { %6306 = vmatmul.msk.f32.gmra.mxu3 %vm1607_vm0, %v7604_v59 }
 0x1d5   : > { %12078 = vst [vmem:[#allocation32_spill] sm:$0xff] %v8090_v44 }
 0x1d6   : > { %v1941_v38 = vpop.f32.mrf.mxu2  ;;  %6275 = vmatmul.msk.f32.gmra.mxu2 %vm1607_vm0, %v7625_v1  ;;  %v2695_v1 = vsel %vm2640_vm1, %v8090_v44, -inf }
 0x1d7   : > { %v2066_v63 = vpop.f32.mrf.mxu3  ;;  %v1694_v49 = vpop.f32.mrf.mxu0  ;;  %v8097_v59 = vadd.f32 %v1941_v38, %v1577_v61 }
 0x1d8   : > { %v8074_v50 = vadd.f32 %v2066_v63, %v1577_v61  ;;  %6243 = vmatmul.msk.f32.gmra.mxu1 %vm1607_vm0, %v7635_v4 }
 0x1d9   : > { %12079 = vst [vmem:[#allocation33_spill] sm:$0xff] %v8097_v59  ;;  %v2743_v38 = vsel %vm2640_vm1, %v8097_v59, -inf }
 0x1da   : > { %12077 = vst [vmem:[#allocation31_spill] sm:$0xff] %v8074_v50  ;;  %v2791_v57 = vsel %vm2640_vm1, %v8074_v50, -inf  ;;  %6212 = vmatmul.msk.f32.gmra.mxu0 %vm1607_vm0, %v7659_v12 }
 0x1db   : > { %2792 = vmax.xlane.f32.xlu2 %v2791_v57  ;;  %2648 = vmax.xlane.f32.xlu1 %v2647_v45  ;;  %v1819_v45 = vpop.f32.mrf.mxu1 }
 0x1dc   : > { %2741 = vmax.xlane.f32.xlu0 %v2740_v58  ;;  %6307 = vmatmul.msk.f32.gmra.mxu3 %vm1607_vm0, %v7632_v3  ;;  %v8120_v58 = vadd.f32 %v1694_v49, %v1578_v43 }
 0x1de   : > { %v1944_v46 = vpop.f32.mrf.mxu2  ;;  %6276 = vmatmul.msk.f32.gmra.mxu2 %vm1607_vm0, %v7656_v11  ;;  %12083 = vst [vmem:[#allocation37_spill] sm:$0xff] %v8120_v58  ;;  %v2650_v11 = vsel %vm2640_vm1, %v8120_v58, -inf }
 0x1df   : > { %v8099_v63 = vadd.f32 %v1944_v46, %v1578_v43  ;;  %v1697_v61 = vpop.f32.mrf.mxu0  ;;  %v2069_v57 = vpop.f32.mrf.mxu3 }
 0x1e0   : > { %v8114_v2 = vadd.f32 %v1697_v61, %v1579_v47  ;;  %v8116_v4 = vadd.f32 %v2069_v57, %v1578_v43  ;;  %6244 = vmatmul.msk.f32.gmra.mxu1 %vm1607_vm0, %v7666_v14  ;;  %v1563_v14 = vld [vmem:[%s11871_s6 + $0x28] sm:$0xff] }
 0x1e1   : > { %12080 = vst [vmem:[#allocation34_spill] sm:$0xff] %v8099_v63  ;;  %v2746_v0 = vsel %vm2640_vm1, %v8099_v63, -inf }
 0x1e2   : > { %12081 = vst [vmem:[#allocation35_spill] sm:$0xff] %v8114_v2  ;;  %v2653_v3 = vsel %vm2640_vm1, %v8114_v2, -inf  ;;  %v2794_v60 = vsel %vm2640_vm1, %v8116_v4, -inf  ;;  %6213 = vmatmul.msk.f32.gmra.mxu0 %vm1607_vm0, %v7688_v21 }
 0x1e3   : > { %2747 = vmax.xlane.f32.xlu2 %v2746_v0  ;;  %2744 = vmax.xlane.f32.xlu1 %v2743_v38  ;;  %12082 = vst [vmem:[#allocation36_spill] sm:$0xff] %v8116_v4  ;;  %v1822_v46 = vpop.f32.mrf.mxu1  ;;  %v1580_v38 = vadd.f32 %v7960_v52, %v1563_v14 }
 0x1e4   : > { %2696 = vmax.xlane.f32.xlu0 %v2695_v1  ;;  %6308 = vmatmul.msk.f32.gmra.mxu3 %vm1607_vm0, %v7663_v13  ;;  %v8134_v12 = vadd.f32 %v1822_v46, %v1579_v47  ;;  %v8143_v1 = vadd.f32 %v1819_v45, %v1578_v43 }
 0x1e6   : > { %v1947_v49 = vpop.f32.mrf.mxu2  ;;  %12084 = vst [vmem:[#allocation38_spill] sm:$0xff] %v8134_v12  ;;  %6277 = vmatmul.msk.f32.gmra.mxu2 %vm1607_vm0, %v7691_v22  ;;  %v2701_v61 = vsel %vm2640_vm1, %v8134_v12, -inf  ;;  %v2698_v22 = vsel %vm2640_vm1, %v8143_v1, -inf }
 0x1e7   : > { %v8136_v0 = vadd.f32 %v1947_v49, %v1579_v47  ;;  %12086 = vst [vmem:[#allocation40_spill] sm:$0xff] %v8143_v1  ;;  %v2072_v13 = vpop.f32.mrf.mxu3 }
 0x1e8   : > { %6245 = vmatmul.msk.f32.gmra.mxu1 %vm1607_vm0, %v7699_v24  ;;  %v8160_v45 = vadd.f32 %v2072_v13, %v1579_v47 }
 0x1e9   : > { %12085 = vst [vmem:[#allocation39_spill] sm:$0xff] %v8136_v0  ;;  %v2749_v57 = vsel %vm2640_vm1, %v8136_v0, -inf }
 0x1ea   : > { %12088 = vst [vmem:[#allocation42_spill] sm:$0xff] %v8160_v45  ;;  %6214 = vmatmul.msk.f32.gmra.mxu0 %vm1607_vm0, %v7717_v29  ;;  %v2797_v47 = vsel %vm2640_vm1, %v8160_v45, -inf }
 0x1eb   : > { %2654 = vmax.xlane.f32.xlu2 %v2653_v3  ;;  %2651 = vmax.xlane.f32.xlu1 %v2650_v11  ;;  %v1700_v3 = vpop.f32.mrf.mxu0  ;;  %v1825_v43 = vpop.f32.mrf.mxu1 }
 0x1ec   : > { %2795 = vmax.xlane.f32.xlu0 %v2794_v60  ;;  %6309 = vmatmul.msk.f32.gmra.mxu3 %vm1607_vm0, %v7695_v23  ;;  %v8158_v21 = vadd.f32 %v1700_v3, %v1580_v38  ;;  %v8162_v60 = vadd.f32 %v1825_v43, %v1580_v38  ;;  %v1564_v23 = vld [vmem:[%s11871_s6 + $0x30] sm:$0xff] }
 0x1ed   : > { %v1581_v49 = vadd.f32 %v7960_v52, %v1564_v23 }
 0x1ee   : > { %12087 = vst [vmem:[#allocation41_spill] sm:$0xff] %v8158_v21  ;;  %6278 = vmatmul.msk.f32.gmra.mxu2 %vm1607_vm0, %v7720_v30  ;;  %v1950_v24 = vpop.f32.mrf.mxu2  ;;  %v2656_v46 = vsel %vm2640_vm1, %v8158_v21, -inf  ;;  %v2704_v30 = vsel %vm2640_vm1, %v8162_v60, -inf }
 0x1ef   : > { %12089 = vst [vmem:[#allocation43_spill] sm:$0xff] %v8162_v60  ;;  %v2075_v11 = vpop.f32.mrf.mxu3  ;;  %v8182_v29 = vadd.f32 %v1950_v24, %v1580_v38  ;;  %v2111_v60 = vld [vmem:[%s11870_s5 + $0x18] sm:$0xff] }
 0x1f0   : > { %6246 = vmatmul.msk.f32.gmra.mxu1 %vm1607_vm0, %v7727_v32  ;;  %v8184_v13 = vadd.f32 %v2075_v11, %v1580_v38 }
 0x1f1   : > { %12090 = vst [vmem:[#allocation44_spill] sm:$0xff] %v8182_v29 }
 0x1f2   : > { %12091 = vst [vmem:[#allocation45_spill] sm:$0xff] %v8184_v13  ;;  %6215 = vmatmul.msk.f32.gmra.mxu0 %vm1607_vm0, %v7748_v39 }
 0x1f3   : > { %2702 = vmax.xlane.f32.xlu2 %v2701_v61  ;;  %2699 = vmax.xlane.f32.xlu1 %v2698_v22  ;;  %v1703_v14 = vpop.f32.mrf.mxu0  ;;  %v1828_v32 = vpop.f32.mrf.mxu1 }
 0x1f4   : > { %2750 = vmax.xlane.f32.xlu0 %v2749_v57  ;;  %6310 = vmatmul.msk.f32.gmra.mxu3 %vm1607_vm0, %v7724_v31  ;;  %v8186_v61 = vadd.f32 %v1703_v14, %v1581_v49  ;;  %v2800_v31 = vsel %vm2640_vm1, %v8184_v13, -inf  ;;  %v2752_v57 = vsel %vm2640_vm1, %v8182_v29, -inf  ;;  %v8202_v39 = vadd.f32 %v1828_v32, %v1581_v49 }
 0x1f6   : > { %12092 = vst [vmem:[#allocation46_spill] sm:$0xff] %v8186_v61  ;;  %6279 = vmatmul.msk.f32.gmra.mxu2 %vm1607_vm0, %v7751_v40  ;;  %v2659_v38 = vsel %vm2640_vm1, %v8186_v61, -inf  ;;  %v1953_v3 = vpop.f32.mrf.mxu2  ;;  %v2707_v24 = vsel %vm2640_vm1, %v8202_v39, -inf }
 0x1f7   : > { %v2078_v40 = vpop.f32.mrf.mxu3  ;;  %12093 = vst [vmem:[#allocation47_spill] sm:$0xff] %v8202_v39  ;;  %v8204_v22 = vadd.f32 %v1953_v3, %v1581_v49 }
 0x1f8   : > { %6247 = vmatmul.msk.f32.gmra.mxu1 %vm1607_vm0, %v7758_v42  ;;  %v8206_v43 = vadd.f32 %v2078_v40, %v1581_v49  ;;  %v1565_v42 = vld [vmem:[%s11871_s6 + $0x38] sm:$0xff] }
 0x1f9   : > { %12094 = vst [vmem:[#allocation48_spill] sm:$0xff] %v8204_v22 }
 0x1fa   : > { %12095 = vst [vmem:[#allocation49_spill] sm:$0xff] %v8206_v43  ;;  %6216 = vmatmul.msk.f32.gmra.mxu0 %vm1607_vm0, %v7783_v54 }
 0x1fb   : > { %2657 = vmax.xlane.f32.xlu2 %v2656_v46  ;;  %2798 = vmax.xlane.f32.xlu1 %v2797_v47  ;;  %v1706_v23 = vpop.f32.mrf.mxu0  ;;  %v1582_v46 = vadd.f32 %v7960_v52, %v1565_v42  ;;  %v2803_v47 = vsel %vm2640_vm1, %v8206_v43, -inf  ;;  %v2110_v43 = vld [vmem:[%s11870_s5 + $0x10] sm:$0xff] }
 0x1fc   : > { %2705 = vmax.xlane.f32.xlu0 %v2704_v30  ;;  %6311 = vmatmul.msk.f32.gmra.mxu3 %vm1607_vm0, %v7755_v41  ;;  %v2755_v41 = vsel %vm2640_vm1, %v8204_v22, -inf  ;;  %v1831_v30 = vpop.f32.mrf.mxu1 }
 0x1fd   : > { %v8226_v54 = vadd.f32 %v1706_v23, %v1582_v46  ;;  %v8228_v11 = vadd.f32 %v1831_v30, %v1582_v46 }
 0x1fe   : > { %6280 = vmatmul.msk.f32.gmra.mxu2 %vm1607_vm0, %v7780_v53  ;;  %v1956_v53 = vpop.f32.mrf.mxu2 }
 0x1ff   : > { %12096 = vst [vmem:[#allocation50_spill] sm:$0xff] %v8226_v54  ;;  %v8230_v49 = vadd.f32 %v1956_v53, %v1582_v46  ;;  %v2081_v14 = vpop.f32.mrf.mxu3  ;;  %v2662_v32 = vsel %vm2640_vm1, %v8226_v54, -inf }
 0x200   : > { %6248 = vmatmul.msk.f32.gmra.mxu1 %vm1607_vm0, %v7791_v56  ;;  %12097 = vst [vmem:[#allocation51_spill] sm:$0xff] %v8228_v11  ;;  %v1566_v56 = vld [vmem:[%s11871_s6 + $0x40] sm:$0xff]  ;;  %v8252_v3 = vadd.f32 %v2081_v14, %v1582_v46 }
 0x201   : > { %12098 = vst [vmem:[#allocation52_spill] sm:$0xff] %v8230_v49 }
 0x202   : > { %6217 = vmatmul.msk.f32.gmra.mxu0 %vm1607_vm0, %v7809_v5  ;;  %12100 = vst [vmem:[#allocation54_spill] sm:$0xff] %v8252_v3  ;;  %v2806_v23 = vsel %vm2640_vm1, %v8252_v3, -inf }
 0x203   : > { %2801 = vmax.xlane.f32.xlu2 %v2800_v31  ;;  %2753 = vmax.xlane.f32.xlu1 %v2752_v57  ;;  %v1583_v31 = vadd.f32 %v7960_v52, %v1566_v56  ;;  %v2758_v57 = vsel %vm2640_vm1, %v8230_v49, -inf }
 0x204   : > { %2660 = vmax.xlane.f32.xlu0 %v2659_v38  ;;  %6312 = vmatmul.msk.f32.gmra.mxu3 %vm1607_vm0, %v7787_v55  ;;  %v2710_v55 = vsel %vm2640_vm1, %v8228_v11, -inf  ;;  %v1709_v38 = vpop.f32.mrf.mxu0 }
 0x205   : > { %v8250_v5 = vadd.f32 %v1709_v38, %v1583_v31 }
 0x206   : > { %6281 = vmatmul.msk.f32.gmra.mxu2 %vm1607_vm0, %v7812_v6  ;;  %v1834_v6 = vpop.f32.mrf.mxu1  ;;  %v1959_v42 = vpop.f32.mrf.mxu2 }
 0x207   : > { %12099 = vst [vmem:[#allocation53_spill] sm:$0xff] %v8250_v5  ;;  %v8254_v40 = vadd.f32 %v1834_v6, %v1583_v31 }
 0x208   : > { %6249 = vmatmul.msk.f32.gmra.mxu1 %vm1607_vm0, %v7819_v8  ;;  %v1567_v8 = vld [vmem:[%s11871_s6 + $0x48] sm:$0xff] }
 0x209   : > { %12101 = vst [vmem:[#allocation55_spill] sm:$0xff] %v8254_v40 }
 0x20a   : > { %6218 = vmatmul.msk.f32.gmra.mxu0 %vm1607_vm0, %v7830_v9  ;;  %v8274_v9 = vadd.f32 %v1959_v42, %v1583_v31 }
 0x20b   : > { %2756 = vmax.xlane.f32.xlu2 %v2755_v41  ;;  %2708 = vmax.xlane.f32.xlu1 %v2707_v24  ;;  %v2084_v41 = vpop.f32.mrf.mxu3  ;;  %v1584_v24 = vadd.f32 %v7960_v52, %v1567_v8 }
 0x20c   : > { %2804 = vmax.xlane.f32.xlu0 %v2803_v47  ;;  %6313 = vmatmul.msk.f32.gmra.mxu3 %vm1607_vm0, %v7816_v7  ;;  %v2665_v7 = vsel %vm2640_vm1, %v8250_v5, -inf  ;;  %v1712_v46 = vpop.f32.mrf.mxu0  ;;  %12102 = vst [vmem:[#allocation56_spill] sm:$0xff] %v8274_v9  ;;  %v8276_v47 = vadd.f32 %v2084_v41, %v1583_v31  ;;  %v2761_v53 = vsel %vm2640_vm1, %v8274_v9, -inf  ;;  %v2109_v9 = vld [vmem:[%s11870_s5 + $0x8] sm:$0xff] }
 0x20d   : > { %v8278_v30 = vadd.f32 %v1712_v46, %v1584_v24  ;;  %v12112_v46 = vld [vmem:[#allocation13_spill] sm:$0xff] }
 0x20e   : > { %6282 = vmatmul.msk.f32.gmra.mxu2 %vm1607_vm0, %v7833_v10  ;;  %v2713_v10 = vsel %vm2640_vm1, %v8254_v40, -inf  ;;  %12103 = vst [vmem:[#allocation57_spill] sm:$0xff] %v8276_v47  ;;  %v1962_v14 = vpop.f32.mrf.mxu2 }
 0x20f   : > { %12104 = vst [vmem:[#allocation58_spill] sm:$0xff] %v8278_v30  ;;  %v2668_v56 = vsel %vm2640_vm1, %v8278_v30, -inf }
 0x210   : > { %6250 = vmatmul.msk.f32.gmra.mxu1 %vm1607_vm0, %v7839_v16  ;;  %v1837_v16 = vpop.f32.mrf.mxu1 }
 0x212   : > { %6219 = vmatmul.msk.f32.gmra.mxu0 %vm1607_vm0, %v7853_v18  ;;  %v8294_v18 = vadd.f32 %v1837_v16, %v1584_v24 }
 0x213   : > { %2711 = vmax.xlane.f32.xlu2 %v2710_v55  ;;  %2663 = vmax.xlane.f32.xlu1 %v2662_v32  ;;  %v8296_v55 = vadd.f32 %v1962_v14, %v1584_v24 }
 0x214   : > { %2759 = vmax.xlane.f32.xlu0 %v2758_v57  ;;  %6314 = vmatmul.msk.f32.gmra.mxu3 %vm1607_vm0, %v7836_v15  ;;  %v2809_v15 = vsel %vm2640_vm1, %v8276_v47, -inf  ;;  %12105 = vst [vmem:[#allocation59_spill] sm:$0xff] %v8294_v18  ;;  %v1715_v31 = vpop.f32.mrf.mxu0  ;;  %v2716_v57 = vsel %vm2640_vm1, %v8294_v18, -inf }
 0x215   : > { %12106 = vst [vmem:[#allocation60_spill] sm:$0xff] %v8296_v55 }
 0x216   : > { %6283 = vmatmul.msk.f32.gmra.mxu2 %vm1607_vm0, %v7850_v17  ;;  %v2087_v17 = vpop.f32.mrf.mxu3 }
 0x217   : > { %v8298_v32 = vadd.f32 %v2087_v17, %v1584_v24 }
 0x218   : > { %6251 = vmatmul.msk.f32.gmra.mxu1 %vm1607_vm0, %v7859_v20  ;;  %v1568_v20 = vld [vmem:[%s11871_s6 + $0x50] sm:$0xff]  ;;  %v1840_v8 = vpop.f32.mrf.mxu1 }
 0x219   : > { %12107 = vst [vmem:[#allocation61_spill] sm:$0xff] %v8298_v32  ;;  %v1585_v38 = vadd.f32 %v7960_v52, %v1568_v20  ;;  %v2812_v6 = vsel %vm2640_vm1, %v8298_v32, -inf  ;;  %v12117_v20 = vld [vmem:[#allocation14_spill] sm:$0xff] }
 0x21a   : > { %6220 = vmatmul.msk.f32.gmra.mxu0 %vm1607_vm0, %v7870_v25 }
 0x21b   : > { %2666 = vmax.xlane.f32.xlu2 %v2665_v7  ;;  %2807 = vmax.xlane.f32.xlu1 %v2806_v23  ;;  %v8318_v25 = vadd.f32 %v1715_v31, %v1585_v38  ;;  %v8320_v42 = vadd.f32 %v1840_v8, %v1585_v38  ;;  %v1570_v31 = vld [vmem:[%s11871_s6 + $0x60] sm:$0xff] }
 0x21c   : > { %2714 = vmax.xlane.f32.xlu0 %v2713_v10  ;;  %6315 = vmatmul.msk.f32.gmra.mxu3 %vm1607_vm0, %v7856_v19  ;;  %v2764_v19 = vsel %vm2640_vm1, %v8296_v55, -inf  ;;  %v12111_v10 = vld [vmem:[#allocation11_spill] sm:$0xff] }
 0x21d   : > { %12108 = vst [vmem:[#allocation62_spill] sm:$0xff] %v8318_v25  ;;  %v2671_v41 = vsel %vm2640_vm1, %v8318_v25, -inf }
 0x21e   : > { %6284 = vmatmul.msk.f32.gmra.mxu2 %vm1607_vm0, %v7873_v26  ;;  %v1965_v26 = vpop.f32.mrf.mxu2  ;;  %12109 = vst [vmem:[#allocation63_spill] sm:$0xff] %v8320_v42  ;;  %v2090_v23 = vpop.f32.mrf.mxu3 }
 0x21f   : > { %v8322_v7 = vadd.f32 %v1965_v26, %v1585_v38  ;;  %v8344_v14 = vadd.f32 %v2090_v23, %v1585_v38  ;;  %v12119_v26 = vld [vmem:[#allocation16_spill] sm:$0xff] }
 0x220   : > { %6252 = vmatmul.msk.f32.gmra.mxu1 %vm1607_vm0, %v7879_v28  ;;  %v1569_v28 = vld [vmem:[%s11871_s6 + $0x58] sm:$0xff] }
 0x221   : > { %12110 = vst [vmem:[#allocation64_spill] sm:$0xff] %v8322_v7  ;;  %v1586_v24 = vadd.f32 %v7960_v52, %v1569_v28  ;;  %v2767_v16 = vsel %vm2640_vm1, %v8322_v7, -inf  ;;  %v2815_v38 = vsel %vm2640_vm1, %v8344_v14, -inf }
 0x222   : > { %6221 = vmatmul.msk.f32.gmra.mxu0 %vm1607_vm0, %v12111_v10  ;;  %12115 = vst [vmem:[#allocation13_spill] sm:$0xff] %v8344_v14  ;;  %v1587_v10 = vadd.f32 %v7960_v52, %v1570_v31 }
 0x223   : > { %2810 = vmax.xlane.f32.xlu2 %v2809_v15  ;;  %2762 = vmax.xlane.f32.xlu1 %v2761_v53  ;;  %v1718_v15 = vpop.f32.mrf.mxu0  ;;  %v1843_v53 = vpop.f32.mrf.mxu1 }
 0x224   : > { %2669 = vmax.xlane.f32.xlu0 %v2668_v56  ;;  %6316 = vmatmul.msk.f32.gmra.mxu3 %vm1607_vm0, %v7876_v27  ;;  %v2719_v27 = vsel %vm2640_vm1, %v8320_v42, -inf  ;;  %v8342_v56 = vadd.f32 %v1718_v15, %v1586_v24  ;;  %v8346_v17 = vadd.f32 %v1843_v53, %v1586_v24 }
 0x226   : > { %6285 = vmatmul.msk.f32.gmra.mxu2 %vm1607_vm0, %v7893_v34  ;;  %v12113_v34 = vld [vmem:[#allocation12_spill] sm:$0xff]  ;;  %12114 = vst [vmem:[#allocation11_spill] sm:$0xff] %v8342_v56  ;;  %v2674_v8 = vsel %vm2640_vm1, %v8342_v56, -inf  ;;  %v2722_v28 = vsel %vm2640_vm1, %v8346_v17, -inf  ;;  %v2093_v23 = vpop.f32.mrf.mxu3 }
 0x227   : > { %12116 = vst [vmem:[#allocation12_spill] sm:$0xff] %v8346_v17  ;;  %v8372_v15 = vadd.f32 %v2093_v23, %v1586_v24  ;;  %v12127_v23 = vld [vmem:[#allocation21_spill] sm:$0xff] }
 0x228   : > { %6253 = vmatmul.msk.f32.gmra.mxu1 %vm1607_vm0, %v12112_v46 }
 0x22b   : > { %2765 = vmax.xlane.f32.xlu2 %v2764_v19  ;;  %2717 = vmax.xlane.f32.xlu1 %v2716_v57  ;;  %v1968_v57 = vpop.f32.mrf.mxu2 }
 0x22c   : > { %2813 = vmax.xlane.f32.xlu0 %v2812_v6  ;;  %6317 = vmatmul.msk.f32.gmra.mxu3 %vm1607_vm0, %v12113_v34  ;;  %v12118_v6 = vld [vmem:[#allocation15_spill] sm:$0xff] }
 0x22d   : > { %6222 = vmatmul.msk.f32.gmra.mxu0 %vm1607_vm0, %v12118_v6  ;;  %12122 = vst [vmem:[#allocation15_spill] sm:$0xff] %v8372_v15  ;;  %v1846_v6 = vpop.f32.mrf.mxu1 }
 0x22e   : > { %6286 = vmatmul.msk.f32.gmra.mxu2 %vm1607_vm0, %v12117_v20  ;;  %v12124_v20 = vld [vmem:[#allocation20_spill] sm:$0xff] }
 0x230   : > { %6254 = vmatmul.msk.f32.gmra.mxu1 %vm1607_vm0, %v12119_v26  ;;  %v12125_v26 = vld [vmem:[#allocation18_spill] sm:$0xff] }
 0x233   : > { %2720 = vmax.xlane.f32.xlu2 %v2719_v27  ;;  %2672 = vmax.xlane.f32.xlu1 %v2671_v41  ;;  %v12120_v27 = vld [vmem:[#allocation17_spill] sm:$0xff]  ;;  %v1721_v41 = vpop.f32.mrf.mxu0 }
 0x234   : > { %2768 = vmax.xlane.f32.xlu0 %v2767_v16  ;;  %6318 = vmatmul.msk.f32.gmra.mxu3 %vm1607_vm0, %v12120_v27  ;;  %v8370_v16 = vadd.f32 %v1968_v57, %v1586_v24  ;;  %v8376_v53 = vadd.f32 %v1721_v41, %v1587_v10  ;;  %v12126_v57 = vld [vmem:[#allocation19_spill] sm:$0xff]  ;;  %v2096_v27 = vpop.f32.mrf.mxu3  ;;  %v8394_v41 = vadd.f32 %v1846_v6, %v1587_v10  ;;  %v12132_v6 = vld [vmem:[#allocation24_spill] sm:$0xff] }
 0x235   : > { %6223 = vmatmul.msk.f32.gmra.mxu0 %vm1607_vm0, %v12125_v26 }
 0x236   : > { %v8353_v19 = vpop.xlane.xlu0 %2642  ;;  %12121 = vst [vmem:[#allocation14_spill] sm:$0xff] %v8370_v16  ;;  %6287 = vmatmul.msk.f32.gmra.mxu2 %vm1607_vm0, %v12124_v20  ;;  %v2770_v24 = vsel %vm2640_vm1, %v8370_v16, -inf  ;;  %v12133_v16 = vld [vmem:[#allocation26_spill] sm:$0xff] }
 0x237   : > { %12123 = vst [vmem:[#allocation16_spill] sm:$0xff] %v8376_v53 }
 0x238   : > { %6255 = vmatmul.msk.f32.gmra.mxu1 %vm1607_vm0, %v12126_v57  ;;  %12128 = vst [vmem:[#allocation17_spill] sm:$0xff] %v8394_v41  ;;  %v1571_v57 = vld [vmem:[%s11871_s6 + $0x68] sm:$0xff] }
 0x239   : > { %v8368_v46 = vpop.xlane.xlu1 %2690 }
 0x23b   : > { %2675 = vmax.xlane.f32.xlu2 %v2674_v8  ;;  %2816 = vmax.xlane.f32.xlu1 %v2815_v38  ;;  %v2818_v8 = vsel %vm2640_vm1, %v8372_v15, -inf  ;;  %v2677_v38 = vsel %vm2640_vm1, %v8376_v53, -inf  ;;  %v8400_v15 = vadd.f32 %v2096_v27, %v1587_v10  ;;  %v12131_v53 = vld [vmem:[#allocation25_spill] sm:$0xff]  ;;  %v1849_v27 = vpop.f32.mrf.mxu1 }
 0x23c   : > { %2723 = vmax.xlane.f32.xlu0 %v2722_v28  ;;  %v1971_v28 = vpop.f32.mrf.mxu2  ;;  %6319 = vmatmul.msk.f32.gmra.mxu3 %vm1607_vm0, %v12127_v23 }
 0x23d   : > { %v8374_v34 = vpop.xlane.xlu2 %2738  ;;  %v8396_v20 = vadd.f32 %v1971_v28, %v1587_v10  ;;  %12130 = vst [vmem:[#allocation18_spill] sm:$0xff] %v8400_v15  ;;  %6224 = vmatmul.msk.f32.gmra.mxu0 %vm1607_vm0, %v12132_v6  ;;  %v2725_v10 = vsel %vm2640_vm1, %v8394_v41, -inf  ;;  %v1588_v28 = vadd.f32 %v7960_v52, %v1571_v57 }
 0x23e   : > { %v8380_v31 = vpop.xlane.xlu0 %2786  ;;  %6288 = vmatmul.msk.f32.gmra.mxu2 %vm1607_vm0, %v12131_v53  ;;  %v2821_v53 = vsel %vm2640_vm1, %v8400_v15, -inf }
 0x23f   : > { %12129 = vst [vmem:[#allocation20_spill] sm:$0xff] %v8396_v20 }
 0x240   : > { %6256 = vmatmul.msk.f32.gmra.mxu1 %vm1607_vm0, %v8018_v37  ;;  %v1572_v37 = vld [vmem:[%s11871_s6 + $0x70] sm:$0xff] }
 0x243   : > { %2819 = vmax.xlane.f32.xlu2 %v2818_v8  ;;  %2771 = vmax.xlane.f32.xlu1 %v2770_v24  ;;  %v1724_v24 = vpop.f32.mrf.mxu0 }
 0x244   : > { %2678 = vmax.xlane.f32.xlu0 %v2677_v38  ;;  %v2773_v38 = vsel %vm2640_vm1, %v8396_v20, -inf  ;;  %6320 = vmatmul.msk.f32.gmra.mxu3 %vm1607_vm0, %v12133_v16  ;;  %v1974_v56 = vpop.f32.mrf.mxu2  ;;  %v8424_v6 = vadd.f32 %v1724_v24, %v1588_v28  ;;  %v8426_v20 = vadd.f32 %v1849_v27, %v1588_v28  ;;  %v2099_v16 = vpop.f32.mrf.mxu3 }
 0x245   : > { %v8398_v26 = vpop.xlane.xlu2 %2693  ;;  %v8428_v41 = vadd.f32 %v1974_v56, %v1588_v28  ;;  %v1589_v56 = vadd.f32 %v7960_v52, %v1572_v37  ;;  %v1852_v27 = vpop.f32.mrf.mxu1  ;;  %v8448_v14 = vadd.f32 %v2099_v16, %v1588_v28  ;;  %v1573_v37 = vld [vmem:[%s11871_s6 + $0x78] sm:$0xff] }
 0x246   : > { %v8407_v23 = vpop.xlane.xlu1 %2789  ;;  %v8409_v8 = vpop.xlane.xlu0 %2645  ;;  %12134 = vst [vmem:[#allocation19_spill] sm:$0xff] %v8424_v6  ;;  %v2680_v24 = vsel %vm2640_vm1, %v8424_v6, -inf }
 0x247   : > { %12135 = vst [vmem:[#allocation21_spill] sm:$0xff] %v8426_v20  ;;  %v8450_v7 = vadd.f32 %v1852_v27, %v1589_v56  ;;  %v2824_v28 = vsel %vm2640_vm1, %v8448_v14, -inf }
 0x248   : > { %12136 = vst [vmem:[#allocation25_spill] sm:$0xff] %v8428_v41 }
 0x249   : > { %12138 = vst [vmem:[#allocation26_spill] sm:$0xff] %v8448_v14  ;;  %v2731_v16 = vsel %vm2640_vm1, %v8450_v7, -inf }
 0x24a   : > { %12139 = vst [vmem:[#allocation65_spill] sm:$0xff] %v8450_v7 }
 0x24b   : > { %2774 = vmax.xlane.f32.xlu2 %v2773_v38  ;;  %2726 = vmax.xlane.f32.xlu1 %v2725_v10  ;;  %v2728_v38 = vsel %vm2640_vm1, %v8426_v20, -inf  ;;  %v2776_v10 = vsel %vm2640_vm1, %v8428_v41, -inf }
 0x24c   : > { %2822 = vmax.xlane.f32.xlu0 %v2821_v53  ;;  %v1727_v53 = vpop.f32.mrf.mxu0  ;;  %v1977_v20 = vpop.f32.mrf.mxu2 }
 0x24d   : > { %v8446_v42 = vadd.f32 %v1727_v53, %v1589_v56  ;;  %v8468_v27 = vadd.f32 %v1977_v20, %v1589_v56 }
 0x24e   : > { %v8433_v57 = vpop.xlane.xlu2 %2792  ;;  %v8435_v15 = vpop.xlane.xlu1 %2648 }
 0x24f   : > { %v8437_v17 = vpop.xlane.xlu0 %2741  ;;  %12137 = vst [vmem:[#allocation24_spill] sm:$0xff] %v8446_v42 }
 0x250   : > { %12140 = vst [vmem:[#allocation66_spill] sm:$0xff] %v8468_v27 }
 0x253   : > { %2729 = vmax.xlane.f32.xlu2 %v2728_v38  ;;  %2681 = vmax.xlane.f32.xlu1 %v2680_v24  ;;  %v2683_v38 = vsel %vm2640_vm1, %v8446_v42, -inf  ;;  %v2102_v24 = vpop.f32.mrf.mxu3  ;;  %v1855_v42 = vpop.f32.mrf.mxu1 }
 0x254   : > { %2777 = vmax.xlane.f32.xlu0 %v2776_v10  ;;  %v1590_v10 = vadd.f32 %v7960_v52, %v1573_v37  ;;  %v1730_v53 = vpop.f32.mrf.mxu0  ;;  %v8470_v25 = vadd.f32 %v2102_v24, %v1589_v56  ;;  %v2779_v37 = vsel %vm2640_vm1, %v8468_v27, -inf }
 0x256   : > { %v8452_v55 = vpop.xlane.xlu2 %2747  ;;  %v8454_v6 = vpop.xlane.xlu1 %2744  ;;  %12141 = vst [vmem:[#allocation67_spill] sm:$0xff] %v8470_v25  ;;  %v8472_v32 = vadd.f32 %v1730_v53, %v1590_v10  ;;  %v2827_v52 = vsel %vm2640_vm1, %v8470_v25, -inf }
 0x257   : > { %v8459_v41 = vpop.xlane.xlu0 %2696 }
 0x258   : > { %12142 = vst [vmem:[#allocation68_spill] sm:$0xff] %v8472_v32  ;;  %v2686_v20 = vsel %vm2640_vm1, %v8472_v32, -inf }
 0x25b   : > { %2684 = vmax.xlane.f32.xlu2 %v2683_v38  ;;  %2825 = vmax.xlane.f32.xlu1 %v2824_v28  ;;  %v1980_v38 = vpop.f32.mrf.mxu2  ;;  %v2105_v56 = vpop.f32.mrf.mxu3  ;;  %v8486_v28 = vadd.f32 %v1855_v42, %v1590_v10 }
 0x25c   : > { %2732 = vmax.xlane.f32.xlu0 %v2731_v16  ;;  %v8488_v16 = vadd.f32 %v1980_v38, %v1590_v10  ;;  %v8490_v24 = vadd.f32 %v2105_v56, %v1590_v10  ;;  %v2253_v53 = vpop.f32.mrf.mxu0  ;;  %v2108_v10 = vld [vmem:[%s11870_s5] sm:$0xff] }
 0x25d   : > { %12143 = vst [vmem:[#allocation69_spill] sm:$0xff] %v8486_v28  ;;  %v8515_v5 = vadd.f32 %v2253_v53, %v2108_v10 }
 0x25e   : > { %v8474_v47 = vpop.xlane.xlu2 %2654  ;;  %v8476_v14 = vpop.xlane.xlu1 %2651  ;;  %12144 = vst [vmem:[#allocation70_spill] sm:$0xff] %v8488_v16  ;;  %v2782_v32 = vsel %vm2640_vm1, %v8488_v16, -inf  ;;  %v2830_v42 = vsel %vm2640_vm1, %v8490_v24, -inf }
 0x25f   : > { %v8478_v18 = vpop.xlane.xlu0 %2795  ;;  %12145 = vst [vmem:[#allocation71_spill] sm:$0xff] %v8490_v24 }
 0x263   : > { %2828 = vmax.xlane.f32.xlu2 %v2827_v52  ;;  %2780 = vmax.xlane.f32.xlu1 %v2779_v37  ;;  %v2734_v52 = vsel %vm2640_vm1, %v8486_v28, -inf  ;;  %v2366_v37 = vpop.f32.mrf.mxu1  ;;  %v2479_v38 = vpop.f32.mrf.mxu2 }
 0x264   : > { %2687 = vmax.xlane.f32.xlu0 %v2686_v20  ;;  %v2592_v20 = vpop.f32.mrf.mxu3  ;;  %v8513_v28 = vadd.f32 %v2366_v37, %v2108_v10  ;;  %v8517_v24 = vadd.f32 %v2479_v38, %v2108_v10 }
 0x265   : > { %v8535_v3 = vadd.f32 %v2592_v20, %v2108_v10 }
 0x266   : > { %v8492_v7 = vpop.xlane.xlu2 %2702  ;;  %v8494_v25 = vpop.xlane.xlu1 %2699 }
 0x267   : > { %v8496_v27 = vpop.xlane.xlu0 %2750 }
 0x26b   : > { %2783 = vmax.xlane.f32.xlu2 %v2782_v32  ;;  %2735 = vmax.xlane.f32.xlu1 %v2734_v52  ;;  %v2256_v32 = vpop.f32.mrf.mxu0  ;;  %v2369_v52 = vpop.f32.mrf.mxu1 }
 0x26c   : > { %2831 = vmax.xlane.f32.xlu0 %v2830_v42  ;;  %v2482_v42 = vpop.f32.mrf.mxu2  ;;  %v8531_v38 = vadd.f32 %v2256_v32, %v2109_v9  ;;  %v2595_v49 = vpop.f32.mrf.mxu3  ;;  %v8553_v61 = vadd.f32 %v2369_v52, %v2109_v9 }
 0x26d   : > { %v8533_v11 = vadd.f32 %v2482_v42, %v2109_v9  ;;  %v8549_v10 = vadd.f32 %v2595_v49, %v2109_v9 }
 0x26e   : > { %v8507_v56 = vpop.xlane.xlu2 %2657  ;;  %v8509_v30 = vpop.xlane.xlu1 %2798 }
 0x26f   : > { %12146 = vst [vmem:[#allocation72_spill] sm:$0xff] %v8507_v56  ;;  %v8511_v16 = vpop.xlane.xlu0 %2705 }
 0x270   : > { %12147 = vst [vmem:[#allocation73_spill] sm:$0xff] %v8511_v16 }
 0x273   : > { %2865 = vmax.xlane.f32.xlu2 %v8513_v28  ;;  %2833 = vmax.xlane.f32.xlu1 %v8515_v5  ;;  %v2259_v22 = vpop.f32.mrf.mxu0  ;;  %v2372_v54 = vpop.f32.mrf.mxu1 }
 0x274   : > { %2897 = vmax.xlane.f32.xlu0 %v8517_v24  ;;  %v8551_v20 = vadd.f32 %v2372_v54, %v2110_v43  ;;  %v2485_v39 = vpop.f32.mrf.mxu2  ;;  %v2598_v21 = vpop.f32.mrf.mxu3  ;;  %v8571_v0 = vadd.f32 %v2259_v22, %v2110_v43 }
 0x275   : > { %v8567_v9 = vadd.f32 %v2485_v39, %v2110_v43 }
 0x276   : > { %v8525_v40 = vpop.xlane.xlu2 %2801  ;;  %v8527_v37 = vpop.xlane.xlu1 %2753 }
 0x277   : > { %12148 = vst [vmem:[#allocation74_spill] sm:$0xff] %v8525_v40  ;;  %v8529_v53 = vpop.xlane.xlu0 %2660 }
 0x278   : > { %12149 = vst [vmem:[#allocation75_spill] sm:$0xff] %v8527_v37 }
 0x279   : > { %12150 = vst [vmem:[#allocation76_spill] sm:$0xff] %v8529_v53 }
 0x27b   : > { %2835 = vmax.xlane.f32.xlu2 %v8531_v38  ;;  %2899 = vmax.xlane.f32.xlu1 %v8533_v11  ;;  %v2262_v29 = vpop.f32.mrf.mxu0  ;;  %v2375_v45 = vpop.f32.mrf.mxu1 }
 0x27c   : > { %2929 = vmax.xlane.f32.xlu0 %v8535_v3  ;;  %v8569_v52 = vadd.f32 %v2262_v29, %v2111_v60  ;;  %v2488_v2 = vpop.f32.mrf.mxu2  ;;  %v2601_v63 = vpop.f32.mrf.mxu3  ;;  %v8582_v39 = vadd.f32 %v2375_v45, %v2111_v60 }
 0x27d   : > { %v8584_v29 = vadd.f32 %v2601_v63, %v2111_v60 }
 0x27e   : > { %v8543_v13 = vpop.xlane.xlu2 %2756  ;;  %v8545_v32 = vpop.xlane.xlu1 %2708 }
 0x27f   : > { %12151 = vst [vmem:[#allocation77_spill] sm:$0xff] %v8543_v13  ;;  %v8547_v42 = vpop.xlane.xlu0 %2804 }
 0x280   : > { %12152 = vst [vmem:[#allocation78_spill] sm:$0xff] %v8545_v32 }
 0x281   : > { %12153 = vst [vmem:[#allocation79_spill] sm:$0xff] %v8547_v42 }
 0x283   : > { %2931 = vmax.xlane.f32.xlu2 %v8549_v10  ;;  %2869 = vmax.xlane.f32.xlu1 %v8551_v20  ;;  %v2265_v22 = vpop.f32.mrf.mxu0  ;;  %v2378_v13 = vpop.f32.mrf.mxu1 }
 0x284   : > { %2867 = vmax.xlane.f32.xlu0 %v8553_v61  ;;  %v2491_v50 = vpop.f32.mrf.mxu2 }
 0x286   : > { %v8561_v12 = vpop.xlane.xlu2 %2711  ;;  %v8563_v49 = vpop.xlane.xlu1 %2663 }
 0x287   : > { %12154 = vst [vmem:[#allocation80_spill] sm:$0xff] %v8561_v12  ;;  %v8565_v54 = vpop.xlane.xlu0 %2759 }
 0x288   : > { %12155 = vst [vmem:[#allocation81_spill] sm:$0xff] %v8563_v49  ;;  %v8604_v49 = vadd.f32 %v2488_v2, %v2111_v60 }
 0x289   : > { %12156 = vst [vmem:[#allocation82_spill] sm:$0xff] %v8565_v54  ;;  %v8586_v54 = vadd.f32 %v2598_v21, %v2110_v43 }
 0x28b   : > { %2901 = vmax.xlane.f32.xlu2 %v8567_v9  ;;  %2839 = vmax.xlane.f32.xlu1 %v8569_v52  ;;  %v2268_v42 = vpop.f32.mrf.mxu0  ;;  %v2381_v58 = vpop.f32.mrf.mxu1 }
 0x28c   : > { %2837 = vmax.xlane.f32.xlu0 %v8571_v0 }
 0x28e   : > { %v8576_v12 = vpop.xlane.xlu2 %2666  ;;  %v8578_v4 = vpop.xlane.xlu1 %2807 }
 0x28f   : > { %12157 = vst [vmem:[#allocation83_spill] sm:$0xff] %v8576_v12  ;;  %v8580_v1 = vpop.xlane.xlu0 %2714  ;;  %v2112_v12 = vld [vmem:[%s11870_s5 + $0x20] sm:$0xff] }
 0x290   : > { %12158 = vst [vmem:[#allocation84_spill] sm:$0xff] %v8578_v4  ;;  %v8600_v21 = vadd.f32 %v2265_v22, %v2112_v12  ;;  %v8602_v43 = vadd.f32 %v2491_v50, %v2112_v12  ;;  %v2604_v4 = vpop.f32.mrf.mxu3  ;;  %v8622_v40 = vadd.f32 %v2378_v13, %v2112_v12 }
 0x291   : > { %12159 = vst [vmem:[#allocation85_spill] sm:$0xff] %v8580_v1  ;;  %v8618_v2 = vadd.f32 %v2604_v4, %v2112_v12 }
 0x293   : > { %2871 = vmax.xlane.f32.xlu2 %v8582_v39  ;;  %2935 = vmax.xlane.f32.xlu1 %v8584_v29  ;;  %12166 = vst [vmem:[#allocation92_spill] sm:$0xff] %v8618_v2  ;;  %v2271_v48 = vpop.f32.mrf.mxu0 }
 0x294   : > { %2933 = vmax.xlane.f32.xlu0 %v8586_v54 }
 0x296   : > { %v8594_v1 = vpop.xlane.xlu2 %2810  ;;  %v8596_v45 = vpop.xlane.xlu1 %2762 }
 0x297   : > { %12160 = vst [vmem:[#allocation86_spill] sm:$0xff] %v8594_v1  ;;  %v8598_v63 = vpop.xlane.xlu0 %2669  ;;  %v2113_v1 = vld [vmem:[%s11870_s5 + $0x28] sm:$0xff] }
 0x298   : > { %12161 = vst [vmem:[#allocation87_spill] sm:$0xff] %v8596_v45  ;;  %v8620_v60 = vadd.f32 %v2381_v58, %v2113_v1  ;;  %v2494_v45 = vpop.f32.mrf.mxu2  ;;  %v2607_v32 = vpop.f32.mrf.mxu3  ;;  %v8640_v59 = vadd.f32 %v2268_v42, %v2113_v1 }
 0x299   : > { %12162 = vst [vmem:[#allocation88_spill] sm:$0xff] %v8598_v63  ;;  %v8636_v12 = vadd.f32 %v2494_v45, %v2113_v1 }
 0x29a   : > { %12167 = vst [vmem:[#allocation93_spill] sm:$0xff] %v8620_v60 }
 0x29b   : > { %2841 = vmax.xlane.f32.xlu2 %v8600_v21  ;;  %2905 = vmax.xlane.f32.xlu1 %v8602_v43  ;;  %12171 = vst [vmem:[#allocation97_spill] sm:$0xff] %v8636_v12  ;;  %v2274_v42 = vpop.f32.mrf.mxu0 }
 0x29c   : > { %2903 = vmax.xlane.f32.xlu0 %v8604_v49  ;;  %12173 = vst [vmem:[#allocation99_spill] sm:$0xff] %v8640_v59 }
 0x29e   : > { %v8612_v63 = vpop.xlane.xlu2 %2765  ;;  %v8614_v22 = vpop.xlane.xlu1 %2717 }
 0x29f   : > { %12163 = vst [vmem:[#allocation89_spill] sm:$0xff] %v8612_v63  ;;  %v8616_v50 = vpop.xlane.xlu0 %2813  ;;  %v2114_v63 = vld [vmem:[%s11870_s5 + $0x30] sm:$0xff] }
 0x2a0   : > { %12164 = vst [vmem:[#allocation90_spill] sm:$0xff] %v8614_v22  ;;  %v8638_v13 = vadd.f32 %v2271_v48, %v2114_v63  ;;  %v2384_v22 = vpop.f32.mrf.mxu1  ;;  %v2497_v44 = vpop.f32.mrf.mxu2 }
 0x2a1   : > { %12165 = vst [vmem:[#allocation91_spill] sm:$0xff] %v8616_v50  ;;  %v8651_v48 = vadd.f32 %v2384_v22, %v2114_v63  ;;  %v3760_v22 = vld [vmem:[%s8662_s16 + $0x78] sm:$0xff] }
 0x2a2   : > { %12172 = vst [vmem:[#allocation98_spill] sm:$0xff] %v8638_v13  ;;  %3809 = vmatpush.msra.mxu0 %v3760_v22  ;;  %v3774_v22 = vld [vmem:[%s8662_s16 + $0xe8] sm:$0xff] }
 0x2a3   : > { %2937 = vmax.xlane.f32.xlu2 %v8618_v2  ;;  %2875 = vmax.xlane.f32.xlu1 %v8620_v60  ;;  %12177 = vst [vmem:[#allocation103_spill] sm:$0xff] %v8651_v48  ;;  %v8655_v60 = vadd.f32 %v2607_v32, %v2113_v1  ;;  %v2115_v32 = vld [vmem:[%s11870_s5 + $0x38] sm:$0xff] }
 0x2a4   : > { %2873 = vmax.xlane.f32.xlu0 %v8622_v40 }
 0x2a5   : > { %12179 = vst [vmem:[#allocation105_spill] sm:$0xff] %v8655_v60 }
 0x2a6   : > { %v8630_v50 = vpop.xlane.xlu2 %2720  ;;  %v8632_v4 = vpop.xlane.xlu1 %2672 }
 0x2a7   : > { %12168 = vst [vmem:[#allocation94_spill] sm:$0xff] %v8630_v50  ;;  %v8634_v58 = vpop.xlane.xlu0 %2768  ;;  %v2610_v50 = vpop.f32.mrf.mxu3 }
 0x2a8   : > { %12169 = vst [vmem:[#allocation95_spill] sm:$0xff] %v8632_v4  ;;  %v8657_v56 = vpop.f32.mrf.mxu1  ;;  %v2500_v1 = vpop.f32.mrf.mxu2 }
 0x2a9   : > { %12170 = vst [vmem:[#allocation96_spill] sm:$0xff] %v8634_v58  ;;  %v8653_v58 = vadd.f32 %v2610_v50, %v2114_v63 }
 0x2ab   : > { %2907 = vmax.xlane.f32.xlu2 %v8636_v12  ;;  %2845 = vmax.xlane.f32.xlu1 %v8638_v13  ;;  %12178 = vst [vmem:[#allocation104_spill] sm:$0xff] %v8653_v58  ;;  %v8681_v12 = vadd.f32 %v2500_v1, %v2115_v32  ;;  %v3773_v1 = vld [vmem:[%s8662_s16 + $0xe0] sm:$0xff] }
 0x2ac   : > { %2843 = vmax.xlane.f32.xlu0 %v8640_v59 }
 0x2ad   : > { %12184 = vst [vmem:[#allocation110_spill] sm:$0xff] %v8681_v12 }
 0x2ae   : > { %v8645_v53 = vpop.xlane.xlu2 %2675  ;;  %v8647_v4 = vpop.xlane.xlu1 %2816 }
 0x2af   : > { %12174 = vst [vmem:[#allocation100_spill] sm:$0xff] %v8645_v53  ;;  %v8649_v45 = vpop.xlane.xlu0 %2723  ;;  %v3776_v53 = vld [vmem:[%s8662_s16 + $0xf8] sm:$0xff]  ;;  %v2613_v59 = vpop.f32.mrf.mxu3 }
 0x2b0   : > { %12175 = vst [vmem:[#allocation101_spill] sm:$0xff] %v8647_v4  ;;  %3874 = vmatpush.msra.mxu1 %v3776_v53  ;;  %v3759_v4 = vld [vmem:[%s8662_s16 + $0x70] sm:$0xff]  ;;  %v3758_v53 = vld [vmem:[%s8662_s16 + $0x68] sm:$0xff]  ;;  %v8713_v37 = vadd.f32 %v2613_v59, %v2115_v32 }
 0x2b1   : > { %12176 = vst [vmem:[#allocation102_spill] sm:$0xff] %v8649_v45  ;;  %3810 = vmatpush.msra.mxu0 %v3759_v4  ;;  %v3790_v4 = vld [vmem:[%s8662_s16 + $0x168] sm:$0xff] }
 0x2b2   : > { %12189 = vst [vmem:[#allocation115_spill] sm:$0xff] %v8713_v37  ;;  %v3770_v59 = vld [vmem:[%s8662_s16 + $0xc8] sm:$0xff] }
 0x2b3   : > { %2877 = vmax.xlane.f32.xlu2 %v8651_v48  ;;  %2941 = vmax.xlane.f32.xlu1 %v8653_v58  ;;  %v3775_v58 = vld [vmem:[%s8662_s16 + $0xf0] sm:$0xff]  ;;  %v3792_v48 = vld [vmem:[%s8662_s16 + $0x178] sm:$0xff] }
 0x2b4   : > { %2939 = vmax.xlane.f32.xlu0 %v8655_v60  ;;  %v8679_v60 = vadd.f32 %v2274_v42, %v2115_v32  ;;  %3875 = vmatpush.msra.mxu1 %v3775_v58  ;;  %v8689_v42 = vpop.f32.mrf.mxu0  ;;  %v3756_v58 = vld [vmem:[%s8662_s16 + $0x58] sm:$0xff] }
 0x2b5   : > { %3939 = vmatpush.msra.mxu2 %v3792_v48  ;;  %3811 = vmatpush.msra.mxu0 %v3758_v53  ;;  %v2390_v48 = vpop.f32.mrf.mxu1 }
 0x2b6   : > { %v8670_v50 = vpop.xlane.xlu2 %2819  ;;  %v8672_v45 = vpop.xlane.xlu1 %2771  ;;  %12183 = vst [vmem:[#allocation109_spill] sm:$0xff] %v8679_v60  ;;  %3876 = vmatpush.msra.mxu1 %v3774_v22 }
 0x2b7   : > { %12180 = vst [vmem:[#allocation106_spill] sm:$0xff] %v8670_v50  ;;  %v8677_v13 = vpop.xlane.xlu0 %2678  ;;  %v3791_v50 = vld [vmem:[%s8662_s16 + $0x170] sm:$0xff] }
 0x2b8   : > { %12181 = vst [vmem:[#allocation107_spill] sm:$0xff] %v8672_v45  ;;  %v3757_v45 = vld [vmem:[%s8662_s16 + $0x60] sm:$0xff]  ;;  %3940 = vmatpush.msra.mxu2 %v3791_v50  ;;  %3877 = vmatpush.msra.mxu1 %v3773_v1  ;;  %v3808_v1 = vld [vmem:[%s8662_s16 + $0x1f8] sm:$0xff] }
 0x2b9   : > { %12182 = vst [vmem:[#allocation108_spill] sm:$0xff] %v8677_v13  ;;  %v8687_v13 = vadd.f32 %v2497_v44, %v2114_v63  ;;  %v8700_v44 = vld [vmem:[%s11870_s5 + $0x40] sm:$0xff]  ;;  %3812 = vmatpush.msra.mxu0 %v3757_v45  ;;  %v3772_v63 = vld [vmem:[%s8662_s16 + $0xd8] sm:$0xff]  ;;  %4004 = vmatpush.msra.mxu3 %v3808_v1 }
 0x2ba   : > { %v3789_v50 = vld [vmem:[%s8662_s16 + $0x160] sm:$0xff]  ;;  %3941 = vmatpush.msra.mxu2 %v3790_v4  ;;  %v8716_v45 = vadd.f32 %v2390_v48, %v8700_v44  ;;  %3878 = vmatpush.msra.mxu1 %v3772_v63  ;;  %v3754_v4 = vld [vmem:[%s8662_s16 + $0x48] sm:$0xff]  ;;  %v8725_v48 = vpop.f32.mrf.mxu3  ;;  %v3787_v63 = vld [vmem:[%s8662_s16 + $0x150] sm:$0xff] }
 0x2bb   : > { %12185 = vst [vmem:[#allocation111_spill] sm:$0xff] %v8687_v13  ;;  %2847 = vmax.xlane.f32.xlu2 %v8679_v60  ;;  %2911 = vmax.xlane.f32.xlu1 %v8681_v12  ;;  %v3755_v12 = vld [vmem:[%s8662_s16 + $0x50] sm:$0xff]  ;;  %v3788_v60 = vld [vmem:[%s8662_s16 + $0x158] sm:$0xff] }
 0x2bc   : > { %2909 = vmax.xlane.f32.xlu0 %v8687_v13  ;;  %3813 = vmatpush.msra.mxu0 %v3756_v58  ;;  %v3771_v13 = vld [vmem:[%s8662_s16 + $0xd0] sm:$0xff]  ;;  %12190 = vst [vmem:[#allocation116_spill] sm:$0xff] %v8716_v45  ;;  %v3752_v1 = vld [vmem:[%s8662_s16 + $0x38] sm:$0xff] }
 0x2bd   : > { %3942 = vmatpush.msra.mxu2 %v3789_v50  ;;  %v3807_v58 = vld [vmem:[%s8662_s16 + $0x1f0] sm:$0xff]  ;;  %3879 = vmatpush.msra.mxu1 %v3771_v13  ;;  %v3753_v50 = vld [vmem:[%s8662_s16 + $0x40] sm:$0xff]  ;;  %v2280_v13 = vpop.f32.mrf.mxu0 }
 0x2be   : > { %v8704_v53 = vpop.xlane.xlu2 %2774  ;;  %v8706_v22 = vpop.xlane.xlu1 %2726  ;;  %3814 = vmatpush.msra.mxu0 %v3755_v12  ;;  %4005 = vmatpush.msra.mxu3 %v3807_v58  ;;  %v3769_v12 = vld [vmem:[%s8662_s16 + $0xc0] sm:$0xff] }
 0x2bf   : > { %12186 = vst [vmem:[#allocation112_spill] sm:$0xff] %v8704_v53  ;;  %v8711_v35 = vpop.xlane.xlu0 %2822  ;;  %v2503_v53 = vpop.f32.mrf.mxu2  ;;  %3943 = vmatpush.msra.mxu2 %v3788_v60  ;;  %v3806_v60 = vld [vmem:[%s8662_s16 + $0x1e8] sm:$0xff]  ;;  %3880 = vmatpush.msra.mxu1 %v3770_v59  ;;  %v3805_v58 = vld [vmem:[%s8662_s16 + $0x1e0] sm:$0xff] }
 0x2c0   : > { %12187 = vst [vmem:[#allocation113_spill] sm:$0xff] %v8706_v22  ;;  %3815 = vmatpush.msra.mxu0 %v3754_v4  ;;  %v3768_v4 = vld [vmem:[%s8662_s16 + $0xb8] sm:$0xff]  ;;  %4006 = vmatpush.msra.mxu3 %v3806_v60  ;;  %v8751_v59 = vadd.f32 %v2503_v53, %v8700_v44  ;;  %v3767_v60 = vld [vmem:[%s8662_s16 + $0xb0] sm:$0xff]  ;;  %v8761_v53 = vadd.f32 %v8689_v42, %v8700_v44 }
 0x2c1   : > { %12188 = vst [vmem:[#allocation114_spill] sm:$0xff] %v8711_v35  ;;  %v8723_v35 = vadd.f32 %v8657_v56, %v2115_v32  ;;  %v8737_v56 = vld [vmem:[%s11870_s5 + $0x48] sm:$0xff]  ;;  %3944 = vmatpush.msra.mxu2 %v3787_v63  ;;  %3881 = vmatpush.msra.mxu1 %v3769_v12  ;;  %v3751_v12 = vld [vmem:[%s8662_s16 + $0x30] sm:$0xff] }
 0x2c2   : > { %v3786_v32 = vld [vmem:[%s8662_s16 + $0x148] sm:$0xff]  ;;  %3816 = vmatpush.msra.mxu0 %v3753_v50  ;;  %12195 = vst [vmem:[#allocation121_spill] sm:$0xff] %v8751_v59  ;;  %v8754_v63 = vadd.f32 %v2280_v13, %v8737_v56  ;;  %v2393_v50 = vpop.f32.mrf.mxu1  ;;  %4007 = vmatpush.msra.mxu3 %v3805_v58  ;;  %v2619_v42 = vpop.f32.mrf.mxu3  ;;  %v3803_v58 = vld [vmem:[%s8662_s16 + $0x1d0] sm:$0xff] }
 0x2c3   : > { %12191 = vst [vmem:[#allocation117_spill] sm:$0xff] %v8723_v35  ;;  %2943 = vmax.xlane.f32.xlu2 %v8713_v37  ;;  %2881 = vmax.xlane.f32.xlu1 %v8716_v45  ;;  %v3785_v37 = vld [vmem:[%s8662_s16 + $0x140] sm:$0xff] }
 0x2c4   : > { %2879 = vmax.xlane.f32.xlu0 %v8723_v35  ;;  %12196 = vst [vmem:[#allocation122_spill] sm:$0xff] %v8754_v63  ;;  %3945 = vmatpush.msra.mxu2 %v3786_v32  ;;  %v3804_v32 = vld [vmem:[%s8662_s16 + $0x1d8] sm:$0xff] }
 0x2c5   : > { %3817 = vmatpush.msra.mxu0 %v3752_v1  ;;  %3882 = vmatpush.msra.mxu1 %v3768_v4  ;;  %12197 = vst [vmem:[#allocation123_spill] sm:$0xff] %v8761_v53  ;;  %v3766_v1 = vld [vmem:[%s8662_s16 + $0xa8] sm:$0xff]  ;;  %v3783_v4 = vld [vmem:[%s8662_s16 + $0x130] sm:$0xff] }
 0x2c6   : > { %v8743_v22 = vpop.xlane.xlu2 %2729  ;;  %v8745_v45 = vpop.xlane.xlu1 %2681  ;;  %3946 = vmatpush.msra.mxu2 %v3785_v37  ;;  %v3750_v37 = vld [vmem:[%s8662_s16 + $0x28] sm:$0xff]  ;;  %4008 = vmatpush.msra.mxu3 %v3804_v32  ;;  %v8787_v32 = vadd.f32 %v2619_v42, %v8737_v56 }
 0x2c7   : > { %12192 = vst [vmem:[#allocation118_spill] sm:$0xff] %v8743_v22  ;;  %v8748_v35 = vpop.xlane.xlu0 %2777  ;;  %v3784_v22 = vld [vmem:[%s8662_s16 + $0x138] sm:$0xff]  ;;  %v8763_v13 = vpop.f32.mrf.mxu2  ;;  %3818 = vmatpush.msra.mxu0 %v3751_v12  ;;  %3883 = vmatpush.msra.mxu1 %v3767_v60  ;;  %v3749_v12 = vld [vmem:[%s8662_s16 + $0x20] sm:$0xff] }
 0x2c8   : > { %12193 = vst [vmem:[#allocation119_spill] sm:$0xff] %v8745_v45  ;;  %3947 = vmatpush.msra.mxu2 %v3784_v22  ;;  %v3765_v60 = vld [vmem:[%s8662_s16 + $0xa0] sm:$0xff]  ;;  %v8784_v22 = vadd.f32 %v2393_v50, %v8737_v56  ;;  %4009 = vmatpush.msra.mxu3 %v3803_v58  ;;  %v3747_v58 = vld [vmem:[%s8662_s16 + $0x10] sm:$0xff] }
 0x2c9   : > { %12194 = vst [vmem:[#allocation120_spill] sm:$0xff] %v8748_v35  ;;  %3819 = vmatpush.msra.mxu0 %v3750_v37  ;;  %v3782_v35 = vld [vmem:[%s8662_s16 + $0x128] sm:$0xff]  ;;  %3884 = vmatpush.msra.mxu1 %v3766_v1  ;;  %v3748_v37 = vld [vmem:[%s8662_s16 + $0x18] sm:$0xff]  ;;  %v2283_v1 = vpop.f32.mrf.mxu0  ;;  %v3801_v50 = vld [vmem:[%s8662_s16 + $0x1c0] sm:$0xff] }
 0x2ca   : > { %3948 = vmatpush.msra.mxu2 %v3783_v4  ;;  %12201 = vst [vmem:[#allocation127_spill] sm:$0xff] %v8784_v22  ;;  %v8795_v4 = vadd.f32 %v8725_v48, %v8700_v44  ;;  %v2396_v42 = vpop.f32.mrf.mxu1  ;;  %v2118_v44 = vld [vmem:[%s11870_s5 + $0x50] sm:$0xff]  ;;  %v3762_v48 = vld [vmem:[%s8662_s16 + $0x88] sm:$0xff]  ;;  %v2622_v2 = vpop.f32.mrf.mxu3 }
 0x2cb   : > { %2913 = vmax.xlane.f32.xlu2 %v8751_v59  ;;  %2851 = vmax.xlane.f32.xlu1 %v8754_v63  ;;  %v3802_v59 = vld [vmem:[%s8662_s16 + $0x1c8] sm:$0xff]  ;;  %12202 = vst [vmem:[#allocation128_spill] sm:$0xff] %v8787_v32 }
 0x2cc   : > { %2849 = vmax.xlane.f32.xlu0 %v8761_v53  ;;  %3820 = vmatpush.msra.mxu0 %v3749_v12  ;;  %12203 = vst [vmem:[#allocation129_spill] sm:$0xff] %v8795_v4  ;;  %v3763_v12 = vld [vmem:[%s8662_s16 + $0x90] sm:$0xff] }
 0x2cd   : > { %3885 = vmatpush.msra.mxu1 %v3765_v60  ;;  %3949 = vmatpush.msra.mxu2 %v3782_v35  ;;  %v3780_v35 = vld [vmem:[%s8662_s16 + $0x118] sm:$0xff] }
 0x2ce   : > { %v8776_v45 = vpop.xlane.xlu2 %2684  ;;  %v8778_v63 = vpop.xlane.xlu1 %2825  ;;  %4010 = vmatpush.msra.mxu3 %v3802_v59  ;;  %3821 = vmatpush.msra.mxu0 %v3748_v37  ;;  %v3800_v59 = vld [vmem:[%s8662_s16 + $0x1b8] sm:$0xff]  ;;  %v3799_v37 = vld [vmem:[%s8662_s16 + $0x1b0] sm:$0xff] }
 0x2cf   : > { %12198 = vst [vmem:[#allocation124_spill] sm:$0xff] %v8776_v45  ;;  %v8781_v53 = vpop.xlane.xlu0 %2732  ;;  %v3764_v45 = vld [vmem:[%s8662_s16 + $0x98] sm:$0xff]  ;;  %v2509_v60 = vpop.f32.mrf.mxu2 }
 0x2d0   : > { %12199 = vst [vmem:[#allocation125_spill] sm:$0xff] %v8778_v63  ;;  %v3781_v63 = vld [vmem:[%s8662_s16 + $0x120] sm:$0xff]  ;;  %3886 = vmatpush.msra.mxu1 %v3764_v45  ;;  %4011 = vmatpush.msra.mxu3 %v3801_v50  ;;  %v3746_v45 = vld [vmem:[%s8662_s16 + $0x8] sm:$0xff]  ;;  %v8819_v50 = vadd.f32 %v2283_v1, %v2118_v44  ;;  %v8821_v16 = vadd.f32 %v2509_v60, %v2118_v44 }
 0x2d1   : > { %12200 = vst [vmem:[#allocation126_spill] sm:$0xff] %v8781_v53  ;;  %3950 = vmatpush.msra.mxu2 %v3781_v63  ;;  %3822 = vmatpush.msra.mxu0 %v3747_v58  ;;  %v3779_v63 = vld [vmem:[%s8662_s16 + $0x110] sm:$0xff]  ;;  %v3778_v58 = vld [vmem:[%s8662_s16 + $0x108] sm:$0xff]  ;;  %v2286_v1 = vpop.f32.mrf.mxu0  ;;  %v3797_v60 = vld [vmem:[%s8662_s16 + $0x1a0] sm:$0xff] }
 0x2d2   : > { %3887 = vmatpush.msra.mxu1 %v3763_v12  ;;  %4012 = vmatpush.msra.mxu3 %v3800_v59  ;;  %v3798_v12 = vld [vmem:[%s8662_s16 + $0x1a8] sm:$0xff]  ;;  %v8828_v59 = vadd.f32 %v8763_v13, %v8737_v56 }
 0x2d3   : > { %2883 = vmax.xlane.f32.xlu2 %v8784_v22  ;;  %2947 = vmax.xlane.f32.xlu1 %v8787_v32  ;;  %v3761_v22 = vld [vmem:[%s8662_s16 + $0x80] sm:$0xff] }
 0x2d4   : > { %2945 = vmax.xlane.f32.xlu0 %v8795_v4  ;;  %3951 = vmatpush.msra.mxu2 %v3780_v35  ;;  %v3745_v4 = vld [vmem:[%s8662_s16] sm:$0xff] }
 0x2d5   : > { %3823 = vmatpush.msra.mxu0 %v3746_v45  ;;  %3888 = vmatpush.msra.mxu1 %v3762_v48  ;;  %v3777_v35 = vld [vmem:[%s8662_s16 + $0x100] sm:$0xff]  ;;  %v2399_v45 = vpop.f32.mrf.mxu1  ;;  %v3795_v48 = vld [vmem:[%s8662_s16 + $0x190] sm:$0xff] }
 0x2d6   : > { %v8811_v53 = vpop.xlane.xlu2 %2828  ;;  %v8813_v32 = vpop.xlane.xlu1 %2780  ;;  %3952 = vmatpush.msra.mxu2 %v3779_v63  ;;  %4013 = vmatpush.msra.mxu3 %v3799_v37  ;;  %v8845_v37 = vadd.f32 %v2622_v2, %v2118_v44  ;;  %v8859_v2 = vld [vmem:[%s11870_s5 + $0x60] sm:$0xff] }
 0x2d7   : > { %12204 = vst [vmem:[#allocation130_spill] sm:$0xff] %v8811_v53  ;;  %v8817_v62 = vpop.xlane.xlu0 %2687  ;;  %3824 = vmatpush.msra.mxu0 %v3745_v4  ;;  %3889 = vmatpush.msra.mxu1 %v3761_v22  ;;  %v2119_v22 = vld [vmem:[%s11870_s5 + $0x58] sm:$0xff]  ;;  %v3794_v53 = vld [vmem:[%s8662_s16 + $0x188] sm:$0xff] }
 0x2d8   : > { %12205 = vst [vmem:[#allocation131_spill] sm:$0xff] %v8813_v32  ;;  %3953 = vmatpush.msra.mxu2 %v3778_v58  ;;  %4014 = vmatpush.msra.mxu3 %v3798_v12  ;;  %v3796_v4 = vld [vmem:[%s8662_s16 + $0x198] sm:$0xff]  ;;  %v8847_v58 = vadd.f32 %v2399_v45, %v2119_v22  ;;  %v2512_v12 = vpop.f32.mrf.mxu2 }
 0x2d9   : > { %12206 = vst [vmem:[#allocation132_spill] sm:$0xff] %v8817_v62  ;;  %v8850_v62 = vadd.f32 %v2396_v42, %v2118_v44 }
 0x2da   : > { %3954 = vmatpush.msra.mxu2 %v3777_v35  ;;  %4015 = vmatpush.msra.mxu3 %v3797_v60  ;;  %12210 = vst [vmem:[#allocation136_spill] sm:$0xff] %v8847_v58  ;;  %v2625_v35 = vpop.f32.mrf.mxu3  ;;  %v3793_v60 = vld [vmem:[%s8662_s16 + $0x180] sm:$0xff] }
 0x2db   : > { %2853 = vmax.xlane.f32.xlu2 %v8819_v50  ;;  %2917 = vmax.xlane.f32.xlu1 %v8821_v16 }
 0x2dc   : > { %2915 = vmax.xlane.f32.xlu0 %v8828_v59  ;;  %4016 = vmatpush.msra.mxu3 %v3796_v4 }
 0x2de   : > { %v8838_v56 = vpop.xlane.xlu2 %2783  ;;  %v8840_v13 = vpop.xlane.xlu1 %2735  ;;  %4017 = vmatpush.msra.mxu3 %v3795_v48 }
 0x2df   : > { %12207 = vst [vmem:[#allocation133_spill] sm:$0xff] %v8838_v56  ;;  %v8843_v63 = vpop.xlane.xlu0 %2831  ;;  %v2289_v56 = vpop.f32.mrf.mxu0 }
 0x2e0   : > { %12208 = vst [vmem:[#allocation134_spill] sm:$0xff] %v8840_v13  ;;  %4018 = vmatpush.msra.mxu3 %v3794_v53  ;;  %v8870_v13 = vadd.f32 %v2289_v56, %v8859_v2 }
 0x2e1   : > { %12209 = vst [vmem:[#allocation135_spill] sm:$0xff] %v8843_v63  ;;  %v8867_v63 = vadd.f32 %v2512_v12, %v2119_v22  ;;  %v2515_v12 = vpop.f32.mrf.mxu2 }
 0x2e2   : > { %4019 = vmatpush.msra.mxu3 %v3793_v60  ;;  %12211 = vst [vmem:[#allocation137_spill] sm:$0xff] %v8870_v13  ;;  %v8881_v60 = vadd.f32 %v2286_v1, %v2119_v22  ;;  %v2628_v56 = vpop.f32.mrf.mxu3 }
 0x2e3   : > { %2949 = vmax.xlane.f32.xlu2 %v8845_v37  ;;  %2887 = vmax.xlane.f32.xlu1 %v8847_v58  ;;  %v2402_v58 = vpop.f32.mrf.mxu1 }
 0x2e4   : > { %2885 = vmax.xlane.f32.xlu0 %v8850_v62 }
 0x2e6   : > { %v2866_v45 = vpop.xlane.xlu2 %2865  ;;  %v2834_v4 = vpop.xlane.xlu1 %2833 }
 0x2e7   : > { %v8862_v42 = vmax.f32 %v8368_v46, %v2866_v45  ;;  %v8865_v44 = vmax.f32 %v8353_v19, %v2834_v4  ;;  %v2898_v48 = vpop.xlane.xlu0 %2897 }
 0x2e8   : > { %v8873_v32 = vmax.f32 %v8374_v34, %v2898_v48 }
 0x2e9   : > { %v3441_v53 = vsub.f32 %v8513_v28, %v8862_v42  ;;  %v3425_v46 = vsub.f32 %v8515_v5, %v8865_v44 }
 0x2ea   : > { %v3457_v19 = vsub.f32 %v8517_v24, %v8873_v32 }
 0x2eb   : > { %v3521_v45 = vmul.f32 1.442695, %v3441_v53  ;;  %2919 = vmax.xlane.f32.xlu2 %v8867_v63  ;;  %2857 = vmax.xlane.f32.xlu1 %v8870_v13  ;;  %v3489_v34 = vmul.f32 1.442695, %v3425_v46  ;;  %v8893_v53 = vadd.f32 %v2402_v58, %v8859_v2  ;;  %v8896_v13 = vadd.f32 %v2628_v56, %v8859_v2 }
 0x2ec   : > { %2855 = vmax.xlane.f32.xlu0 %v8881_v60  ;;  %v3553_v28 = vmul.f32 1.442695, %v3457_v19  ;;  %v2292_v19 = vpop.f32.mrf.mxu0  ;;  %v8907_v58 = vadd.f32 %v2625_v35, %v2119_v22 }
 0x2ed   : > { %6470 = vpow2.f32 %v3521_v45  ;;  %12212 = vst [vmem:[#allocation138_spill] sm:$0xff] %v8896_v13 }
 0x2ee   : > { %v2836_v4 = vpop.xlane.xlu2 %2835  ;;  %v2900_v48 = vpop.xlane.xlu1 %2899  ;;  %6472 = vpow2.f32 %v3489_v34  ;;  %12213 = vst [vmem:[#allocation139_spill] sm:$0xff] %v8907_v58 }
 0x2ef   : > { %v8887_v5 = vmax.f32 %v8409_v8, %v2836_v4  ;;  %v8890_v24 = vmax.f32 %v8437_v17, %v2900_v48  ;;  %v2930_v1 = vpop.xlane.xlu0 %2929  ;;  %6474 = vpow2.f32 %v3553_v28  ;;  %v2405_v4 = vpop.f32.mrf.mxu1 }
 0x2f0   : > { %v8899_v46 = vmax.f32 %v8380_v31, %v2930_v1 }
 0x2f1   : > { %v3426_v45 = vsub.f32 %v8531_v38, %v8887_v5  ;;  %v3458_v17 = vsub.f32 %v8533_v11, %v8890_v24  ;;  %v2518_v38 = vpop.f32.mrf.mxu2  ;;  %v2121_v11 = vld [vmem:[%s11870_s5 + $0x68] sm:$0xff] }
 0x2f2   : > { %v3473_v8 = vsub.f32 %v8535_v3, %v8899_v46 }
 0x2f3   : > { %v3491_v56 = vmul.f32 1.442695, %v3426_v45  ;;  %2889 = vmax.xlane.f32.xlu2 %v8893_v53  ;;  %2953 = vmax.xlane.f32.xlu1 %v8896_v13  ;;  %v8911_v31 = vpop.eup %6470  ;;  %v3555_v34 = vmul.f32 1.442695, %v3458_v17  ;;  %v8924_v45 = vadd.f32 %v2292_v19, %v2121_v11  ;;  %v8926_v13 = vadd.f32 %v2518_v38, %v2121_v11 }
 0x2f4   : > { %12214 = vst [vmem:[#allocation140_spill] sm:$0xff] %v8911_v31  ;;  %2951 = vmax.xlane.f32.xlu0 %v8907_v58  ;;  %3890 = vmatmul.f32.vlgmr.msra.gmra.mxu1 %v8911_v31  ;;  %v8918_v3 = vpop.eup %6472  ;;  %v3585_v22 = vmul.f32 1.442695, %v3473_v8  ;;  %v8939_v19 = vadd.f32 %v2515_v12, %v8859_v2 }
 0x2f5   : > { %6476 = vpow2.f32 %v3491_v56  ;;  %3825 = vmatmul.f32.vlgmr.msra.gmra.mxu0 %v8918_v3  ;;  %12215 = vst [vmem:[#allocation141_spill] sm:$0xff] %v8926_v13  ;;  %v8928_v58 = vpop.eup %6474  ;;  %v2295_v56 = vpop.f32.mrf.mxu0 }
 0x2f6   : > { %v2932_v35 = vpop.xlane.xlu2 %2931  ;;  %v2870_v28 = vpop.xlane.xlu1 %2869  ;;  %12216 = vst [vmem:[#allocation142_spill] sm:$0xff] %v8928_v58  ;;  %6478 = vpow2.f32 %v3555_v34  ;;  %3955 = vmatmul.f32.vlgmr.msra.gmra.mxu2 %v8928_v58  ;;  %v8949_v34 = vld [vmem:[%s11870_s5 + $0x70] sm:$0xff] }
 0x2f7   : > { %v8922_v48 = vmax.f32 %v8407_v23, %v2932_v35  ;;  %v2868_v1 = vpop.xlane.xlu0 %2867  ;;  %6480 = vpow2.f32 %v3585_v22  ;;  %12217 = vst [vmem:[#allocation143_spill] sm:$0xff] %v8939_v19  ;;  %v2408_v38 = vpop.f32.mrf.mxu1  ;;  %v8952_v2 = vmax.f32 %v8459_v41, %v2870_v28 }
 0x2f8   : > { %v8931_v17 = vmax.f32 %v8398_v26, %v2868_v1 }
 0x2f9   : > { %v3474_v8 = vsub.f32 %v8549_v10, %v8922_v48  ;;  %v2631_v10 = vpop.f32.mrf.mxu3  ;;  %v3443_v28 = vsub.f32 %v8551_v20, %v8952_v2 }
 0x2fa   : > { %v3442_v23 = vsub.f32 %v8553_v61, %v8931_v17 }
 0x2fb   : > { %2859 = vmax.xlane.f32.xlu2 %v8924_v45  ;;  %2923 = vmax.xlane.f32.xlu1 %v8926_v13  ;;  %v8943_v26 = vpop.eup %6476  ;;  %v3587_v61 = vmul.f32 1.442695, %v3474_v8  ;;  %v8960_v13 = vadd.f32 %v2631_v10, %v2121_v11  ;;  %v2521_v10 = vpop.f32.mrf.mxu2 }
 0x2fc   : > { %2921 = vmax.xlane.f32.xlu0 %v8939_v19  ;;  %v3523_v12 = vmul.f32 1.442695, %v3442_v23  ;;  %v8954_v1 = vpop.eup %6478  ;;  %v8963_v19 = vadd.f32 %v2408_v38, %v8949_v34  ;;  %v8978_v38 = vadd.f32 %v2405_v4, %v2121_v11  ;;  %v12220_v4 = vld [vmem:[#allocation22_spill] sm:$0xff] }
 0x2fd   : > { %12218 = vst [vmem:[#allocation144_spill] sm:$0xff] %v8954_v1  ;;  %3828 = vmatmul.f32.gmra.mxu0 %v8943_v26  ;;  %v8965_v8 = vpop.eup %6480  ;;  %6482 = vpow2.f32 %v3587_v61  ;;  %v3025_v11 = vsub.f32 %v12220_v4, %v8865_v44 }
 0x2fe   : > { %v2902_v22 = vpop.xlane.xlu2 %2901  ;;  %v2840_v35 = vpop.xlane.xlu1 %2839  ;;  %12219 = vst [vmem:[#allocation145_spill] sm:$0xff] %v8965_v8  ;;  %3958 = vmatmul.f32.gmra.mxu2 %v8954_v1  ;;  %4020 = vmatmul.f32.vlgmr.msra.gmra.mxu3 %v8965_v8  ;;  %6484 = vpow2.f32 %v3523_v12  ;;  %v8999_v8 = vadd.f32 %v2521_v10, %v8949_v34 }
 0x2ff   : > { %v8958_v58 = vmax.f32 %v8454_v6, %v2902_v22  ;;  %v2838_v31 = vpop.xlane.xlu0 %2837  ;;  %v8983_v20 = vmax.f32 %v8476_v14, %v2840_v35  ;;  %v3089_v10 = vmul.f32 1.442695, %v3025_v11  ;;  %v12226_v11 = vld [vmem:[#allocation23_spill] sm:$0xff] }
 0x300   : > { %v8968_v41 = vmax.f32 %v8435_v15, %v2838_v31  ;;  %v8989_v31 = vld [vmem:[%s11870_s5 + $0x78] sm:$0xff]  ;;  %12222 = vst [vmem:[#allocation146_spill] sm:$0xff] %v8999_v8 }
 0x301   : > { %v3459_v23 = vsub.f32 %v8567_v9, %v8958_v58  ;;  %v2298_v9 = vpop.f32.mrf.mxu0  ;;  %v3428_v44 = vsub.f32 %v8569_v52, %v8983_v20  ;;  %v2634_v52 = vpop.f32.mrf.mxu3 }
 0x302   : > { %v3427_v6 = vsub.f32 %v8571_v0, %v8968_v41  ;;  %v3525_v0 = vmul.f32 1.442695, %v3443_v28  ;;  %v9002_v1 = vadd.f32 %v2298_v9, %v8989_v31  ;;  %v9018_v9 = vadd.f32 %v2295_v56, %v8949_v34 }
 0x303   : > { %v3557_v15 = vmul.f32 1.442695, %v3459_v23  ;;  %2955 = vmax.xlane.f32.xlu2 %v8960_v13  ;;  %2893 = vmax.xlane.f32.xlu1 %v8963_v19  ;;  %v8993_v23 = vpop.eup %6482  ;;  %v2524_v4 = vpop.f32.mrf.mxu2 }
 0x304   : > { %2891 = vmax.xlane.f32.xlu0 %v8978_v38  ;;  %v3493_v61 = vmul.f32 1.442695, %v3427_v6  ;;  %12221 = vst [vmem:[#allocation22_spill] sm:$0xff] %v8993_v23  ;;  %v9004_v28 = vpop.eup %6484 }
 0x305   : > { %6486 = vpow2.f32 %v3557_v15  ;;  %12223 = vst [vmem:[#allocation147_spill] sm:$0xff] %v9002_v1  ;;  %3893 = vmatmul.f32.gmra.mxu1 %v9004_v28 }
 0x306   : > { %v2872_v12 = vpop.xlane.xlu2 %2871  ;;  %v2936_v22 = vpop.xlane.xlu1 %2935  ;;  %12224 = vst [vmem:[#allocation148_spill] sm:$0xff] %v9004_v28  ;;  %6488 = vpow2.f32 %v3525_v0  ;;  %4023 = vmatmul.f32.gmra.mxu3 %v8993_v23 }
 0x307   : > { %v8996_v14 = vmax.f32 %v8494_v25, %v2872_v12  ;;  %v2934_v35 = vpop.xlane.xlu0 %2933  ;;  %6490 = vpow2.f32 %v3493_v61  ;;  %v2411_v0 = vpop.f32.mrf.mxu1  ;;  %v3041_v61 = vsub.f32 %v12226_v11, %v8862_v42 }
 0x308   : > { %v9009_v6 = vmax.f32 %v8433_v57, %v2934_v35  ;;  %6492 = vpow2.f32 %v3089_v10  ;;  %v9039_v42 = vadd.f32 %v2411_v0, %v8989_v31 }
 0x309   : > { %v3444_v25 = vsub.f32 %v8582_v39, %v8996_v14  ;;  %v3495_v39 = vmul.f32 1.442695, %v3428_v44  ;;  %v9033_v44 = vmax.f32 %v8478_v18, %v2936_v22  ;;  %v9052_v18 = vadd.f32 %v2634_v52, %v8949_v34 }
 0x30a   : > { %v3475_v15 = vsub.f32 %v8586_v54, %v9009_v6  ;;  %v3057_v54 = vsub.f32 %v8021_v33, %v8873_v32  ;;  %v12228_v33 = vld [vmem:[#allocation27_spill] sm:$0xff] }
 0x30b   : > { %2925 = vmax.xlane.f32.xlu2 %v8999_v8  ;;  %2863 = vmax.xlane.f32.xlu1 %v9002_v1  ;;  %v9022_v57 = vpop.eup %6486  ;;  %v3527_v12 = vmul.f32 1.442695, %v3444_v25  ;;  %v9042_v25 = vadd.f32 %v2524_v4, %v8989_v31  ;;  %v3073_v32 = vsub.f32 %v12228_v33, %v8899_v46  ;;  %6494 = vpow2.f32 %v3495_v39 }
 0x30c   : > { %12225 = vst [vmem:[#allocation149_spill] sm:$0xff] %v9022_v57  ;;  %2861 = vmax.xlane.f32.xlu0 %v9018_v9  ;;  %3961 = vmatmul.f32.gmra.mxu2 %v9022_v57  ;;  %v3589_v56 = vmul.f32 1.442695, %v3475_v15  ;;  %v9030_v28 = vpop.eup %6488  ;;  %v3153_v0 = vmul.f32 1.442695, %v3057_v54 }
 0x30d   : > { %12227 = vst [vmem:[#allocation23_spill] sm:$0xff] %v9030_v28  ;;  %v9044_v10 = vpop.eup %6490  ;;  %6496 = vpow2.f32 %v3527_v12  ;;  %3896 = vmatmul.f32.gmra.mxu1 %v9030_v28  ;;  %v3026_v12 = vsub.f32 %v8042_v36, %v8887_v5 }
 0x30e   : > { %v2842_v35 = vpop.xlane.xlu2 %2841  ;;  %v2906_v23 = vpop.xlane.xlu1 %2905  ;;  %3831 = vmatmul.f32.gmra.mxu0 %v9044_v10  ;;  %6498 = vpow2.f32 %v3589_v56 }
 0x30f   : > { %v9036_v1 = vmax.f32 %v8474_v47, %v2842_v35  ;;  %v2904_v8 = vpop.xlane.xlu0 %2903  ;;  %v3121_v47 = vmul.f32 1.442695, %v3041_v61  ;;  %v9064_v34 = vpop.eup %6492  ;;  %v9068_v39 = vmax.f32 %v8496_v27, %v2906_v23  ;;  %v3058_v23 = vsub.f32 %v8070_v51, %v8890_v24  ;;  %v12231_v24 = vld [vmem:[#allocation92_spill] sm:$0xff] }
 0x310   : > { %v9049_v15 = vmax.f32 %v8452_v55, %v2904_v8  ;;  %v3476_v55 = vsub.f32 %v8584_v29, %v9033_v44  ;;  %v3185_v8 = vmul.f32 1.442695, %v3073_v32  ;;  %v3217_v51 = vsel %vm2640_vm1, %v9064_v34, 0.0 }
 0x311   : > { %v3429_v22 = vsub.f32 %v8600_v21, %v9036_v1  ;;  %v2637_v21 = vpop.f32.mrf.mxu3  ;;  %6500 = vpow2.f32 %v3121_v47  ;;  %v9070_v4 = vpop.eup %6494  ;;  %v3461_v36 = vsub.f32 %v8602_v43, %v9068_v39  ;;  %v3155_v47 = vmul.f32 1.442695, %v3058_v23 }
 0x312   : > { %v3460_v46 = vsub.f32 %v8604_v49, %v9049_v15  ;;  %6502 = vpow2.f32 %v3153_v0  ;;  %v3591_v54 = vmul.f32 1.442695, %v3476_v55  ;;  %v9080_v33 = vadd.f32 %v2637_v21, %v8989_v31 }
 0x313   : > { %2895 = vmax.xlane.f32.xlu2 %v9039_v42  ;;  %2927 = vmax.xlane.f32.xlu1 %v9042_v25  ;;  %v3497_v52 = vmul.f32 1.442695, %v3429_v22  ;;  %v9072_v61 = vpop.eup %6496  ;;  %6504 = vpow2.f32 %v3185_v8  ;;  %v3561_v22 = vmul.f32 1.442695, %v3461_v36 }
 0x314   : > { %2957 = vmax.xlane.f32.xlu0 %v9052_v18  ;;  %v3559_v49 = vmul.f32 1.442695, %v3460_v46  ;;  %12229 = vst [vmem:[#allocation27_spill] sm:$0xff] %v9072_v61  ;;  %v9082_v27 = vpop.eup %6498 }
 0x315   : > { %12230 = vst [vmem:[#allocation150_spill] sm:$0xff] %v9082_v27  ;;  %6506 = vpow2.f32 %v3497_v52  ;;  %3899 = vmatmul.f32.gmra.mxu1 %v9072_v61  ;;  %4026 = vmatmul.f32.gmra.mxu3 %v9082_v27 }
 0x316   : > { %v2938_v29 = vpop.xlane.xlu2 %2937  ;;  %v2876_v11 = vpop.xlane.xlu1 %2875  ;;  %3834 = vmatmul.f32.gmra.mxu0 %v9070_v4  ;;  %6508 = vpow2.f32 %v3559_v49  ;;  %v12234_v49 = vld [vmem:[#allocation29_spill] sm:$0xff] }
 0x317   : > { %v9077_v56 = vmax.f32 %v8509_v30, %v2938_v29  ;;  %v2874_v35 = vpop.xlane.xlu0 %2873  ;;  %v9098_v5 = vpop.eup %6500  ;;  %6510 = vpow2.f32 %v3591_v54  ;;  %v3074_v29 = vsub.f32 %v12234_v49, %v8922_v48  ;;  %v12235_v54 = vld [vmem:[#allocation75_spill] sm:$0xff] }
 0x318   : > { %v9087_v32 = vmax.f32 %v8492_v7, %v2874_v35  ;;  %v3091_v7 = vmul.f32 1.442695, %v3026_v12  ;;  %v9103_v31 = vpop.eup %6502 }
 0x319   : > { %v3477_v43 = vsub.f32 %v12231_v24, %v9077_v56  ;;  %v9109_v46 = vpop.eup %6504 }
 0x31a   : > { %v3445_v30 = vsub.f32 %v8622_v40, %v9087_v32  ;;  %v12232_v40 = vld [vmem:[#allocation73_spill] sm:$0xff]  ;;  %12233 = vst [vmem:[#allocation92_spill] sm:$0xff] %v9109_v46  ;;  %6512 = vpow2.f32 %v3091_v7 }
 0x31b   : > { %2959 = vmax.xlane.f32.xlu1 %v9080_v33  ;;  %3218 = vadd.xlane.f32.xlu2 %v3217_v51  ;;  %v9107_v0 = vmax.f32 %v12232_v40, %v2876_v11  ;;  %v9111_v52 = vpop.eup %6506  ;;  %v3593_v12 = vmul.f32 1.442695, %v3477_v43  ;;  %6514 = vpow2.f32 %v3155_v47  ;;  %v12237_v11 = vld [vmem:[#allocation28_spill] sm:$0xff]  ;;  %v12240_v7 = vld [vmem:[#allocation93_spill] sm:$0xff]  ;;  %v12241_v43 = vld [vmem:[#allocation99_spill] sm:$0xff]  ;;  %v3361_v40 = vsel %vm2640_vm1, %v9109_v46, 0.0 }
 0x31c   : > { %3617 = vadd.xlane.f32.xlu0 %v8918_v3  ;;  %v3529_v55 = vmul.f32 1.442695, %v3445_v30  ;;  %v9118_v23 = vpop.eup %6508  ;;  %v3042_v36 = vsub.f32 %v12237_v11, %v8931_v17  ;;  %v12238_v30 = vld [vmem:[#allocation72_spill] sm:$0xff]  ;;  %6516 = vpow2.f32 %v3561_v22  ;;  %v3313_v17 = vsel %vm2640_vm1, %v9103_v31, 0.0 }
 0x31d   : > { %12236 = vst [vmem:[#allocation73_spill] sm:$0xff] %v9118_v23  ;;  %v9125_v24 = vpop.eup %6510  ;;  %v3446_v48 = vsub.f32 %v12240_v7, %v9107_v0  ;;  %3964 = vmatmul.f32.gmra.mxu2 %v9118_v23  ;;  %v3187_v22 = vmul.f32 1.442695, %v3074_v29  ;;  %v12245_v7 = vld [vmem:[#allocation32_spill] sm:$0xff] }
 0x31e   : > { %v2908_v8 = vpop.xlane.xlu2 %2907  ;;  %v2846_v21 = vpop.xlane.xlu1 %2845  ;;  %12239 = vst [vmem:[#allocation29_spill] sm:$0xff] %v9125_v24  ;;  %3837 = vmatmul.f32.gmra.mxu0 %v9111_v52  ;;  %6518 = vpow2.f32 %v3529_v55  ;;  %4029 = vmatmul.f32.gmra.mxu3 %v9125_v24  ;;  %v3265_v55 = vsel %vm2640_vm1, %v9098_v5, 0.0 }
 0x31f   : > { %v9116_v35 = vmax.f32 %v12235_v54, %v2908_v8  ;;  %v2844_v3 = vpop.xlane.xlu0 %2843  ;;  %6520 = vpow2.f32 %v3593_v12  ;;  %v12242_v8 = vld [vmem:[#allocation97_spill] sm:$0xff]  ;;  %v3123_v54 = vmul.f32 1.442695, %v3042_v36  ;;  %v3531_v29 = vmul.f32 1.442695, %v3446_v48 }
 0x320   : > { %v9123_v51 = vmax.f32 %v12238_v30, %v2844_v3  ;;  %v12243_v3 = vld [vmem:[#allocation76_spill] sm:$0xff]  ;;  %v9145_v30 = vpop.eup %6512  ;;  %6522 = vpow2.f32 %v3187_v22 }
 0x321   : > { %v3462_v49 = vsub.f32 %v12242_v8, %v9116_v35  ;;  %v9143_v11 = vmax.f32 %v12243_v3, %v2846_v21  ;;  %12244 = vst [vmem:[#allocation75_spill] sm:$0xff] %v9145_v30  ;;  %v9149_v12 = vpop.eup %6514  ;;  %v12247_v8 = vld [vmem:[#allocation33_spill] sm:$0xff]  ;;  %v12249_v21 = vld [vmem:[#allocation30_spill] sm:$0xff]  ;;  %6524 = vpow2.f32 %v3123_v54 }
 0x322   : > { %v3430_v47 = vsub.f32 %v12241_v43, %v9123_v51  ;;  %v3043_v43 = vsub.f32 %v12245_v7, %v8952_v2  ;;  %12246 = vst [vmem:[#allocation28_spill] sm:$0xff] %v9149_v12  ;;  %v9153_v57 = vpop.eup %6516  ;;  %v3027_v36 = vsub.f32 %v12249_v21, %v8968_v41  ;;  %v12250_v3 = vld [vmem:[#allocation78_spill] sm:$0xff]  ;;  %6526 = vpow2.f32 %v3531_v29  ;;  %v12255_v41 = vld [vmem:[#allocation103_spill] sm:$0xff]  ;;  %v12256_v54 = vld [vmem:[#allocation105_spill] sm:$0xff] }
 0x323   : > { %3314 = vadd.xlane.f32.xlu1 %v3313_v17  ;;  %3362 = vadd.xlane.f32.xlu2 %v3361_v40  ;;  %v3059_v17 = vsub.f32 %v12247_v8, %v8958_v58  ;;  %12248 = vst [vmem:[#allocation72_spill] sm:$0xff] %v9153_v57  ;;  %v12252_v7 = vld [vmem:[#allocation98_spill] sm:$0xff] }
 0x324   : > { %3266 = vadd.xlane.f32.xlu0 %v3265_v55  ;;  %v3499_v40 = vmul.f32 1.442695, %v3430_v47  ;;  %v3563_v55 = vmul.f32 1.442695, %v3462_v49  ;;  %v9160_v48 = vpop.eup %6518  ;;  %v3431_v58 = vsub.f32 %v12252_v7, %v9143_v11  ;;  %v12253_v47 = vld [vmem:[#allocation74_spill] sm:$0xff] }
 0x325   : > { %12251 = vst [vmem:[#allocation93_spill] sm:$0xff] %v9160_v48  ;;  %v9167_v61 = vpop.eup %6520  ;;  %v3125_v22 = vmul.f32 1.442695, %v3043_v43  ;;  %3902 = vmatmul.f32.gmra.mxu1 %v9160_v48  ;;  %3967 = vmatmul.f32.gmra.mxu2 %v9153_v57  ;;  %v3220_v43 = vsel %vm2640_vm1, %v9145_v30, 0.0  ;;  %v12264_v57 = vld [vmem:[#allocation77_spill] sm:$0xff] }
 0x326   : > { %v2878_v24 = vpop.xlane.xlu2 %2877  ;;  %v2942_v27 = vpop.xlane.xlu1 %2941  ;;  %12254 = vst [vmem:[#allocation99_spill] sm:$0xff] %v9167_v61  ;;  %6528 = vpow2.f32 %v3499_v40  ;;  %4032 = vmatmul.f32.gmra.mxu3 %v9167_v61  ;;  %v3501_v29 = vmul.f32 1.442695, %v3431_v58  ;;  %v12262_v58 = vld [vmem:[#allocation81_spill] sm:$0xff] }
 0x327   : > { %v9158_v23 = vmax.f32 %v12250_v3, %v2878_v24  ;;  %v2940_v2 = vpop.xlane.xlu0 %2939  ;;  %v3157_v24 = vmul.f32 1.442695, %v3059_v17  ;;  %v3316_v3 = vsel %vm2640_vm1, %v9149_v12, 0.0  ;;  %6530 = vpow2.f32 %v3563_v55  ;;  %v9181_v17 = vpop.eup %6522  ;;  %v12276_v12 = vld [vmem:[#allocation84_spill] sm:$0xff] }
 0x328   : > { %v9165_v8 = vmax.f32 %v12253_v47, %v2940_v2  ;;  %v3093_v2 = vmul.f32 1.442695, %v3027_v36  ;;  %12257 = vst [vmem:[#allocation97_spill] sm:$0xff] %v9181_v17  ;;  %6532 = vpow2.f32 %v3125_v22  ;;  %v9183_v7 = vpop.eup %6524 }
 0x329   : > { %v3447_v49 = vsub.f32 %v12255_v41, %v9158_v23  ;;  %12258 = vst [vmem:[#allocation76_spill] sm:$0xff] %v9183_v7  ;;  %6534 = vpow2.f32 %v3157_v24  ;;  %v9185_v36 = vpop.eup %6526  ;;  %v12263_v24 = vld [vmem:[#allocation31_spill] sm:$0xff] }
 0x32a   : > { %v3478_v21 = vsub.f32 %v12256_v54, %v9165_v8  ;;  %12259 = vst [vmem:[#allocation32_spill] sm:$0xff] %v9185_v36  ;;  %6536 = vpow2.f32 %v3093_v2  ;;  %v12267_v2 = vld [vmem:[#allocation111_spill] sm:$0xff] }
 0x32b   : > { %3619 = vadd.xlane.f32.xlu1 %v8943_v26  ;;  %3317 = vadd.xlane.f32.xlu2 %v3316_v3  ;;  %v3533_v40 = vmul.f32 1.442695, %v3447_v49  ;;  %v12260_v26 = vld [vmem:[#allocation37_spill] sm:$0xff]  ;;  %v12261_v3 = vld [vmem:[#allocation79_spill] sm:$0xff]  ;;  %6538 = vpow2.f32 %v3501_v29 }
 0x32c   : > { %3221 = vadd.xlane.f32.xlu0 %v3220_v43  ;;  %v3595_v47 = vmul.f32 1.442695, %v3478_v21  ;;  %v3028_v55 = vsub.f32 %v12260_v26, %v8983_v20  ;;  %v9190_v61 = vmax.f32 %v12261_v3, %v2942_v27  ;;  %v9195_v49 = vpop.eup %6528  ;;  %v3075_v21 = vsub.f32 %v12263_v24, %v9009_v6  ;;  %v12266_v20 = vld [vmem:[#allocation109_spill] sm:$0xff] }
 0x32d   : > { %v9202_v28 = vpop.eup %6530  ;;  %6540 = vpow2.f32 %v3533_v40  ;;  %3840 = vmatmul.f32.gmra.mxu0 %v9195_v49  ;;  %3905 = vmatmul.f32.gmra.mxu1 %v9185_v36  ;;  %v12269_v40 = vld [vmem:[#allocation104_spill] sm:$0xff] }
 0x32e   : > { %v2848_v41 = vpop.xlane.xlu2 %2847  ;;  %v2912_v54 = vpop.xlane.xlu1 %2911  ;;  %12265 = vst [vmem:[#allocation33_spill] sm:$0xff] %v9202_v28  ;;  %6542 = vpow2.f32 %v3595_v47  ;;  %3970 = vmatmul.f32.gmra.mxu2 %v9202_v28  ;;  %v3479_v26 = vsub.f32 %v12269_v40, %v9190_v61  ;;  %v3364_v47 = vsel %vm2640_vm1, %v9181_v17, 0.0  ;;  %v12273_v40 = vld [vmem:[#allocation40_spill] sm:$0xff] }
 0x32f   : > { %v9193_v43 = vmax.f32 %v12262_v58, %v2848_v41  ;;  %v2910_v22 = vpop.xlane.xlu0 %2909  ;;  %v9213_v29 = vpop.eup %6532  ;;  %v3095_v41 = vmul.f32 1.442695, %v3028_v55  ;;  %v3189_v58 = vmul.f32 1.442695, %v3075_v21  ;;  %v12275_v21 = vld [vmem:[#allocation36_spill] sm:$0xff] }
 0x330   : > { %v9200_v48 = vmax.f32 %v12264_v57, %v2910_v22  ;;  %v3268_v57 = vsel %vm2640_vm1, %v9183_v7, 0.0  ;;  %12268 = vst [vmem:[#allocation30_spill] sm:$0xff] %v9213_v29  ;;  %v9220_v3 = vpop.eup %6534  ;;  %v3597_v17 = vmul.f32 1.442695, %v3479_v26  ;;  %v12278_v7 = vld [vmem:[#allocation34_spill] sm:$0xff] }
 0x331   : > { %v3432_v27 = vsub.f32 %v12266_v20, %v9193_v43  ;;  %12270 = vst [vmem:[#allocation78_spill] sm:$0xff] %v9220_v3  ;;  %v9222_v22 = vpop.eup %6536  ;;  %v12271_v20 = vld [vmem:[#allocation82_spill] sm:$0xff]  ;;  %6544 = vpow2.f32 %v3095_v41 }
 0x332   : > { %v3463_v6 = vsub.f32 %v12267_v2, %v9200_v48  ;;  %v9225_v2 = vmax.f32 %v12271_v20, %v2912_v54  ;;  %v9227_v55 = vpop.eup %6538  ;;  %6546 = vpow2.f32 %v3189_v58  ;;  %v12280_v41 = vld [vmem:[#allocation110_spill] sm:$0xff]  ;;  %v3223_v26 = vsel %vm2640_vm1, %v9222_v22, 0.0 }
 0x333   : > { %3269 = vadd.xlane.f32.xlu1 %v3268_v57  ;;  %3621 = vadd.xlane.f32.xlu2 %v9044_v10  ;;  %v3503_v24 = vmul.f32 1.442695, %v3432_v27  ;;  %12272 = vst [vmem:[#allocation98_spill] sm:$0xff] %v9227_v55  ;;  %v3044_v57 = vsub.f32 %v12273_v40, %v8996_v14  ;;  %v9231_v46 = vpop.eup %6540  ;;  %v3060_v14 = vsub.f32 %v12278_v7, %v9049_v15  ;;  %v12281_v15 = vld [vmem:[#allocation117_spill] sm:$0xff] }
 0x334   : > { %3365 = vadd.xlane.f32.xlu0 %v3364_v47  ;;  %v3565_v28 = vmul.f32 1.442695, %v3463_v6  ;;  %12274 = vst [vmem:[#allocation74_spill] sm:$0xff] %v9231_v46  ;;  %v3076_v47 = vsub.f32 %v12275_v21, %v9033_v44  ;;  %v9238_v20 = vpop.eup %6542  ;;  %v12279_v6 = vld [vmem:[#allocation80_spill] sm:$0xff]  ;;  %v3464_v30 = vsub.f32 %v12280_v41, %v9225_v2  ;;  %v3271_v44 = vsel %vm2640_vm1, %v9213_v29, 0.0 }
 0x335   : > { %12277 = vst [vmem:[#allocation103_spill] sm:$0xff] %v9238_v20  ;;  %6548 = vpow2.f32 %v3503_v24  ;;  %3843 = vmatmul.f32.gmra.mxu0 %v9227_v55  ;;  %3908 = vmatmul.f32.gmra.mxu1 %v9231_v46  ;;  %v12282_v24 = vld [vmem:[#allocation115_spill] sm:$0xff]  ;;  %v3319_v21 = vsel %vm2640_vm1, %v9220_v3, 0.0 }
 0x336   : > { %v2944_v10 = vpop.xlane.xlu2 %2943  ;;  %v2882_v36 = vpop.xlane.xlu1 %2881  ;;  %6550 = vpow2.f32 %v3565_v28  ;;  %4035 = vmatmul.f32.gmra.mxu3 %v9238_v20  ;;  %v3191_v58 = vmul.f32 1.442695, %v3076_v47 }
 0x337   : > { %v9236_v27 = vmax.f32 %v12276_v12, %v2944_v10  ;;  %v2880_v54 = vpop.xlane.xlu0 %2879  ;;  %v3127_v12 = vmul.f32 1.442695, %v3044_v57  ;;  %6552 = vpow2.f32 %v3597_v17  ;;  %v3159_v57 = vmul.f32 1.442695, %v3060_v14  ;;  %v9260_v28 = vpop.eup %6544 }
 0x338   : > { %v9243_v40 = vmax.f32 %v12279_v6, %v2880_v54  ;;  %12283 = vst [vmem:[#allocation105_spill] sm:$0xff] %v9260_v28  ;;  %v3567_v54 = vmul.f32 1.442695, %v3464_v30  ;;  %v12284_v6 = vld [vmem:[#allocation85_spill] sm:$0xff] }
 0x339   : > { %v3480_v10 = vsub.f32 %v12282_v24, %v9236_v27  ;;  %v9263_v41 = vmax.f32 %v12284_v6, %v2882_v36  ;;  %6554 = vpow2.f32 %v3127_v12  ;;  %v12290_v36 = vld [vmem:[#allocation39_spill] sm:$0xff] }
 0x33a   : > { %v3448_v7 = vsub.f32 %v12281_v15, %v9243_v40  ;;  %v9265_v15 = vpop.eup %6546  ;;  %6556 = vpow2.f32 %v3191_v58  ;;  %v3061_v6 = vsub.f32 %v12290_v36, %v9068_v39  ;;  %v12291_v12 = vld [vmem:[#allocation83_spill] sm:$0xff]  ;;  %v12293_v58 = vld [vmem:[#allocation116_spill] sm:$0xff] }
 0x33b   : > { %3272 = vadd.xlane.f32.xlu2 %v3271_v44  ;;  %3224 = vadd.xlane.f32.xlu1 %v3223_v26  ;;  %12285 = vst [vmem:[#allocation37_spill] sm:$0xff] %v9265_v15  ;;  %v9267_v24 = vpop.eup %6548  ;;  %v12287_v44 = vld [vmem:[#allocation35_spill] sm:$0xff]  ;;  %v3599_v14 = vmul.f32 1.442695, %v3480_v10  ;;  %6558 = vpow2.f32 %v3159_v57  ;;  %v3226_v57 = vsel %vm2640_vm1, %v9260_v28, 0.0  ;;  %v12296_v36 = vld [vmem:[#allocation88_spill] sm:$0xff] }
 0x33c   : > { %3320 = vadd.xlane.f32.xlu0 %v3319_v21  ;;  %v3535_v17 = vmul.f32 1.442695, %v3448_v7  ;;  %12286 = vst [vmem:[#allocation79_spill] sm:$0xff] %v9267_v24  ;;  %v3029_v26 = vsub.f32 %v12287_v44, %v9036_v1  ;;  %v12288_v21 = vld [vmem:[#allocation87_spill] sm:$0xff]  ;;  %v9274_v55 = vpop.eup %6550  ;;  %6560 = vpow2.f32 %v3567_v54  ;;  %v3449_v1 = vsub.f32 %v12293_v58, %v9263_v41  ;;  %v12295_v44 = vld [vmem:[#allocation121_spill] sm:$0xff]  ;;  %v12304_v28 = vld [vmem:[#allocation122_spill] sm:$0xff] }
 0x33d   : > { %12289 = vst [vmem:[#allocation81_spill] sm:$0xff] %v9274_v55  ;;  %v9281_v3 = vpop.eup %6552  ;;  %3846 = vmatmul.f32.gmra.mxu0 %v9267_v24  ;;  %3973 = vmatmul.f32.gmra.mxu2 %v9274_v55  ;;  %v12294_v10 = vld [vmem:[#allocation123_spill] sm:$0xff]  ;;  %v12302_v24 = vld [vmem:[#allocation90_spill] sm:$0xff] }
 0x33e   : > { %v2914_v47 = vpop.xlane.xlu2 %2913  ;;  %v2852_v20 = vpop.xlane.xlu1 %2851  ;;  %12292 = vst [vmem:[#allocation31_spill] sm:$0xff] %v9281_v3  ;;  %6562 = vpow2.f32 %v3535_v17  ;;  %4038 = vmatmul.f32.gmra.mxu3 %v9281_v3  ;;  %v3097_v54 = vmul.f32 1.442695, %v3029_v26  ;;  %v3161_v17 = vmul.f32 1.442695, %v3061_v6  ;;  %v12299_v26 = vld [vmem:[#allocation42_spill] sm:$0xff] }
 0x33f   : > { %v9272_v46 = vmax.f32 %v12288_v21, %v2914_v47  ;;  %v2850_v30 = vpop.xlane.xlu0 %2849  ;;  %v3367_v47 = vsel %vm2640_vm1, %v9265_v15, 0.0  ;;  %6564 = vpow2.f32 %v3599_v14  ;;  %v3077_v14 = vsub.f32 %v12299_v26, %v9077_v56  ;;  %v12301_v6 = vld [vmem:[#allocation38_spill] sm:$0xff] }
 0x340   : > { %v9279_v7 = vmax.f32 %v12291_v12, %v2850_v30  ;;  %v9296_v30 = vpop.eup %6554  ;;  %v9299_v12 = vmax.f32 %v12296_v36, %v2852_v20  ;;  %6566 = vpow2.f32 %v3097_v54  ;;  %v3045_v20 = vsub.f32 %v12301_v6, %v9087_v32  ;;  %v12307_v54 = vld [vmem:[#allocation127_spill] sm:$0xff] }
 0x341   : > { %v3465_v21 = vsub.f32 %v12295_v44, %v9272_v46  ;;  %v9302_v58 = vpop.eup %6556  ;;  %6568 = vpow2.f32 %v3161_v17 }
 0x342   : > { %v3433_v39 = vsub.f32 %v12294_v10, %v9279_v7  ;;  %12297 = vst [vmem:[#allocation77_spill] sm:$0xff] %v9302_v58  ;;  %v3537_v10 = vmul.f32 1.442695, %v3449_v1  ;;  %v9304_v3 = vpop.eup %6558  ;;  %v3434_v56 = vsub.f32 %v12304_v28, %v9299_v12  ;;  %v12308_v28 = vld [vmem:[#allocation129_spill] sm:$0xff] }
 0x343   : > { %3227 = vadd.xlane.f32.xlu2 %v3226_v57  ;;  %3368 = vadd.xlane.f32.xlu1 %v3367_v47  ;;  %12298 = vst [vmem:[#allocation109_spill] sm:$0xff] %v9304_v3  ;;  %v9308_v47 = vpop.eup %6560  ;;  %v3569_v36 = vmul.f32 1.442695, %v3465_v21  ;;  %v3193_v21 = vmul.f32 1.442695, %v3077_v14  ;;  %v3322_v17 = vsel %vm2640_vm1, %v9304_v3, 0.0 }
 0x344   : > { %3623 = vadd.xlane.f32.xlu0 %v9070_v4  ;;  %v3505_v55 = vmul.f32 1.442695, %v3433_v39  ;;  %12300 = vst [vmem:[#allocation111_spill] sm:$0xff] %v9308_v47  ;;  %v9315_v1 = vpop.eup %6562  ;;  %v12305_v39 = vld [vmem:[#allocation86_spill] sm:$0xff]  ;;  %6570 = vpow2.f32 %v3537_v10  ;;  %v3129_v10 = vmul.f32 1.442695, %v3045_v20 }
 0x345   : > { %12303 = vst [vmem:[#allocation104_spill] sm:$0xff] %v9315_v1  ;;  %v9322_v29 = vpop.eup %6564  ;;  %3911 = vmatmul.f32.gmra.mxu1 %v9315_v1  ;;  %3976 = vmatmul.f32.gmra.mxu2 %v9308_v47  ;;  %v3507_v6 = vmul.f32 1.442695, %v3434_v56  ;;  %v12312_v56 = vld [vmem:[#allocation91_spill] sm:$0xff] }
 0x346   : > { %v2884_v44 = vpop.xlane.xlu2 %2883  ;;  %v2948_v57 = vpop.xlane.xlu1 %2947  ;;  %12306 = vst [vmem:[#allocation82_spill] sm:$0xff] %v9322_v29  ;;  %6572 = vpow2.f32 %v3505_v55  ;;  %4041 = vmatmul.f32.gmra.mxu3 %v9322_v29  ;;  %v12313_v1 = vld [vmem:[#allocation95_spill] sm:$0xff] }
 0x347   : > { %v9313_v4 = vmax.f32 %v12302_v24, %v2884_v44  ;;  %v2946_v15 = vpop.xlane.xlu0 %2945  ;;  %v3370_v24 = vsel %vm2640_vm1, %v9302_v58, 0.0  ;;  %6574 = vpow2.f32 %v3569_v36  ;;  %v3274_v44 = vsel %vm2640_vm1, %v9296_v30, 0.0 }
 0x348   : > { %v9320_v26 = vmax.f32 %v12305_v39, %v2946_v15  ;;  %v9337_v39 = vpop.eup %6566  ;;  %6576 = vpow2.f32 %v3193_v21 }
 0x349   : > { %v3450_v32 = vsub.f32 %v12307_v54, %v9313_v4  ;;  %v9339_v14 = vpop.eup %6568  ;;  %v12309_v54 = vld [vmem:[#allocation43_spill] sm:$0xff]  ;;  %6578 = vpow2.f32 %v3129_v10 }
 0x34a   : > { %v3481_v15 = vsub.f32 %v12308_v28, %v9320_v26  ;;  %v3046_v28 = vsub.f32 %v12309_v54, %v9107_v0  ;;  %v9343_v36 = vpop.eup %6570  ;;  %v12315_v0 = vld [vmem:[#allocation41_spill] sm:$0xff]  ;;  %6580 = vpow2.f32 %v3507_v6 }
 0x34b   : > { %3371 = vadd.xlane.f32.xlu2 %v3370_v24  ;;  %3323 = vadd.xlane.f32.xlu1 %v3322_v17  ;;  %v3539_v55 = vmul.f32 1.442695, %v3450_v32  ;;  %12310 = vst [vmem:[#allocation40_spill] sm:$0xff] %v9343_v36  ;;  %v12311_v24 = vld [vmem:[#allocation44_spill] sm:$0xff]  ;;  %v12316_v54 = vld [vmem:[#allocation89_spill] sm:$0xff] }
 0x34c   : > { %3275 = vadd.xlane.f32.xlu0 %v3274_v44  ;;  %v3601_v29 = vmul.f32 1.442695, %v3481_v15  ;;  %v3062_v17 = vsub.f32 %v12311_v24, %v9116_v35  ;;  %v9348_v44 = vmax.f32 %v12312_v56, %v2948_v57  ;;  %v9353_v21 = vpop.eup %6572  ;;  %v3030_v15 = vsub.f32 %v12315_v0, %v9123_v51  ;;  %v12319_v24 = vld [vmem:[#allocation96_spill] sm:$0xff]  ;;  %v12321_v0 = vld [vmem:[#allocation46_spill] sm:$0xff] }
 0x34d   : > { %12314 = vst [vmem:[#allocation36_spill] sm:$0xff] %v9353_v21  ;;  %v9360_v10 = vpop.eup %6574  ;;  %6582 = vpow2.f32 %v3539_v55  ;;  %3849 = vmatmul.f32.gmra.mxu0 %v9353_v21  ;;  %3914 = vmatmul.f32.gmra.mxu1 %v9343_v36  ;;  %v3131_v57 = vmul.f32 1.442695, %v3046_v28 }
 0x34e   : > { %v2854_v47 = vpop.xlane.xlu2 %2853  ;;  %v2918_v20 = vpop.xlane.xlu1 %2917  ;;  %12317 = vst [vmem:[#allocation84_spill] sm:$0xff] %v9360_v10  ;;  %6584 = vpow2.f32 %v3601_v29  ;;  %3979 = vmatmul.f32.gmra.mxu2 %v9360_v10  ;;  %v3099_v29 = vmul.f32 1.442695, %v3030_v15  ;;  %v12323_v15 = vld [vmem:[#allocation47_spill] sm:$0xff] }
 0x34f   : > { %v9351_v32 = vmax.f32 %v12313_v1, %v2854_v47  ;;  %v2916_v58 = vpop.xlane.xlu0 %2915  ;;  %v3163_v47 = vmul.f32 1.442695, %v3062_v17  ;;  %v12318_v1 = vld [vmem:[#allocation128_spill] sm:$0xff]  ;;  %v9376_v55 = vpop.eup %6576  ;;  %v9381_v56 = vmax.f32 %v12319_v24, %v2918_v20  ;;  %6586 = vpow2.f32 %v3131_v57 }
 0x350   : > { %v9358_v3 = vmax.f32 %v12316_v54, %v2916_v58  ;;  %v3325_v58 = vsel %vm2640_vm1, %v9339_v14, 0.0  ;;  %v3482_v6 = vsub.f32 %v12318_v1, %v9348_v44  ;;  %v9378_v28 = vpop.eup %6578  ;;  %v3031_v54 = vsub.f32 %v12321_v0, %v9143_v11  ;;  %v12326_v11 = vld [vmem:[#allocation45_spill] sm:$0xff] }
 0x351   : > { %v3435_v35 = vsub.f32 %v8819_v50, %v9351_v32  ;;  %v3229_v50 = vsel %vm2640_vm1, %v9337_v39, 0.0  ;;  %v9383_v17 = vpop.eup %6580  ;;  %6588 = vpow2.f32 %v3163_v47  ;;  %v3078_v57 = vsub.f32 %v12326_v11, %v9165_v8 }
 0x352   : > { %v3466_v51 = vsub.f32 %v8828_v59, %v9358_v3  ;;  %12320 = vst [vmem:[#allocation34_spill] sm:$0xff] %v9383_v17  ;;  %v3603_v36 = vmul.f32 1.442695, %v3482_v6  ;;  %6590 = vpow2.f32 %v3099_v29  ;;  %v3467_v47 = vsub.f32 %v8821_v16, %v9381_v56  ;;  %v3420_v29 = vld [vmem:[%s9411_s18 + $0x58] sm:$0xff] }
 0x353   : > { %3326 = vadd.xlane.f32.xlu2 %v3325_v58  ;;  %3625 = vadd.xlane.f32.xlu1 %v9111_v52  ;;  %v3509_v59 = vmul.f32 1.442695, %v3435_v35  ;;  %v9387_v10 = vpop.eup %6582  ;;  %v12324_v35 = vld [vmem:[#allocation101_spill] sm:$0xff]  ;;  %v3277_v8 = vsel %vm2640_vm1, %v9378_v28, 0.0  ;;  %v3424_v16 = vld [vmem:[%s9411_s18 + $0x78] sm:$0xff] }
 0x354   : > { %3230 = vadd.xlane.f32.xlu0 %v3229_v50  ;;  %v3571_v52 = vmul.f32 1.442695, %v3466_v51  ;;  %12322 = vst [vmem:[#allocation80_spill] sm:$0xff] %v9387_v10  ;;  %v3047_v50 = vsub.f32 %v12323_v15, %v9158_v23  ;;  %v9394_v21 = vpop.eup %6584  ;;  %v12327_v51 = vld [vmem:[#allocation94_spill] sm:$0xff]  ;;  %v3101_v23 = vmul.f32 1.442695, %v3031_v54  ;;  %4355 = vmatpush.msrb.mxu2 %v3420_v29 }
 0x355   : > { %12325 = vst [vmem:[#allocation110_spill] sm:$0xff] %v9394_v21  ;;  %6592 = vpow2.f32 %v3509_v59  ;;  %3852 = vmatmul.f32.gmra.mxu0 %v9383_v17  ;;  %3917 = vmatmul.f32.gmra.mxu1 %v9387_v10  ;;  %v12345_v17 = vld [vmem:[#allocation113_spill] sm:$0xff] }
 0x356   : > { %v2950_v58 = vpop.xlane.xlu2 %2949  ;;  %v2888_v1 = vpop.xlane.xlu1 %2887  ;;  %6594 = vpow2.f32 %v3571_v52  ;;  %4044 = vmatmul.f32.gmra.mxu3 %v9394_v21  ;;  %v3133_v59 = vmul.f32 1.442695, %v3047_v50 }
 0x357   : > { %v9392_v20 = vmax.f32 %v12324_v35, %v2950_v58  ;;  %v2886_v24 = vpop.xlane.xlu0 %2885  ;;  %6596 = vpow2.f32 %v3603_v36  ;;  %v9420_v52 = vpop.eup %6586  ;;  %v3195_v58 = vmul.f32 1.442695, %v3078_v57  ;;  %v3573_v35 = vmul.f32 1.442695, %v3467_v47  ;;  %4468 = vmatpush.msrb.mxu3 %v3424_v16  ;;  %v12331_v57 = vld [vmem:[#allocation50_spill] sm:$0xff] }
 0x358   : > { %v9399_v0 = vmax.f32 %v12327_v51, %v2886_v24  ;;  %v9422_v15 = vpop.eup %6588  ;;  %v12328_v24 = vld [vmem:[#allocation102_spill] sm:$0xff]  ;;  %6598 = vpow2.f32 %v3101_v23  ;;  %v3032_v29 = vsub.f32 %v12331_v57, %v9193_v43  ;;  %v12337_v43 = vld [vmem:[#allocation136_spill] sm:$0xff] }
 0x359   : > { %v3483_v54 = vsub.f32 %v8845_v37, %v9392_v20  ;;  %v9425_v50 = vmax.f32 %v12328_v24, %v2888_v1  ;;  %v9427_v36 = vpop.eup %6590  ;;  %v12329_v37 = vld [vmem:[#allocation49_spill] sm:$0xff]  ;;  %6600 = vpow2.f32 %v3133_v59  ;;  %v3412_v57 = vld [vmem:[%s9411_s18 + $0x18] sm:$0xff] }
 0x35a   : > { %v3451_v6 = vsub.f32 %v8850_v62, %v9399_v0  ;;  %v3373_v62 = vsel %vm2640_vm1, %v9376_v55, 0.0  ;;  %6602 = vpow2.f32 %v3195_v58  ;;  %4129 = vmatpush.msrb.mxu0 %v3412_v57  ;;  %v12344_v57 = vld [vmem:[#allocation51_spill] sm:$0xff] }
 0x35b   : > { %3278 = vadd.xlane.f32.xlu1 %v3277_v8  ;;  %3627 = vadd.xlane.f32.xlu2 %v9195_v49  ;;  %v3079_v49 = vsub.f32 %v12329_v37, %v9190_v61  ;;  %v9431_v21 = vpop.eup %6592  ;;  %v3605_v47 = vmul.f32 1.442695, %v3483_v54  ;;  %v12334_v61 = vld [vmem:[#allocation48_spill] sm:$0xff]  ;;  %6604 = vpow2.f32 %v3573_v35  ;;  %v3452_v54 = vsub.f32 %v12337_v43, %v9425_v50 }
 0x35c   : > { %3374 = vadd.xlane.f32.xlu0 %v3373_v62  ;;  %v3541_v11 = vmul.f32 1.442695, %v3451_v6  ;;  %12330 = vst [vmem:[#allocation117_spill] sm:$0xff] %v9431_v21  ;;  %v12332_v62 = vld [vmem:[#allocation107_spill] sm:$0xff]  ;;  %v9438_v24 = vpop.eup %6594  ;;  %v3063_v23 = vsub.f32 %v12334_v61, %v9200_v48  ;;  %v12335_v6 = vld [vmem:[#allocation100_spill] sm:$0xff]  ;;  %v3232_v35 = vsel %vm2640_vm1, %v9427_v36, 0.0 }
 0x35d   : > { %12333 = vst [vmem:[#allocation115_spill] sm:$0xff] %v9438_v24  ;;  %v9445_v59 = vpop.eup %6596  ;;  %3855 = vmatmul.f32.gmra.mxu0 %v9431_v21  ;;  %3982 = vmatmul.f32.gmra.mxu2 %v9438_v24  ;;  %v3197_v58 = vmul.f32 1.442695, %v3079_v49  ;;  %v3328_v49 = vsel %vm2640_vm1, %v9422_v15, 0.0  ;;  %v12338_v43 = vld [vmem:[#allocation108_spill] sm:$0xff] }
 0x35e   : > { %v2920_v51 = vpop.xlane.xlu2 %2919  ;;  %v2858_v8 = vpop.xlane.xlu1 %2857  ;;  %12336 = vst [vmem:[#allocation85_spill] sm:$0xff] %v9445_v59  ;;  %6606 = vpow2.f32 %v3541_v11  ;;  %4047 = vmatmul.f32.gmra.mxu3 %v9445_v59  ;;  %v3543_v24 = vmul.f32 1.442695, %v3452_v54 }
 0x35f   : > { %v9436_v1 = vmax.f32 %v12332_v62, %v2920_v51  ;;  %v2856_v16 = vpop.xlane.xlu0 %2855  ;;  %v3280_v51 = vsel %vm2640_vm1, %v9420_v52, 0.0  ;;  %v3416_v62 = vld [vmem:[%s9411_s18 + $0x38] sm:$0xff]  ;;  %6608 = vpow2.f32 %v3605_v47  ;;  %v9464_v11 = vpop.eup %6598 }
 0x360   : > { %v9443_v37 = vmax.f32 %v12335_v6, %v2856_v16  ;;  %v3103_v16 = vmul.f32 1.442695, %v3032_v29  ;;  %v3165_v6 = vmul.f32 1.442695, %v3063_v23  ;;  %v9469_v59 = vpop.eup %6600  ;;  %v12340_v29 = vld [vmem:[#allocation52_spill] sm:$0xff]  ;;  %4242 = vmatpush.msrb.mxu1 %v3416_v62  ;;  %6610 = vpow2.f32 %v3197_v58  ;;  %v12347_v58 = vld [vmem:[#allocation137_spill] sm:$0xff] }
 0x361   : > { %v3468_v61 = vsub.f32 %v8867_v63, %v9436_v1  ;;  %12339 = vst [vmem:[#allocation35_spill] sm:$0xff] %v9469_v59  ;;  %v3064_v47 = vsub.f32 %v12340_v29, %v9225_v2  ;;  %v9473_v63 = vpop.eup %6602 }
 0x362   : > { %v3436_v48 = vsub.f32 %v8881_v60, %v9443_v37  ;;  %v9467_v60 = vmax.f32 %v12338_v43, %v2858_v8  ;;  %12341 = vst [vmem:[#allocation87_spill] sm:$0xff] %v9473_v63  ;;  %v9477_v8 = vpop.eup %6604  ;;  %6612 = vpow2.f32 %v3103_v16 }
 0x363   : > { %3281 = vadd.xlane.f32.xlu2 %v3280_v51  ;;  %3233 = vadd.xlane.f32.xlu1 %v3232_v35  ;;  %v12342_v51 = vld [vmem:[#allocation54_spill] sm:$0xff]  ;;  %12343 = vst [vmem:[#allocation39_spill] sm:$0xff] %v9477_v8  ;;  %v3575_v43 = vmul.f32 1.442695, %v3468_v61  ;;  %6614 = vpow2.f32 %v3165_v6  ;;  %v3167_v16 = vmul.f32 1.442695, %v3064_v47 }
 0x364   : > { %3329 = vadd.xlane.f32.xlu0 %v3328_v49  ;;  %v3080_v35 = vsub.f32 %v12342_v51, %v9236_v27  ;;  %v3511_v10 = vmul.f32 1.442695, %v3436_v48  ;;  %v3048_v49 = vsub.f32 %v12344_v57, %v9243_v40  ;;  %v9484_v62 = vpop.eup %6606  ;;  %v3437_v27 = vsub.f32 %v12347_v58, %v9467_v60  ;;  %v12348_v48 = vld [vmem:[#allocation106_spill] sm:$0xff]  ;;  %v12350_v6 = vld [vmem:[#allocation139_spill] sm:$0xff] }
 0x365   : > { %12346 = vst [vmem:[#allocation83_spill] sm:$0xff] %v9484_v62  ;;  %v9491_v51 = vpop.eup %6608  ;;  %6616 = vpow2.f32 %v3543_v24  ;;  %3920 = vmatmul.f32.gmra.mxu1 %v9484_v62  ;;  %3985 = vmatmul.f32.gmra.mxu2 %v9477_v8  ;;  %v3376_v24 = vsel %vm2640_vm1, %v9473_v63, 0.0 }
 0x366   : > { %v2890_v23 = vpop.xlane.xlu2 %2889  ;;  %v2954_v21 = vpop.xlane.xlu1 %2953  ;;  %12349 = vst [vmem:[#allocation116_spill] sm:$0xff] %v9491_v51  ;;  %v3199_v61 = vmul.f32 1.442695, %v3080_v35  ;;  %6618 = vpow2.f32 %v3511_v10  ;;  %4050 = vmatmul.f32.gmra.mxu3 %v9491_v51  ;;  %v3135_v47 = vmul.f32 1.442695, %v3048_v49  ;;  %v12356_v51 = vld [vmem:[#allocation56_spill] sm:$0xff] }
 0x367   : > { %v9482_v2 = vmax.f32 %v12345_v17, %v2890_v23  ;;  %v2952_v54 = vpop.xlane.xlu0 %2951  ;;  %v3235_v17 = vsel %vm2640_vm1, %v9464_v11, 0.0  ;;  %6620 = vpow2.f32 %v3575_v43  ;;  %v9506_v57 = vpop.eup %6610 }
 0x368   : > { %v9489_v29 = vmax.f32 %v12348_v48, %v2952_v54  ;;  %12351 = vst [vmem:[#allocation123_spill] sm:$0xff] %v9506_v57  ;;  %v3513_v54 = vmul.f32 1.442695, %v3437_v27  ;;  %v9508_v10 = vpop.eup %6612  ;;  %6622 = vpow2.f32 %v3167_v16  ;;  %v12354_v48 = vld [vmem:[#allocation55_spill] sm:$0xff]  ;;  %v3065_v27 = vsub.f32 %v12356_v51, %v9272_v46 }
 0x369   : > { %v3453_v40 = vsub.f32 %v8893_v53, %v9482_v2  ;;  %v3283_v53 = vsel %vm2640_vm1, %v9469_v59, 0.0  ;;  %12352 = vst [vmem:[#allocation121_spill] sm:$0xff] %v9508_v10  ;;  %v9510_v58 = vpop.eup %6614  ;;  %6624 = vpow2.f32 %v3199_v61  ;;  %v3049_v49 = vsub.f32 %v12354_v48, %v9263_v41  ;;  %v12358_v16 = vld [vmem:[#allocation119_spill] sm:$0xff]  ;;  %v12360_v41 = vld [vmem:[#allocation53_spill] sm:$0xff]  ;;  %v12361_v48 = vld [vmem:[#allocation112_spill] sm:$0xff] }
 0x36a   : > { %v3484_v23 = vsub.f32 %v12350_v6, %v9489_v29  ;;  %12353 = vst [vmem:[#allocation88_spill] sm:$0xff] %v9510_v58  ;;  %6626 = vpow2.f32 %v3135_v47 }
 0x36b   : > { %3236 = vadd.xlane.f32.xlu2 %v3235_v17  ;;  %3377 = vadd.xlane.f32.xlu1 %v3376_v24  ;;  %v3545_v35 = vmul.f32 1.442695, %v3453_v40  ;;  %v9514_v24 = vpop.eup %6616  ;;  %6628 = vpow2.f32 %v3513_v54  ;;  %v3137_v51 = vmul.f32 1.442695, %v3049_v49  ;;  %v3331_v54 = vsel %vm2640_vm1, %v9510_v58, 0.0 }
 0x36c   : > { %3284 = vadd.xlane.f32.xlu0 %v3283_v53  ;;  %v3607_v43 = vmul.f32 1.442695, %v3484_v23  ;;  %12355 = vst [vmem:[#allocation42_spill] sm:$0xff] %v9514_v24  ;;  %v12357_v53 = vld [vmem:[#allocation114_spill] sm:$0xff]  ;;  %v9524_v61 = vpop.eup %6618  ;;  %v3033_v23 = vsub.f32 %v12360_v41, %v9279_v7  ;;  %v12363_v7 = vld [vmem:[#allocation143_spill] sm:$0xff]  ;;  %v3238_v49 = vsel %vm2640_vm1, %v9508_v10, 0.0 }
 0x36d   : > { %v9519_v8 = vmax.f32 %v12357_v53, %v2954_v21  ;;  %12359 = vst [vmem:[#allocation38_spill] sm:$0xff] %v9524_v61  ;;  %v9531_v47 = vpop.eup %6620  ;;  %6630 = vpow2.f32 %v3545_v35  ;;  %3858 = vmatmul.f32.gmra.mxu0 %v9524_v61  ;;  %3923 = vmatmul.f32.gmra.mxu1 %v9514_v24  ;;  %v3379_v21 = vsel %vm2640_vm1, %v9506_v57, 0.0 }
 0x36e   : > { %v2860_v17 = vpop.xlane.xlu2 %2859  ;;  %v2924_v6 = vpop.xlane.xlu1 %2923  ;;  %12362 = vst [vmem:[#allocation90_spill] sm:$0xff] %v9531_v47  ;;  %6632 = vpow2.f32 %v3607_v43  ;;  %3988 = vmatmul.f32.gmra.mxu2 %v9531_v47 }
 0x36f   : > { %v9522_v40 = vmax.f32 %v12358_v16, %v2860_v17  ;;  %v2922_v62 = vpop.xlane.xlu0 %2921  ;;  %v9544_v35 = vpop.eup %6622  ;;  %v12365_v17 = vld [vmem:[#allocation138_spill] sm:$0xff]  ;;  %v3105_v16 = vmul.f32 1.442695, %v3033_v23  ;;  %6634 = vpow2.f32 %v3137_v51  ;;  %v12371_v23 = vld [vmem:[#allocation59_spill] sm:$0xff]  ;;  %v12374_v51 = vld [vmem:[#allocation57_spill] sm:$0xff] }
 0x370   : > { %v9529_v63 = vmax.f32 %v12361_v48, %v2922_v62  ;;  %12364 = vst [vmem:[#allocation122_spill] sm:$0xff] %v9544_v35  ;;  %v3485_v53 = vsub.f32 %v12365_v17, %v9519_v8  ;;  %v9550_v43 = vpop.eup %6624 }
 0x371   : > { %v3438_v46 = vsub.f32 %v8924_v45, %v9522_v40  ;;  %v3169_v45 = vmul.f32 1.442695, %v3065_v27  ;;  %12366 = vst [vmem:[#allocation86_spill] sm:$0xff] %v9550_v43  ;;  %v9552_v41 = vpop.eup %6626  ;;  %v12369_v27 = vld [vmem:[#allocation58_spill] sm:$0xff] }
 0x372   : > { %v3469_v62 = vsub.f32 %v12363_v7, %v9529_v63  ;;  %v12367_v7 = vld [vmem:[#allocation120_spill] sm:$0xff]  ;;  %v9557_v24 = vpop.eup %6628  ;;  %v3609_v10 = vmul.f32 1.442695, %v3485_v53 }
 0x373   : > { %3380 = vadd.xlane.f32.xlu2 %v3379_v21  ;;  %3332 = vadd.xlane.f32.xlu1 %v3331_v54  ;;  %v3515_v48 = vmul.f32 1.442695, %v3438_v46  ;;  %v9555_v47 = vmax.f32 %v12367_v7, %v2924_v6  ;;  %12368 = vst [vmem:[#allocation127_spill] sm:$0xff] %v9557_v24  ;;  %v3034_v21 = vsub.f32 %v12369_v27, %v9299_v12  ;;  %v9561_v57 = vpop.eup %6630  ;;  %6636 = vpow2.f32 %v3169_v45  ;;  %v12372_v46 = vld [vmem:[#allocation125_spill] sm:$0xff] }
 0x374   : > { %3239 = vadd.xlane.f32.xlu0 %v3238_v49  ;;  %v3577_v54 = vmul.f32 1.442695, %v3469_v62  ;;  %12370 = vst [vmem:[#allocation129_spill] sm:$0xff] %v9561_v57  ;;  %v3050_v49 = vsub.f32 %v12371_v23, %v9313_v4  ;;  %v9568_v7 = vpop.eup %6632  ;;  %6638 = vpow2.f32 %v3105_v16  ;;  %v3081_v12 = vsub.f32 %v12374_v51, %v9320_v26  ;;  %v12375_v62 = vld [vmem:[#allocation118_spill] sm:$0xff]  ;;  %v12376_v45 = vld [vmem:[#allocation141_spill] sm:$0xff] }
 0x375   : > { %12373 = vst [vmem:[#allocation43_spill] sm:$0xff] %v9568_v7  ;;  %6640 = vpow2.f32 %v3515_v48  ;;  %v3470_v59 = vsub.f32 %v12376_v45, %v9555_v47  ;;  %3861 = vmatmul.f32.gmra.mxu0 %v9557_v24  ;;  %3926 = vmatmul.f32.gmra.mxu1 %v9561_v57  ;;  %v3334_v4 = vsel %vm2640_vm1, %v9544_v35, 0.0  ;;  %v3107_v53 = vmul.f32 1.442695, %v3034_v21  ;;  %v12378_v45 = vld [vmem:[#allocation61_spill] sm:$0xff]  ;;  %v12381_v24 = vld [vmem:[#allocation131_spill] sm:$0xff] }
 0x376   : > { %v2956_v17 = vpop.xlane.xlu2 %2955  ;;  %v2894_v61 = vpop.xlane.xlu1 %2893  ;;  %6642 = vpow2.f32 %v3577_v54  ;;  %4053 = vmatmul.f32.gmra.mxu3 %v9568_v7  ;;  %v3286_v16 = vsel %vm2640_vm1, %v9552_v41, 0.0  ;;  %v3139_v48 = vmul.f32 1.442695, %v3050_v49  ;;  %v3382_v21 = vsel %vm2640_vm1, %v9550_v43, 0.0  ;;  %v3423_v49 = vld [vmem:[%s9411_s18 + $0x70] sm:$0xff] }
 0x377   : > { %v9566_v58 = vmax.f32 %v12372_v46, %v2956_v17  ;;  %v2892_v6 = vpop.xlane.xlu0 %2891  ;;  %6644 = vpow2.f32 %v3609_v10  ;;  %v9590_v54 = vpop.eup %6634  ;;  %v3201_v23 = vmul.f32 1.442695, %v3081_v12  ;;  %v3579_v46 = vmul.f32 1.442695, %v3470_v59  ;;  %v3419_v10 = vld [vmem:[%s9411_s18 + $0x50] sm:$0xff]  ;;  %4469 = vmatpush.msrb.mxu3 %v3423_v49 }
 0x378   : > { %v9573_v27 = vmax.f32 %v12375_v62, %v2892_v6  ;;  %v12377_v6 = vld [vmem:[#allocation126_spill] sm:$0xff]  ;;  %v3411_v62 = vld [vmem:[%s9411_s18 + $0x10] sm:$0xff]  ;;  %6646 = vpow2.f32 %v3107_v53  ;;  %4356 = vmatpush.msrb.mxu2 %v3419_v10  ;;  %v12383_v10 = vld [vmem:[#allocation60_spill] sm:$0xff] }
 0x379   : > { %v3486_v17 = vsub.f32 %v8960_v13, %v9566_v58  ;;  %v9595_v51 = vmax.f32 %v12377_v6, %v2894_v61  ;;  %v3415_v59 = vld [vmem:[%s9411_s18 + $0x30] sm:$0xff]  ;;  %6648 = vpow2.f32 %v3139_v48  ;;  %v12380_v61 = vld [vmem:[#allocation62_spill] sm:$0xff]  ;;  %4130 = vmatpush.msrb.mxu0 %v3411_v62  ;;  %v3066_v49 = vsub.f32 %v12383_v10, %v9358_v3  ;;  %v12384_v48 = vld [vmem:[#allocation124_spill] sm:$0xff] }
 0x37a   : > { %v3454_v26 = vsub.f32 %v8978_v38, %v9573_v27  ;;  %v9592_v38 = vpop.eup %6636  ;;  %v3035_v6 = vsub.f32 %v12380_v61, %v9351_v32  ;;  %4243 = vmatpush.msrb.mxu1 %v3415_v59  ;;  %6650 = vpow2.f32 %v3201_v23  ;;  %v3414_v3 = vld [vmem:[%s9411_s18 + $0x28] sm:$0xff]  ;;  %v3417_v62 = vld [vmem:[%s9411_s18 + $0x40] sm:$0xff]  ;;  %v12386_v59 = vld [vmem:[#allocation146_spill] sm:$0xff] }
 0x37b   : > { %3335 = vadd.xlane.f32.xlu2 %v3334_v4  ;;  %3287 = vadd.xlane.f32.xlu1 %v3286_v16  ;;  %v9600_v13 = vpop.eup %6638  ;;  %v3082_v4 = vsub.f32 %v12378_v45, %v9348_v44  ;;  %v3611_v57 = vmul.f32 1.442695, %v3486_v17  ;;  %v3410_v44 = vld [vmem:[%s9411_s18 + $0x8] sm:$0xff]  ;;  %6652 = vpow2.f32 %v3579_v46  ;;  %v3289_v17 = vsel %vm2640_vm1, %v9590_v54, 0.0 }
 0x37c   : > { %3383 = vadd.xlane.f32.xlu0 %v3382_v21  ;;  %v3547_v12 = vmul.f32 1.442695, %v3454_v26  ;;  %v9605_v7 = vpop.eup %6640  ;;  %v3418_v26 = vld [vmem:[%s9411_s18 + $0x48] sm:$0xff]  ;;  %v3241_v46 = vsel %vm2640_vm1, %v9600_v13, 0.0  ;;  %4131 = vmatpush.msrb.mxu0 %v3410_v44 }
 0x37d   : > { %12379 = vst [vmem:[#allocation44_spill] sm:$0xff] %v9605_v7  ;;  %v9614_v45 = vpop.eup %6642  ;;  %4357 = vmatpush.msrb.mxu2 %v3418_v26  ;;  %3864 = vmatmul.f32.gmra.mxu0 %v9605_v7  ;;  %v3203_v23 = vmul.f32 1.442695, %v3082_v4  ;;  %v3337_v4 = vsel %vm2640_vm1, %v9592_v38, 0.0  ;;  %v12387_v10 = vld [vmem:[#allocation132_spill] sm:$0xff] }
 0x37e   : > { %v2926_v16 = vpop.xlane.xlu2 %2925  ;;  %v2864_v21 = vpop.xlane.xlu1 %2863  ;;  %12382 = vst [vmem:[#allocation91_spill] sm:$0xff] %v9614_v45  ;;  %3991 = vmatmul.f32.gmra.mxu2 %v9614_v45  ;;  %6654 = vpow2.f32 %v3547_v12  ;;  %v3413_v12 = vld [vmem:[%s9411_s18 + $0x20] sm:$0xff]  ;;  %4244 = vmatpush.msrb.mxu1 %v3414_v3 }
 0x37f   : > { %v9610_v53 = vmax.f32 %v12381_v24, %v2926_v16  ;;  %v2862_v43 = vpop.xlane.xlu0 %2861  ;;  %v9621_v32 = vpop.eup %6644  ;;  %v3455_v24 = vsub.f32 %v8963_v19, %v9595_v51  ;;  %v3409_v19 = vld [vmem:[%s9411_s18] sm:$0xff]  ;;  %v3109_v16 = vmul.f32 1.442695, %v3035_v6  ;;  %6656 = vpow2.f32 %v3611_v57  ;;  %v12388_v57 = vld [vmem:[#allocation64_spill] sm:$0xff]  ;;  %4358 = vmatpush.msrb.mxu2 %v3417_v62 }
 0x380   : > { %v9619_v35 = vmax.f32 %v12384_v48, %v2862_v43  ;;  %12385 = vst [vmem:[#allocation95_spill] sm:$0xff] %v9621_v32  ;;  %4056 = vmatmul.f32.gmra.mxu3 %v9621_v32  ;;  %v9642_v26 = vpop.eup %6646  ;;  %v9645_v48 = vmax.f32 %v12387_v10, %v2864_v21  ;;  %v3067_v44 = vsub.f32 %v12388_v57, %v9381_v56  ;;  %6658 = vpow2.f32 %v3203_v23  ;;  %v3422_v21 = vld [vmem:[%s9411_s18 + $0x68] sm:$0xff]  ;;  %v12391_v3 = vld [vmem:[#allocation63_spill] sm:$0xff] }
 0x381   : > { %v3471_v61 = vsub.f32 %v12386_v59, %v9610_v53  ;;  %v9647_v6 = vpop.eup %6648  ;;  %4132 = vmatpush.msrb.mxu0 %v3409_v19  ;;  %v12389_v59 = vld [vmem:[#allocation13_spill] sm:$0xff]  ;;  %4245 = vmatpush.msrb.mxu1 %v3413_v12  ;;  %6660 = vpow2.f32 %v3109_v16  ;;  %v3051_v10 = vsub.f32 %v12391_v3, %v9399_v0  ;;  %v12395_v16 = vld [vmem:[#allocation130_spill] sm:$0xff] }
 0x382   : > { %v3439_v43 = vsub.f32 %v9018_v9, %v9619_v35  ;;  %v3171_v9 = vmul.f32 1.442695, %v3066_v49  ;;  %v3083_v32 = vsub.f32 %v12389_v59, %v9392_v20  ;;  %4470 = vmatpush.msrb.mxu3 %v3422_v21  ;;  %v12393_v20 = vld [vmem:[#allocation147_spill] sm:$0xff]  ;;  %v12394_v12 = vld [vmem:[#allocation133_spill] sm:$0xff] }
 0x383   : > { %3290 = vadd.xlane.f32.xlu2 %v3289_v17  ;;  %3242 = vadd.xlane.f32.xlu1 %v3241_v46  ;;  %v3549_v17 = vmul.f32 1.442695, %v3455_v24  ;;  %v9651_v46 = vpop.eup %6650  ;;  %v3581_v56 = vmul.f32 1.442695, %v3471_v61  ;;  %v12392_v24 = vld [vmem:[#allocation134_spill] sm:$0xff]  ;;  %v3421_v21 = vld [vmem:[%s9411_s18 + $0x60] sm:$0xff] }
 0x384   : > { %3338 = vadd.xlane.f32.xlu0 %v3337_v4  ;;  %v3517_v49 = vmul.f32 1.442695, %v3439_v43  ;;  %v9656_v4 = vpop.eup %6652  ;;  %6662 = vpow2.f32 %v3171_v9  ;;  %v3440_v43 = vsub.f32 %v12393_v20, %v9645_v48  ;;  %v3244_v9 = vsel %vm2640_vm1, %v9642_v26, 0.0  ;;  %4471 = vmatpush.msrb.mxu3 %v3421_v21 }
 0x385   : > { %12390 = vst [vmem:[#allocation41_spill] sm:$0xff] %v9656_v4  ;;  %v9663_v57 = vpop.eup %6654  ;;  %6664 = vpow2.f32 %v3549_v17  ;;  %v3205_v3 = vmul.f32 1.442695, %v3083_v32  ;;  %v3141_v17 = vmul.f32 1.442695, %v3051_v10 }
 0x386   : > { %v2896_v45 = vpop.xlane.xlu2 %2895  ;;  %v2928_v62 = vpop.xlane.xlu1 %2927  ;;  %3929 = vmatmul.f32.gmra.mxu1 %v9663_v57  ;;  %3994 = vmatmul.f32.gmra.mxu2 %v9656_v4  ;;  %6666 = vpow2.f32 %v3517_v49 }
 0x387   : > { %v9661_v19 = vmax.f32 %v12392_v24, %v2896_v45  ;;  %v2958_v23 = vpop.xlane.xlu0 %2957  ;;  %v9668_v59 = vmax.f32 %v12394_v12, %v2928_v62  ;;  %v9673_v0 = vpop.eup %6656  ;;  %v3173_v45 = vmul.f32 1.442695, %v3067_v44  ;;  %v3385_v24 = vsel %vm2640_vm1, %v9651_v46, 0.0 }
 0x388   : > { %v9671_v7 = vmax.f32 %v12395_v16, %v2958_v23  ;;  %12396 = vst [vmem:[#allocation89_spill] sm:$0xff] %v9673_v0  ;;  %4059 = vmatmul.f32.gmra.mxu3 %v9673_v0  ;;  %v3292_v44 = vsel %vm2640_vm1, %v9647_v6, 0.0  ;;  %6668 = vpow2.f32 %v3581_v56  ;;  %v9691_v32 = vpop.eup %6658  ;;  %v9693_v49 = vpop.f32.mrf.mxu0  ;;  %v3519_v23 = vmul.f32 1.442695, %v3440_v43  ;;  %v12398_v43 = vld [vmem:[#allocation12_spill] sm:$0xff] }
 0x389   : > { %v3456_v61 = vsub.f32 %v9039_v42, %v9661_v19  ;;  %v3472_v42 = vsub.f32 %v9042_v25, %v9668_v59  ;;  %v9695_v20 = vpop.eup %6660  ;;  %6670 = vpow2.f32 %v3173_v45  ;;  %v9699_v25 = vpop.f32.mrf.mxu1  ;;  %v3052_v21 = vsub.f32 %v12398_v43, %v9425_v50  ;;  %v12399_v45 = vld [vmem:[#allocation135_spill] sm:$0xff] }
 0x38a   : > { %v3487_v62 = vsub.f32 %v9052_v18, %v9671_v7  ;;  %v9697_v56 = vpop.eup %6662  ;;  %6672 = vpow2.f32 %v3205_v3  ;;  %12397 = vst [vmem:[#allocation128_spill] sm:$0xff] %v9699_v25  ;;  %v9733_v43 = vpop.f32.mrf.mxu2 }
 0x38b   : > { %3245 = vadd.xlane.f32.xlu2 %v3244_v9  ;;  %3386 = vadd.xlane.f32.xlu1 %v3385_v24  ;;  %v3551_v10 = vmul.f32 1.442695, %v3456_v61  ;;  %v9701_v18 = vpop.eup %6664  ;;  %6674 = vpow2.f32 %v3141_v17  ;;  %v3583_v16 = vmul.f32 1.442695, %v3472_v42  ;;  %v12402_v42 = vld [vmem:[#allocation14_spill] sm:$0xff]  ;;  %12403 = vst [vmem:[#allocation46_spill] sm:$0xff] %v9733_v43 }
 0x38c   : > { %3293 = vadd.xlane.f32.xlu0 %v3292_v44  ;;  %v3613_v12 = vmul.f32 1.442695, %v3487_v62  ;;  %v9703_v0 = vpop.eup %6666  ;;  %6676 = vpow2.f32 %v3519_v23  ;;  %v12401_v62 = vld [vmem:[#allocation11_spill] sm:$0xff]  ;;  %v3068_v50 = vsub.f32 %v12402_v42, %v9436_v1  ;;  %v3388_v23 = vsel %vm2640_vm1, %v9691_v32, 0.0 }
 0x38d   : > { %v3036_v25 = vsub.f32 %v12401_v62, %v9443_v37  ;;  %6678 = vpow2.f32 %v3551_v10  ;;  %3867 = vmatmul.f32.gmra.mxu0 %v9703_v0  ;;  %v3247_v1 = vsel %vm2640_vm1, %v9695_v20, 0.0 }
 0x38e   : > { %v2960_v9 = vpop.xlane.xlu1 %2959  ;;  %v3219_v24 = vpop.xlane.xlu2 %3218  ;;  %3932 = vmatmul.f32.gmra.mxu1 %v9701_v18  ;;  %6680 = vpow2.f32 %v3613_v12 }
 0x38f   : > { %v9708_v61 = vmax.f32 %v12399_v45, %v2960_v9  ;;  %v3618_v44 = vpop.xlane.xlu0 %3617  ;;  %v9710_v3 = vpop.eup %6668  ;;  %v3340_v9 = vsel %vm2640_vm1, %v9697_v56, 0.0  ;;  %6682 = vpow2.f32 %v3583_v16  ;;  %v3175_v16 = vmul.f32 1.442695, %v3068_v50 }
 0x390   : > { %12400 = vst [vmem:[#allocation96_spill] sm:$0xff] %v9710_v3  ;;  %v9716_v17 = vadd.f32 %v3618_v44, %v3219_v24  ;;  %3997 = vmatmul.f32.gmra.mxu2 %v9710_v3  ;;  %v9725_v37 = vpop.eup %6670  ;;  %v3143_v24 = vmul.f32 1.442695, %v3052_v21  ;;  %v3111_v44 = vmul.f32 1.442695, %v3036_v25  ;;  %v9739_v42 = vpop.f32.mrf.mxu0 }
 0x391   : > { %v3488_v10 = vsub.f32 %v9080_v33, %v9708_v61  ;;  %v9731_v12 = vpop.eup %6672  ;;  %12404 = vst [vmem:[#allocation47_spill] sm:$0xff] %v9739_v42  ;;  %v9741_v33 = vpop.f32.mrf.mxu1 }
 0x392   : > { %v9735_v45 = vpop.eup %6674  ;;  %12405 = vst [vmem:[#allocation101_spill] sm:$0xff] %v9741_v33  ;;  %6684 = vpow2.f32 %v3143_v24  ;;  %v12412_v33 = vld [vmem:[#allocation15_spill] sm:$0xff]  ;;  %v9763_v24 = vpop.f32.mrf.mxu3  ;;  %vm4590_vm3 = vweird.f32 %v9716_v17 }
 0x393   : > { %3389 = vadd.xlane.f32.xlu2 %v3388_v23  ;;  %3341 = vadd.xlane.f32.xlu1 %v3340_v9  ;;  %v9737_v62 = vpop.eup %6676  ;;  %v3615_v9 = vmul.f32 1.442695, %v3488_v10  ;;  %6686 = vpow2.f32 %v3111_v44  ;;  %v3084_v42 = vsub.f32 %v12412_v33, %v9489_v29  ;;  %v12413_v10 = vld [vmem:[#allocation17_spill] sm:$0xff]  ;;  %12414 = vst [vmem:[#allocation107_spill] sm:$0xff] %v9763_v24  ;;  %v3295_v29 = vsel %vm2640_vm1, %v9735_v45, 0.0 }
 0x394   : > { %3248 = vadd.xlane.f32.xlu0 %v3247_v1  ;;  %v9743_v23 = vpop.eup %6678  ;;  %v12409_v1 = vld [vmem:[#allocation16_spill] sm:$0xff]  ;;  %6688 = vpow2.f32 %v3175_v16  ;;  %v3391_v44 = vsel %vm2640_vm1, %v9731_v12, 0.0 }
 0x395   : > { %v9749_v21 = vpop.eup %6680  ;;  %v3037_v25 = vsub.f32 %v12409_v1, %v9467_v60  ;;  %3870 = vmatmul.f32.gmra.mxu0 %v9737_v62  ;;  %v3343_v60 = vsel %vm2640_vm1, %v9725_v37, 0.0  ;;  %6690 = vpow2.f32 %v3615_v9 }
 0x396   : > { %v9745_v3 = vpop.xlane.xlu1 %3314  ;;  %v9747_v4 = vpop.xlane.xlu2 %3362  ;;  %12408 = vst [vmem:[#allocation102_spill] sm:$0xff] %v9749_v21  ;;  %3935 = vmatmul.f32.gmra.mxu1 %v9743_v23  ;;  %4062 = vmatmul.f32.gmra.mxu3 %v9749_v21 }
 0x397   : > { %12406 = vst [vmem:[#allocation45_spill] sm:$0xff] %v9745_v3  ;;  %v9753_v43 = vpop.xlane.xlu0 %3266  ;;  %v9755_v50 = vpop.eup %6682  ;;  %v3113_v16 = vmul.f32 1.442695, %v3037_v25 }
 0x398   : > { %12407 = vst [vmem:[#allocation94_spill] sm:$0xff] %v9747_v4  ;;  %v3053_v4 = vsub.f32 %v12413_v10, %v9482_v2  ;;  %4000 = vmatmul.f32.gmra.mxu2 %v9755_v50  ;;  %v3207_v2 = vmul.f32 1.442695, %v3084_v42  ;;  %v9773_v33 = vpop.eup %6684  ;;  %v9775_v10 = vpop.f32.mrf.mxu2 }
 0x399   : > { %12410 = vst [vmem:[#allocation49_spill] sm:$0xff] %v9753_v43  ;;  %v9777_v3 = vpop.f32.mrf.mxu0  ;;  %v9779_v21 = vpop.eup %6686  ;;  %6692 = vpow2.f32 %v3113_v16 }
 0x39a   : > { %12411 = vst [vmem:[#allocation50_spill] sm:$0xff] %v9755_v50  ;;  %v3145_v1 = vmul.f32 1.442695, %v3053_v4  ;;  %v9783_v9 = vpop.eup %6688  ;;  %6694 = vpow2.f32 %v3207_v2  ;;  %v12420_v4 = vld [vmem:[#allocation20_spill] sm:$0xff]  ;;  %v9810_v2 = vpop.f32.mrf.mxu3 }
 0x39b   : > { %3344 = vadd.xlane.f32.xlu2 %v3343_v60  ;;  %3296 = vadd.xlane.f32.xlu1 %v3295_v29  ;;  %12415 = vst [vmem:[#allocation48_spill] sm:$0xff] %v9775_v10  ;;  %v12417_v60 = vld [vmem:[#allocation18_spill] sm:$0xff]  ;;  %v9787_v29 = vpop.f32.mrf.mxu1  ;;  %v3069_v10 = vsub.f32 %v12420_v4, %v9529_v63  ;;  %v3298_v63 = vsel %vm2640_vm1, %v9773_v33, 0.0 }
 0x39c   : > { %3392 = vadd.xlane.f32.xlu0 %v3391_v44  ;;  %v3085_v25 = vsub.f32 %v12417_v60, %v9519_v8  ;;  %12418 = vst [vmem:[#allocation136_spill] sm:$0xff] %v9787_v29  ;;  %v9789_v44 = vpop.eup %6690  ;;  %6696 = vpow2.f32 %v3145_v1  ;;  %v12421_v8 = vld [vmem:[#allocation19_spill] sm:$0xff] }
 0x39d   : > { %12419 = vst [vmem:[#allocation108_spill] sm:$0xff] %v9789_v44  ;;  %6321 = vmatmul.msk.f32.vlgmr.msrb.gmra.mxu0 %vm2640_vm1, %v9064_v34  ;;  %v3038_v16 = vsub.f32 %v12421_v8, %v9522_v40  ;;  %v3250_v34 = vsel %vm2640_vm1, %v9779_v21, 0.0  ;;  %v3177_v40 = vmul.f32 1.442695, %v3069_v10  ;;  %v12427_v10 = vld [vmem:[#allocation21_spill] sm:$0xff] }
 0x39e   : > { %v3620_v43 = vpop.xlane.xlu1 %3619  ;;  %v9781_v24 = vpop.xlane.xlu2 %3317  ;;  %6337 = vmatmul.msk.f32.vlgmr.msrb.gmra.mxu1 %vm2640_vm1, %v9098_v5  ;;  %4065 = vmatmul.f32.gmra.mxu3 %v9789_v44  ;;  %v3346_v5 = vsel %vm2640_vm1, %v9783_v9, 0.0  ;;  %12422 = vst [vmem:[#allocation52_spill] sm:$0xff] %v9810_v2  ;;  %v12428_v2 = vld [vmem:[#allocation75_spill] sm:$0xff] }
 0x39f   : > { %12416 = vst [vmem:[#allocation100_spill] sm:$0xff] %v9781_v24  ;;  %v3222_v42 = vpop.xlane.xlu0 %3221  ;;  %v9812_v1 = vpop.eup %6692  ;;  %v3115_v60 = vmul.f32 1.442695, %v3038_v16  ;;  %v3054_v16 = vsub.f32 %v12427_v10, %v9573_v27 }
 0x3a0   : > { %v9797_v24 = vadd.f32 %v3620_v43, %v3222_v42  ;;  %6353 = vmatmul.msk.f32.vlgmr.msrb.gmra.mxu2 %vm2640_vm1, %v9103_v31  ;;  %v3209_v43 = vmul.f32 1.442695, %v3085_v25  ;;  %v9814_v31 = vpop.f32.mrf.mxu2  ;;  %v9816_v42 = vpop.eup %6694  ;;  %v3253_v27 = vsel %vm2640_vm1, %v9812_v1, 0.0 }
 0x3a1   : > { %12423 = vst [vmem:[#allocation54_spill] sm:$0xff] %v9814_v31  ;;  %v9824_v44 = vpop.f32.mrf.mxu0  ;;  %v12429_v31 = vld [vmem:[#allocation76_spill] sm:$0xff] }
 0x3a2   : > { %6698 = vpow2.f32 %v3209_v43  ;;  %v12430_v43 = vld [vmem:[#allocation26_spill] sm:$0xff]  ;;  %vm4604_vm7 = vweird.f32 %v9797_v24 }
 0x3a3   : > { %3299 = vadd.xlane.f32.xlu2 %v3298_v63  ;;  %3251 = vadd.xlane.f32.xlu1 %v3250_v34  ;;  %v9820_v63 = vpop.eup %6696  ;;  %v12425_v34 = vld [vmem:[#allocation25_spill] sm:$0xff]  ;;  %6700 = vpow2.f32 %v3177_v40  ;;  %v9836_v29 = vpop.f32.mrf.mxu1 }
 0x3a4   : > { %3347 = vadd.xlane.f32.xlu0 %v3346_v5  ;;  %v3070_v25 = vsub.f32 %v12425_v34, %v9555_v47  ;;  %6702 = vpow2.f32 %v3115_v60  ;;  %12431 = vst [vmem:[#allocation137_spill] sm:$0xff] %v9836_v29  ;;  %v12432_v47 = vld [vmem:[#allocation28_spill] sm:$0xff]  ;;  %v3301_v40 = vsel %vm2640_vm1, %v9820_v63, 0.0  ;;  %v9848_v60 = vpop.f32.mrf.mxu3 }
 0x3a5   : > { %6322 = vmatmul.msk.f32.gmra.mxu0 %vm2640_vm1, %v12428_v2  ;;  %v12433_v34 = vld [vmem:[#allocation92_spill] sm:$0xff]  ;;  %v3394_v2 = vsel %vm2640_vm1, %v9816_v42, 0.0  ;;  %12434 = vst [vmem:[#allocation106_spill] sm:$0xff] %v9848_v60  ;;  %v12440_v60 = vld [vmem:[#allocation30_spill] sm:$0xff] }
 0x3a6   : > { %v9818_v4 = vpop.xlane.xlu1 %3269  ;;  %v3622_v8 = vpop.xlane.xlu2 %3621  ;;  %6338 = vmatmul.msk.f32.gmra.mxu1 %vm2640_vm1, %v12429_v31  ;;  %6369 = vmatmul.msk.f32.vlgmr.msrb.gmra.mxu3 %vm2640_vm1, %v12433_v34  ;;  %v3147_v31 = vmul.f32 1.442695, %v3054_v16 }
 0x3a7   : > { %12424 = vst [vmem:[#allocation51_spill] sm:$0xff] %v9818_v4  ;;  %v9826_v5 = vpop.xlane.xlu0 %3365  ;;  %v3086_v4 = vsub.f32 %v12430_v43, %v9566_v58  ;;  %v3179_v58 = vmul.f32 1.442695, %v3070_v25 }
 0x3a8   : > { %12426 = vst [vmem:[#allocation113_spill] sm:$0xff] %v9826_v5  ;;  %6354 = vmatmul.msk.f32.gmra.mxu2 %vm2640_vm1, %v12432_v47  ;;  %v9850_v10 = vpop.eup %6698  ;;  %v9852_v47 = vpop.f32.mrf.mxu2 }
 0x3a9   : > { %v3211_v43 = vmul.f32 1.442695, %v3086_v4  ;;  %12435 = vst [vmem:[#allocation139_spill] sm:$0xff] %v9852_v47  ;;  %v9854_v34 = vpop.eup %6700  ;;  %6704 = vpow2.f32 %v3179_v58  ;;  %v12439_v4 = vld [vmem:[#allocation24_spill] sm:$0xff]  ;;  %v12441_v58 = vld [vmem:[#allocation66_spill] sm:$0xff]  ;;  %v9874_v47 = vpop.f32.mrf.mxu0 }
 0x3aa   : > { %6706 = vpow2.f32 %v3147_v31  ;;  %v3039_v16 = vsub.f32 %v12439_v4, %v9619_v35  ;;  %v3349_v35 = vsel %vm2640_vm1, %v9854_v34, 0.0 }
 0x3ab   : > { %3254 = vadd.xlane.f32.xlu2 %v3253_v27  ;;  %3395 = vadd.xlane.f32.xlu1 %v3394_v2  ;;  %v9858_v27 = vpop.eup %6702  ;;  %v12437_v2 = vld [vmem:[#allocation65_spill] sm:$0xff]  ;;  %6708 = vpow2.f32 %v3211_v43 }
 0x3ac   : > { %3302 = vadd.xlane.f32.xlu0 %v3301_v40  ;;  %v3055_v25 = vsub.f32 %v12437_v2, %v9595_v51  ;;  %v9876_v51 = vpop.f32.mrf.mxu1  ;;  %v3117_v31 = vmul.f32 1.442695, %v3039_v16  ;;  %v9890_v4 = vpop.f32.mrf.mxu3  ;;  %v12449_v16 = vld [vmem:[#allocation67_spill] sm:$0xff] }
 0x3ad   : > { %6323 = vmatmul.msk.f32.gmra.mxu0 %vm2640_vm1, %v9222_v22  ;;  %12442 = vst [vmem:[#allocation114_spill] sm:$0xff] %v9876_v51  ;;  %v3397_v22 = vsel %vm2640_vm1, %v9850_v10, 0.0 }
 0x3ae   : > { %v9856_v5 = vpop.xlane.xlu2 %3272  ;;  %v3225_v29 = vpop.xlane.xlu1 %3224  ;;  %6339 = vmatmul.msk.f32.gmra.mxu1 %vm2640_vm1, %v12440_v60  ;;  %v3149_v60 = vmul.f32 1.442695, %v3055_v25  ;;  %12445 = vst [vmem:[#allocation119_spill] sm:$0xff] %v9890_v4 }
 0x3af   : > { %12436 = vst [vmem:[#allocation55_spill] sm:$0xff] %v9856_v5  ;;  %v9862_v50 = vadd.f32 %v3622_v8, %v3225_v29  ;;  %v9864_v40 = vpop.xlane.xlu0 %3320  ;;  %v3071_v5 = vsub.f32 %v12441_v58, %v9610_v53  ;;  %v12443_v29 = vld [vmem:[#allocation78_spill] sm:$0xff]  ;;  %v12444_v8 = vld [vmem:[#allocation97_spill] sm:$0xff]  ;;  %v3256_v53 = vsel %vm2640_vm1, %v9858_v27, 0.0  ;;  %v9888_v43 = vpop.eup %6704 }
 0x3b0   : > { %12438 = vst [vmem:[#allocation56_spill] sm:$0xff] %v9864_v40  ;;  %6355 = vmatmul.msk.f32.gmra.mxu2 %vm2640_vm1, %v12443_v29  ;;  %6370 = vmatmul.msk.f32.gmra.mxu3 %vm2640_vm1, %v12444_v8  ;;  %v9892_v58 = vpop.eup %6706  ;;  %6710 = vpow2.f32 %v3149_v60  ;;  %v9900_v51 = vpop.f32.mrf.mxu2  ;;  %v12451_v60 = vld [vmem:[#allocation69_spill] sm:$0xff] }
 0x3b1   : > { %v3181_v2 = vmul.f32 1.442695, %v3071_v5  ;;  %v9896_v40 = vpop.eup %6708  ;;  %12448 = vst [vmem:[#allocation112_spill] sm:$0xff] %v9900_v51  ;;  %6712 = vpow2.f32 %v3117_v31  ;;  %v3087_v5 = vsub.f32 %v12449_v16, %v9671_v7  ;;  %v3056_v4 = vsub.f32 %v12451_v60, %v9661_v19  ;;  %v12453_v31 = vld [vmem:[#allocation37_spill] sm:$0xff] }
 0x3b2   : > { %v3352_v7 = vsel %vm2640_vm1, %v9888_v43, 0.0  ;;  %vm4618_vm11 = vweird.f32 %v9862_v50 }
 0x3b3   : > { %3398 = vadd.xlane.f32.xlu2 %v3397_v22  ;;  %3350 = vadd.xlane.f32.xlu1 %v3349_v35  ;;  %v12447_v22 = vld [vmem:[#allocation68_spill] sm:$0xff]  ;;  %6714 = vpow2.f32 %v3181_v2  ;;  %v3400_v2 = vsel %vm2640_vm1, %v9896_v40, 0.0 }
 0x3b4   : > { %3257 = vadd.xlane.f32.xlu0 %v3256_v53  ;;  %v3040_v35 = vsub.f32 %v12447_v22, %v9645_v48  ;;  %v12450_v53 = vld [vmem:[#allocation105_spill] sm:$0xff]  ;;  %v9912_v48 = vpop.f32.mrf.mxu0 }
 0x3b5   : > { %6324 = vmatmul.msk.f32.gmra.mxu0 %vm2640_vm1, %v12450_v53  ;;  %v12452_v22 = vld [vmem:[#allocation109_spill] sm:$0xff]  ;;  %v3151_v53 = vmul.f32 1.442695, %v3056_v4 }
 0x3b6   : > { %v3228_v29 = vpop.xlane.xlu2 %3227  ;;  %v9894_v8 = vpop.xlane.xlu1 %3368  ;;  %6340 = vmatmul.msk.f32.gmra.mxu1 %vm2640_vm1, %v9296_v30  ;;  %v3304_v30 = vsel %vm2640_vm1, %v9892_v58, 0.0  ;;  %v3119_v19 = vmul.f32 1.442695, %v3040_v35  ;;  %v12458_v35 = vld [vmem:[#allocation77_spill] sm:$0xff] }
 0x3b7   : > { %12446 = vst [vmem:[#allocation53_spill] sm:$0xff] %v9894_v8  ;;  %v3624_v25 = vpop.xlane.xlu0 %3623  ;;  %v9926_v16 = vpop.eup %6710 }
 0x3b8   : > { %v9908_v8 = vadd.f32 %v3624_v25, %v3228_v29  ;;  %6356 = vmatmul.msk.f32.gmra.mxu2 %vm2640_vm1, %v12452_v22  ;;  %6371 = vmatmul.msk.f32.gmra.mxu3 %vm2640_vm1, %v12453_v31  ;;  %v9924_v29 = vpop.f32.mrf.mxu1  ;;  %v3213_v25 = vmul.f32 1.442695, %v3087_v5  ;;  %v9928_v60 = vpop.eup %6712  ;;  %6716 = vpow2.f32 %v3119_v19  ;;  %v3307_v5 = vsel %vm2640_vm1, %v9926_v16, 0.0 }
 0x3b9   : > { %v9934_v51 = vpop.eup %6714  ;;  %v9944_v4 = vpop.f32.mrf.mxu2 }
 0x3ba   : > { %6718 = vpow2.f32 %v3213_v25  ;;  %vm4632_vm15 = vweird.f32 %v9908_v8 }
 0x3bb   : > { %3353 = vadd.xlane.f32.xlu2 %v3352_v7  ;;  %3305 = vadd.xlane.f32.xlu1 %v3304_v30  ;;  %v9936_v7 = vpop.f32.mrf.mxu3  ;;  %6720 = vpow2.f32 %v3151_v53 }
 0x3bc   : > { %3401 = vadd.xlane.f32.xlu0 %v3400_v2  ;;  %12456 = vst [vmem:[#allocation120_spill] sm:$0xff] %v9936_v7  ;;  %v3259_v2 = vsel %vm2640_vm1, %v9928_v60, 0.0  ;;  %v12462_v7 = vld [vmem:[#allocation71_spill] sm:$0xff] }
 0x3bd   : > { %6325 = vmatmul.msk.f32.gmra.mxu0 %vm2640_vm1, %v9337_v39  ;;  %v3355_v39 = vsel %vm2640_vm1, %v9934_v51, 0.0 }
 0x3be   : > { %v9930_v22 = vpop.xlane.xlu2 %3371  ;;  %v9932_v31 = vpop.xlane.xlu1 %3323  ;;  %6341 = vmatmul.msk.f32.gmra.mxu1 %vm2640_vm1, %v9378_v28 }
 0x3bf   : > { %12454 = vst [vmem:[#allocation143_spill] sm:$0xff] %v9930_v22  ;;  %v9938_v30 = vpop.xlane.xlu0 %3275  ;;  %v9956_v28 = vpop.f32.mrf.mxu0 }
 0x3c0   : > { %12455 = vst [vmem:[#allocation138_spill] sm:$0xff] %v9932_v31  ;;  %6357 = vmatmul.msk.f32.gmra.mxu2 %vm2640_vm1, %v9339_v14  ;;  %6372 = vmatmul.msk.f32.gmra.mxu3 %vm2640_vm1, %v12458_v35  ;;  %v9958_v19 = vpop.eup %6716  ;;  %v9960_v14 = vpop.f32.mrf.mxu1 }
 0x3c1   : > { %12457 = vst [vmem:[#allocation58_spill] sm:$0xff] %v9938_v30  ;;  %v9962_v25 = vpop.eup %6718 }
 0x3c2   : > { %12459 = vst [vmem:[#allocation59_spill] sm:$0xff] %v9960_v14  ;;  %v9966_v22 = vpop.eup %6720 }
 0x3c3   : > { %3308 = vadd.xlane.f32.xlu2 %v3307_v5  ;;  %3260 = vadd.xlane.f32.xlu1 %v3259_v2  ;;  %v12461_v5 = vld [vmem:[#allocation70_spill] sm:$0xff]  ;;  %v9970_v31 = vpop.f32.mrf.mxu3 }
 0x3c4   : > { %3356 = vadd.xlane.f32.xlu0 %v3355_v39  ;;  %v3072_v2 = vsub.f32 %v12461_v5, %v9668_v59  ;;  %v3088_v39 = vsub.f32 %v12462_v7, %v9708_v61  ;;  %v3262_v59 = vsel %vm2640_vm1, %v9958_v19, 0.0  ;;  %v3403_v61 = vsel %vm2640_vm1, %v9962_v25, 0.0 }
 0x3c5   : > { %6326 = vmatmul.msk.f32.gmra.mxu0 %vm2640_vm1, %v9427_v36 }
 0x3c6   : > { %v9964_v53 = vpop.xlane.xlu2 %3326  ;;  %v3626_v35 = vpop.xlane.xlu1 %3625  ;;  %6342 = vmatmul.msk.f32.gmra.mxu1 %vm2640_vm1, %v9420_v52  ;;  %v3310_v52 = vsel %vm2640_vm1, %v9966_v22, 0.0  ;;  %v3183_v36 = vmul.f32 1.442695, %v3072_v2  ;;  %v3215_v7 = vmul.f32 1.442695, %v3088_v39  ;;  %v12468_v39 = vld [vmem:[#allocation88_spill] sm:$0xff] }
 0x3c7   : > { %12460 = vst [vmem:[#allocation125_spill] sm:$0xff] %v9964_v53  ;;  %v3231_v30 = vpop.xlane.xlu0 %3230  ;;  %v9980_v53 = vpop.f32.mrf.mxu2 }
 0x3c8   : > { %v9978_v14 = vadd.f32 %v3626_v35, %v3231_v30  ;;  %6358 = vmatmul.msk.f32.gmra.mxu2 %vm2640_vm1, %v9422_v15  ;;  %6373 = vmatmul.msk.f32.gmra.mxu3 %vm2640_vm1, %v9376_v55  ;;  %v9992_v30 = vpop.f32.mrf.mxu0  ;;  %v9994_v15 = vpop.f32.mrf.mxu1  ;;  %6722 = vpow2.f32 %v3183_v36  ;;  %v12471_v36 = vld [vmem:[#allocation79_spill] sm:$0xff] }
 0x3c9   : > { %12463 = vst [vmem:[#allocation57_spill] sm:$0xff] %v9994_v15  ;;  %6724 = vpow2.f32 %v3215_v7  ;;  %v12473_v7 = vld [vmem:[#allocation98_spill] sm:$0xff] }
 0x3ca   : > { %6726 = vrcp.f32 %v9716_v17 }
 0x3cb   : > { %3263 = vadd.xlane.f32.xlu2 %v3262_v59  ;;  %3404 = vadd.xlane.f32.xlu1 %v3403_v61  ;;  %v12466_v59 = vld [vmem:[#allocation35_spill] sm:$0xff]  ;;  %v10004_v2 = vpop.f32.mrf.mxu3  ;;  %6728 = vrcp.f32 %v9797_v24 }
 0x3cc   : > { %3311 = vadd.xlane.f32.xlu0 %v3310_v52  ;;  %12467 = vst [vmem:[#allocation126_spill] sm:$0xff] %v10004_v2  ;;  %v12469_v61 = vld [vmem:[#allocation87_spill] sm:$0xff]  ;;  %v12470_v52 = vld [vmem:[#allocation36_spill] sm:$0xff]  ;;  %6730 = vrcp.f32 %v9862_v50 }
 0x3cd   : > { %6327 = vmatmul.msk.f32.gmra.mxu0 %vm2640_vm1, %v9464_v11  ;;  %6732 = vrcp.f32 %v9908_v8 }
 0x3ce   : > { %v9996_v35 = vpop.xlane.xlu1 %3278  ;;  %v3628_v55 = vpop.xlane.xlu2 %3627  ;;  %6343 = vmatmul.msk.f32.gmra.mxu1 %vm2640_vm1, %v12466_v59  ;;  %6734 = vrcp.f32 %v9978_v14 }
 0x3cf   : > { %12464 = vst [vmem:[#allocation118_spill] sm:$0xff] %v9996_v35  ;;  %v9998_v5 = vpop.xlane.xlu0 %3374  ;;  %v10015_v11 = vpop.eup %6722 }
 0x3d0   : > { %12465 = vst [vmem:[#allocation141_spill] sm:$0xff] %v9998_v5  ;;  %6359 = vmatmul.msk.f32.gmra.mxu2 %vm2640_vm1, %v12468_v39  ;;  %6374 = vmatmul.msk.f32.gmra.mxu3 %vm2640_vm1, %v12469_v61  ;;  %v10012_v5 = vpop.f32.mrf.mxu2  ;;  %v10017_v35 = vpop.f32.mrf.mxu0 }
 0x3d1   : > { %12472 = vst [vmem:[#allocation61_spill] sm:$0xff] %v10012_v5  ;;  %v10019_v59 = vpop.eup %6724  ;;  %v10023_v15 = vpop.f32.mrf.mxu1  ;;  %v12479_v5 = vld [vmem:[#allocation123_spill] sm:$0xff] }
 0x3d2   : > { %12475 = vst [vmem:[#allocation131_spill] sm:$0xff] %v10023_v15 }
 0x3d3   : > { %3633 = vadd.xlane.f32.xlu2 %v12470_v52  ;;  %3631 = vadd.xlane.f32.xlu1 %v12471_v36  ;;  %v12477_v36 = vld [vmem:[#allocation121_spill] sm:$0xff] }
 0x3d4   : > { %3629 = vadd.xlane.f32.xlu0 %v12473_v7  ;;  %v12478_v7 = vld [vmem:[#allocation122_spill] sm:$0xff] }
 0x3d5   : > { %6328 = vmatmul.msk.f32.gmra.mxu0 %vm2640_vm1, %v12477_v36  ;;  %v12481_v36 = vld [vmem:[#allocation34_spill] sm:$0xff] }
 0x3d6   : > { %v10021_v2 = vpop.xlane.xlu2 %3281  ;;  %v3234_v39 = vpop.xlane.xlu1 %3233  ;;  %6344 = vmatmul.msk.f32.gmra.mxu1 %vm2640_vm1, %v9552_v41 }
 0x3d7   : > { %12474 = vst [vmem:[#allocation62_spill] sm:$0xff] %v10021_v2  ;;  %v10025_v61 = vadd.f32 %v3628_v55, %v3234_v39  ;;  %v10027_v52 = vpop.xlane.xlu0 %3329  ;;  %v3406_v2 = vsel %vm2640_vm1, %v10019_v59, 0.0  ;;  %v3358_v55 = vsel %vm2640_vm1, %v10015_v11, 0.0  ;;  %v10041_v39 = vpop.f32.mrf.mxu3 }
 0x3d8   : > { %12476 = vst [vmem:[#allocation60_spill] sm:$0xff] %v10027_v52  ;;  %6360 = vmatmul.msk.f32.gmra.mxu2 %vm2640_vm1, %v12478_v7  ;;  %6375 = vmatmul.msk.f32.gmra.mxu3 %vm2640_vm1, %v12479_v5  ;;  %v10044_v52 = vpop.f32.mrf.mxu2  ;;  %v10050_v15 = vpop.f32.mrf.mxu0 }
 0x3d9   : > { %12480 = vst [vmem:[#allocation124_spill] sm:$0xff] %v10041_v39  ;;  %6736 = vrcp.f32 %v10025_v61 }
 0x3da   : > { %12482 = vst [vmem:[#allocation146_spill] sm:$0xff] %v10044_v52  ;;  %v12490_v52 = vld [vmem:[#allocation127_spill] sm:$0xff] }
 0x3db   : > { %3407 = vadd.xlane.f32.xlu2 %v3406_v2  ;;  %3359 = vadd.xlane.f32.xlu1 %v3358_v55  ;;  %v10058_v2 = vpop.f32.mrf.mxu1  ;;  %v12486_v55 = vld [vmem:[#allocation86_spill] sm:$0xff] }
 0x3dc   : > { %3635 = vadd.xlane.f32.xlu0 %v12481_v36  ;;  %12485 = vst [vmem:[#allocation13_spill] sm:$0xff] %v10058_v2  ;;  %v12487_v36 = vld [vmem:[#allocation38_spill] sm:$0xff] }
 0x3dd   : > { %6329 = vmatmul.msk.f32.gmra.mxu0 %vm2640_vm1, %v9600_v13 }
 0x3de   : > { %v10046_v41 = vpop.xlane.xlu2 %3236  ;;  %v10048_v7 = vpop.xlane.xlu1 %3377  ;;  %6345 = vmatmul.msk.f32.gmra.mxu1 %vm2640_vm1, %v9590_v54 }
 0x3df   : > { %12483 = vst [vmem:[#allocation132_spill] sm:$0xff] %v10048_v7  ;;  %v10052_v5 = vpop.xlane.xlu0 %3284  ;;  %v12488_v7 = vld [vmem:[#allocation117_spill] sm:$0xff]  ;;  %v10066_v39 = vpop.f32.mrf.mxu3 }
 0x3e0   : > { %12484 = vst [vmem:[#allocation64_spill] sm:$0xff] %v10052_v5  ;;  %6361 = vmatmul.msk.f32.gmra.mxu2 %vm2640_vm1, %v9592_v38  ;;  %6376 = vmatmul.msk.f32.gmra.mxu3 %vm2640_vm1, %v12486_v55  ;;  %v10073_v54 = vpop.f32.mrf.mxu2  ;;  %v10081_v38 = vpop.f32.mrf.mxu0 }
 0x3e1   : > { %12489 = vst [vmem:[#allocation63_spill] sm:$0xff] %v10066_v39 }
 0x3e2   : > { %12493 = vst [vmem:[#allocation133_spill] sm:$0xff] %v10073_v54 }
 0x3e3   : > { %3639 = vadd.xlane.f32.xlu2 %v12487_v36  ;;  %3637 = vadd.xlane.f32.xlu1 %v12488_v7  ;;  %v10083_v7 = vpop.f32.mrf.mxu1 }
 0x3e4   : > { %3641 = vadd.xlane.f32.xlu0 %v12490_v52  ;;  %v12494_v52 = vld [vmem:[#allocation44_spill] sm:$0xff] }
 0x3e5   : > { %6330 = vmatmul.msk.f32.gmra.mxu0 %vm2640_vm1, %v9642_v26 }
 0x3e6   : > { %v10069_v13 = vpop.xlane.xlu2 %3380  ;;  %v10071_v5 = vpop.xlane.xlu1 %3332  ;;  %6346 = vmatmul.msk.f32.gmra.mxu1 %vm2640_vm1, %v9647_v6 }
 0x3e7   : > { %12491 = vst [vmem:[#allocation134_spill] sm:$0xff] %v10069_v13  ;;  %v10075_v2 = vpop.xlane.xlu0 %3239  ;;  %v10092_v26 = vpop.f32.mrf.mxu3 }
 0x3e8   : > { %12492 = vst [vmem:[#allocation147_spill] sm:$0xff] %v10071_v5  ;;  %6362 = vmatmul.msk.f32.gmra.mxu2 %vm2640_vm1, %v9697_v56  ;;  %6377 = vmatmul.msk.f32.gmra.mxu3 %vm2640_vm1, %v9651_v46  ;;  %v10104_v46 = vpop.f32.mrf.mxu2  ;;  %v12499_v56 = vld [vmem:[#allocation148_spill] sm:$0xff] }
 0x3e9   : > { %12495 = vst [vmem:[#allocation130_spill] sm:$0xff] %v10092_v26 }
 0x3ea   : > { %12498 = vst [vmem:[#allocation11_spill] sm:$0xff] %v10104_v46 }
 0x3eb   : > { %3645 = vadd.xlane.f32.xlu2 %v9703_v0  ;;  %3643 = vadd.xlane.f32.xlu1 %v12494_v52  ;;  %v10106_v0 = vpop.f32.mrf.mxu0  ;;  %v10114_v52 = vpop.f32.mrf.mxu1 }
 0x3ec   : > { %3647 = vadd.xlane.f32.xlu0 %v9737_v62  ;;  %v12500_v62 = vld [vmem:[#allocation140_spill] sm:$0xff] }
 0x3ed   : > { %6331 = vmatmul.msk.f32.gmra.mxu0 %vm2640_vm1, %v9695_v20  ;;  %v12501_v20 = vld [vmem:[#allocation23_spill] sm:$0xff] }
 0x3ee   : > { %v10094_v55 = vpop.xlane.xlu2 %3335  ;;  %v10096_v6 = vpop.xlane.xlu1 %3287  ;;  %6347 = vmatmul.msk.f32.gmra.mxu1 %vm2640_vm1, %v9735_v45 }
 0x3ef   : > { %12496 = vst [vmem:[#allocation12_spill] sm:$0xff] %v10094_v55  ;;  %v10098_v36 = vpop.xlane.xlu0 %3383 }
 0x3f0   : > { %12497 = vst [vmem:[#allocation135_spill] sm:$0xff] %v10098_v36  ;;  %6363 = vmatmul.msk.f32.gmra.mxu2 %vm2640_vm1, %v9725_v37  ;;  %6378 = vmatmul.msk.f32.gmra.mxu3 %vm2640_vm1, %v9691_v32  ;;  %v10123_v36 = vpop.f32.mrf.mxu3  ;;  %v12504_v32 = vld [vmem:[#allocation93_spill] sm:$0xff]  ;;  %v12505_v37 = vld [vmem:[#allocation27_spill] sm:$0xff] }
 0x3f1   : > { %12503 = vst [vmem:[#allocation16_spill] sm:$0xff] %v10123_v36 }
 0x3f3   : > { %3651 = vadd.xlane.f32.xlu2 %v12499_v56  ;;  %3649 = vadd.xlane.f32.xlu1 %v12500_v62  ;;  %v10135_v56 = vpop.f32.mrf.mxu2  ;;  %v10137_v62 = vpop.f32.mrf.mxu0 }
 0x3f4   : > { %3653 = vadd.xlane.f32.xlu0 %v12501_v20  ;;  %12506 = vst [vmem:[#allocation15_spill] sm:$0xff] %v10135_v56  ;;  %v12507_v20 = vld [vmem:[#allocation32_spill] sm:$0xff] }
 0x3f5   : > { %6332 = vmatmul.msk.f32.gmra.mxu0 %vm2640_vm1, %v9779_v21  ;;  %v10140_v21 = vpop.f32.mrf.mxu1 }
 0x3f6   : > { %v10117_v26 = vpop.xlane.xlu2 %3290  ;;  %v10119_v45 = vpop.xlane.xlu1 %3242  ;;  %6348 = vmatmul.msk.f32.gmra.mxu1 %vm2640_vm1, %v9773_v33  ;;  %12508 = vst [vmem:[#allocation17_spill] sm:$0xff] %v10140_v21 }
 0x3f7   : > { %v10121_v39 = vpop.xlane.xlu0 %3338 }
 0x3f8   : > { %12502 = vst [vmem:[#allocation14_spill] sm:$0xff] %v10121_v39  ;;  %6364 = vmatmul.msk.f32.gmra.mxu2 %vm2640_vm1, %v9783_v9  ;;  %6379 = vmatmul.msk.f32.gmra.mxu3 %vm2640_vm1, %v9731_v12  ;;  %v12511_v12 = vld [vmem:[#allocation104_spill] sm:$0xff] }
 0x3f9   : > { %v10148_v13 = vpop.f32.mrf.mxu3 }
 0x3fa   : > { %12510 = vst [vmem:[#allocation20_spill] sm:$0xff] %v10148_v13 }
 0x3fb   : > { %3657 = vadd.xlane.f32.xlu2 %v12504_v32  ;;  %3655 = vadd.xlane.f32.xlu1 %v12505_v37  ;;  %v12512_v32 = vld [vmem:[#allocation74_spill] sm:$0xff] }
 0x3fc   : > { %3659 = vadd.xlane.f32.xlu0 %v12507_v20  ;;  %v12514_v20 = vld [vmem:[#allocation40_spill] sm:$0xff] }
 0x3fd   : > { %6333 = vmatmul.msk.f32.gmra.mxu0 %vm2640_vm1, %v9812_v1  ;;  %v10164_v1 = vpop.f32.mrf.mxu0 }
 0x3fe   : > { %v10142_v36 = vpop.xlane.xlu2 %3245  ;;  %v10144_v33 = vpop.xlane.xlu1 %3386  ;;  %6349 = vmatmul.msk.f32.gmra.mxu1 %vm2640_vm1, %v9820_v63  ;;  %12515 = vst [vmem:[#allocation25_spill] sm:$0xff] %v10164_v1 }
 0x3ff   : > { %12509 = vst [vmem:[#allocation18_spill] sm:$0xff] %v10144_v33  ;;  %v10146_v9 = vpop.xlane.xlu0 %3293 }
 0x400   : > { %6365 = vmatmul.msk.f32.gmra.mxu2 %vm2640_vm1, %v9854_v34  ;;  %6380 = vmatmul.msk.f32.gmra.mxu3 %vm2640_vm1, %v9816_v42  ;;  %v10178_v42 = vpop.eup %6726 }
 0x401   : > { %v10161_v37 = vpop.f32.mrf.mxu2  ;;  %vm4591_vm2 = vweird.f32 %v10178_v42 }
 0x402   : > { %12513 = vst [vmem:[#allocation19_spill] sm:$0xff] %v10161_v37  ;;  %vm4592_vm4 = vmor %vm4590_vm3, %vm4591_vm2 }
 0x403   : > { %3663 = vadd.xlane.f32.xlu2 %v12511_v12  ;;  %3661 = vadd.xlane.f32.xlu1 %v12512_v32  ;;  %v10166_v13 = vpop.f32.mrf.mxu1  ;;  %v10184_v12 = vpop.f32.mrf.mxu3  ;;  %v12520_v32 = vld [vmem:[#allocation83_spill] sm:$0xff] }
 0x404   : > { %3665 = vadd.xlane.f32.xlu0 %v12514_v20  ;;  %12516 = vst [vmem:[#allocation21_spill] sm:$0xff] %v10166_v13  ;;  %v12521_v20 = vld [vmem:[#allocation80_spill] sm:$0xff]  ;;  %v12584_v13 = vld [vmem:[#allocation99_spill] sm:$0xff] }
 0x405   : > { %6334 = vmatmul.msk.f32.gmra.mxu0 %vm2640_vm1, %v9858_v27  ;;  %12519 = vst [vmem:[#allocation26_spill] sm:$0xff] %v10184_v12 }
 0x406   : > { %v10168_v63 = vpop.xlane.xlu2 %3389  ;;  %v10170_v34 = vpop.xlane.xlu1 %3341  ;;  %6350 = vmatmul.msk.f32.gmra.mxu1 %vm2640_vm1, %v9892_v58  ;;  %v4586_v58 = vmul.f32 %v10178_v42, %v9716_v17 }
 0x407   : > { %12517 = vst [vmem:[#allocation75_spill] sm:$0xff] %v10168_v63  ;;  %v10172_v33 = vpop.xlane.xlu0 %3248  ;;  %v12523_v63 = vld [vmem:[#allocation42_spill] sm:$0xff] }
 0x408   : > { %12518 = vst [vmem:[#allocation76_spill] sm:$0xff] %v10170_v34  ;;  %6366 = vmatmul.msk.f32.gmra.mxu2 %vm2640_vm1, %v9888_v43  ;;  %6381 = vmatmul.msk.f32.gmra.mxu3 %vm2640_vm1, %v9850_v10 }
 0x409   : > { %v10189_v27 = vpop.f32.mrf.mxu2 }
 0x40a   : > { %12522 = vst [vmem:[#allocation28_spill] sm:$0xff] %v10189_v27  ;;  %v10196_v43 = vpop.f32.mrf.mxu0 }
 0x40b   : > { %3669 = vadd.xlane.f32.xlu2 %v12520_v32  ;;  %3667 = vadd.xlane.f32.xlu1 %v12521_v20  ;;  %v10194_v39 = vpop.f32.mrf.mxu1  ;;  %12525 = vst [vmem:[#allocation65_spill] sm:$0xff] %v10196_v43  ;;  %v4587_v20 = vsub.f32 1.0, %v4586_v58  ;;  %v12583_v43 = vld [vmem:[#allocation103_spill] sm:$0xff] }
 0x40c   : > { %3671 = vadd.xlane.f32.xlu0 %v12523_v63  ;;  %12524 = vst [vmem:[#allocation92_spill] sm:$0xff] %v10194_v39  ;;  %v10208_v63 = vpop.eup %6728 }
 0x40d   : > { %6335 = vmatmul.msk.f32.gmra.mxu0 %vm2640_vm1, %v9928_v60  ;;  %v4600_v60 = vmul.f32 %v10208_v63, %v9797_v24  ;;  %vm4605_vm6 = vweird.f32 %v10208_v63 }
 0x40e   : > { %v10198_v10 = vpop.xlane.xlu2 %3344  ;;  %v10200_v12 = vpop.xlane.xlu1 %3296  ;;  %6351 = vmatmul.msk.f32.gmra.mxu1 %vm2640_vm1, %v9926_v16  ;;  %vm4606_vm8 = vmor %vm4604_vm7, %vm4605_vm6 }
 0x40f   : > { %12526 = vst [vmem:[#allocation24_spill] sm:$0xff] %v10198_v10  ;;  %v10202_v32 = vpop.xlane.xlu0 %3392  ;;  %v12528_v10 = vld [vmem:[#allocation129_spill] sm:$0xff]  ;;  %v10220_v16 = vpop.f32.mrf.mxu3 }
 0x410   : > { %12527 = vst [vmem:[#allocation30_spill] sm:$0xff] %v10202_v32  ;;  %6367 = vmatmul.msk.f32.gmra.mxu2 %vm2640_vm1, %v9934_v51  ;;  %6382 = vmatmul.msk.f32.gmra.mxu3 %vm2640_vm1, %v9896_v40  ;;  %v4588_v51 = vmul.f32 %v10178_v42, %v4587_v20  ;;  %v10241_v20 = vpop.eup %6730 }
 0x411   : > { %12529 = vst [vmem:[#allocation66_spill] sm:$0xff] %v10220_v16  ;;  %vm4619_vm10 = vweird.f32 %v10241_v20 }
 0x412   : > { %v10227_v40 = vpop.f32.mrf.mxu0  ;;  %v4589_v16 = vadd.f32 %v10178_v42, %v4588_v51  ;;  %vm4620_vm12 = vmor %vm4618_vm11, %vm4619_vm10 }
 0x413   : > { %3675 = vadd.xlane.f32.xlu2 %v9663_v57  ;;  %3673 = vadd.xlane.f32.xlu1 %v12528_v10  ;;  %v10222_v58 = vpop.f32.mrf.mxu2  ;;  %v10225_v32 = vpop.f32.mrf.mxu1  ;;  %12532 = vst [vmem:[#allocation68_spill] sm:$0xff] %v10227_v40 }
 0x414   : > { %3677 = vadd.xlane.f32.xlu0 %v9701_v18  ;;  %12530 = vst [vmem:[#allocation78_spill] sm:$0xff] %v10222_v58  ;;  %v4601_v18 = vsub.f32 1.0, %v4600_v60  ;;  %v4596_v60 = vand.u32 2147483648, %v9716_v17 }
 0x415   : > { %12531 = vst [vmem:[#allocation97_spill] sm:$0xff] %v10225_v32  ;;  %6336 = vmatmul.msk.f32.gmra.mxu0 %vm2640_vm1, %v9958_v19  ;;  %v12536_v19 = vld [vmem:[#allocation144_spill] sm:$0xff] }
 0x416   : > { %v10229_v57 = vpop.xlane.xlu2 %3299  ;;  %v10231_v10 = vpop.xlane.xlu1 %3251  ;;  %6352 = vmatmul.msk.f32.gmra.mxu1 %vm2640_vm1, %v9966_v22  ;;  %v4594_v22 = vand.u32 2147483647, %v9716_v17  ;;  %v4602_v55 = vmul.f32 %v10208_v63, %v4601_v18  ;;  %v12541_v18 = vld [vmem:[#allocation73_spill] sm:$0xff] }
 0x417   : > { %12533 = vst [vmem:[#allocation67_spill] sm:$0xff] %v10229_v57  ;;  %v10233_v34 = vpop.xlane.xlu0 %3347 }
 0x418   : > { %12534 = vst [vmem:[#allocation105_spill] sm:$0xff] %v10233_v34  ;;  %6368 = vmatmul.msk.f32.gmra.mxu2 %vm2640_vm1, %v10015_v11  ;;  %6383 = vmatmul.msk.f32.gmra.mxu3 %vm2640_vm1, %v9962_v25  ;;  %v12535_v34 = vld [vmem:[#allocation142_spill] sm:$0xff]  ;;  %v4614_v11 = vmul.f32 %v10241_v20, %v9862_v50  ;;  %vm4595_vm5 = vcmp.eq.f32.partialorder %v4594_v22, 8.507059e+37 }
 0x419   : > { %v10258_v25 = vpop.f32.mrf.mxu3 }
 0x41a   : > { %12538 = vst [vmem:[#allocation109_spill] sm:$0xff] %v10258_v25  ;;  %v4134_v17 = vpop.f32.mrf.mxu0  ;;  %v4615_v25 = vsub.f32 1.0, %v4614_v11 }
 0x41b   : > { %3681 = vadd.xlane.f32.xlu2 %v12535_v34  ;;  %3679 = vadd.xlane.f32.xlu1 %v9743_v23  ;;  %v10256_v51 = vpop.f32.mrf.mxu2  ;;  %v4593_v34 = vsel %vm4592_vm4, %v10178_v42, %v4589_v16  ;;  %v10262_v5 = vpop.f32.mrf.mxu1  ;;  %v4597_v23 = vor.u32 1.1754944e-38, %v4596_v60  ;;  %v4135_v58 = vadd.f32 %v4134_v17, %v9693_v49  ;;  %v4603_v42 = vadd.f32 %v10208_v63, %v4602_v55 }
 0x41c   : > { %3683 = vadd.xlane.f32.xlu0 %v12536_v19  ;;  %12537 = vst [vmem:[#allocation69_spill] sm:$0xff] %v10256_v51  ;;  %v10273_v16 = vpop.eup %6732  ;;  %v4610_v49 = vand.u32 2147483648, %v9797_v24  ;;  %v4608_v55 = vand.u32 2147483647, %v9797_v24  ;;  %v4616_v11 = vmul.f32 %v10241_v20, %v4615_v25  ;;  %vm4646_vm4 = vweird.f32 %v9978_v14 }
 0x41d   : > { %v4598_v37 = vsel %vm4595_vm5, %v4597_v23, %v4593_v34  ;;  %v12545_v23 = vld [vmem:[#allocation47_spill] sm:$0xff]  ;;  %v10308_v25 = vpop.eup %6734  ;;  %vm4633_vm14 = vweird.f32 %v10273_v16 }
 0x41e   : > { %v10265_v19 = vpop.xlane.xlu2 %3254  ;;  %v10267_v27 = vpop.xlane.xlu1 %3395  ;;  %v5481_v56 = vmul.f32 %v4598_v37, %v4135_v58  ;;  %v12542_v37 = vld [vmem:[#allocation149_spill] sm:$0xff]  ;;  %v12543_v58 = vld [vmem:[#allocation72_spill] sm:$0xff]  ;;  %v4611_v17 = vor.u32 1.1754944e-38, %v4610_v49  ;;  %vm4609_vm9 = vcmp.eq.f32.partialorder %v4608_v55, 8.507059e+37  ;;  %v4622_v55 = vand.u32 2147483647, %v9862_v50 }
 0x41f   : > { %12539 = vst [vmem:[#allocation37_spill] sm:$0xff] %v10267_v27  ;;  %v10269_v51 = vpop.xlane.xlu0 %3302  ;;  %v12548_v49 = vld [vmem:[#allocation81_spill] sm:$0xff]  ;;  %vm4647_vm3 = vweird.f32 %v10308_v25 }
 0x420   : > { %12540 = vst [vmem:[#allocation77_spill] sm:$0xff] %v10269_v51  ;;  %6384 = vmatmul.msk.f32.gmra.mxu3 %vm2640_vm1, %v10019_v59  ;;  %v4628_v59 = vmul.f32 %v10273_v16, %v9908_v8  ;;  %vm4623_vm13 = vcmp.eq.f32.partialorder %v4622_v55, 8.507059e+37  ;;  %v12555_v55 = vld [vmem:[#allocation84_spill] sm:$0xff]  ;;  %vm4634_vm1 = vmor %vm4632_vm15, %vm4633_vm14 }
 0x421   : > { %5545 = vst.msk [vmem:[%s10279_s14] sm:$0xff] %vm1607_vm0, %v5481_v56  ;;  %v10291_v60 = vpop.f32.mrf.mxu3  ;;  %v4607_v56 = vsel %vm4606_vm8, %v10208_v63, %v4603_v42  ;;  %v4617_v63 = vadd.f32 %v10241_v20, %v4616_v11  ;;  %v4624_v42 = vand.u32 2147483648, %v9862_v50  ;;  %vm4648_vm5 = vmor %vm4646_vm4, %vm4647_vm3  ;;  %vm4660_vm8 = vweird.f32 %v10025_v61 }
 0x422   : > { %12544 = vst [vmem:[#allocation70_spill] sm:$0xff] %v10291_v60  ;;  %v4137_v34 = vpop.f32.mrf.mxu0  ;;  %v4612_v27 = vsel %vm4609_vm9, %v4611_v17, %v4607_v56  ;;  %v4629_v46 = vsub.f32 1.0, %v4628_v59  ;;  %v12549_v56 = vld [vmem:[#allocation33_spill] sm:$0xff]  ;;  %v4642_v59 = vmul.f32 %v10308_v25, %v9978_v14 }
 0x423   : > { %3687 = vadd.xlane.f32.xlu2 %v12541_v18  ;;  %3685 = vadd.xlane.f32.xlu1 %v12542_v37  ;;  %v10293_v22 = vpop.f32.mrf.mxu2  ;;  %v10297_v24 = vpop.f32.mrf.mxu1  ;;  %v4138_v18 = vadd.f32 %v4137_v34, %v12545_v23 }
 0x424   : > { %3689 = vadd.xlane.f32.xlu0 %v12543_v58  ;;  %v4630_v17 = vmul.f32 %v10273_v16, %v4629_v46  ;;  %v4643_v32 = vsub.f32 1.0, %v4642_v59  ;;  %v10338_v46 = vpop.eup %6736 }
 0x425   : > { %v5482_v54 = vmul.f32 %v4612_v27, %v4138_v18  ;;  %v12550_v27 = vld [vmem:[#allocation111_spill] sm:$0xff]  ;;  %v4625_v18 = vor.u32 1.1754944e-38, %v4624_v42  ;;  %v4636_v42 = vand.u32 2147483647, %v9908_v8  ;;  %v4656_v59 = vmul.f32 %v10338_v46, %v10025_v61 }
 0x426   : > { %v10300_v37 = vpop.xlane.xlu2 %3398  ;;  %v10302_v58 = vpop.xlane.xlu1 %3350  ;;  %vm4661_vm7 = vweird.f32 %v10338_v46 }
 0x427   : > { %12546 = vst [vmem:[#allocation71_spill] sm:$0xff] %v10300_v37  ;;  %v10304_v60 = vpop.xlane.xlu0 %3257  ;;  %vm4637_vm2 = vcmp.eq.f32.partialorder %v4636_v42, 8.507059e+37  ;;  %v12560_v42 = vld [vmem:[#allocation90_spill] sm:$0xff]  ;;  %vm4662_vm9 = vmor %vm4660_vm8, %vm4661_vm7 }
 0x428   : > { %12547 = vst [vmem:[#allocation35_spill] sm:$0xff] %v10302_v58 }
 0x429   : > { %5546 = vst.msk [vmem:[%s10279_s14 + $0x8] sm:$0xff] %vm1607_vm0, %v5482_v54  ;;  %v10323_v34 = vpop.f32.mrf.mxu3  ;;  %v4621_v54 = vsel %vm4620_vm12, %v10241_v20, %v4617_v63  ;;  %v4631_v20 = vadd.f32 %v10273_v16, %v4630_v17  ;;  %v4638_v63 = vand.u32 2147483648, %v9908_v8 }
 0x42a   : > { %v4140_v23 = vpop.f32.mrf.mxu0  ;;  %v4626_v37 = vsel %vm4623_vm13, %v4625_v18, %v4621_v54 }
 0x42b   : > { %3693 = vadd.xlane.f32.xlu2 %v12548_v49  ;;  %3691 = vadd.xlane.f32.xlu1 %v12549_v56  ;;  %v10321_v11 = vpop.f32.mrf.mxu2  ;;  %v10327_v50 = vpop.f32.mrf.mxu1  ;;  %v4141_v49 = vadd.f32 %v4140_v23, %v9777_v3  ;;  %v12554_v3 = vld [vmem:[#allocation115_spill] sm:$0xff]  ;;  %v4635_v17 = vsel %vm4634_vm1, %v10273_v16, %v4631_v20  ;;  %v4652_v20 = vand.u32 2147483648, %v9978_v14 }
 0x42c   : > { %3695 = vadd.xlane.f32.xlu0 %v12550_v27 }
 0x42d   : > { %v5483_v40 = vmul.f32 %v4626_v37, %v4141_v49  ;;  %v12556_v37 = vld [vmem:[#allocation39_spill] sm:$0xff]  ;;  %v4639_v49 = vor.u32 1.1754944e-38, %v4638_v63  ;;  %v4650_v63 = vand.u32 2147483647, %v9978_v14 }
 0x42e   : > { %v10330_v56 = vpop.xlane.xlu2 %3353  ;;  %v10332_v27 = vpop.xlane.xlu1 %3305 }
 0x42f   : > { %12551 = vst [vmem:[#allocation88_spill] sm:$0xff] %v10330_v56  ;;  %v10334_v58 = vpop.xlane.xlu0 %3401  ;;  %v4657_v56 = vsub.f32 1.0, %v4656_v59  ;;  %v12561_v59 = vld [vmem:[#allocation41_spill] sm:$0xff]  ;;  %vm4651_vm6 = vcmp.eq.f32.partialorder %v4650_v63, 8.507059e+37  ;;  %v4664_v63 = vand.u32 2147483647, %v10025_v61 }
 0x430   : > { %12552 = vst [vmem:[#allocation87_spill] sm:$0xff] %v10332_v27 }
 0x431   : > { %12553 = vst [vmem:[#allocation36_spill] sm:$0xff] %v10334_v58  ;;  %vm4665_vm10 = vcmp.eq.f32.partialorder %v4664_v63, 8.507059e+37 }
 0x432   : > { %5547 = vst.msk [vmem:[%s10279_s14 + $0x10] sm:$0xff] %vm1607_vm0, %v5483_v40  ;;  %v4644_v40 = vmul.f32 %v10308_v25, %v4643_v32  ;;  %v4143_v18 = vpop.f32.mrf.mxu0 }
 0x433   : > { %3699 = vadd.xlane.f32.xlu2 %v12554_v3  ;;  %3697 = vadd.xlane.f32.xlu1 %v12555_v55  ;;  %v10350_v54 = vpop.f32.mrf.mxu2  ;;  %v10354_v23 = vpop.f32.mrf.mxu1  ;;  %v4144_v8 = vadd.f32 %v4143_v18, %v9824_v44  ;;  %v12559_v44 = vld [vmem:[#allocation91_spill] sm:$0xff] }
 0x434   : > { %3701 = vadd.xlane.f32.xlu0 %v12556_v37  ;;  %v4640_v37 = vsel %vm4637_vm2, %v4639_v49, %v4635_v17  ;;  %v10363_v39 = vpop.f32.mrf.mxu3  ;;  %v4645_v32 = vadd.f32 %v10308_v25, %v4644_v40  ;;  %v4658_v40 = vmul.f32 %v10338_v46, %v4657_v56 }
 0x435   : > { %v5484_v16 = vmul.f32 %v4640_v37, %v4144_v8  ;;  %v4653_v8 = vor.u32 1.1754944e-38, %v4652_v20 }
 0x436   : > { %v10357_v3 = vpop.xlane.xlu2 %3308  ;;  %v10359_v55 = vpop.xlane.xlu1 %3260  ;;  %v4649_v17 = vsel %vm4648_vm5, %v10308_v25, %v4645_v32  ;;  %v4659_v56 = vadd.f32 %v10338_v46, %v4658_v40  ;;  %v4666_v32 = vand.u32 2147483648, %v10025_v61 }
 0x437   : > { %12557 = vst [vmem:[#allocation79_spill] sm:$0xff] %v10357_v3  ;;  %v10361_v58 = vpop.xlane.xlu0 %3356 }
 0x438   : > { %12558 = vst [vmem:[#allocation98_spill] sm:$0xff] %v10361_v58  ;;  %v4663_v40 = vsel %vm4662_vm9, %v10338_v46, %v4659_v56 }
 0x439   : > { %5548 = vst.msk [vmem:[%s10279_s14 + $0x18] sm:$0xff] %vm1607_vm0, %v5484_v16 }
 0x43a   : > { %v4146_v49 = vpop.f32.mrf.mxu0 }
 0x43b   : > { %3705 = vadd.xlane.f32.xlu2 %v12559_v44  ;;  %3703 = vadd.xlane.f32.xlu1 %v12560_v42  ;;  %v10377_v18 = vpop.f32.mrf.mxu1  ;;  %v4147_v37 = vadd.f32 %v4146_v49, %v9874_v47  ;;  %v4654_v44 = vsel %vm4651_vm6, %v4653_v8, %v4649_v17  ;;  %v12564_v47 = vld [vmem:[#allocation50_spill] sm:$0xff]  ;;  %v12565_v17 = vld [vmem:[#allocation96_spill] sm:$0xff]  ;;  %v12566_v49 = vld [vmem:[#allocation145_spill] sm:$0xff] }
 0x43c   : > { %3707 = vadd.xlane.f32.xlu0 %v12561_v59  ;;  %v10386_v59 = vpop.f32.mrf.mxu2  ;;  %v10391_v20 = vpop.f32.mrf.mxu3 }
 0x43d   : > { %v5485_v25 = vmul.f32 %v4654_v44, %v4147_v37  ;;  %v4667_v44 = vor.u32 1.1754944e-38, %v4666_v32  ;;  %v12570_v32 = vld [vmem:[#allocation128_spill] sm:$0xff] }
 0x43e   : > { %v10380_v16 = vpop.xlane.xlu2 %3263  ;;  %v10382_v14 = vpop.xlane.xlu1 %3404  ;;  %v10431_v63 = vadd.f32 %v10262_v5, %v12570_v32  ;;  %v12578_v5 = vld [vmem:[#allocation107_spill] sm:$0xff] }
 0x43f   : > { %12562 = vst [vmem:[#allocation121_spill] sm:$0xff] %v10382_v14  ;;  %v10384_v42 = vpop.xlane.xlu0 %3311  ;;  %v4668_v58 = vsel %vm4665_vm10, %v4667_v44, %v4663_v40  ;;  %v12573_v44 = vld [vmem:[#allocation46_spill] sm:$0xff] }
 0x440   : > { %12563 = vst [vmem:[#allocation122_spill] sm:$0xff] %v10384_v42 }
 0x441   : > { %5549 = vst.msk [vmem:[%s10279_s14 + $0x20] sm:$0xff] %vm1607_vm0, %v5485_v25 }
 0x442   : > { %v4149_v37 = vpop.f32.mrf.mxu0 }
 0x443   : > { %3711 = vadd.xlane.f32.xlu2 %v12564_v47  ;;  %3709 = vadd.xlane.f32.xlu1 %v12565_v17  ;;  %v10401_v8 = vpop.f32.mrf.mxu1  ;;  %v4150_v25 = vadd.f32 %v4149_v37, %v9912_v48  ;;  %v12567_v48 = vld [vmem:[#allocation150_spill] sm:$0xff] }
 0x444   : > { %3713 = vadd.xlane.f32.xlu0 %v12566_v49  ;;  %v10414_v56 = vpop.f32.mrf.mxu2 }
 0x445   : > { %v5486_v42 = vmul.f32 %v4668_v58, %v4150_v25  ;;  %v10423_v58 = vpop.f32.mrf.mxu3  ;;  %v10441_v25 = vadd.f32 %v10293_v22, %v12573_v44 }
 0x446   : > { %v3634_v47 = vpop.xlane.xlu2 %3633  ;;  %v3632_v14 = vpop.xlane.xlu1 %3631 }
 0x447   : > { %v10405_v61 = vadd.f32 %v3634_v47, %v10119_v45  ;;  %v10408_v17 = vadd.f32 %v3632_v14, %v10075_v2  ;;  %v3630_v49 = vpop.xlane.xlu0 %3629  ;;  %5550 = vst.msk [vmem:[%s10279_s14 + $0x28] sm:$0xff] %vm1607_vm0, %v5486_v42  ;;  %v12568_v45 = vld [vmem:[#allocation22_spill] sm:$0xff]  ;;  %v12569_v2 = vld [vmem:[#allocation29_spill] sm:$0xff] }
 0x448   : > { %v10411_v46 = vadd.f32 %v3630_v49, %v10046_v41  ;;  %12574 = vst [vmem:[#allocation86_spill] sm:$0xff] %v10441_v25  ;;  %v12575_v47 = vld [vmem:[#allocation101_spill] sm:$0xff]  ;;  %v12580_v25 = vld [vmem:[#allocation136_spill] sm:$0xff] }
 0x449   : > { %6738 = vrcp.f32 %v10405_v61  ;;  %v10445_v49 = vadd.f32 %v10297_v24, %v12575_v47  ;;  %v4692_v44 = vand.u32 2147483647, %v10408_v17  ;;  %v4694_v24 = vand.u32 2147483648, %v10408_v17 }
 0x44a   : > { %6740 = vrcp.f32 %v10408_v17  ;;  %v10427_v14 = vpop.f32.mrf.mxu0  ;;  %vm4674_vm11 = vweird.f32 %v10411_v46  ;;  %vm4688_vm12 = vweird.f32 %v10408_v17  ;;  %vm4702_vm1 = vweird.f32 %v10405_v61 }
 0x44b   : > { %3717 = vadd.xlane.f32.xlu2 %v12567_v48  ;;  %3715 = vadd.xlane.f32.xlu1 %v12568_v45  ;;  %6742 = vrcp.f32 %v10411_v46  ;;  %v10425_v41 = vpop.f32.mrf.mxu1  ;;  %v12576_v48 = vld [vmem:[#allocation48_spill] sm:$0xff]  ;;  %vm10486_vm13 = vcmp.eq.f32.partialorder %v4692_v44, 8.507059e+37  ;;  %v4708_v21 = vand.u32 2147483648, %v10405_v61 }
 0x44c   : > { %3719 = vadd.xlane.f32.xlu0 %v12569_v2  ;;  %v10449_v45 = vadd.f32 %v10321_v11, %v12576_v48  ;;  %v10453_v2 = vadd.f32 %v10323_v34, %v12578_v5  ;;  %v10464_v11 = vadd.f32 %v10327_v50, %v12580_v25  ;;  %v12581_v48 = vld [vmem:[#allocation54_spill] sm:$0xff]  ;;  %v12585_v50 = vld [vmem:[#allocation52_spill] sm:$0xff] }
 0x44d   : > { %v10468_v34 = vadd.f32 %v10350_v54, %v12581_v48  ;;  %v10479_v25 = vadd.f32 %v10363_v39, %v12585_v50  ;;  %v10499_v27 = vpop.f32.mrf.mxu3 }
 0x44e   : > { %v10433_v42 = vpop.xlane.xlu2 %3407  ;;  %v10435_v40 = vpop.xlane.xlu1 %3359  ;;  %12577 = vst [vmem:[#allocation38_spill] sm:$0xff] %v10449_v45 }
 0x44f   : > { %12571 = vst [vmem:[#allocation123_spill] sm:$0xff] %v10433_v42  ;;  %v10437_v37 = vpop.eup %6738  ;;  %v3636_v32 = vpop.xlane.xlu0 %3635 }
 0x450   : > { %12572 = vst [vmem:[#allocation34_spill] sm:$0xff] %v10435_v40  ;;  %v6741_v42 = vpop.eup %6740  ;;  %v4698_v40 = vmul.f32 %v10437_v37, %v10405_v61  ;;  %v10458_v22 = vadd.f32 %v3636_v32, %v10142_v36  ;;  %v4680_v32 = vand.u32 2147483648, %v10411_v46  ;;  %vm4703_vm4 = vweird.f32 %v10437_v37 }
 0x451   : > { %12579 = vst [vmem:[#allocation117_spill] sm:$0xff] %v10453_v2  ;;  %v6743_v47 = vpop.eup %6742  ;;  %v4684_v5 = vmul.f32 %v6741_v42, %v10408_v17  ;;  %v4678_v2 = vand.u32 2147483647, %v10411_v46  ;;  %vm4689_vm15 = vweird.f32 %v6741_v42  ;;  %vm10542_vm6 = vmor %vm4702_vm1, %vm4703_vm4 }
 0x452   : > { %12582 = vst [vmem:[#allocation127_spill] sm:$0xff] %v10468_v34  ;;  %v4699_v45 = vsub.f32 1.0, %v4698_v40  ;;  %v4670_v36 = vmul.f32 %v6743_v47, %v10411_v46  ;;  %6744 = vrcp.f32 %v10458_v22  ;;  %v12587_v40 = vld [vmem:[#allocation31_spill] sm:$0xff]  ;;  %v10484_v34 = vpop.f32.mrf.mxu2  ;;  %v4155_v50 = vpop.f32.mrf.mxu0  ;;  %vm4675_vm2 = vweird.f32 %v6743_v47  ;;  %vm4690_vm3 = vmor %vm4688_vm12, %vm4689_vm15  ;;  %v12592_v46 = vld [vmem:[#allocation110_spill] sm:$0xff] }
 0x453   : > { %3723 = vadd.xlane.f32.xlu2 %v12583_v43  ;;  %3721 = vadd.xlane.f32.xlu1 %v12584_v13  ;;  %12586 = vst [vmem:[#allocation44_spill] sm:$0xff] %v10479_v25  ;;  %v4685_v54 = vsub.f32 1.0, %v4684_v5  ;;  %v4695_v43 = vor.u32 1.1754944e-38, %v4694_v24  ;;  %vm10491_vm14 = vcmp.eq.f32.partialorder %v4678_v2, 8.507059e+37  ;;  %v10495_v5 = vpop.f32.mrf.mxu1  ;;  %v4681_v44 = vor.u32 1.1754944e-38, %v4680_v32  ;;  %vm4676_vm5 = vmor %vm4674_vm11, %vm4675_vm2 }
 0x454   : > { %3725 = vadd.xlane.f32.xlu0 %v12587_v40  ;;  %v4671_v48 = vsub.f32 1.0, %v4670_v36  ;;  %v4700_v13 = vmul.f32 %v10437_v37, %v4699_v45  ;;  %v4706_v24 = vand.u32 2147483647, %v10405_v61  ;;  %vm4716_vm9 = vweird.f32 %v10458_v22 }
 0x455   : > { %v4686_v25 = vmul.f32 %v6741_v42, %v4685_v54 }
 0x456   : > { %v4672_v36 = vmul.f32 %v6743_v47, %v4671_v48  ;;  %v3640_v40 = vpop.xlane.xlu2 %3639  ;;  %v3638_v51 = vpop.xlane.xlu1 %3637  ;;  %vm4707_vm7 = vcmp.eq.f32.partialorder %v4706_v24, 8.507059e+37 }
 0x457   : > { %v4687_v45 = vadd.f32 %v6741_v42, %v4686_v25  ;;  %v10502_v2 = vadd.f32 %v3640_v40, %v10231_v10  ;;  %v10505_v1 = vadd.f32 %v3638_v51, %v10172_v33  ;;  %v3642_v54 = vpop.xlane.xlu0 %3641  ;;  %v4701_v25 = vadd.f32 %v10437_v37, %v4700_v13  ;;  %v12594_v40 = vld [vmem:[#allocation137_spill] sm:$0xff] }
 0x458   : > { %v10508_v57 = vpop.eup %6744  ;;  %v4673_v48 = vadd.f32 %v6743_v47, %v4672_v36  ;;  %v10514_v32 = vadd.f32 %v3642_v54, %v10265_v19  ;;  %v4156_v10 = vadd.f32 %v4155_v50, %v9992_v30  ;;  %v4153_v19 = vadd.f32 %v10427_v14, %v9956_v28  ;;  %v12593_v36 = vld [vmem:[#allocation82_spill] sm:$0xff]  ;;  %v12597_v14 = vld [vmem:[#allocation85_spill] sm:$0xff] }
 0x459   : > { %v4712_v33 = vmul.f32 %v10508_v57, %v10458_v22  ;;  %v4691_v51 = vsel %vm4690_vm3, %v6741_v42, %v4687_v45  ;;  %6746 = vrcp.f32 %v10502_v2  ;;  %v10534_v30 = vadd.f32 %v10354_v23, %v12594_v40  ;;  %v12601_v45 = vld [vmem:[#allocation114_spill] sm:$0xff] }
 0x45a   : > { %v4677_v17 = vsel %vm4676_vm5, %v6743_v47, %v4673_v48  ;;  %v4696_v13 = vsel %vm10486_vm13, %v4695_v43, %v4691_v51  ;;  %6748 = vrcp.f32 %v10505_v1  ;;  %v12598_v47 = vld [vmem:[#allocation139_spill] sm:$0xff]  ;;  %v4705_v39 = vsel %vm10542_vm6, %v10437_v37, %v4701_v25  ;;  %v4158_v48 = vpop.f32.mrf.mxu0 }
 0x45b   : > { %3729 = vadd.xlane.f32.xlu2 %v12592_v46  ;;  %3727 = vadd.xlane.f32.xlu1 %v12593_v36  ;;  %v4682_v42 = vsel %vm10491_vm14, %v4681_v44, %v4677_v17  ;;  %v4713_v50 = vsub.f32 1.0, %v4712_v33  ;;  %v5488_v28 = vmul.f32 %v4696_v13, %v4156_v10  ;;  %v10549_v23 = vadd.f32 %v10386_v59, %v12598_v47  ;;  %v12599_v44 = vld [vmem:[#allocation106_spill] sm:$0xff]  ;;  %v12602_v10 = vld [vmem:[#allocation112_spill] sm:$0xff]  ;;  %v4378_v36 = vpop.f32.mrf.mxu2  ;;  %v4271_v24 = vpop.f32.mrf.mxu1 }
 0x45c   : > { %3731 = vadd.xlane.f32.xlu0 %v12597_v14  ;;  %v5487_v43 = vmul.f32 %v4682_v42, %v4153_v19  ;;  %6750 = vrcp.f32 %v10514_v32  ;;  %v10557_v61 = vadd.f32 %v10391_v20, %v12599_v44  ;;  %v10561_v54 = vadd.f32 %v10377_v18, %v12601_v45  ;;  %v12604_v19 = vld [vmem:[#allocation119_spill] sm:$0xff] }
 0x45d   : > { %5552 = vst.msk [vmem:[%s10279_s14 + $0x38] sm:$0xff] %vm1607_vm0, %v5488_v28  ;;  %v4709_v59 = vor.u32 1.1754944e-38, %v4708_v21  ;;  %v4714_v33 = vmul.f32 %v10508_v57, %v4713_v50  ;;  %v10568_v51 = vadd.f32 %v10414_v56, %v12602_v10  ;;  %v10572_v37 = vadd.f32 %v10423_v58, %v12604_v19  ;;  %v4488_v28 = vpop.f32.mrf.mxu3  ;;  %v12611_v45 = vld [vmem:[#allocation59_spill] sm:$0xff] }
 0x45e   : > { %12600 = vst [vmem:[#allocation148_spill] sm:$0xff] %v10557_v61  ;;  %v4159_v20 = vadd.f32 %v4158_v48, %v10017_v35  ;;  %v3646_v18 = vpop.xlane.xlu2 %3645  ;;  %v3644_v25 = vpop.xlane.xlu1 %3643  ;;  %vm4717_vm8 = vweird.f32 %v10508_v57  ;;  %v4720_v56 = vand.u32 2147483647, %v10458_v22  ;;  %v10594_v50 = vadd.f32 %v10401_v8, %v9924_v29  ;;  %v12607_v29 = vld [vmem:[#allocation43_spill] sm:$0xff]  ;;  %v12608_v8 = vld [vmem:[#allocation116_spill] sm:$0xff] }
 0x45f   : > { %12603 = vst [vmem:[#allocation140_spill] sm:$0xff] %v10568_v51  ;;  %v10577_v17 = vpop.eup %6746  ;;  %v4710_v21 = vsel %vm4707_vm7, %v4709_v59, %v4705_v39  ;;  %v10580_v13 = vadd.f32 %v3646_v18, %v10359_v55  ;;  %v3648_v46 = vpop.xlane.xlu0 %3647  ;;  %v4715_v55 = vadd.f32 %v10508_v57, %v4714_v33  ;;  %v10599_v14 = vadd.f32 %v3644_v25, %v10304_v60  ;;  %v12609_v60 = vld [vmem:[#allocation120_spill] sm:$0xff]  ;;  %vm10627_vm10 = vmor %vm4716_vm9, %vm4717_vm8 }
 0x460   : > { %12605 = vst [vmem:[#allocation23_spill] sm:$0xff] %v10572_v37  ;;  %v10584_v58 = vpop.eup %6748  ;;  %v4740_v35 = vmul.f32 %v10577_v17, %v10502_v2  ;;  %v5489_v40 = vmul.f32 %v4710_v21, %v4159_v20  ;;  %v10589_v42 = vadd.f32 %v3648_v46, %v10380_v16  ;;  %v4722_v47 = vand.u32 2147483648, %v10458_v22  ;;  %v12615_v22 = vld [vmem:[#allocation95_spill] sm:$0xff] }
 0x461   : > { %5551 = vst.msk [vmem:[%s10279_s14 + $0x30] sm:$0xff] %vm1607_vm0, %v5487_v43  ;;  %v4726_v3 = vmul.f32 %v10584_v58, %v10505_v1  ;;  %v10606_v16 = vadd.f32 %v10484_v34, %v9944_v4  ;;  %6752 = vrcp.f32 %v10580_v13  ;;  %v10616_v44 = vadd.f32 %v10499_v27, %v12609_v60  ;;  %v12617_v27 = vld [vmem:[#allocation57_spill] sm:$0xff] }
 0x462   : > { %v10602_v43 = vpop.eup %6750  ;;  %v4741_v39 = vsub.f32 1.0, %v4740_v35  ;;  %5553 = vst.msk [vmem:[%s10279_s14 + $0x40] sm:$0xff] %vm1607_vm0, %v5489_v40  ;;  %v10620_v48 = vadd.f32 %v10425_v41, %v12611_v45  ;;  %v10623_v4 = vadd.f32 %v4378_v36, %v9980_v53  ;;  %v10633_v33 = vadd.f32 %v4488_v28, %v9970_v31  ;;  %v4161_v19 = vpop.f32.mrf.mxu0  ;;  %v12619_v35 = vld [vmem:[#allocation49_spill] sm:$0xff]  ;;  %v12621_v45 = vld [vmem:[#allocation131_spill] sm:$0xff] }
 0x463   : > { %12606 = vst [vmem:[#allocation93_spill] sm:$0xff] %v10606_v16  ;;  %3735 = vadd.xlane.f32.xlu2 %v12607_v29  ;;  %3733 = vadd.xlane.f32.xlu1 %v12608_v8  ;;  %v4727_v34 = vsub.f32 1.0, %v4726_v3  ;;  %v10637_v10 = vadd.f32 %v10495_v5, %v12617_v27  ;;  %v4719_v53 = vsel %vm10627_vm10, %v10508_v57, %v4715_v55  ;;  %vm4721_vm11 = vcmp.eq.f32.partialorder %v4720_v56, 8.507059e+37  ;;  %v12618_v56 = vld [vmem:[#allocation51_spill] sm:$0xff]  ;;  %v4274_v59 = vpop.f32.mrf.mxu1  ;;  %v12624_v27 = vld [vmem:[#allocation102_spill] sm:$0xff] }
 0x464   : > { %12610 = vst [vmem:[#allocation27_spill] sm:$0xff] %v10616_v44  ;;  %3737 = vadd.xlane.f32.xlu0 %v12615_v22  ;;  %v4754_v41 = vmul.f32 %v10602_v43, %v10514_v32  ;;  %6754 = vrcp.f32 %v10599_v14  ;;  %v4723_v20 = vor.u32 1.1754944e-38, %v4722_v47  ;;  %v4742_v18 = vmul.f32 %v10577_v17, %v4741_v39  ;;  %v12620_v47 = vld [vmem:[#allocation55_spill] sm:$0xff] }
 0x465   : > { %12612 = vst [vmem:[#allocation32_spill] sm:$0xff] %v10623_v4  ;;  %6756 = vrcp.f32 %v10589_v42  ;;  %v4162_v31 = vadd.f32 %v4161_v19, %v10050_v15  ;;  %v4734_v21 = vand.u32 2147483647, %v10505_v1  ;;  %v4736_v57 = vand.u32 2147483648, %v10505_v1 }
 0x466   : > { %12616 = vst [vmem:[#allocation104_spill] sm:$0xff] %v10633_v33  ;;  %v3652_v5 = vpop.xlane.xlu2 %3651  ;;  %v3650_v25 = vpop.xlane.xlu1 %3649  ;;  %v4724_v46 = vsel %vm4721_vm11, %v4723_v20, %v4719_v53  ;;  %v4728_v28 = vmul.f32 %v10584_v58, %v4727_v34  ;;  %vm4730_vm12 = vweird.f32 %v10505_v1  ;;  %v4750_v29 = vand.u32 2147483648, %v10502_v2  ;;  %v12625_v53 = vld [vmem:[#allocation89_spill] sm:$0xff] }
 0x467   : > { %v10651_v36 = vadd.f32 %v3652_v5, %v12618_v56  ;;  %v10654_v40 = vadd.f32 %v3650_v25, %v12619_v35  ;;  %v3654_v55 = vpop.xlane.xlu0 %3653  ;;  %v10657_v3 = vpop.eup %6752  ;;  %v5490_v15 = vmul.f32 %v4724_v46, %v4162_v31  ;;  %v4755_v8 = vsub.f32 1.0, %v4754_v41  ;;  %v12629_v56 = vld [vmem:[#allocation13_spill] sm:$0xff] }
 0x468   : > { %v10660_v39 = vadd.f32 %v3654_v55, %v12620_v47  ;;  %v10666_v60 = vadd.f32 %v10577_v17, %v4742_v18  ;;  %vm4745_vm13 = vweird.f32 %v10577_v17  ;;  %v10670_v34 = vadd.f32 %v4271_v24, %v12621_v45  ;;  %v12626_v18 = vld [vmem:[#allocation108_spill] sm:$0xff] }
 0x469   : > { %6758 = vrcp.f32 %v10651_v36  ;;  %5554 = vst.msk [vmem:[%s10279_s14 + $0x48] sm:$0xff] %vm1607_vm0, %v5490_v15  ;;  %vm10675_vm14 = vcmp.eq.f32.partialorder %v4734_v21, 8.507059e+37  ;;  %vm4744_vm15 = vweird.f32 %v10502_v2  ;;  %v10686_v24 = vmul.f32 %v10657_v3, %v10580_v13 }
 0x46a   : > { %6760 = vrcp.f32 %v10654_v40  ;;  %v10682_v41 = vpop.eup %6754  ;;  %v4729_v19 = vadd.f32 %v10584_v58, %v4728_v28  ;;  %vm4731_vm1 = vweird.f32 %v10584_v58  ;;  %v4737_v20 = vor.u32 1.1754944e-38, %v4736_v57  ;;  %vm10697_vm2 = vmor %vm4744_vm15, %vm4745_vm13  ;;  %v4164_v35 = vpop.f32.mrf.mxu0 }
 0x46b   : > { %3741 = vadd.xlane.f32.xlu2 %v12624_v27  ;;  %3739 = vadd.xlane.f32.xlu1 %v12625_v53  ;;  %v10691_v31 = vpop.eup %6756  ;;  %v4832_v5 = vand.u32 2147483647, %v10651_v36  ;;  %6762 = vrcp.f32 %v10660_v39  ;;  %v4748_v21 = vand.u32 2147483647, %v10502_v2  ;;  %v10702_v46 = vor.u32 1.1754944e-38, %v4750_v29  ;;  %vm4732_vm4 = vmor %vm4730_vm12, %vm4731_vm1  ;;  %v12632_v27 = vld [vmem:[#allocation118_spill] sm:$0xff] }
 0x46c   : > { %3743 = vadd.xlane.f32.xlu0 %v12626_v18  ;;  %v10705_v57 = vadd.f32 %v4274_v59, %v12629_v56  ;;  %v10712_v28 = vmul.f32 %v10602_v43, %v4755_v8  ;;  %v10717_v47 = vmul.f32 %v10682_v41, %v10599_v14  ;;  %vm4828_vm3 = vweird.f32 %v10651_v36 }
 0x46d   : > { %v4834_v2 = vand.u32 2147483648, %v10651_v36  ;;  %v4165_v29 = vadd.f32 %v4164_v35, %v10081_v38  ;;  %v10729_v53 = vmul.f32 %v10691_v31, %v10589_v42  ;;  %v4818_v18 = vand.u32 2147483647, %v10654_v40 }
 0x46e   : > { %v3658_v45 = vpop.xlane.xlu2 %3657  ;;  %v3656_v8 = vpop.xlane.xlu1 %3655  ;;  %v4733_v56 = vsel %vm4732_vm4, %v10584_v58, %v4729_v19  ;;  %vm10734_vm5 = vcmp.eq.f32.partialorder %v4832_v5, 8.507059e+37  ;;  %vm4814_vm6 = vweird.f32 %v10654_v40  ;;  %v12633_v58 = vld [vmem:[#allocation58_spill] sm:$0xff]  ;;  %v4820_v16 = vand.u32 2147483648, %v10654_v40 }
 0x46f   : > { %v6759_v59 = vpop.eup %6758  ;;  %v4738_v1 = vsel %vm10675_vm14, %v4737_v20, %v4733_v56  ;;  %v10741_v55 = vadd.f32 %v3658_v45, %v12632_v27  ;;  %v10746_v19 = vadd.f32 %v3656_v8, %v12633_v58  ;;  %v4835_v61 = vor.u32 1.1754944e-38, %v4834_v2  ;;  %v12636_v58 = vld [vmem:[#allocation62_spill] sm:$0xff] }
 0x470   : > { %v6761_v15 = vpop.eup %6760  ;;  %v4824_v38 = vmul.f32 %v6759_v59, %v10651_v36  ;;  %v5491_v33 = vmul.f32 %v4738_v1, %v4165_v29  ;;  %vm10750_vm7 = vcmp.eq.f32.partialorder %v4818_v18, 8.507059e+37  ;;  %v4846_v27 = vand.u32 2147483647, %v10660_v39  ;;  %v3660_v29 = vpop.xlane.xlu0 %3659 }
 0x471   : > { %v4810_v44 = vmul.f32 %v6761_v15, %v10654_v40  ;;  %v6763_v37 = vpop.eup %6762  ;;  %6764 = vrcp.f32 %v10741_v55  ;;  %vm4829_vm8 = vweird.f32 %v6759_v59  ;;  %v4848_v2 = vand.u32 2147483648, %v10660_v39 }
 0x472   : > { %v4825_v5 = vsub.f32 1.0, %v4824_v38  ;;  %v4838_v45 = vmul.f32 %v6763_v37, %v10660_v39  ;;  %5555 = vst.msk [vmem:[%s10279_s14 + $0x50] sm:$0xff] %vm1607_vm0, %v5491_v33  ;;  %6766 = vrcp.f32 %v10746_v19  ;;  %vm4815_vm9 = vweird.f32 %v6761_v15  ;;  %vm4830_vm12 = vmor %vm4828_vm3, %vm4829_vm8 }
 0x473   : > { %v4811_v22 = vsub.f32 1.0, %v4810_v44  ;;  %vm4842_vm10 = vweird.f32 %v10660_v39  ;;  %v4821_v38 = vor.u32 1.1754944e-38, %v4820_v16  ;;  %v4874_v1 = vand.u32 2147483647, %v10741_v55  ;;  %vm4816_vm15 = vmor %vm4814_vm6, %vm4815_vm9 }
 0x474   : > { %v4826_v8 = vmul.f32 %v6759_v59, %v4825_v5  ;;  %v4839_v44 = vsub.f32 1.0, %v4838_v45  ;;  %v10763_v4 = vadd.f32 %v3660_v29, %v12636_v58  ;;  %vm10765_vm11 = vcmp.eq.f32.partialorder %v4748_v21, 8.507059e+37 }
 0x475   : > { %v4812_v56 = vmul.f32 %v6761_v15, %v4811_v22  ;;  %vm4843_vm13 = vweird.f32 %v6763_v37  ;;  %vm10771_vm14 = vcmp.eq.f32.partialorder %v4846_v27, 8.507059e+37  ;;  %v4849_v21 = vor.u32 1.1754944e-38, %v4848_v2  ;;  %v10791_v2 = vpop.f32.mrf.mxu1 }
 0x476   : > { %v4827_v18 = vadd.f32 %v6759_v59, %v4826_v8  ;;  %v4840_v22 = vmul.f32 %v6763_v37, %v4839_v44  ;;  %v10775_v8 = vpop.f32.mrf.mxu2  ;;  %vm4870_vm1 = vweird.f32 %v10741_v55  ;;  %6768 = vrcp.f32 %v10763_v4  ;;  %vm4844_vm3 = vmor %vm4842_vm10, %vm4843_vm13 }
 0x477   : > { %v4813_v5 = vadd.f32 %v6761_v15, %v4812_v56  ;;  %v6765_v16 = vpop.eup %6764  ;;  %vm10793_vm4 = vcmp.eq.f32.partialorder %v4874_v1, 8.507059e+37  ;;  %v4860_v1 = vand.u32 2147483647, %v10746_v19  ;;  %v4862_v58 = vand.u32 2147483648, %v10746_v19 }
 0x478   : > { %v4831_v51 = vsel %vm4830_vm12, %v6759_v59, %v4827_v18  ;;  %v4841_v29 = vadd.f32 %v6763_v37, %v4840_v22  ;;  %v4866_v56 = vmul.f32 %v6765_v16, %v10741_v55  ;;  %v6767_v44 = vpop.eup %6766  ;;  %vm4856_vm6 = vweird.f32 %v10746_v19 }
 0x479   : > { %v4836_v36 = vsel %vm10734_vm5, %v4835_v61, %v4831_v51  ;;  %v4817_v27 = vsel %vm4816_vm15, %v6761_v15, %v4813_v5  ;;  %v4876_v51 = vand.u32 2147483648, %v10741_v55  ;;  %v4167_v15 = vpop.f32.mrf.mxu0  ;;  %v4852_v20 = vmul.f32 %v6767_v44, %v10746_v19 }
 0x47a   : > { %v5498_v59 = vmul.f32 %v4836_v36, %v10445_v49  ;;  %v4822_v40 = vsel %vm10750_vm7, %v4821_v38, %v4817_v27  ;;  %v4845_v49 = vsel %vm4844_vm3, %v6763_v37, %v4841_v29  ;;  %v4867_v18 = vsub.f32 1.0, %v4866_v56  ;;  %v3664_v38 = vpop.xlane.xlu2 %3663 }
 0x47b   : > { %v5497_v35 = vmul.f32 %v4822_v40, %v10431_v63  ;;  %v4850_v39 = vsel %vm10771_vm14, %v4849_v21, %v4845_v49  ;;  %vm4871_vm5 = vweird.f32 %v6765_v16  ;;  %v4853_v5 = vsub.f32 1.0, %v4852_v20  ;;  %v3666_v40 = vpop.xlane.xlu0 %3665  ;;  %v12646_v49 = vld [vmem:[#allocation64_spill] sm:$0xff] }
 0x47c   : > { %5562 = vst.msk [vmem:[%s10279_s14 + $0x88] sm:$0xff] %vm1607_vm0, %v5498_v59  ;;  %v5499_v63 = vmul.f32 %v4850_v39, %v10464_v11  ;;  %v4868_v37 = vmul.f32 %v6765_v16, %v4867_v18  ;;  %v4168_v22 = vadd.f32 %v4167_v15, %v10106_v0  ;;  %v6769_v36 = vpop.eup %6768  ;;  %v4877_v27 = vor.u32 1.1754944e-38, %v4876_v51  ;;  %v3662_v59 = vpop.xlane.xlu1 %3661  ;;  %vm4872_vm8 = vmor %vm4870_vm1, %vm4871_vm5 }
 0x47d   : > { %5561 = vst.msk [vmem:[%s10279_s14 + $0x80] sm:$0xff] %vm1607_vm0, %v5497_v35  ;;  %vm4857_vm7 = vweird.f32 %v6767_v44  ;;  %v10812_v45 = vadd.f32 %v3664_v38, %v10096_v6  ;;  %v4854_v29 = vmul.f32 %v6767_v44, %v4853_v5  ;;  %v4880_v56 = vmul.f32 %v6769_v36, %v10763_v4  ;;  %v4280_v39 = vpop.f32.mrf.mxu1 }
 0x47e   : > { %5563 = vst.msk [vmem:[%s10279_s14 + $0x90] sm:$0xff] %vm1607_vm0, %v5499_v63  ;;  %v4869_v21 = vadd.f32 %v6765_v16, %v4868_v37  ;;  %v12643_v11 = vsel %vm10697_vm2, %v10577_v17, %v10666_v60  ;;  %vm10828_vm9 = vcmp.eq.f32.partialorder %v4860_v1, 8.507059e+37  ;;  %v4863_v51 = vor.u32 1.1754944e-38, %v4862_v58  ;;  %v10835_v15 = vpop.f32.mrf.mxu2  ;;  %vm4858_vm10 = vmor %vm4856_vm6, %vm4857_vm7 }
 0x47f   : > { %v4752_v0 = vsel %vm10765_vm11, %v10702_v46, %v12643_v11  ;;  %6770 = vrcp.f32 %v10812_v45  ;;  %vm4759_vm2 = vweird.f32 %v10602_v43  ;;  %v4855_v60 = vadd.f32 %v6767_v44, %v4854_v29 }
 0x480   : > { %v5492_v25 = vmul.f32 %v4752_v0, %v4168_v22  ;;  %v4873_v17 = vsel %vm4872_vm8, %v6765_v16, %v4869_v21  ;;  %v4881_v46 = vsub.f32 1.0, %v4880_v56  ;;  %v4888_v33 = vand.u32 2147483647, %v10763_v4 }
 0x481   : > { %v4878_v55 = vsel %vm10793_vm4, %v4877_v27, %v4873_v17  ;;  %v4890_v35 = vand.u32 2147483648, %v10763_v4  ;;  %v10846_v16 = vadd.f32 %v3662_v59, %v12646_v49  ;;  %v10849_v18 = vadd.f32 %v3666_v40, %v10117_v26 }
 0x482   : > { %5556 = vst.msk [vmem:[%s10279_s14 + $0x58] sm:$0xff] %vm1607_vm0, %v5492_v25  ;;  %vm4758_vm11 = vweird.f32 %v10514_v32  ;;  %v5501_v61 = vmul.f32 %v4878_v55, %v10561_v54  ;;  %v4859_v20 = vsel %vm4858_vm10, %v6767_v44, %v4855_v60  ;;  %v4882_v38 = vmul.f32 %v6769_v36, %v4881_v46  ;;  %v3670_v56 = vpop.xlane.xlu2 %3669 }
 0x483   : > { %vm4885_vm12 = vweird.f32 %v6769_v36  ;;  %v4864_v19 = vsel %vm10828_vm9, %v4863_v51, %v4859_v20  ;;  %v4916_v1 = vand.u32 2147483647, %v10812_v45  ;;  %v4918_v58 = vand.u32 2147483648, %v10812_v45  ;;  %vm10896_vm6 = vmor %vm4758_vm11, %vm4759_vm2 }
 0x484   : > { %6772 = vrcp.f32 %v10846_v16  ;;  %5565 = vst.msk [vmem:[%s10279_s14 + $0xa0] sm:$0xff] %vm1607_vm0, %v5501_v61  ;;  %v5500_v26 = vmul.f32 %v4864_v19, %v10534_v30  ;;  %v4883_v63 = vadd.f32 %v6769_v36, %v4882_v38  ;;  %vm4884_vm13 = vweird.f32 %v10763_v4  ;;  %v3668_v49 = vpop.xlane.xlu1 %3667 }
 0x485   : > { %6774 = vrcp.f32 %v10849_v18  ;;  %v6771_v54 = vpop.eup %6770  ;;  %v4769_v44 = vsub.f32 1.0, %v10717_v47  ;;  %v4797_v37 = vsub.f32 1.0, %v10729_v53  ;;  %v10867_v5 = vadd.f32 %v10791_v2, %v10083_v7  ;;  %vm4886_vm14 = vmor %vm4884_vm13, %vm4885_vm12  ;;  %v4170_v2 = vpop.f32.mrf.mxu0 }
 0x486   : > { %v4891_v22 = vor.u32 1.1754944e-38, %v4890_v35  ;;  %5564 = vst.msk [vmem:[%s10279_s14 + $0x98] sm:$0xff] %vm1607_vm0, %v5500_v26  ;;  %v4887_v30 = vsel %vm4886_vm14, %v6769_v36, %v4883_v63  ;;  %vm4889_vm15 = vcmp.eq.f32.partialorder %v4888_v33, 8.507059e+37  ;;  %v10873_v4 = vadd.f32 %v4280_v39, %v10114_v52  ;;  %v10903_v46 = vpop.f32.mrf.mxu2 }
 0x487   : > { %v4908_v27 = vmul.f32 %v6771_v54, %v10812_v45  ;;  %vm4912_vm1 = vweird.f32 %v10812_v45  ;;  %vm10877_vm3 = vcmp.eq.f32.partialorder %v4916_v1, 8.507059e+37  ;;  %v4919_v7 = vor.u32 1.1754944e-38, %v4918_v58 }
 0x488   : > { %v4892_v21 = vsel %vm4889_vm15, %v4891_v22, %v4887_v30  ;;  %vm4898_vm4 = vweird.f32 %v10846_v16  ;;  %v4902_v52 = vand.u32 2147483647, %v10846_v16  ;;  %vm4913_vm5 = vweird.f32 %v6771_v54 }
 0x489   : > { %v5502_v11 = vmul.f32 %v4892_v21, %v10594_v50  ;;  %v4909_v36 = vsub.f32 1.0, %v4908_v27  ;;  %v4904_v59 = vand.u32 2147483648, %v10846_v16  ;;  %v4757_v40 = vadd.f32 %v10602_v43, %v10712_v28  ;;  %vm4914_vm8 = vmor %vm4912_vm1, %vm4913_vm5 }
 0x48a   : > { %v6773_v0 = vpop.eup %6772  ;;  %v4764_v6 = vand.u32 2147483648, %v10514_v32  ;;  %v4171_v17 = vadd.f32 %v4170_v2, %v10137_v62  ;;  %v10901_v28 = vadd.f32 %v3670_v56, %v10200_v12  ;;  %v4930_v55 = vand.u32 2147483647, %v10849_v18 }
 0x48b   : > { %v6775_v51 = vpop.eup %6774  ;;  %5566 = vst.msk [vmem:[%s10279_s14 + $0xa8] sm:$0xff] %vm1607_vm0, %v5502_v11  ;;  %v4910_v25 = vmul.f32 %v6771_v54, %v4909_v36  ;;  %v4894_v50 = vmul.f32 %v6773_v0, %v10846_v16  ;;  %v4761_v62 = vsel %vm10896_vm6, %v10602_v43, %v4757_v40  ;;  %v12651_v38 = vand.u32 2147483647, %v10514_v32  ;;  %v3672_v32 = vpop.xlane.xlu0 %3671 }
 0x48c   : > { %v4922_v33 = vmul.f32 %v6775_v51, %v10849_v18  ;;  %v4765_v35 = vor.u32 1.1754944e-38, %v4764_v6  ;;  %6776 = vrcp.f32 %v10901_v28  ;;  %vm4899_vm9 = vweird.f32 %v6773_v0  ;;  %v3674_v47 = vpop.xlane.xlu1 %3673 }
 0x48d   : > { %v4911_v61 = vadd.f32 %v6771_v54, %v4910_v25  ;;  %v4895_v20 = vsub.f32 1.0, %v4894_v50  ;;  %vm4763_vm7 = vcmp.eq.f32.partialorder %v12651_v38, 8.507059e+37  ;;  %v4932_v19 = vand.u32 2147483648, %v10849_v18  ;;  %vm4900_vm11 = vmor %vm4898_vm4, %vm4899_vm9  ;;  %v4173_v60 = vpop.f32.mrf.mxu0 }
 0x48e   : > { %v4923_v12 = vsub.f32 1.0, %v4922_v33  ;;  %v4766_v39 = vsel %vm4763_vm7, %v4765_v35, %v4761_v62  ;;  %v10918_v26 = vadd.f32 %v3668_v49, %v10146_v9  ;;  %vm4926_vm2 = vweird.f32 %v10849_v18  ;;  %v10950_v18 = vpop.f32.mrf.mxu2  ;;  %v3676_v49 = vpop.xlane.xlu2 %3675 }
 0x48f   : > { %v4915_v43 = vsel %vm4914_vm8, %v6771_v54, %v4911_v61  ;;  %v4896_v1 = vmul.f32 %v6773_v0, %v4895_v20  ;;  %v5493_v58 = vmul.f32 %v4766_v39, %v4171_v17  ;;  %vm4927_vm10 = vweird.f32 %v6775_v51  ;;  %v4283_v54 = vpop.f32.mrf.mxu1  ;;  %v12656_v61 = vld [vmem:[#allocation25_spill] sm:$0xff] }
 0x490   : > { %v4920_v63 = vsel %vm10877_vm3, %v4919_v7, %v4915_v43  ;;  %v4924_v22 = vmul.f32 %v6775_v51, %v4923_v12  ;;  %v4958_v27 = vand.u32 2147483647, %v10901_v28  ;;  %6778 = vrcp.f32 %v10918_v26  ;;  %v12652_v7 = vld [vmem:[#allocation67_spill] sm:$0xff]  ;;  %vm4928_vm13 = vmor %vm4926_vm2, %vm4927_vm10 }
 0x491   : > { %v5504_v45 = vmul.f32 %v4920_v63, %v10637_v10  ;;  %v4897_v30 = vadd.f32 %v6773_v0, %v4896_v1  ;;  %5557 = vst.msk [vmem:[%s10279_s14 + $0x60] sm:$0xff] %vm1607_vm0, %v5493_v58  ;;  %v4905_v9 = vor.u32 1.1754944e-38, %v4904_v59  ;;  %v4960_v29 = vand.u32 2147483648, %v10901_v28  ;;  %v12653_v59 = vld [vmem:[#allocation17_spill] sm:$0xff]  ;;  %v12659_v63 = vld [vmem:[#allocation87_spill] sm:$0xff] }
 0x492   : > { %v4925_v21 = vadd.f32 %v6775_v51, %v4924_v22  ;;  %v10933_v2 = vadd.f32 %v3672_v32, %v12652_v7  ;;  %v6777_v10 = vpop.eup %6776  ;;  %vm4903_vm12 = vcmp.eq.f32.partialorder %v4902_v52, 8.507059e+37  ;;  %vm4931_vm14 = vcmp.eq.f32.partialorder %v4930_v55, 8.507059e+37 }
 0x493   : > { %5568 = vst.msk [vmem:[%s10279_s14 + $0xb8] sm:$0xff] %vm1607_vm0, %v5504_v45  ;;  %v4901_v56 = vsel %vm4900_vm11, %v6773_v0, %v4897_v30  ;;  %v4933_v11 = vor.u32 1.1754944e-38, %v4932_v19  ;;  %v10941_v40 = vadd.f32 %v4283_v54, %v12653_v59  ;;  %v4950_v6 = vmul.f32 %v6777_v10, %v10901_v28  ;;  %v3678_v45 = vpop.xlane.xlu0 %3677 }
 0x494   : > { %v4906_v16 = vsel %vm4903_vm12, %v4905_v9, %v4901_v56  ;;  %v4929_v36 = vsel %vm4928_vm13, %v6775_v51, %v4925_v21  ;;  %vm4954_vm15 = vweird.f32 %v10901_v28  ;;  %vm10946_vm1 = vcmp.eq.f32.partialorder %v4958_v27, 8.507059e+37  ;;  %v12660_v21 = vld [vmem:[#allocation77_spill] sm:$0xff] }
 0x495   : > { %v5503_v25 = vmul.f32 %v4906_v16, %v10620_v48  ;;  %v4934_v50 = vsel %vm4931_vm14, %v4933_v11, %v4929_v36  ;;  %v4951_v51 = vsub.f32 1.0, %v4950_v6  ;;  %v4961_v17 = vor.u32 1.1754944e-38, %v4960_v29  ;;  %v12661_v11 = vld [vmem:[#allocation79_spill] sm:$0xff] }
 0x496   : > { %v5505_v0 = vmul.f32 %v4934_v50, %v10670_v34  ;;  %6780 = vrcp.f32 %v10933_v2  ;;  %v6779_v33 = vpop.eup %6778  ;;  %vm4940_vm3 = vweird.f32 %v10918_v26  ;;  %v4944_v48 = vand.u32 2147483647, %v10918_v26  ;;  %v10999_v6 = vpop.f32.mrf.mxu2 }
 0x497   : > { %5567 = vst.msk [vmem:[%s10279_s14 + $0xb0] sm:$0xff] %vm1607_vm0, %v5503_v25  ;;  %v4946_v55 = vand.u32 2147483648, %v10918_v26  ;;  %v4770_v62 = vmul.f32 %v10682_v41, %v4769_v44  ;;  %v4952_v34 = vmul.f32 %v6777_v10, %v4951_v51  ;;  %vm4955_vm4 = vweird.f32 %v6777_v10 }
 0x498   : > { %5569 = vst.msk [vmem:[%s10279_s14 + $0xc0] sm:$0xff] %vm1607_vm0, %v5505_v0  ;;  %v4936_v35 = vmul.f32 %v6779_v33, %v10918_v26  ;;  %vm4773_vm5 = vweird.f32 %v10682_v41  ;;  %v4174_v20 = vadd.f32 %v4173_v60, %v12656_v61  ;;  %vm4772_vm6 = vweird.f32 %v10599_v14  ;;  %vm4956_vm8 = vmor %vm4954_vm15, %vm4955_vm4 }
 0x499   : > { %v4771_v38 = vadd.f32 %v10682_v41, %v4770_v62  ;;  %v4776_v12 = vand.u32 2147483647, %v10599_v14  ;;  %v4953_v19 = vadd.f32 %v6777_v10, %v4952_v34  ;;  %v4972_v39 = vand.u32 2147483647, %v10933_v2  ;;  %vm10971_vm7 = vmor %vm4772_vm6, %vm4773_vm5 }
 0x49a   : > { %v4937_v44 = vsub.f32 1.0, %v4936_v35  ;;  %v4778_v1 = vand.u32 2147483648, %v10599_v14  ;;  %vm4941_vm9 = vweird.f32 %v6779_v33  ;;  %v4974_v58 = vand.u32 2147483648, %v10933_v2 }
 0x49b   : > { %v4775_v32 = vsel %vm10971_vm7, %v10682_v41, %v4771_v38  ;;  %v10983_v22 = vadd.f32 %v3676_v49, %v12659_v63  ;;  %v4957_v54 = vsel %vm4956_vm8, %v6777_v10, %v4953_v19  ;;  %v10986_v14 = vadd.f32 %v3674_v47, %v12660_v21  ;;  %vm4942_vm10 = vmor %vm4940_vm3, %vm4941_vm9  ;;  %v4176_v49 = vpop.f32.mrf.mxu0  ;;  %v11032_v19 = vpop.f32.mrf.mxu3  ;;  %v12670_v63 = vld [vmem:[#allocation65_spill] sm:$0xff] }
 0x49c   : > { %v6781_v30 = vpop.eup %6780  ;;  %v4938_v27 = vmul.f32 %v6779_v33, %v4937_v44  ;;  %v4779_v9 = vor.u32 1.1754944e-38, %v4778_v1  ;;  %v4962_v28 = vsel %vm10946_vm1, %v4961_v17, %v4957_v54  ;;  %vm4777_vm2 = vcmp.eq.f32.partialorder %v4776_v12, 8.507059e+37  ;;  %v3684_v17 = vpop.xlane.xlu0 %3683 }
 0x49d   : > { %v4964_v29 = vmul.f32 %v6781_v30, %v10933_v2  ;;  %6782 = vrcp.f32 %v10983_v22  ;;  %v5507_v41 = vmul.f32 %v4962_v28, %v10867_v5  ;;  %v10994_v10 = vadd.f32 %v3678_v45, %v12661_v11  ;;  %v4286_v5 = vpop.f32.mrf.mxu1 }
 0x49e   : > { %v4939_v7 = vadd.f32 %v6779_v33, %v4938_v27  ;;  %v4780_v56 = vsel %vm4777_vm2, %v4779_v9, %v4775_v32  ;;  %vm4945_vm11 = vcmp.eq.f32.partialorder %v4944_v48, 8.507059e+37  ;;  %v4947_v16 = vor.u32 1.1754944e-38, %v4946_v55  ;;  %v12664_v55 = vld [vmem:[#allocation21_spill] sm:$0xff]  ;;  %v3682_v9 = vpop.xlane.xlu2 %3681 }
 0x49f   : > { %v4965_v36 = vsub.f32 1.0, %v4964_v29  ;;  %v5494_v59 = vmul.f32 %v4780_v56, %v4174_v20  ;;  %5571 = vst.msk [vmem:[%s10279_s14 + $0xd0] sm:$0xff] %vm1607_vm0, %v5507_v41  ;;  %v5000_v50 = vand.u32 2147483647, %v10983_v22  ;;  %v5002_v52 = vand.u32 2147483648, %v10983_v22  ;;  %v3680_v41 = vpop.xlane.xlu1 %3679 }
 0x4a0   : > { %v4943_v25 = vsel %vm4942_vm10, %v6779_v33, %v4939_v7  ;;  %6784 = vrcp.f32 %v10986_v14  ;;  %vm4968_vm12 = vweird.f32 %v10933_v2  ;;  %vm4969_vm13 = vweird.f32 %v6781_v30  ;;  %v11056_v7 = vpop.f32.mrf.mxu2 }
 0x4a1   : > { %v4948_v26 = vsel %vm4945_vm11, %v4947_v16, %v4943_v25  ;;  %v4966_v0 = vmul.f32 %v6781_v30, %v4965_v36  ;;  %5558 = vst.msk [vmem:[%s10279_s14 + $0x68] sm:$0xff] %vm1607_vm0, %v5494_v59  ;;  %vm11010_vm14 = vcmp.eq.f32.partialorder %v4972_v39, 8.507059e+37  ;;  %v4975_v60 = vor.u32 1.1754944e-38, %v4974_v58  ;;  %vm4970_vm1 = vmor %vm4968_vm12, %vm4969_vm13  ;;  %v12673_v25 = vld [vmem:[#allocation45_spill] sm:$0xff] }
 0x4a2   : > { %v5506_v51 = vmul.f32 %v4948_v26, %v10705_v57  ;;  %6786 = vrcp.f32 %v10994_v10  ;;  %v4287_v62 = vadd.f32 %v4286_v5, %v12664_v55  ;;  %vm4996_vm15 = vweird.f32 %v10983_v22 }
 0x4a3   : > { %v6783_v33 = vpop.eup %6782  ;;  %v4967_v48 = vadd.f32 %v6781_v30, %v4966_v0  ;;  %v4986_v2 = vand.u32 2147483647, %v10986_v14  ;;  %vm11021_vm3 = vcmp.eq.f32.partialorder %v5000_v50, 8.507059e+37  ;;  %v5003_v35 = vor.u32 1.1754944e-38, %v5002_v52  ;;  %v12674_v0 = vld [vmem:[#allocation122_spill] sm:$0xff] }
 0x4a4   : > { %5570 = vst.msk [vmem:[%s10279_s14 + $0xc8] sm:$0xff] %vm1607_vm0, %v5506_v51  ;;  %v4992_v57 = vmul.f32 %v6783_v33, %v10983_v22  ;;  %v12667_v61 = vsub.f32 1.0, %v10686_v24  ;;  %vm4982_vm4 = vweird.f32 %v10986_v14  ;;  %vm4786_vm5 = vweird.f32 %v10580_v13 }
 0x4a5   : > { %v4971_v38 = vsel %vm4970_vm1, %v6781_v30, %v4967_v48  ;;  %vm4787_vm6 = vweird.f32 %v10657_v3  ;;  %v4790_v12 = vand.u32 2147483647, %v10580_v13  ;;  %v4792_v43 = vand.u32 2147483648, %v10580_v13  ;;  %v4289_v59 = vpop.f32.mrf.mxu1 }
 0x4a6   : > { %v4784_v20 = vmul.f32 %v10657_v3, %v12667_v61  ;;  %v6785_v47 = vpop.eup %6784  ;;  %v4976_v44 = vsel %vm11010_vm14, %v4975_v60, %v4971_v38  ;;  %v4993_v39 = vsub.f32 1.0, %v4992_v57  ;;  %vm11040_vm7 = vcmp.eq.f32.partialorder %v4986_v2, 8.507059e+37  ;;  %vm11045_vm8 = vmor %vm4786_vm5, %vm4787_vm6  ;;  %v12675_v2 = vld [vmem:[#allocation92_spill] sm:$0xff] }
 0x4a7   : > { %v5508_v1 = vmul.f32 %v4976_v44, %v10873_v4  ;;  %v4978_v58 = vmul.f32 %v6785_v47, %v10986_v14  ;;  %v4177_v45 = vadd.f32 %v4176_v49, %v12670_v63  ;;  %vm4997_vm9 = vweird.f32 %v6783_v33  ;;  %v12677_v44 = vld [vmem:[#allocation61_spill] sm:$0xff] }
 0x4a8   : > { %v4785_v24 = vadd.f32 %v10657_v3, %v4784_v20  ;;  %v6787_v54 = vpop.eup %6786  ;;  %v4994_v27 = vmul.f32 %v6783_v33, %v4993_v39  ;;  %v4793_v4 = vor.u32 1.1754944e-38, %v4792_v43  ;;  %v4988_v28 = vand.u32 2147483648, %v10986_v14  ;;  %vm4998_vm12 = vmor %vm4996_vm15, %vm4997_vm9  ;;  %v4494_v20 = vpop.f32.mrf.mxu3 }
 0x4a9   : > { %5572 = vst.msk [vmem:[%s10279_s14 + $0xd8] sm:$0xff] %vm1607_vm0, %v5508_v1  ;;  %v4979_v21 = vsub.f32 1.0, %v4978_v58  ;;  %v5006_v29 = vmul.f32 %v6787_v54, %v10994_v10  ;;  %vm4791_vm2 = vcmp.eq.f32.partialorder %v4790_v12, 8.507059e+37  ;;  %vm4983_vm10 = vweird.f32 %v6785_v47  ;;  %v12679_v1 = vld [vmem:[#allocation146_spill] sm:$0xff] }
 0x4aa   : > { %v4789_v13 = vsel %vm11045_vm8, %v10657_v3, %v4785_v24  ;;  %v4995_v56 = vadd.f32 %v6783_v33, %v4994_v27  ;;  %vm5011_vm11 = vweird.f32 %v6787_v54  ;;  %v11062_v5 = vadd.f32 %v3682_v9, %v12673_v25  ;;  %vm4984_vm13 = vmor %vm4982_vm4, %vm4983_vm10  ;;  %v12678_v24 = vld [vmem:[#allocation126_spill] sm:$0xff] }
 0x4ab   : > { %v4794_v11 = vsel %vm4791_vm2, %v4793_v4, %v4789_v13  ;;  %v4980_v3 = vmul.f32 %v6785_v47, %v4979_v21  ;;  %v5007_v16 = vsub.f32 1.0, %v5006_v29  ;;  %v5014_v52 = vand.u32 2147483647, %v10994_v10  ;;  %v3688_v4 = vpop.xlane.xlu2 %3687 }
 0x4ac   : > { %v5495_v36 = vmul.f32 %v4794_v11, %v4177_v45  ;;  %v4999_v50 = vsel %vm4998_vm12, %v6783_v33, %v4995_v56  ;;  %v5016_v26 = vand.u32 2147483648, %v10994_v10  ;;  %v11067_v51 = vadd.f32 %v3680_v41, %v12674_v0  ;;  %v12683_v56 = vld [vmem:[#allocation68_spill] sm:$0xff] }
 0x4ad   : > { %v5004_v22 = vsel %vm11021_vm3, %v5003_v35, %v4999_v50  ;;  %v4981_v60 = vadd.f32 %v6785_v47, %v4980_v3  ;;  %v5008_v48 = vmul.f32 %v6787_v54, %v5007_v16  ;;  %6788 = vrcp.f32 %v11062_v5  ;;  %v12676_v35 = vld [vmem:[#allocation100_spill] sm:$0xff] }
 0x4ae   : > { %5559 = vst.msk [vmem:[%s10279_s14 + $0x70] sm:$0xff] %vm1607_vm0, %v5495_v36  ;;  %v5510_v55 = vmul.f32 %v5004_v22, %v4287_v62  ;;  %v4989_v33 = vor.u32 1.1754944e-38, %v4988_v28  ;;  %v4290_v57 = vadd.f32 %v4289_v59, %v12675_v2  ;;  %vm5010_vm14 = vweird.f32 %v10994_v10  ;;  %v3686_v59 = vpop.xlane.xlu1 %3685  ;;  %v12684_v22 = vld [vmem:[#allocation138_spill] sm:$0xff]  ;;  %v3690_v2 = vpop.xlane.xlu0 %3689 }
 0x4af   : > { %v4985_v49 = vsel %vm4984_vm13, %v6785_v47, %v4981_v60  ;;  %v5009_v34 = vadd.f32 %v6787_v54, %v5008_v48  ;;  %6790 = vrcp.f32 %v11067_v51  ;;  %v11081_v61 = vadd.f32 %v3684_v17, %v12676_v35  ;;  %vm5012_vm15 = vmor %vm5010_vm14, %vm5011_vm11 }
 0x4b0   : > { %5574 = vst.msk [vmem:[%s10279_s14 + $0xe8] sm:$0xff] %vm1607_vm0, %v5510_v55  ;;  %v4990_v14 = vsel %vm11040_vm7, %v4989_v33, %v4985_v49  ;;  %v5017_v62 = vor.u32 1.1754944e-38, %v5016_v26  ;;  %v5042_v38 = vand.u32 2147483647, %v11062_v5  ;;  %v5044_v10 = vand.u32 2147483648, %v11062_v5  ;;  %v12685_v49 = vld [vmem:[#allocation97_spill] sm:$0xff] }
 0x4b1   : > { %v5509_v12 = vmul.f32 %v4990_v14, %v10941_v40  ;;  %v5013_v47 = vsel %vm5012_vm15, %v6787_v54, %v5009_v34  ;;  %vm5015_vm1 = vcmp.eq.f32.partialorder %v5014_v52, 8.507059e+37  ;;  %6792 = vrcp.f32 %v11081_v61  ;;  %v12680_v40 = vld [vmem:[#allocation124_spill] sm:$0xff]  ;;  %v11113_v54 = vpop.f32.mrf.mxu2  ;;  %v4292_v52 = vpop.f32.mrf.mxu1 }
 0x4b2   : > { %v11094_v39 = vadd.f32 %v10775_v8, %v12677_v44  ;;  %v11098_v43 = vadd.f32 %v11032_v19, %v12678_v24  ;;  %v11102_v58 = vadd.f32 %v10835_v15, %v12679_v1  ;;  %v5018_v32 = vsel %vm5015_vm1, %v5017_v62, %v5013_v47  ;;  %v4179_v8 = vpop.f32.mrf.mxu0  ;;  %v12688_v47 = vld [vmem:[#allocation86_spill] sm:$0xff] }
 0x4b3   : > { %v6789_v63 = vpop.eup %6788  ;;  %v11105_v45 = vadd.f32 %v4494_v20, %v12680_v40  ;;  %5573 = vst.msk [vmem:[%s10279_s14 + $0xe0] sm:$0xff] %vm1607_vm0, %v5509_v12  ;;  %v5511_v30 = vmul.f32 %v5018_v32, %v4290_v57  ;;  %vm5038_vm3 = vweird.f32 %v11062_v5  ;;  %v4798_v19 = vmul.f32 %v10691_v31, %v4797_v37  ;;  %v12687_v12 = vld [vmem:[#allocation125_spill] sm:$0xff] }
 0x4b4   : > { %v5034_v15 = vmul.f32 %v6789_v63, %v11062_v5  ;;  %vm11116_vm4 = vcmp.eq.f32.partialorder %v5042_v38, 8.507059e+37  ;;  %v5045_v13 = vor.u32 1.1754944e-38, %v5044_v10  ;;  %vm4800_vm5 = vweird.f32 %v10589_v42  ;;  %v12686_v38 = vld [vmem:[#allocation56_spill] sm:$0xff]  ;;  %v12689_v40 = vld [vmem:[#allocation133_spill] sm:$0xff] }
 0x4b5   : > { %v6791_v9 = vpop.eup %6790  ;;  %5575 = vst.msk [vmem:[%s10279_s14 + $0xf0] sm:$0xff] %vm1607_vm0, %v5511_v30  ;;  %v4799_v21 = vadd.f32 %v10691_v31, %v4798_v19  ;;  %vm4801_vm6 = vweird.f32 %v10691_v31  ;;  %v4804_v53 = vand.u32 2147483647, %v10589_v42  ;;  %v4806_v37 = vand.u32 2147483648, %v10589_v42 }
 0x4b6   : > { %v5035_v28 = vsub.f32 1.0, %v5034_v15  ;;  %v5020_v29 = vmul.f32 %v6791_v9, %v11067_v51  ;;  %vm5052_vm7 = vweird.f32 %v11081_v61  ;;  %v5056_v41 = vand.u32 2147483647, %v11081_v61  ;;  %vm4802_vm8 = vmor %vm4800_vm5, %vm4801_vm6  ;;  %v12690_v15 = vld [vmem:[#allocation11_spill] sm:$0xff] }
 0x4b7   : > { %v4180_v11 = vadd.f32 %v4179_v8, %v12683_v56  ;;  %v6793_v3 = vpop.eup %6792  ;;  %vm5039_vm9 = vweird.f32 %v6789_v63  ;;  %v4803_v16 = vsel %vm4802_vm8, %v10691_v31, %v4799_v21  ;;  %vm4805_vm2 = vcmp.eq.f32.partialorder %v4804_v53, 8.507059e+37  ;;  %v3692_v53 = vpop.xlane.xlu1 %3691 }
 0x4b8   : > { %v4807_v36 = vor.u32 1.1754944e-38, %v4806_v37  ;;  %v5036_v25 = vmul.f32 %v6789_v63, %v5035_v28  ;;  %v5021_v50 = vsub.f32 1.0, %v5020_v29  ;;  %v5048_v42 = vmul.f32 %v6793_v3, %v11081_v61  ;;  %vm5040_vm11 = vmor %vm5038_vm3, %vm5039_vm9  ;;  %v12691_v37 = vld [vmem:[#allocation15_spill] sm:$0xff] }
 0x4b9   : > { %vm5025_vm10 = vweird.f32 %v6791_v9  ;;  %v5028_v0 = vand.u32 2147483647, %v11067_v51  ;;  %v5030_v17 = vand.u32 2147483648, %v11067_v51  ;;  %v11136_v60 = vadd.f32 %v3688_v4, %v12684_v22  ;;  %v4402_v1 = vpop.f32.mrf.mxu2 }
 0x4ba   : > { %v4808_v26 = vsel %vm4805_vm2, %v4807_v36, %v4803_v16  ;;  %v5037_v48 = vadd.f32 %v6789_v63, %v5036_v25  ;;  %v5049_v31 = vsub.f32 1.0, %v5048_v42  ;;  %v5022_v33 = vmul.f32 %v6791_v9, %v5021_v50  ;;  %v12695_v36 = vld [vmem:[#allocation78_spill] sm:$0xff]  ;;  %v12696_v50 = vld [vmem:[#allocation147_spill] sm:$0xff] }
 0x4bb   : > { %v5496_v55 = vmul.f32 %v4808_v26, %v4180_v11  ;;  %v5058_v57 = vand.u32 2147483648, %v11081_v61  ;;  %v4293_v34 = vadd.f32 %v4292_v52, %v12685_v49  ;;  %vm5024_vm12 = vweird.f32 %v11067_v51  ;;  %v12697_v52 = vld [vmem:[#allocation60_spill] sm:$0xff] }
 0x4bc   : > { %6794 = vrcp.f32 %v11136_v60  ;;  %v5041_v35 = vsel %vm5040_vm11, %v6789_v63, %v5037_v48  ;;  %v5050_v20 = vmul.f32 %v6793_v3, %v5049_v31  ;;  %vm5053_vm13 = vweird.f32 %v6793_v3  ;;  %vm5026_vm14 = vmor %vm5024_vm12, %vm5025_vm10  ;;  %v3694_v63 = vpop.xlane.xlu2 %3693 }
 0x4bd   : > { %5560 = vst.msk [vmem:[%s10279_s14 + $0x78] sm:$0xff] %vm1607_vm0, %v5496_v55  ;;  %v5023_v14 = vadd.f32 %v6791_v9, %v5022_v33  ;;  %v5046_v62 = vsel %vm11116_vm4, %v5045_v13, %v5041_v35  ;;  %v5031_v5 = vor.u32 1.1754944e-38, %v5030_v17  ;;  %v11151_v10 = vadd.f32 %v3686_v59, %v12686_v38  ;;  %vm5054_vm1 = vmor %vm5052_vm7, %vm5053_vm13 }
 0x4be   : > { %v11154_v51 = vadd.f32 %v3690_v2, %v12687_v12  ;;  %v5513_v44 = vmul.f32 %v5046_v62, %v12688_v47  ;;  %v5051_v24 = vadd.f32 %v6793_v3, %v5050_v20  ;;  %vm5029_vm15 = vcmp.eq.f32.partialorder %v5028_v0, 8.507059e+37 }
 0x4bf   : > { %v5027_v32 = vsel %vm5026_vm14, %v6791_v9, %v5023_v14  ;;  %v11159_v30 = vadd.f32 %v10903_v46, %v12689_v40  ;;  %v5059_v8 = vor.u32 1.1754944e-38, %v5058_v57  ;;  %6796 = vrcp.f32 %v11151_v10  ;;  %v12702_v57 = vld [vmem:[#allocation12_spill] sm:$0xff]  ;;  %v12705_v40 = vld [vmem:[#allocation69_spill] sm:$0xff] }
 0x4c0   : > { %v5032_v19 = vsel %vm5029_vm15, %v5031_v5, %v5027_v32  ;;  %v11167_v27 = vadd.f32 %v10950_v18, %v12690_v15  ;;  %5577 = vst.msk [vmem:[%s10279_s14 + $0x100] sm:$0xff] %vm1607_vm0, %v5513_v44  ;;  %v5055_v13 = vsel %vm5054_vm1, %v6793_v3, %v5051_v24  ;;  %vm5057_vm3 = vcmp.eq.f32.partialorder %v5056_v41, 8.507059e+37  ;;  %v12692_v18 = vld [vmem:[#allocation19_spill] sm:$0xff]  ;;  %v12693_v41 = vld [vmem:[#allocation38_spill] sm:$0xff]  ;;  %v12694_v3 = vld [vmem:[#allocation28_spill] sm:$0xff] }
 0x4c1   : > { %v5512_v4 = vmul.f32 %v5032_v19, %v4293_v34  ;;  %v5060_v9 = vsel %vm5057_vm3, %v5059_v8, %v5055_v13  ;;  %v5084_v61 = vand.u32 2147483647, %v11136_v60  ;;  %v5086_v21 = vand.u32 2147483648, %v11136_v60  ;;  %v4405_v62 = vpop.f32.mrf.mxu2  ;;  %v12706_v8 = vld [vmem:[#allocation76_spill] sm:$0xff] }
 0x4c2   : > { %v6795_v46 = vpop.eup %6794  ;;  %6798 = vrcp.f32 %v11154_v51  ;;  %v11176_v28 = vadd.f32 %v10999_v6, %v12691_v37  ;;  %v11180_v29 = vadd.f32 %v11056_v7, %v12692_v18  ;;  %v5514_v56 = vmul.f32 %v5060_v9, %v12693_v41  ;;  %v3698_v37 = vpop.xlane.xlu1 %3697 }
 0x4c3   : > { %5576 = vst.msk [vmem:[%s10279_s14 + $0xf8] sm:$0xff] %vm1607_vm0, %v5512_v4  ;;  %v5076_v11 = vmul.f32 %v6795_v46, %v11136_v60  ;;  %v11188_v16 = vadd.f32 %v11113_v54, %v12694_v3  ;;  %v11191_v59 = vadd.f32 %v4402_v1, %v12695_v36  ;;  %vm5080_vm4 = vweird.f32 %v11136_v60  ;;  %v3696_v54 = vpop.xlane.xlu0 %3695 }
 0x4c4   : > { %v5070_v6 = vand.u32 2147483647, %v11151_v10  ;;  %5578 = vst.msk [vmem:[%s10279_s14 + $0x108] sm:$0xff] %vm1607_vm0, %v5514_v56  ;;  %v5072_v25 = vand.u32 2147483648, %v11151_v10  ;;  %v11199_v42 = vadd.f32 %v3694_v63, %v12696_v50  ;;  %v11202_v26 = vadd.f32 %v3692_v53, %v12697_v52  ;;  %v3700_v5 = vpop.xlane.xlu2 %3699 }
 0x4c5   : > { %v5077_v7 = vsub.f32 1.0, %v5076_v11  ;;  %v6797_v0 = vpop.eup %6796  ;;  %vm11204_vm5 = vcmp.eq.f32.partialorder %v5084_v61, 8.507059e+37  ;;  %v5087_v22 = vor.u32 1.1754944e-38, %v5086_v21  ;;  %vm5066_vm6 = vweird.f32 %v11151_v10 }
 0x4c6   : > { %v5098_v48 = vand.u32 2147483647, %v11154_v51  ;;  %vm5081_vm7 = vweird.f32 %v6795_v46  ;;  %v5062_v55 = vmul.f32 %v6797_v0, %v11151_v10  ;;  %6800 = vrcp.f32 %v11199_v42 }
 0x4c7   : > { %v5078_v31 = vmul.f32 %v6795_v46, %v5077_v7  ;;  %vm11212_vm8 = vcmp.eq.f32.partialorder %v5070_v6, 8.507059e+37  ;;  %vm5094_vm9 = vweird.f32 %v11154_v51  ;;  %6802 = vrcp.f32 %v11202_v26  ;;  %vm5082_vm2 = vmor %vm5080_vm4, %vm5081_vm7  ;;  %v12709_v6 = vld [vmem:[#allocation127_spill] sm:$0xff] }
 0x4c8   : > { %v6799_v33 = vpop.eup %6798  ;;  %v11219_v49 = vadd.f32 %v3696_v54, %v12702_v57  ;;  %v5063_v35 = vsub.f32 1.0, %v5062_v55  ;;  %v5073_v20 = vor.u32 1.1754944e-38, %v5072_v25  ;;  %vm5067_vm10 = vweird.f32 %v6797_v0  ;;  %v12713_v57 = vld [vmem:[#allocation14_spill] sm:$0xff] }
 0x4c9   : > { %v5079_v34 = vadd.f32 %v6795_v46, %v5078_v31  ;;  %v5090_v14 = vmul.f32 %v6799_v33, %v11154_v51  ;;  %vm11224_vm11 = vcmp.eq.f32.partialorder %v5098_v48, 8.507059e+37  ;;  %v5100_v12 = vand.u32 2147483648, %v11154_v51  ;;  %vm5068_vm13 = vmor %vm5066_vm6, %vm5067_vm10  ;;  %v12710_v51 = vld [vmem:[#allocation140_spill] sm:$0xff] }
 0x4ca   : > { %v5126_v47 = vand.u32 2147483647, %v11199_v42  ;;  %v5064_v24 = vmul.f32 %v6797_v0, %v5063_v35  ;;  %v5128_v32 = vand.u32 2147483648, %v11199_v42  ;;  %v11234_v60 = vadd.f32 %v4405_v62, %v12705_v40  ;;  %v12716_v40 = vld [vmem:[#allocation32_spill] sm:$0xff] }
 0x4cb   : > { %v5083_v44 = vsel %vm5082_vm2, %v6795_v46, %v5079_v34  ;;  %v5091_v1 = vsub.f32 1.0, %v5090_v14  ;;  %6804 = vrcp.f32 %v11219_v49  ;;  %v11238_v19 = vadd.f32 %v3700_v5, %v12706_v8  ;;  %v3702_v31 = vpop.xlane.xlu0 %3701 }
 0x4cc   : > { %v5088_v63 = vsel %vm11204_vm5, %v5087_v22, %v5083_v44  ;;  %v6801_v15 = vpop.eup %6800  ;;  %v5065_v4 = vadd.f32 %v6797_v0, %v5064_v24  ;;  %vm5095_vm12 = vweird.f32 %v6799_v33  ;;  %v5101_v61 = vor.u32 1.1754944e-38, %v5100_v12  ;;  %v3706_v35 = vpop.xlane.xlu2 %3705  ;;  %v12714_v12 = vld [vmem:[#allocation24_spill] sm:$0xff] }
 0x4cd   : > { %v5516_v13 = vmul.f32 %v5088_v63, %v10549_v23  ;;  %v5092_v46 = vmul.f32 %v6799_v33, %v5091_v1  ;;  %v6803_v9 = vpop.eup %6802  ;;  %v5118_v21 = vmul.f32 %v6801_v15, %v11199_v42  ;;  %vm5122_vm14 = vweird.f32 %v11199_v42  ;;  %vm5096_vm1 = vmor %vm5094_vm9, %vm5095_vm12 }
 0x4ce   : > { %vm11246_vm15 = vcmp.eq.f32.partialorder %v5126_v47, 8.507059e+37  ;;  %v5069_v23 = vsel %vm5068_vm13, %v6797_v0, %v5065_v4  ;;  %v5129_v41 = vor.u32 1.1754944e-38, %v5128_v32  ;;  %v5104_v56 = vmul.f32 %v6803_v9, %v11202_v26  ;;  %v12715_v32 = vld [vmem:[#allocation35_spill] sm:$0xff]  ;;  %v12717_v4 = vld [vmem:[#allocation93_spill] sm:$0xff] }
 0x4cf   : > { %5580 = vst.msk [vmem:[%s10279_s14 + $0x118] sm:$0xff] %vm1607_vm0, %v5516_v13  ;;  %v5093_v18 = vadd.f32 %v6799_v33, %v5092_v46  ;;  %v5074_v10 = vsel %vm11212_vm8, %v5073_v20, %v5069_v23  ;;  %v5119_v11 = vsub.f32 1.0, %v5118_v21  ;;  %v5112_v3 = vand.u32 2147483647, %v11202_v26  ;;  %v3704_v13 = vpop.xlane.xlu1 %3703 }
 0x4d0   : > { %v5114_v36 = vand.u32 2147483648, %v11202_v26  ;;  %v5515_v7 = vmul.f32 %v5074_v10, %v12709_v6  ;;  %v5105_v50 = vsub.f32 1.0, %v5104_v56  ;;  %6806 = vrcp.f32 %v11238_v19 }
 0x4d1   : > { %v5097_v25 = vsel %vm5096_vm1, %v6799_v33, %v5093_v18  ;;  %v6805_v52 = vpop.eup %6804  ;;  %v5120_v0 = vmul.f32 %v6801_v15, %v5119_v11  ;;  %vm5123_vm3 = vweird.f32 %v6801_v15  ;;  %vm5108_vm4 = vweird.f32 %v11202_v26 }
 0x4d2   : > { %v5102_v54 = vsel %vm11224_vm11, %v5101_v61, %v5097_v25  ;;  %5579 = vst.msk [vmem:[%s10279_s14 + $0x110] sm:$0xff] %vm1607_vm0, %v5515_v7  ;;  %v5106_v22 = vmul.f32 %v6803_v9, %v5105_v50  ;;  %vm5109_vm5 = vweird.f32 %v6803_v9  ;;  %v5132_v48 = vmul.f32 %v6805_v52, %v11219_v49  ;;  %vm5124_vm7 = vmor %vm5122_vm14, %vm5123_vm3 }
 0x4d3   : > { %v5517_v17 = vmul.f32 %v5102_v54, %v12710_v51  ;;  %v5121_v55 = vadd.f32 %v6801_v15, %v5120_v0  ;;  %vm11268_vm6 = vcmp.eq.f32.partialorder %v5112_v3, 8.507059e+37  ;;  %v5115_v2 = vor.u32 1.1754944e-38, %v5114_v36  ;;  %vm5110_vm8 = vmor %vm5108_vm4, %vm5109_vm5  ;;  %v3708_v7 = vpop.xlane.xlu0 %3707 }
 0x4d4   : > { %v11273_v34 = vadd.f32 %v3698_v37, %v12713_v57  ;;  %v5107_v20 = vadd.f32 %v6803_v9, %v5106_v22  ;;  %v5133_v14 = vsub.f32 1.0, %v5132_v48  ;;  %v5140_v62 = vand.u32 2147483647, %v11219_v49  ;;  %v12723_v48 = vld [vmem:[#allocation88_spill] sm:$0xff] }
 0x4d5   : > { %5581 = vst.msk [vmem:[%s10279_s14 + $0x120] sm:$0xff] %vm1607_vm0, %v5517_v17  ;;  %v5142_v5 = vand.u32 2147483648, %v11219_v49  ;;  %v5125_v38 = vsel %vm5124_vm7, %v6801_v15, %v5121_v55  ;;  %vm5137_vm9 = vweird.f32 %v6805_v52  ;;  %v11286_v47 = vadd.f32 %v3702_v31, %v12714_v12 }
 0x4d6   : > { %6808 = vrcp.f32 %v11273_v34  ;;  %v6807_v42 = vpop.eup %6806  ;;  %v5130_v44 = vsel %vm11246_vm15, %v5129_v41, %v5125_v38  ;;  %v5111_v24 = vsel %vm5110_vm8, %v6803_v9, %v5107_v20  ;;  %v5134_v1 = vmul.f32 %v6805_v52, %v5133_v14 }
 0x4d7   : > { %v11291_v63 = vadd.f32 %v3706_v35, %v12715_v32  ;;  %v5519_v26 = vmul.f32 %v5130_v44, %v12716_v40  ;;  %v5116_v8 = vsel %vm11268_vm6, %v5115_v2, %v5111_v24  ;;  %vm5136_vm2 = vweird.f32 %v11219_v49  ;;  %v3712_v35 = vpop.xlane.xlu2 %3711  ;;  %v3710_v38 = vpop.xlane.xlu1 %3709 }
 0x4d8   : > { %v5160_v15 = vmul.f32 %v6807_v42, %v11238_v19  ;;  %v5518_v46 = vmul.f32 %v5116_v8, %v12717_v4  ;;  %v5135_v61 = vadd.f32 %v6805_v52, %v5134_v1  ;;  %v5168_v9 = vand.u32 2147483647, %v11238_v19  ;;  %vm5138_vm10 = vmor %vm5136_vm2, %vm5137_vm9  ;;  %v12726_v1 = vld [vmem:[#allocation34_spill] sm:$0xff] }
 0x4d9   : > { %v5170_v21 = vand.u32 2147483648, %v11238_v19  ;;  %5583 = vst.msk [vmem:[%s10279_s14 + $0x130] sm:$0xff] %vm1607_vm0, %v5519_v26  ;;  %vm5141_vm11 = vcmp.eq.f32.partialorder %v5140_v62, 8.507059e+37  ;;  %v5143_v53 = vor.u32 1.1754944e-38, %v5142_v5  ;;  %6810 = vrcp.f32 %v11286_v47  ;;  %v12727_v8 = vld [vmem:[#allocation98_spill] sm:$0xff] }
 0x4da   : > { %v5161_v37 = vsub.f32 1.0, %v5160_v15  ;;  %5582 = vst.msk [vmem:[%s10279_s14 + $0x128] sm:$0xff] %vm1607_vm0, %v5518_v46  ;;  %v5139_v49 = vsel %vm5138_vm10, %v6805_v52, %v5135_v61  ;;  %v5154_v23 = vand.u32 2147483647, %v11273_v34  ;;  %v5156_v18 = vand.u32 2147483648, %v11273_v34  ;;  %v12720_v52 = vld [vmem:[#allocation105_spill] sm:$0xff] }
 0x4db   : > { %6812 = vrcp.f32 %v11291_v63  ;;  %v5144_v56 = vsel %vm5141_vm11, %v5143_v53, %v5139_v49  ;;  %vm5164_vm12 = vweird.f32 %v11238_v19  ;;  %vm5165_vm13 = vweird.f32 %v6807_v42 }
 0x4dc   : > { %v6809_v41 = vpop.eup %6808  ;;  %v5162_v10 = vmul.f32 %v6807_v42, %v5161_v37  ;;  %v5520_v11 = vmul.f32 %v5144_v56, %v11094_v39  ;;  %vm11312_vm14 = vcmp.eq.f32.partialorder %v5168_v9, 8.507059e+37  ;;  %v5171_v36 = vor.u32 1.1754944e-38, %v5170_v21  ;;  %vm5166_vm1 = vmor %vm5164_vm12, %vm5165_vm13 }
 0x4dd   : > { %v5146_v6 = vmul.f32 %v6809_v41, %v11273_v34  ;;  %vm5150_vm15 = vweird.f32 %v11273_v34  ;;  %v5182_v50 = vand.u32 2147483647, %v11286_v47  ;;  %v11320_v54 = vadd.f32 %v3704_v13, %v12720_v52 }
 0x4de   : > { %v5163_v25 = vadd.f32 %v6807_v42, %v5162_v10  ;;  %5584 = vst.msk [vmem:[%s10279_s14 + $0x138] sm:$0xff] %vm1607_vm0, %v5520_v11  ;;  %vm11324_vm3 = vcmp.eq.f32.partialorder %v5154_v23, 8.507059e+37  ;;  %v5157_v0 = vor.u32 1.1754944e-38, %v5156_v18  ;;  %vm5178_vm4 = vweird.f32 %v11286_v47 }
 0x4df   : > { %v5147_v39 = vsub.f32 1.0, %v5146_v6  ;;  %v6811_v51 = vpop.eup %6810  ;;  %v5184_v22 = vand.u32 2147483648, %v11286_v47  ;;  %6814 = vrcp.f32 %v11320_v54  ;;  %v11332_v31 = vadd.f32 %v3708_v7, %v12723_v48  ;;  %v3718_v52 = vpop.xlane.xlu2 %3717 }
 0x4e0   : > { %v5167_v17 = vsel %vm5166_vm1, %v6807_v42, %v5163_v25  ;;  %vm5151_vm5 = vweird.f32 %v6809_v41  ;;  %v5174_v57 = vmul.f32 %v6811_v51, %v11286_v47  ;;  %vm11338_vm6 = vcmp.eq.f32.partialorder %v5182_v50, 8.507059e+37  ;;  %v3714_v47 = vpop.xlane.xlu0 %3713 }
 0x4e1   : > { %v6813_v55 = vpop.eup %6812  ;;  %v5172_v33 = vsel %vm11312_vm14, %v5171_v36, %v5167_v17  ;;  %v5148_v2 = vmul.f32 %v6809_v41, %v5147_v39  ;;  %v5210_v5 = vand.u32 2147483647, %v11291_v63  ;;  %vm5206_vm7 = vweird.f32 %v11291_v63  ;;  %vm5152_vm8 = vmor %vm5150_vm15, %vm5151_vm5 }
 0x4e2   : > { %v5522_v20 = vmul.f32 %v5172_v33, %v11159_v30  ;;  %v5202_v62 = vmul.f32 %v6813_v55, %v11291_v63  ;;  %v5175_v42 = vsub.f32 1.0, %v5174_v57  ;;  %v5212_v44 = vand.u32 2147483648, %v11291_v63 }
 0x4e3   : > { %v5149_v12 = vadd.f32 %v6809_v41, %v5148_v2  ;;  %v5185_v30 = vor.u32 1.1754944e-38, %v5184_v22  ;;  %6816 = vrcp.f32 %v11332_v31  ;;  %v11352_v32 = vadd.f32 %v3712_v35, %v12726_v1  ;;  %v11403_v22 = vpop.f32.mrf.mxu3  ;;  %v12735_v2 = vld [vmem:[#allocation53_spill] sm:$0xff]  ;;  %v3716_v35 = vpop.xlane.xlu1 %3715 }
 0x4e4   : > { %5586 = vst.msk [vmem:[%s10279_s14 + $0x148] sm:$0xff] %vm1607_vm0, %v5522_v20  ;;  %v5203_v24 = vsub.f32 1.0, %v5202_v62  ;;  %v5176_v26 = vmul.f32 %v6811_v51, %v5175_v42  ;;  %vm5179_vm9 = vweird.f32 %v6811_v51  ;;  %v11355_v15 = vadd.f32 %v3710_v38, %v12727_v8 }
 0x4e5   : > { %v5153_v40 = vsel %vm5152_vm8, %v6809_v41, %v5149_v12  ;;  %v6815_v13 = vpop.eup %6814  ;;  %vm5207_vm2 = vweird.f32 %v6813_v55  ;;  %vm11359_vm10 = vcmp.eq.f32.partialorder %v5210_v5, 8.507059e+37  ;;  %v5213_v21 = vor.u32 1.1754944e-38, %v5212_v44  ;;  %vm5180_vm11 = vmor %vm5178_vm4, %vm5179_vm9 }
 0x4e6   : > { %v5158_v4 = vsel %vm11324_vm3, %v5157_v0, %v5153_v40  ;;  %v5204_v34 = vmul.f32 %v6813_v55, %v5203_v24  ;;  %v5177_v9 = vadd.f32 %v6811_v51, %v5176_v26  ;;  %v5188_v53 = vmul.f32 %v6815_v13, %v11320_v54  ;;  %vm5208_vm12 = vmor %vm5206_vm7, %vm5207_vm2  ;;  %v12736_v24 = vld [vmem:[#allocation113_spill] sm:$0xff] }
 0x4e7   : > { %v5521_v61 = vmul.f32 %v5158_v4, %v11102_v58  ;;  %v5196_v49 = vand.u32 2147483647, %v11320_v54  ;;  %v5198_v23 = vand.u32 2147483648, %v11320_v54  ;;  %6818 = vrcp.f32 %v11352_v32 }
 0x4e8   : > { %v5205_v37 = vadd.f32 %v6813_v55, %v5204_v34  ;;  %v5181_v18 = vsel %vm5180_vm11, %v6811_v51, %v5177_v9  ;;  %v5189_v58 = vsub.f32 1.0, %v5188_v53  ;;  %v5224_v41 = vand.u32 2147483647, %v11332_v31  ;;  %v3720_v8 = vpop.xlane.xlu0 %3719 }
 0x4e9   : > { %5585 = vst.msk [vmem:[%s10279_s14 + $0x140] sm:$0xff] %vm1607_vm0, %v5521_v61  ;;  %v5226_v56 = vand.u32 2147483648, %v11332_v31  ;;  %v6817_v10 = vpop.eup %6816  ;;  %v5186_v11 = vsel %vm11338_vm6, %v5185_v30, %v5181_v18  ;;  %vm5193_vm13 = vweird.f32 %v6815_v13  ;;  %6820 = vrcp.f32 %v11355_v15 }
 0x4ea   : > { %v5209_v3 = vsel %vm5208_vm12, %v6813_v55, %v5205_v37  ;;  %v5523_v36 = vmul.f32 %v5186_v11, %v11167_v27  ;;  %v5190_v6 = vmul.f32 %v6815_v13, %v5189_v58  ;;  %v5216_v7 = vmul.f32 %v6817_v10, %v11332_v31  ;;  %v12737_v37 = vld [vmem:[#allocation143_spill] sm:$0xff] }
 0x4eb   : > { %v5214_v63 = vsel %vm11359_vm10, %v5213_v21, %v5209_v3  ;;  %vm5192_vm14 = vweird.f32 %v11320_v54  ;;  %vm11385_vm15 = vcmp.eq.f32.partialorder %v5196_v49, 8.507059e+37  ;;  %vm5220_vm1 = vweird.f32 %v11332_v31  ;;  %v12734_v54 = vld [vmem:[#allocation94_spill] sm:$0xff] }
 0x4ec   : > { %v5525_v25 = vmul.f32 %v5214_v63, %v11180_v29  ;;  %5587 = vst.msk [vmem:[%s10279_s14 + $0x150] sm:$0xff] %vm1607_vm0, %v5523_v36  ;;  %v5191_v27 = vadd.f32 %v6815_v13, %v5190_v6  ;;  %v5199_v39 = vor.u32 1.1754944e-38, %v5198_v23  ;;  %v5217_v19 = vsub.f32 1.0, %v5216_v7  ;;  %vm5194_vm4 = vmor %vm5192_vm14, %vm5193_vm13 }
 0x4ed   : > { %vm11392_vm3 = vcmp.eq.f32.partialorder %v5224_v41, 8.507059e+37  ;;  %v6819_v51 = vpop.eup %6818  ;;  %vm5221_vm5 = vweird.f32 %v6817_v10  ;;  %v5227_v29 = vor.u32 1.1754944e-38, %v5226_v56  ;;  %vm5248_vm6 = vweird.f32 %v11352_v32  ;;  %v3724_v56 = vpop.xlane.xlu2 %3723 }
 0x4ee   : > { %5589 = vst.msk [vmem:[%s10279_s14 + $0x160] sm:$0xff] %vm1607_vm0, %v5525_v25  ;;  %v11401_v17 = vadd.f32 %v3714_v47, %v12734_v54  ;;  %v5195_v48 = vsel %vm5194_vm4, %v6815_v13, %v5191_v27  ;;  %v5218_v55 = vmul.f32 %v6817_v10, %v5217_v19  ;;  %v5244_v33 = vmul.f32 %v6819_v51, %v11352_v32  ;;  %vm5222_vm7 = vmor %vm5220_vm1, %vm5221_vm5  ;;  %v3722_v25 = vpop.xlane.xlu1 %3721  ;;  %v12740_v19 = vld [vmem:[#allocation132_spill] sm:$0xff]  ;;  %v12741_v54 = vld [vmem:[#allocation141_spill] sm:$0xff] }
 0x4ef   : > { %v11407_v57 = vadd.f32 %v3718_v52, %v12735_v2  ;;  %v6821_v20 = vpop.eup %6820  ;;  %v5200_v14 = vsel %vm11385_vm15, %v5199_v39, %v5195_v48  ;;  %v5252_v62 = vand.u32 2147483647, %v11352_v32  ;;  %v5254_v5 = vand.u32 2147483648, %v11352_v32 }
 0x4f0   : > { %6822 = vrcp.f32 %v11401_v17  ;;  %v5524_v38 = vmul.f32 %v5200_v14, %v11176_v28  ;;  %v5219_v12 = vadd.f32 %v6817_v10, %v5218_v55  ;;  %v5245_v42 = vsub.f32 1.0, %v5244_v33 }
 0x4f1   : > { %v5230_v44 = vmul.f32 %v6821_v20, %v11355_v15  ;;  %vm5249_vm8 = vweird.f32 %v6819_v51  ;;  %vm5234_vm9 = vweird.f32 %v11355_v15  ;;  %v5238_v30 = vand.u32 2147483647, %v11355_v15 }
 0x4f2   : > { %v11422_v1 = vadd.f32 %v3716_v35, %v12736_v24  ;;  %5588 = vst.msk [vmem:[%s10279_s14 + $0x158] sm:$0xff] %vm1607_vm0, %v5524_v38  ;;  %v5223_v40 = vsel %vm5222_vm7, %v6817_v10, %v5219_v12  ;;  %v5246_v28 = vmul.f32 %v6819_v51, %v5245_v42  ;;  %6824 = vrcp.f32 %v11407_v57  ;;  %vm5250_vm10 = vmor %vm5248_vm6, %vm5249_vm8  ;;  %v11451_v10 = vpop.f32.mrf.mxu3  ;;  %v3726_v12 = vpop.xlane.xlu0 %3725  ;;  %v12744_v42 = vld [vmem:[#allocation117_spill] sm:$0xff]  ;;  %v12758_v35 = vld [vmem:[#allocation135_spill] sm:$0xff] }
 0x4f3   : > { %v5231_v26 = vsub.f32 1.0, %v5230_v44  ;;  %v5228_v31 = vsel %vm11392_vm3, %v5227_v29, %v5223_v40  ;;  %vm5235_vm2 = vweird.f32 %v6821_v20  ;;  %v5240_v13 = vand.u32 2147483648, %v11355_v15 }
 0x4f4   : > { %v5266_v4 = vand.u32 2147483647, %v11401_v17  ;;  %v5526_v34 = vmul.f32 %v5228_v31, %v11188_v16  ;;  %v5247_v46 = vadd.f32 %v6819_v51, %v5246_v28  ;;  %v5268_v9 = vand.u32 2147483648, %v11401_v17  ;;  %vm5236_vm13 = vmor %vm5234_vm9, %vm5235_vm2 }
 0x4f5   : > { %v5232_v61 = vmul.f32 %v6821_v20, %v5231_v26  ;;  %vm5253_vm11 = vcmp.eq.f32.partialorder %v5252_v62, 8.507059e+37  ;;  %v5255_v53 = vor.u32 1.1754944e-38, %v5254_v5  ;;  %6826 = vrcp.f32 %v11422_v1 }
 0x4f6   : > { %v6823_v21 = vpop.eup %6822  ;;  %v11438_v49 = vadd.f32 %v3720_v8, %v12737_v37  ;;  %5590 = vst.msk [vmem:[%s10279_s14 + $0x168] sm:$0xff] %vm1607_vm0, %v5526_v34  ;;  %v5251_v23 = vsel %vm5250_vm10, %v6819_v51, %v5247_v46  ;;  %vm5239_vm12 = vcmp.eq.f32.partialorder %v5238_v30, 8.507059e+37  ;;  %v5241_v32 = vor.u32 1.1754944e-38, %v5240_v13  ;;  %v3730_v8 = vpop.xlane.xlu2 %3729 }
 0x4f7   : > { %v5233_v16 = vadd.f32 %v6821_v20, %v5232_v61  ;;  %v5258_v18 = vmul.f32 %v6823_v21, %v11401_v17  ;;  %v5256_v58 = vsel %vm5253_vm11, %v5255_v53, %v5251_v23  ;;  %vm5262_vm14 = vweird.f32 %v11401_v17  ;;  %v12747_v61 = vld [vmem:[#allocation148_spill] sm:$0xff]  ;;  %v12750_v53 = vld [vmem:[#allocation134_spill] sm:$0xff] }
 0x4f8   : > { %vm11447_vm15 = vcmp.eq.f32.partialorder %v5266_v4, 8.507059e+37  ;;  %v6825_v47 = vpop.eup %6824  ;;  %v5528_v11 = vmul.f32 %v5256_v58, %v11234_v60  ;;  %v5269_v63 = vor.u32 1.1754944e-38, %v5268_v9  ;;  %v5294_v7 = vand.u32 2147483647, %v11407_v57  ;;  %v12751_v58 = vld [vmem:[#allocation18_spill] sm:$0xff] }
 0x4f9   : > { %v5237_v3 = vsel %vm5236_vm13, %v6821_v20, %v5233_v16  ;;  %v5259_v36 = vsub.f32 1.0, %v5258_v18  ;;  %v5286_v6 = vmul.f32 %v6825_v47, %v11407_v57  ;;  %6828 = vrcp.f32 %v11438_v49 }
 0x4fa   : > { %v5242_v15 = vsel %vm5239_vm12, %v5241_v32, %v5237_v3  ;;  %5592 = vst.msk [vmem:[%s10279_s14 + $0x178] sm:$0xff] %vm1607_vm0, %v5528_v11  ;;  %vm5263_vm1 = vweird.f32 %v6823_v21  ;;  %v5296_v60 = vand.u32 2147483648, %v11407_v57  ;;  %vm5290_vm3 = vweird.f32 %v11407_v57  ;;  %v11494_v31 = vpop.f32.mrf.mxu3  ;;  %v12752_v11 = vld [vmem:[#allocation44_spill] sm:$0xff] }
 0x4fb   : > { %v5527_v50 = vmul.f32 %v5242_v15, %v11191_v59  ;;  %v5260_v52 = vmul.f32 %v6823_v21, %v5259_v36  ;;  %v6827_v27 = vpop.eup %6826  ;;  %v5287_v39 = vsub.f32 1.0, %v5286_v6  ;;  %vm5276_vm4 = vweird.f32 %v11422_v1  ;;  %vm5264_vm5 = vmor %vm5262_vm14, %vm5263_vm1 }
 0x4fc   : > { %v11464_v0 = vadd.f32 %v3724_v56, %v12740_v19  ;;  %v5272_v29 = vmul.f32 %v6827_v27, %v11422_v1  ;;  %v5280_v59 = vand.u32 2147483647, %v11422_v1  ;;  %v11471_v48 = vadd.f32 %v3722_v25, %v12741_v54 }
 0x4fd   : > { %5591 = vst.msk [vmem:[%s10279_s14 + $0x170] sm:$0xff] %vm1607_vm0, %v5527_v50  ;;  %v5261_v51 = vadd.f32 %v6823_v21, %v5260_v52  ;;  %v5288_v55 = vmul.f32 %v6825_v47, %v5287_v39  ;;  %vm5291_vm6 = vweird.f32 %v6825_v47  ;;  %v5282_v33 = vand.u32 2147483648, %v11422_v1 }
 0x4fe   : > { %6830 = vrcp.f32 %v11464_v0  ;;  %vm11477_vm7 = vcmp.eq.f32.partialorder %v5294_v7, 8.507059e+37  ;;  %v5297_v20 = vor.u32 1.1754944e-38, %v5296_v60  ;;  %v5273_v14 = vsub.f32 1.0, %v5272_v29  ;;  %vm5292_vm8 = vmor %vm5290_vm3, %vm5291_vm6  ;;  %v12755_v29 = vld [vmem:[#allocation23_spill] sm:$0xff] }
 0x4ff   : > { %v5265_v2 = vsel %vm5264_vm5, %v6823_v21, %v5261_v51  ;;  %v6829_v62 = vpop.eup %6828  ;;  %v5289_v17 = vadd.f32 %v6825_v47, %v5288_v55  ;;  %v5308_v38 = vand.u32 2147483647, %v11438_v49  ;;  %6832 = vrcp.f32 %v11471_v48  ;;  %v3732_v51 = vpop.xlane.xlu0 %3731 }
 0x500   : > { %v5270_v5 = vsel %vm11447_vm15, %v5269_v63, %v5265_v2  ;;  %v5274_v30 = vmul.f32 %v6827_v27, %v5273_v14  ;;  %vm5277_vm9 = vweird.f32 %v6827_v27  ;;  %v5300_v24 = vmul.f32 %v6829_v62, %v11438_v49  ;;  %v3736_v14 = vpop.xlane.xlu2 %3735 }
 0x501   : > { %v5529_v44 = vmul.f32 %v5270_v5, %v12744_v42  ;;  %v5293_v40 = vsel %vm5292_vm8, %v6825_v47, %v5289_v17  ;;  %vm11489_vm2 = vcmp.eq.f32.partialorder %v5280_v59, 8.507059e+37  ;;  %v5283_v26 = vor.u32 1.1754944e-38, %v5282_v33  ;;  %vm5278_vm11 = vmor %vm5276_vm4, %vm5277_vm9 }
 0x502   : > { %vm5304_vm10 = vweird.f32 %v11438_v49  ;;  %v5298_v57 = vsel %vm11477_vm7, %v5297_v20, %v5293_v40  ;;  %v5275_v13 = vadd.f32 %v6827_v27, %v5274_v30  ;;  %v5301_v4 = vsub.f32 1.0, %v5300_v24  ;;  %v12760_v40 = vld [vmem:[#allocation104_spill] sm:$0xff] }
 0x503   : > { %5593 = vst.msk [vmem:[%s10279_s14 + $0x180] sm:$0xff] %vm1607_vm0, %v5529_v44  ;;  %v5310_v34 = vand.u32 2147483648, %v11438_v49  ;;  %v5531_v9 = vmul.f32 %v5298_v57, %v12747_v61  ;;  %vm5305_vm12 = vweird.f32 %v6829_v62  ;;  %vm11505_vm13 = vcmp.eq.f32.partialorder %v5308_v38, 8.507059e+37  ;;  %v12761_v57 = vld [vmem:[#allocation37_spill] sm:$0xff] }
 0x504   : > { %v6831_v46 = vpop.eup %6830  ;;  %v11510_v37 = vadd.f32 %v3726_v12, %v12750_v53  ;;  %v5279_v23 = vsel %vm5278_vm11, %v6827_v27, %v5275_v13  ;;  %v5302_v16 = vmul.f32 %v6829_v62, %v5301_v4  ;;  %v11514_v32 = vadd.f32 %v3730_v8, %v12751_v58  ;;  %vm5306_vm14 = vmor %vm5304_vm10, %vm5305_vm12  ;;  %v3728_v27 = vpop.xlane.xlu1 %3727  ;;  %v12759_v12 = vld [vmem:[#allocation75_spill] sm:$0xff] }
 0x505   : > { %v5328_v18 = vmul.f32 %v6831_v46, %v11464_v0  ;;  %v6833_v41 = vpop.eup %6832  ;;  %5595 = vst.msk [vmem:[%s10279_s14 + $0x190] sm:$0xff] %vm1607_vm0, %v5531_v9  ;;  %v5284_v1 = vsel %vm11489_vm2, %v5283_v26, %v5279_v23  ;;  %v5336_v56 = vand.u32 2147483647, %v11464_v0  ;;  %v5338_v47 = vand.u32 2147483648, %v11464_v0  ;;  %v12762_v9 = vld [vmem:[#allocation27_spill] sm:$0xff] }
 0x506   : > { %6834 = vrcp.f32 %v11510_v37  ;;  %v5530_v3 = vmul.f32 %v5284_v1, %v12752_v11  ;;  %v5303_v36 = vadd.f32 %v6829_v62, %v5302_v16  ;;  %v5314_v15 = vmul.f32 %v6833_v41, %v11471_v48  ;;  %v12763_v23 = vld [vmem:[#allocation63_spill] sm:$0xff] }
 0x507   : > { %v5329_v63 = vsub.f32 1.0, %v5328_v18  ;;  %v5311_v6 = vor.u32 1.1754944e-38, %v5310_v34  ;;  %vm5333_vm15 = vweird.f32 %v6831_v46  ;;  %v5322_v7 = vand.u32 2147483647, %v11471_v48  ;;  %v12764_v18 = vld [vmem:[#allocation130_spill] sm:$0xff] }
 0x508   : > { %v5324_v25 = vand.u32 2147483648, %v11471_v48  ;;  %5594 = vst.msk [vmem:[%s10279_s14 + $0x188] sm:$0xff] %vm1607_vm0, %v5530_v3  ;;  %v5307_v50 = vsel %vm5306_vm14, %v6829_v62, %v5303_v36  ;;  %v5315_v60 = vsub.f32 1.0, %v5314_v15  ;;  %6836 = vrcp.f32 %v11514_v32  ;;  %v4506_v62 = vpop.f32.mrf.mxu3 }
 0x509   : > { %v5330_v52 = vmul.f32 %v6831_v46, %v5329_v63  ;;  %v5312_v39 = vsel %vm11505_vm13, %v5311_v6, %v5307_v50  ;;  %vm5332_vm1 = vweird.f32 %v11464_v0  ;;  %vm11536_vm3 = vcmp.eq.f32.partialorder %v5336_v56, 8.507059e+37 }
 0x50a   : > { %v5339_v19 = vor.u32 1.1754944e-38, %v5338_v47  ;;  %v5532_v59 = vmul.f32 %v5312_v39, %v12755_v29  ;;  %v5316_v55 = vmul.f32 %v6833_v41, %v5315_v60  ;;  %vm5319_vm4 = vweird.f32 %v6833_v41  ;;  %vm5334_vm5 = vmor %vm5332_vm1, %vm5333_vm15  ;;  %v12768_v39 = vld [vmem:[#allocation30_spill] sm:$0xff] }
 0x50b   : > { %v5331_v54 = vadd.f32 %v6831_v46, %v5330_v52  ;;  %vm5318_vm6 = vweird.f32 %v11471_v48  ;;  %vm11543_vm7 = vcmp.eq.f32.partialorder %v5322_v7, 8.507059e+37  ;;  %v5325_v0 = vor.u32 1.1754944e-38, %v5324_v25 }
 0x50c   : > { %v6835_v33 = vpop.eup %6834  ;;  %v11548_v20 = vadd.f32 %v3728_v27, %v12758_v35  ;;  %5596 = vst.msk [vmem:[%s10279_s14 + $0x198] sm:$0xff] %vm1607_vm0, %v5532_v59  ;;  %v5317_v17 = vadd.f32 %v6833_v41, %v5316_v55  ;;  %v11554_v42 = vadd.f32 %v3732_v51, %v12759_v12  ;;  %vm5320_vm8 = vmor %vm5318_vm6, %vm5319_vm4  ;;  %v5350_v44 = vand.u32 2147483647, %v11510_v37  ;;  %v3734_v11 = vpop.xlane.xlu1 %3733 }
 0x50d   : > { %v5335_v5 = vsel %vm5334_vm5, %v6831_v46, %v5331_v54  ;;  %v5342_v38 = vmul.f32 %v6835_v33, %v11510_v37  ;;  %v5352_v30 = vand.u32 2147483648, %v11510_v37  ;;  %v11564_v13 = vadd.f32 %v3736_v14, %v12761_v57 }
 0x50e   : > { %v5340_v48 = vsel %vm11536_vm3, %v5339_v19, %v5335_v5  ;;  %6838 = vrcp.f32 %v11548_v20  ;;  %v6837_v24 = vpop.eup %6836  ;;  %v5321_v26 = vsel %vm5320_vm8, %v6833_v41, %v5317_v17  ;;  %v5378_v46 = vand.u32 2147483647, %v11514_v32  ;;  %v12765_v41 = vld [vmem:[#allocation20_spill] sm:$0xff]  ;;  %v12769_v19 = vld [vmem:[#allocation71_spill] sm:$0xff] }
 0x50f   : > { %v5534_v28 = vmul.f32 %v5340_v48, %v12760_v40  ;;  %v5343_v8 = vsub.f32 1.0, %v5342_v38  ;;  %v5326_v4 = vsel %vm11543_vm7, %v5325_v0, %v5321_v26  ;;  %v5370_v34 = vmul.f32 %v6837_v24, %v11514_v32 }
 0x510   : > { %v5380_v61 = vand.u32 2147483648, %v11514_v32  ;;  %v5533_v21 = vmul.f32 %v5326_v4, %v12762_v9  ;;  %vm5347_vm9 = vweird.f32 %v6835_v33  ;;  %6840 = vrcp.f32 %v11554_v42  ;;  %v11596_v60 = vpop.f32.mrf.mxu3 }
 0x511   : > { %5598 = vst.msk [vmem:[%s10279_s14 + $0x1a8] sm:$0xff] %vm1607_vm0, %v5534_v28  ;;  %v5344_v53 = vmul.f32 %v6835_v33, %v5343_v8  ;;  %v4498_v16 = vadd.f32 %v11403_v22, %v12763_v23  ;;  %v11579_v58 = vadd.f32 %v11451_v10, %v12764_v18  ;;  %v11582_v1 = vadd.f32 %v4506_v62, %v12765_v41  ;;  %v3738_v10 = vpop.xlane.xlu0 %3737 }
 0x512   : > { %v5371_v56 = vsub.f32 1.0, %v5370_v34  ;;  %5597 = vst.msk [vmem:[%s10279_s14 + $0x1a0] sm:$0xff] %vm1607_vm0, %v5533_v21  ;;  %vm5346_vm2 = vweird.f32 %v11510_v37  ;;  %vm5351_vm10 = vcmp.eq.f32.partialorder %v5350_v44, 8.507059e+37  ;;  %6842 = vrcp.f32 %v11564_v13  ;;  %v3742_v44 = vpop.xlane.xlu2 %3741 }
 0x513   : > { %v5345_v47 = vadd.f32 %v6835_v33, %v5344_v53  ;;  %vm5348_vm11 = vmor %vm5346_vm2, %vm5347_vm9  ;;  %v5353_v22 = vor.u32 1.1754944e-38, %v5352_v30  ;;  %vm5374_vm12 = vweird.f32 %v11514_v32  ;;  %vm5375_vm13 = vweird.f32 %v6837_v24 }
 0x514   : > { %v6839_v3 = vpop.eup %6838  ;;  %v5372_v36 = vmul.f32 %v6837_v24, %v5371_v56  ;;  %vm11589_vm14 = vcmp.eq.f32.partialorder %v5378_v46, 8.507059e+37  ;;  %v5381_v6 = vor.u32 1.1754944e-38, %v5380_v61  ;;  %vm5360_vm15 = vweird.f32 %v11548_v20  ;;  %vm5376_vm1 = vmor %vm5374_vm12, %vm5375_vm13  ;;  %v3740_v26 = vpop.xlane.xlu1 %3739  ;;  %v12774_v61 = vld [vmem:[#allocation121_spill] sm:$0xff] }
 0x515   : > { %v5349_v63 = vsel %vm5348_vm11, %v6835_v33, %v5345_v47  ;;  %v5356_v37 = vmul.f32 %v6839_v3, %v11548_v20  ;;  %v5364_v50 = vand.u32 2147483647, %v11548_v20  ;;  %v11600_v49 = vadd.f32 %v3734_v11, %v12768_v39 }
 0x516   : > { %v5354_v7 = vsel %vm5351_vm10, %v5353_v22, %v5349_v63  ;;  %v5373_v25 = vadd.f32 %v6837_v24, %v5372_v36  ;;  %v6841_v52 = vpop.eup %6840  ;;  %v11603_v51 = vadd.f32 %v3738_v10, %v12769_v19  ;;  %v5366_v59 = vand.u32 2147483648, %v11548_v20 }
 0x517   : > { %v5535_v32 = vmul.f32 %v5354_v7, %v11098_v43  ;;  %v5357_v27 = vsub.f32 1.0, %v5356_v37  ;;  %v5384_v54 = vmul.f32 %v6841_v52, %v11554_v42  ;;  %v5392_v55 = vand.u32 2147483647, %v11554_v42 }
 0x518   : > { %v5377_v29 = vsel %vm5376_vm1, %v6837_v24, %v5373_v25  ;;  %v6843_v33 = vpop.eup %6842  ;;  %vm5361_vm3 = vweird.f32 %v6839_v3  ;;  %6844 = vrcp.f32 %v11600_v49  ;;  %vm11613_vm4 = vcmp.eq.f32.partialorder %v5364_v50, 8.507059e+37  ;;  %v11644_v56 = vpop.f32.mrf.mxu3 }
 0x519   : > { %5599 = vst.msk [vmem:[%s10279_s14 + $0x1b0] sm:$0xff] %vm1607_vm0, %v5535_v32  ;;  %v5382_v43 = vsel %vm11589_vm14, %v5381_v6, %v5377_v29  ;;  %v5358_v2 = vmul.f32 %v6839_v3, %v5357_v27  ;;  %v5385_v14 = vsub.f32 1.0, %v5384_v54  ;;  %v5412_v62 = vmul.f32 %v6843_v33, %v11564_v13  ;;  %vm5362_vm6 = vmor %vm5360_vm15, %vm5361_vm3  ;;  %v3744_v63 = vpop.xlane.xlu0 %3743  ;;  %v12778_v54 = vld [vmem:[#allocation26_spill] sm:$0xff] }
 0x51a   : > { %v5537_v0 = vmul.f32 %v5382_v43, %v4498_v16  ;;  %vm5388_vm5 = vweird.f32 %v11554_v42  ;;  %v5394_v17 = vand.u32 2147483648, %v11554_v42  ;;  %6846 = vrcp.f32 %v11603_v51  ;;  %v12775_v16 = vld [vmem:[#allocation36_spill] sm:$0xff] }
 0x51b   : > { %v5359_v5 = vadd.f32 %v6839_v3, %v5358_v2  ;;  %v5367_v38 = vor.u32 1.1754944e-38, %v5366_v59  ;;  %v5386_v12 = vmul.f32 %v6841_v52, %v5385_v14  ;;  %vm5389_vm7 = vweird.f32 %v6841_v52 }
 0x51c   : > { %5601 = vst.msk [vmem:[%s10279_s14 + $0x1c0] sm:$0xff] %vm1607_vm0, %v5537_v0  ;;  %v5413_v48 = vsub.f32 1.0, %v5412_v62  ;;  %vm11625_vm8 = vcmp.eq.f32.partialorder %v5392_v55, 8.507059e+37  ;;  %v5420_v40 = vand.u32 2147483647, %v11564_v13  ;;  %v5422_v28 = vand.u32 2147483648, %v11564_v13  ;;  %vm5390_vm2 = vmor %vm5388_vm5, %vm5389_vm7 }
 0x51d   : > { %v5363_v30 = vsel %vm5362_vm6, %v6839_v3, %v5359_v5  ;;  %v5387_v20 = vadd.f32 %v6841_v52, %v5386_v12  ;;  %vm5417_vm9 = vweird.f32 %v6843_v33  ;;  %v5395_v46 = vor.u32 1.1754944e-38, %v5394_v17 }
 0x51e   : > { %v5368_v8 = vsel %vm11613_vm4, %v5367_v38, %v5363_v30  ;;  %v5414_v57 = vmul.f32 %v6843_v33, %v5413_v48  ;;  %v6845_v4 = vpop.eup %6844  ;;  %vm5416_vm10 = vweird.f32 %v11564_v13  ;;  %v11638_v9 = vadd.f32 %v3742_v44, %v12774_v61 }
 0x51f   : > { %v5536_v34 = vmul.f32 %v5368_v8, %v11105_v45  ;;  %v5391_v21 = vsel %vm5390_vm2, %v6841_v52, %v5387_v20  ;;  %v5398_v23 = vmul.f32 %v6845_v4, %v11600_v49  ;;  %v11642_v18 = vadd.f32 %v3740_v26, %v12775_v16  ;;  %vm5418_vm11 = vmor %vm5416_vm10, %vm5417_vm9  ;;  %v12776_v52 = vld [vmem:[#allocation123_spill] sm:$0xff]  ;;  %v12779_v26 = vld [vmem:[#allocation109_spill] sm:$0xff] }
 0x520   : > { %v5415_v53 = vadd.f32 %v6843_v33, %v5414_v57  ;;  %v6847_v41 = vpop.eup %6846  ;;  %v5396_v45 = vsel %vm11625_vm8, %v5395_v46, %v5391_v21  ;;  %vm5421_vm12 = vcmp.eq.f32.partialorder %v5420_v40, 8.507059e+37  ;;  %v5423_v42 = vor.u32 1.1754944e-38, %v5422_v28  ;;  %v4515_v35 = vpop.f32.mrf.mxu3  ;;  %v12780_v21 = vld [vmem:[#allocation66_spill] sm:$0xff] }
 0x521   : > { %5600 = vst.msk [vmem:[%s10279_s14 + $0x1b8] sm:$0xff] %vm1607_vm0, %v5536_v34  ;;  %6848 = vrcp.f32 %v11638_v9  ;;  %v5538_v13 = vmul.f32 %v5396_v45, %v11579_v58  ;;  %v5399_v11 = vsub.f32 1.0, %v5398_v23  ;;  %v5426_v3 = vmul.f32 %v6847_v41, %v11603_v51 }
 0x522   : > { %v5419_v47 = vsel %vm5418_vm11, %v6843_v33, %v5415_v53  ;;  %vm5403_vm13 = vweird.f32 %v6845_v4  ;;  %v5406_v36 = vand.u32 2147483647, %v11600_v49  ;;  %v5408_v10 = vand.u32 2147483648, %v11600_v49 }
 0x523   : > { %v5424_v22 = vsel %vm5421_vm12, %v5423_v42, %v5419_v47  ;;  %5602 = vst.msk [vmem:[%s10279_s14 + $0x1c8] sm:$0xff] %vm1607_vm0, %v5538_v13  ;;  %v5400_v6 = vmul.f32 %v6845_v4, %v5399_v11  ;;  %v5427_v37 = vsub.f32 1.0, %v5426_v3  ;;  %6850 = vrcp.f32 %v11642_v18  ;;  %v12781_v11 = vld [vmem:[#allocation70_spill] sm:$0xff] }
 0x524   : > { %v5540_v15 = vmul.f32 %v5424_v22, %v11582_v1  ;;  %vm5402_vm14 = vweird.f32 %v11600_v49  ;;  %v5434_v58 = vand.u32 2147483647, %v11603_v51  ;;  %v5436_v7 = vand.u32 2147483648, %v11603_v51  ;;  %v12777_v1 = vld [vmem:[#allocation16_spill] sm:$0xff] }
 0x525   : > { %v5401_v25 = vadd.f32 %v6845_v4, %v5400_v6  ;;  %v5428_v50 = vmul.f32 %v6847_v41, %v5427_v37  ;;  %vm5431_vm15 = vweird.f32 %v6847_v41  ;;  %v11666_v32 = vadd.f32 %v3744_v63, %v12776_v52  ;;  %vm5404_vm1 = vmor %vm5402_vm14, %vm5403_vm13  ;;  %v5776_v63 = vld [vmem:[%s10279_s14] sm:$0xff] (%p7056_p12)  ;;  %v5780_v6 = vld [vmem:[%s10279_s14 + $0x10] sm:$0xff] (%p7056_p12) }
 0x526   : > { %5604 = vst.msk [vmem:[%s10279_s14 + $0x1d8] sm:$0xff] %vm1607_vm0, %v5540_v15  ;;  %v4504_v39 = vadd.f32 %v11494_v31, %v12777_v1  ;;  %v5409_v19 = vor.u32 1.1754944e-38, %v5408_v10  ;;  %vm5430_vm3 = vweird.f32 %v11603_v51  ;;  %vm5407_vm4 = vcmp.eq.f32.partialorder %v5406_v36, 8.507059e+37  ;;  %v5778_v15 = vld [vmem:[%s10279_s14 + $0x8] sm:$0xff] (%p7056_p12)  ;;  %v5782_v37 = vld [vmem:[%s10279_s14 + $0x18] sm:$0xff] (%p7056_p12)  ;;  %v5792_v52 = vld [vmem:[%s10279_s14 + $0x40] sm:$0xff] (%p7056_p12) }
 0x527   : > { %v6849_v27 = vpop.eup %6848  ;;  %v5405_v49 = vsel %vm5404_vm1, %v6845_v4, %v5401_v25  ;;  %v5429_v29 = vadd.f32 %v6847_v41, %v5428_v50  ;;  %v4510_v55 = vadd.f32 %v11596_v60, %v12778_v54  ;;  %vm5432_vm5 = vmor %vm5430_vm3, %vm5431_vm15  ;;  %v5437_v43 = vor.u32 1.1754944e-38, %v5436_v7  ;;  %5777 = vst [vmem:[%s11710_s23] sm:$0xff] (%p7056_p12), %v5776_v63  ;;  %v5786_v7 = vld [vmem:[%s10279_s14 + $0x28] sm:$0xff] (%p7056_p12)  ;;  %v5788_v25 = vld [vmem:[%s10279_s14 + $0x30] sm:$0xff] (%p7056_p12) }
 0x528   : > { %v5454_v59 = vmul.f32 %v6849_v27, %v11638_v9  ;;  %v5410_v33 = vsel %vm5407_vm4, %v5409_v19, %v5405_v49  ;;  %6852 = vrcp.f32 %v11666_v32  ;;  %vm5435_vm6 = vcmp.eq.f32.partialorder %v5434_v58, 8.507059e+37  ;;  %v4518_v42 = vpop.f32.mrf.mxu3  ;;  %5779 = vst [vmem:[%s11710_s23 + $0x8] sm:$0xff] (%p7056_p12), %v5778_v15  ;;  %v5784_v58 = vld [vmem:[%s10279_s14 + $0x20] sm:$0xff] (%p7056_p12)  ;;  %v5790_v50 = vld [vmem:[%s10279_s14 + $0x38] sm:$0xff] (%p7056_p12)  ;;  %v5802_v19 = vld [vmem:[%s10279_s14 + $0x68] sm:$0xff] (%p7056_p12) }
 0x529   : > { %v6851_v31 = vpop.eup %6850  ;;  %v5539_v2 = vmul.f32 %v5410_v33, %v4504_v39  ;;  %v5433_v0 = vsel %vm5432_vm5, %v6847_v41, %v5429_v29  ;;  %v5464_v62 = vand.u32 2147483648, %v11638_v9  ;;  %vm5459_vm7 = vweird.f32 %v6849_v27  ;;  %5781 = vst [vmem:[%s11710_s23 + $0x10] sm:$0xff] (%p7056_p12), %v5780_v6  ;;  %v5798_v1 = vld [vmem:[%s10279_s14 + $0x58] sm:$0xff] (%p7056_p12)  ;;  %v5800_v39 = vld [vmem:[%s10279_s14 + $0x60] sm:$0xff] (%p7056_p12)  ;;  %v5804_v49 = vld [vmem:[%s10279_s14 + $0x70] sm:$0xff] (%p7056_p12) }
 0x52a   : > { %v5455_v51 = vsub.f32 1.0, %v5454_v59  ;;  %v5438_v14 = vsel %vm5435_vm6, %v5437_v43, %v5433_v0  ;;  %v5440_v5 = vmul.f32 %v6851_v31, %v11642_v18  ;;  %v5462_v38 = vand.u32 2147483647, %v11638_v9  ;;  %5783 = vst [vmem:[%s11710_s23 + $0x18] sm:$0xff] (%p7056_p12), %v5782_v37  ;;  %v5806_v29 = vld [vmem:[%s10279_s14 + $0x78] sm:$0xff] (%p7056_p12)  ;;  %v5808_v59 = vld [vmem:[%s10279_s14 + $0x80] sm:$0xff] (%p7056_p12) }
 0x52b   : > { %5603 = vst.msk [vmem:[%s10279_s14 + $0x1d0] sm:$0xff] %vm1607_vm0, %v5539_v2  ;;  %v5541_v60 = vmul.f32 %v5438_v14, %v4510_v55  ;;  %vm5458_vm8 = vweird.f32 %v11638_v9  ;;  %v5450_v44 = vand.u32 2147483648, %v11642_v18  ;;  %v5465_v24 = vor.u32 1.1754944e-38, %v5464_v62  ;;  %v5810_v54 = vld [vmem:[%s10279_s14 + $0x88] sm:$0xff] (%p7056_p12)  ;;  %v5812_v55 = vld [vmem:[%s10279_s14 + $0x90] sm:$0xff] (%p7056_p12)  ;;  %v5814_v33 = vld [vmem:[%s10279_s14 + $0x98] sm:$0xff] (%p7056_p12) }
 0x52c   : > { %v5456_v17 = vmul.f32 %v6849_v27, %v5455_v51  ;;  %v5441_v12 = vsub.f32 1.0, %v5440_v5  ;;  %vm5460_vm9 = vmor %vm5458_vm8, %vm5459_vm7  ;;  %vm5445_vm2 = vweird.f32 %v6851_v31  ;;  %v5448_v28 = vand.u32 2147483647, %v11642_v18  ;;  %5785 = vst [vmem:[%s11710_s23 + $0x20] sm:$0xff] (%p7056_p12), %v5784_v58  ;;  %v5816_v43 = vld [vmem:[%s10279_s14 + $0xa0] sm:$0xff] (%p7056_p12)  ;;  %v5820_v2 = vld [vmem:[%s10279_s14 + $0xb0] sm:$0xff] (%p7056_p12) }
 0x52d   : > { %5605 = vst.msk [vmem:[%s10279_s14 + $0x1e0] sm:$0xff] %vm1607_vm0, %v5541_v60  ;;  %v4516_v8 = vadd.f32 %v4515_v35, %v12779_v26  ;;  %vm5463_vm10 = vcmp.eq.f32.partialorder %v5462_v38, 8.507059e+37  ;;  %vm5444_vm11 = vweird.f32 %v11642_v18  ;;  %v5451_v61 = vor.u32 1.1754944e-38, %v5450_v44  ;;  %v5822_v0 = vld [vmem:[%s10279_s14 + $0xb8] sm:$0xff] (%p7056_p12)  ;;  %v5824_v51 = vld [vmem:[%s10279_s14 + $0xc0] sm:$0xff] (%p7056_p12)  ;;  %v5826_v35 = vld [vmem:[%s10279_s14 + $0xc8] sm:$0xff] (%p7056_p12) }
 0x52e   : > { %v5457_v48 = vadd.f32 %v6849_v27, %v5456_v17  ;;  %v6853_v30 = vpop.eup %6852  ;;  %v5442_v40 = vmul.f32 %v6851_v31, %v5441_v12  ;;  %vm5446_vm12 = vmor %vm5444_vm11, %vm5445_vm2  ;;  %v4513_v53 = vadd.f32 %v11644_v56, %v12780_v21  ;;  %vm5449_vm13 = vcmp.eq.f32.partialorder %v5448_v28, 8.507059e+37  ;;  %5787 = vst [vmem:[%s11710_s23 + $0x28] sm:$0xff] (%p7056_p12), %v5786_v7  ;;  %v5828_v14 = vld [vmem:[%s10279_s14 + $0xd0] sm:$0xff] (%p7056_p12)  ;;  %v5830_v62 = vld [vmem:[%s10279_s14 + $0xd8] sm:$0xff] (%p7056_p12) }
 0x52f   : > { %v5468_v57 = vmul.f32 %v6853_v30, %v11666_v32  ;;  %v5478_v16 = vand.u32 2147483648, %v11666_v32  ;;  %vm5473_vm14 = vweird.f32 %v6853_v30  ;;  %v5476_v18 = vand.u32 2147483647, %v11666_v32  ;;  %5789 = vst [vmem:[%s11710_s23 + $0x30] sm:$0xff] (%p7056_p12), %v5788_v25  ;;  %v5832_v5 = vld [vmem:[%s10279_s14 + $0xe0] sm:$0xff] (%p7056_p12)  ;;  %v5834_v60 = vld [vmem:[%s10279_s14 + $0xe8] sm:$0xff] (%p7056_p12) }
 0x530   : > { %v5461_v20 = vsel %vm5460_vm9, %v6849_v27, %v5457_v48  ;;  %v5443_v34 = vadd.f32 %v6851_v31, %v5442_v40  ;;  %vm5472_vm15 = vweird.f32 %v11666_v32  ;;  %v4519_v3 = vadd.f32 %v4518_v42, %v12781_v11  ;;  %v5794_v32 = vld [vmem:[%s10279_s14 + $0x48] sm:$0xff] (%p7056_p12)  ;;  %5791 = vst [vmem:[%s11710_s23 + $0x38] sm:$0xff] (%p7056_p12), %v5790_v50  ;;  %v5796_v27 = vld [vmem:[%s10279_s14 + $0x50] sm:$0xff] (%p7056_p12)  ;;  %v5838_v38 = vld [vmem:[%s10279_s14 + $0xf8] sm:$0xff] (%p7056_p12) }
 0x531   : > { %v5466_v4 = vsel %vm5463_vm10, %v5465_v24, %v5461_v20  ;;  %v5469_v9 = vsub.f32 1.0, %v5468_v57  ;;  %vm5474_vm1 = vmor %vm5472_vm15, %vm5473_vm14  ;;  %v5479_v56 = vor.u32 1.1754944e-38, %v5478_v16  ;;  %vm5477_vm3 = vcmp.eq.f32.partialorder %v5476_v18, 8.507059e+37  ;;  %5793 = vst [vmem:[%s11710_s23 + $0x40] sm:$0xff] (%p7056_p12), %v5792_v52  ;;  %v5836_v17 = vld [vmem:[%s10279_s14 + $0xf0] sm:$0xff] (%p7056_p12)  ;;  %v5840_v12 = vld [vmem:[%s10279_s14 + $0x100] sm:$0xff] (%p7056_p12) }
 0x532   : > { %v5543_v46 = vmul.f32 %v5466_v4, %v4516_v8  ;;  %v5447_v23 = vsel %vm5446_vm12, %v6851_v31, %v5443_v34  ;;  %5795 = vst [vmem:[%s11710_s23 + $0x48] sm:$0xff] (%p7056_p12), %v5794_v32  ;;  %v5818_v31 = vld [vmem:[%s10279_s14 + $0xa8] sm:$0xff] (%p7056_p12)  ;;  %v5844_v44 = vld [vmem:[%s10279_s14 + $0x110] sm:$0xff] (%p7056_p12)  ;;  %v5848_v24 = vld [vmem:[%s10279_s14 + $0x120] sm:$0xff] (%p7056_p12) }
 0x533   : > { %v5452_v41 = vsel %vm5449_vm13, %v5451_v61, %v5447_v23  ;;  %v5470_v45 = vmul.f32 %v6853_v30, %v5469_v9  ;;  %5797 = vst [vmem:[%s11710_s23 + $0x50] sm:$0xff] (%p7056_p12), %v5796_v27  ;;  %v5842_v48 = vld [vmem:[%s10279_s14 + $0x108] sm:$0xff] (%p7056_p12)  ;;  %v5852_v28 = vld [vmem:[%s10279_s14 + $0x130] sm:$0xff] (%p7056_p12)  ;;  %v5854_v26 = vld [vmem:[%s10279_s14 + $0x138] sm:$0xff] (%p7056_p12) }
 0x534   : > { %5607 = vst.msk [vmem:[%s10279_s14 + $0x1f0] sm:$0xff] %vm1607_vm0, %v5543_v46  ;;  %v5542_v13 = vmul.f32 %v5452_v41, %v4513_v53  ;;  %v5850_v40 = vld [vmem:[%s10279_s14 + $0x128] sm:$0xff] (%p7056_p12)  ;;  %v5856_v8 = vld [vmem:[%s10279_s14 + $0x140] sm:$0xff] (%p7056_p12)  ;;  %v5860_v57 = vld [vmem:[%s10279_s14 + $0x150] sm:$0xff] (%p7056_p12) }
 0x535   : > { %v5471_v47 = vadd.f32 %v6853_v30, %v5470_v45  ;;  %5799 = vst [vmem:[%s11710_s23 + $0x58] sm:$0xff] (%p7056_p12), %v5798_v1  ;;  %v5858_v20 = vld [vmem:[%s10279_s14 + $0x148] sm:$0xff] (%p7056_p12)  ;;  %v5862_v4 = vld [vmem:[%s10279_s14 + $0x158] sm:$0xff] (%p7056_p12)  ;;  %v5864_v34 = vld [vmem:[%s10279_s14 + $0x160] sm:$0xff] (%p7056_p12) }
 0x536   : > { %5606 = vst.msk [vmem:[%s10279_s14 + $0x1e8] sm:$0xff] %vm1607_vm0, %v5542_v13  ;;  %v5866_v46 = vld [vmem:[%s10279_s14 + $0x168] sm:$0xff] (%p7056_p12)  ;;  %v5868_v61 = vld [vmem:[%s10279_s14 + $0x170] sm:$0xff] (%p7056_p12)  ;;  %v5870_v9 = vld [vmem:[%s10279_s14 + $0x178] sm:$0xff] (%p7056_p12) }
 0x537   : > { %v5475_v22 = vsel %vm5474_vm1, %v6853_v30, %v5471_v47  ;;  %5615 = sbr.rel (!%p7056_p12) target bundleno = 1388 (0x56c), region = 242  ;;  %5801 = vst [vmem:[%s11710_s23 + $0x60] sm:$0xff] (%p7056_p12), %v5800_v39  ;;  %v5846_v30 = vld [vmem:[%s10279_s14 + $0x118] sm:$0xff] (%p7056_p12)  ;;  %v5872_v21 = vld [vmem:[%s10279_s14 + $0x180] sm:$0xff] (%p7056_p12)  ;;  %v5874_v53 = vld [vmem:[%s10279_s14 + $0x188] sm:$0xff] (%p7056_p12) }
 0x538   : > { %v5480_v36 = vsel %vm5477_vm3, %v5479_v56, %v5475_v22  ;;  %5803 = vst [vmem:[%s11710_s23 + $0x68] sm:$0xff] (%p7056_p12), %v5802_v19  ;;  %v5876_v23 = vld [vmem:[%s10279_s14 + $0x190] sm:$0xff] (%p7056_p12)  ;;  %v5878_v16 = vld [vmem:[%s10279_s14 + $0x198] sm:$0xff] (%p7056_p12)  ;;  %v5880_v41 = vld [vmem:[%s10279_s14 + $0x1a0] sm:$0xff] (%p7056_p12) }
 0x539   : > { %v5544_v10 = vmul.f32 %v5480_v36, %v4519_v3  ;;  %5805 = vst [vmem:[%s11710_s23 + $0x70] sm:$0xff] (%p7056_p12), %v5804_v49  ;;  %v5882_v45 = vld [vmem:[%s10279_s14 + $0x1a8] sm:$0xff] (%p7056_p12)  ;;  %v5884_v18 = vld [vmem:[%s10279_s14 + $0x1b0] sm:$0xff] (%p7056_p12)  ;;  %v5886_v42 = vld [vmem:[%s10279_s14 + $0x1b8] sm:$0xff] (%p7056_p12) }
 0x53a   : > { %5807 = vst [vmem:[%s11710_s23 + $0x78] sm:$0xff] (%p7056_p12), %v5806_v29  ;;  %v5888_v13 = vld [vmem:[%s10279_s14 + $0x1c0] sm:$0xff] (%p7056_p12)  ;;  %v5890_v47 = vld [vmem:[%s10279_s14 + $0x1c8] sm:$0xff] (%p7056_p12)  ;;  %v5892_v56 = vld [vmem:[%s10279_s14 + $0x1d0] sm:$0xff] (%p7056_p12) }
 0x53b   : > { %5608 = vst.msk [vmem:[%s10279_s14 + $0x1f8] sm:$0xff] %vm1607_vm0, %v5544_v10  ;;  %v5894_v11 = vld [vmem:[%s10279_s14 + $0x1d8] sm:$0xff] (%p7056_p12)  ;;  %v5896_v3 = vld [vmem:[%s10279_s14 + $0x1e0] sm:$0xff] (%p7056_p12)  ;;  %v5900_v36 = vld [vmem:[%s10279_s14 + $0x1f0] sm:$0xff] (%p7056_p12) }
 0x53c   : > { %5809 = vst [vmem:[%s11710_s23 + $0x200] sm:$0xff] %v5808_v59 }
 0x53d   : > { %5811 = vst [vmem:[%s11710_s23 + $0x208] sm:$0xff] %v5810_v54  ;;  %v5898_v22 = vld [vmem:[%s10279_s14 + $0x1e8] sm:$0xff] }
 0x53e   : > { %5813 = vst [vmem:[%s11710_s23 + $0x210] sm:$0xff] %v5812_v55 }
 0x53f   : > { %5815 = vst [vmem:[%s11710_s23 + $0x218] sm:$0xff] %v5814_v33 }
 0x540   : > { %5817 = vst [vmem:[%s11710_s23 + $0x220] sm:$0xff] %v5816_v43 }
 0x541   : > { %5819 = vst [vmem:[%s11710_s23 + $0x228] sm:$0xff] %v5818_v31 }
 0x542   : > { %5821 = vst [vmem:[%s11710_s23 + $0x230] sm:$0xff] %v5820_v2  ;;  %v5902_v10 = vld [vmem:[%s10279_s14 + $0x1f8] sm:$0xff] }
 0x543   : > { %5823 = vst [vmem:[%s11710_s23 + $0x238] sm:$0xff] %v5822_v0 }
 0x544   : > { %5825 = vst [vmem:[%s11710_s23 + $0x240] sm:$0xff] %v5824_v51 }
 0x545   : > { %5827 = vst [vmem:[%s11710_s23 + $0x248] sm:$0xff] %v5826_v35 }
 0x546   : > { %5829 = vst [vmem:[%s11710_s23 + $0x250] sm:$0xff] %v5828_v14 }
 0x547   : > { %5831 = vst [vmem:[%s11710_s23 + $0x258] sm:$0xff] %v5830_v62 }
 0x548   : > { %5833 = vst [vmem:[%s11710_s23 + $0x260] sm:$0xff] %v5832_v5 }
 0x549   : > { %5835 = vst [vmem:[%s11710_s23 + $0x268] sm:$0xff] %v5834_v60 }
 0x54a   : > { %5837 = vst [vmem:[%s11710_s23 + $0x270] sm:$0xff] %v5836_v17 }
 0x54b   : > { %5839 = vst [vmem:[%s11710_s23 + $0x278] sm:$0xff] %v5838_v38 }
 0x54c   : > { %5841 = vst [vmem:[%s11710_s23 + $0x400] sm:$0xff] %v5840_v12 }
 0x54d   : > { %5843 = vst [vmem:[%s11710_s23 + $0x408] sm:$0xff] %v5842_v48 }
 0x54e   : > { %5845 = vst [vmem:[%s11710_s23 + $0x410] sm:$0xff] %v5844_v44 }
 0x54f   : > { %5847 = vst [vmem:[%s11710_s23 + $0x418] sm:$0xff] %v5846_v30 }
 0x550   : > { %5849 = vst [vmem:[%s11710_s23 + $0x420] sm:$0xff] %v5848_v24 }
 0x551   : > { %5851 = vst [vmem:[%s11710_s23 + $0x428] sm:$0xff] %v5850_v40 }
 0x552   : > { %5853 = vst [vmem:[%s11710_s23 + $0x430] sm:$0xff] %v5852_v28 }
 0x553   : > { %5855 = vst [vmem:[%s11710_s23 + $0x438] sm:$0xff] %v5854_v26 }
 0x554   : > { %5857 = vst [vmem:[%s11710_s23 + $0x440] sm:$0xff] %v5856_v8 }
 0x555   : > { %5859 = vst [vmem:[%s11710_s23 + $0x448] sm:$0xff] %v5858_v20 }
 0x556   : > { %5861 = vst [vmem:[%s11710_s23 + $0x450] sm:$0xff] %v5860_v57 }
 0x557   : > { %5863 = vst [vmem:[%s11710_s23 + $0x458] sm:$0xff] %v5862_v4 }
 0x558   : > { %5865 = vst [vmem:[%s11710_s23 + $0x460] sm:$0xff] %v5864_v34 }
 0x559   : > { %5867 = vst [vmem:[%s11710_s23 + $0x468] sm:$0xff] %v5866_v46 }
 0x55a   : > { %5869 = vst [vmem:[%s11710_s23 + $0x470] sm:$0xff] %v5868_v61 }
 0x55b   : > { %5871 = vst [vmem:[%s11710_s23 + $0x478] sm:$0xff] %v5870_v9 }
 0x55c   : > { %5873 = vst [vmem:[%s11710_s23 + $0x600] sm:$0xff] %v5872_v21 }
 0x55d   : > { %5875 = vst [vmem:[%s11710_s23 + $0x608] sm:$0xff] %v5874_v53 }
 0x55e   : > { %5877 = vst [vmem:[%s11710_s23 + $0x610] sm:$0xff] %v5876_v23 }
 0x55f   : > { %5879 = vst [vmem:[%s11710_s23 + $0x618] sm:$0xff] %v5878_v16 }
 0x560   : > { %5881 = vst [vmem:[%s11710_s23 + $0x620] sm:$0xff] %v5880_v41 }
 0x561   : > { %5883 = vst [vmem:[%s11710_s23 + $0x628] sm:$0xff] %v5882_v45 }
 0x562   : > { %5885 = vst [vmem:[%s11710_s23 + $0x630] sm:$0xff] %v5884_v18 }
 0x563   : > { %5887 = vst [vmem:[%s11710_s23 + $0x638] sm:$0xff] %v5886_v42 }
 0x564   : > { %5889 = vst [vmem:[%s11710_s23 + $0x640] sm:$0xff] %v5888_v13 }
 0x565   : > { %5891 = vst [vmem:[%s11710_s23 + $0x648] sm:$0xff] %v5890_v47 }
 0x566   : > { %5893 = vst [vmem:[%s11710_s23 + $0x650] sm:$0xff] %v5892_v56 }
 0x567   : > { %5895 = vst [vmem:[%s11710_s23 + $0x658] sm:$0xff] %v5894_v11 }
 0x568   : > { %5897 = vst [vmem:[%s11710_s23 + $0x660] sm:$0xff] %v5896_v3 }
 0x569   : > { %5899 = vst [vmem:[%s11710_s23 + $0x668] sm:$0xff] %v5898_v22 }
 0x56a   : > { %5901 = vst [vmem:[%s11710_s23 + $0x670] sm:$0xff] %v5900_v36 }
 0x56b   : > { %5903 = vst [vmem:[%s11710_s23 + $0x678] sm:$0xff] %v5902_v10 }
 0x56c PF: > { %s17_s9 = sadd.s32 1, %s6924_s9   ;;  %s12782_s28 = sld [smem:[#allocation10_spill]] }
 0x56d   : > { %p14_p4 = scmp.ge.s32.totalorder %s17_s9, 10   ;;  %s12783_s11 = sld [smem:[#allocation8_spill]] }
 0x56e   : > { %s12784_s16 = sld [smem:[#allocation9_spill]]  ;;  %s12785_s24 = smov %s6896_s25 }
 0x56f   : > { %s12786_s25 = smov %s7061_s17  ;;  %s12787_s26 = smov %s6904_s27 }
 0x570   : > { %s12790_s29 = smov %s6920_s8  ;;  %16 = sbr.rel (!%p14_p4) target bundleno = 7 (0x7), region = 343 }
 0x572   : > { %s12788_s27 = smov %s12782_s28  ;;  %s12789_s28 = smov %s6916_s30 }
 0x573   : > { %s12791_s30 = smov %s12783_s11 }
 0x574   : > { %s12792_s8 = smov %s12784_s16 }

</bundles_post_ra>
